<compile_context>
chip_gen: v5e
topology: v5e:2x2
jax: 0.10.0
libtpu: 0.0.40
codegen_flags: <defaults>
</compile_context>

<pallas_src>
import math
import functools

import jax
import jax.numpy as jnp
from jax import lax
from jax.experimental import pallas as pl
from jax.experimental.pallas import tpu as pltpu


def _round_up(x, m):
    return (x + m - 1) // m * m


# -----------------------------------------------------------------------------
# Kernel
# -----------------------------------------------------------------------------
def spec_to_wave_kernel(x_ref, m1_ref, b1_ref, m2_ref, b2_ref,
                        wl_ref, bl_ref, tall_ref, o_ref, *, n_bands, out_size):
    # x_ref   : (BT, C*T)        one batch tile of the flattened spec
    # m1_ref  : (C*T, CL1p)      conv1 as banded matrix (zero-padded cols)
    # b1_ref  : (1, CL1p)
    # m2_ref  : (CL1p, Fp)       conv2 as banded matrix
    # b2_ref  : (1, Fp)
    # wl_ref  : (Fp, Jp)         linear weight, cols = p*nb + band, pre-scaled
    # bl_ref  : (1, Jp)
    # tall_ref: (Jp, 3*nb*S)     synthesis-broadcast matrix (t folded in)
    # o_ref   : (BT, S)          lane-dense output block
    nb, S = n_bands, out_size
    G = nb * S

    x = x_ref[...]                                                   # (BT, C*T)

    # conv1 (valid, stride 1) + ReLU : one MXU matmul.
    h1 = jnp.maximum(
        jnp.dot(x, m1_ref[...], preferred_element_type=jnp.float32)
        + b1_ref[...], 0.0)                                          # (BT, CL1p)

    # conv2 + ReLU : one MXU matmul.
    h2 = jnp.maximum(
        jnp.dot(h1, m2_ref[...], preferred_element_type=jnp.float32)
        + b2_ref[...], 0.0)                                          # (BT, Fp)

    # linear (constants already folded into the rows in the wrapper).
    y = jnp.dot(h2, wl_ref[...], preferred_element_type=jnp.float32) \
        + bl_ref[...]                                                # (BT, Jp)

    # Synthesis broadcast: map the per-(sample, band) params to lane-dense
    # (band, t) argument groups, with t = linspace(0,1,S) folded into tall:
    #   a[:, 0*G:1*G] = (t*100*freq + phase)    * 6.28
    #   a[:, 1*G:2*G] = (t*amp_freq + amp_phase) * 6.28
    #   a[:, 2*G:3*G] = amp / n_bands            (broadcast along t)
    a = jnp.dot(y, tall_ref[...], preferred_element_type=jnp.float32)  # (BT,3G)

    wave = jnp.sin(a[:, 0:G]) * (a[:, 2 * G:3 * G] * jnp.sin(a[:, G:2 * G]))

    # Band mean (the 1/n_bands is folded into the amp rows): sum the nb
    # lane-aligned S-wide groups, then one lane-dense full-block store.
    acc = wave[:, 0:S]
    for n in range(1, nb):                    # nb is small & batch-independent
        acc = acc + wave[:, n * S:(n + 1) * S]
    o_ref[...] = acc


# -----------------------------------------------------------------------------
# One-time parameter transforms (hoisted out of the per-call path)
# -----------------------------------------------------------------------------
def _conv1d_as_matrix(w, in_len):
    """Valid stride-1 Conv1d (PyTorch cross-correlation) as a dense matrix.

    w: (C_out, C_in, K).  Returns M of shape (C_in*in_len, C_out*out_len) with
    M[i*in_len + t, o*out_len + l] = w[o, i, t - l] if 0 <= t-l < K else 0,
    so that (x_flat @ M)[o*out_len + l] == conv1d(x, w)[o, l].
    """
    c_out, c_in, k = w.shape
    out_len = in_len - k + 1
    t_idx = jnp.arange(in_len)[:, None]                   # (T, 1)
    l_idx = jnp.arange(out_len)[None, :]                  # (1, L)
    kk = t_idx - l_idx                                    # (T, L)
    valid = ((kk >= 0) & (kk < k)).astype(w.dtype)
    kk_c = jnp.clip(kk, 0, k - 1)
    wt = w[:, :, kk_c] * valid[None, None, :, :]          # (C_out, C_in, T, L)
    return jnp.transpose(wt, (1, 2, 0, 3)).reshape(c_in * in_len,
                                                   c_out * out_len)


def build_spec_to_wave_params(conv1_w, conv1_b, conv2_w, conv2_b, lin_w, lin_b,
                              *, spec_shape, out_size, n_bands):
    """Precompute the banded / reordered / pre-scaled matrices once per
    weight update; the jitted forward only consumes them."""
    C, T = spec_shape
    K = conv1_w.shape[-1]
    C1o = conv1_w.shape[0]
    C2 = conv2_w.shape[0]
    L1 = T - (K - 1)
    L2 = L1 - (conv2_w.shape[-1] - 1)
    nb, S = n_bands, out_size
    J = 5 * nb
    CL1, F = C1o * L1, C2 * L2
    CL1p, Fp, Jp = _round_up(CL1, 128), _round_up(F, 128), _round_up(J, 128)
    f32 = jnp.float32

    m1 = jnp.pad(_conv1d_as_matrix(conv1_w.astype(f32), T),
                 ((0, 0), (0, CL1p - CL1)))                         # (C*T, CL1p)
    b1 = jnp.pad(jnp.repeat(conv1_b.astype(f32), L1),
                 (0, CL1p - CL1))[None, :]                          # (1, CL1p)
    m2 = jnp.pad(_conv1d_as_matrix(conv2_w.astype(f32), L1),
                 ((0, CL1p - CL1), (0, Fp - F)))                    # (CL1p, Fp)
    b2 = jnp.pad(jnp.repeat(conv2_b.astype(f32), L2),
                 (0, Fp - F))[None, :]                              # (1, Fp)

    # Linear: PyTorch row index = band*5 + p  ->  reorder to p*nb + band and
    # fold the forward's scalar constants into the rows.
    scale = jnp.concatenate([
        jnp.full((nb,), 100.0 * 6.28, f32),   # freq
        jnp.full((nb,), 6.28, f32),           # phase
        jnp.full((nb,), 1.0 / nb, f32),       # amp  (band mean -> sum)
        jnp.full((nb,), 6.28, f32),           # amp_freq (* 1 * 6.28)
        jnp.full((nb,), 6.28, f32)])          # amp_phase
    wlr = lin_w.astype(f32).reshape(nb, 5, F).transpose(1, 0, 2).reshape(J, F)
    blr = lin_b.astype(f32).reshape(nb, 5).T.reshape(J)
    wl = jnp.pad((wlr * scale[:, None]).T, ((0, Fp - F), (0, Jp - J)))  # (Fp,Jp)
    bl = jnp.pad(blr * scale, (0, Jp - J))[None, :]                     # (1, Jp)

    # Synthesis-broadcast matrix: folds t = linspace(0,1,S) and the parameter
    # -> (band, t) broadcast into a single small matmul inside the kernel.
    G = nb * S
    t = jnp.arange(S, dtype=f32) / float(max(S - 1, 1))
    eye = jnp.eye(nb, dtype=f32)
    bt_t = jnp.kron(eye, t[None, :])                 # (nb, G): per-band t row
    bt_1 = jnp.kron(eye, jnp.ones((1, S), f32))      # (nb, G): per-band ones
    tall = jnp.zeros((Jp, 3 * G), f32)
    tall = tall.at[0 * nb:1 * nb, 0 * G:1 * G].set(bt_t)   # freq * t
    tall = tall.at[1 * nb:2 * nb, 0 * G:1 * G].set(bt_1)   # + phase
    tall = tall.at[3 * nb:4 * nb, 1 * G:2 * G].set(bt_t)   # amp_freq * t
    tall = tall.at[4 * nb:5 * nb, 1 * G:2 * G].set(bt_1)   # + amp_phase
    tall = tall.at[2 * nb:3 * nb, 2 * G:3 * G].set(bt_1)   # amp broadcast
    return dict(m1=m1, b1=b1, m2=m2, b2=b2, wl=wl, bl=bl, tall=tall)


# -----------------------------------------------------------------------------
# Forward
# -----------------------------------------------------------------------------
def spec_to_wave(spec, params, *, out_size, n_bands, batch_tile=128):
    """spec: (B, C, T) -> (B, 1, out_size); params from build_spec_to_wave_params."""
    m1, b1, m2, b2 = params["m1"], params["b1"], params["m2"], params["b2"]
    wl, bl, tall = params["wl"], params["bl"], params["tall"]
    B, C, T = spec.shape
    CT = C * T
    CL1p, Fp, Jp, AW = m1.shape[1], m2.shape[1], wl.shape[1], tall.shape[1]

    bt = min(batch_tile, _round_up(B, 8))
    B_pad = _round_up(B, bt)
    x2d = spec.reshape(B, CT).astype(jnp.float32)
    if B_pad != B:
        x2d = jnp.pad(x2d, ((0, B_pad - B), (0, 0)))

    kernel = functools.partial(spec_to_wave_kernel,
                               n_bands=n_bands, out_size=out_size)
    out = pl.pallas_call(
        kernel,
        out_shape=jax.ShapeDtypeStruct((B_pad, out_size), jnp.float32),
        grid=(B_pad // bt,),
        in_specs=[
            pl.BlockSpec((bt, CT), lambda i: (i, 0)),      # streamed per tile
            pl.BlockSpec((CT, CL1p), lambda i: (0, 0)),    # weights: constant
            pl.BlockSpec((1, CL1p), lambda i: (0, 0)),     #   index maps keep
            pl.BlockSpec((CL1p, Fp), lambda i: (0, 0)),    #   them VMEM-resident
            pl.BlockSpec((1, Fp), lambda i: (0, 0)),
            pl.BlockSpec((Fp, Jp), lambda i: (0, 0)),
            pl.BlockSpec((1, Jp), lambda i: (0, 0)),
            pl.BlockSpec((Jp, AW), lambda i: (0, 0)),
        ],
        out_specs=pl.BlockSpec((bt, out_size), lambda i: (i, 0)),
        compiler_params=pltpu.CompilerParams(
            dimension_semantics=("parallel",),     # 2-TC sharding on v7x
            vmem_limit_bytes=32 * 1024 * 1024),
    )(x2d, m1, b1, m2, b2, wl, bl, tall)

    return out[:B, None, :]                                   # (B, 1, out_size)


# -----------------------------------------------------------------------------
# Pure-JAX reference (re-statement of the PyTorch forward, for self-check)
# -----------------------------------------------------------------------------
def reference_forward(spec, conv1_w, conv1_b, conv2_w, conv2_b, lin_w, lin_b,
                      out_size, n_bands):
    hp = lax.Precision.HIGHEST
    B, C, T = spec.shape
    K = conv1_w.shape[-1]
    L1, L2 = T - (K - 1), T - 2 * (K - 1)
    h1 = jnp.zeros((B, conv1_w.shape[0], L1), jnp.float32)
    for k in range(K):
        h1 = h1 + jnp.einsum('oi,bil->bol', conv1_w[:, :, k],
                             spec[:, :, k:k + L1], precision=hp)
    h1 = jnp.maximum(h1 + conv1_b[None, :, None], 0.0)
    h2 = jnp.zeros((B, conv2_w.shape[0], L2), jnp.float32)
    for k in range(K):
        h2 = h2 + jnp.einsum('oi,bil->bol', conv2_w[:, :, k],
                             h1[:, :, k:k + L2], precision=hp)
    h2 = jnp.maximum(h2 + conv2_b[None, :, None], 0.0)
    b = (jnp.einsum('bf,jf->bj', h2.reshape(B, -1), lin_w, precision=hp)
         + lin_b).reshape(B, n_bands, 5)
    t = jnp.linspace(0.0, 1.0, out_size, dtype=jnp.float32).reshape(1, 1, -1)
    freq, phase, amp = b[..., 0:1] * 100.0, b[..., 1:2], b[..., 2:3]
    amp_freq, amp_phase = b[..., 3:4] * 1.0, b[..., 4:5]
    amp = amp * jnp.sin((t * amp_freq + amp_phase) * 6.28)
    wave = jnp.sin((t * freq + phase) * 6.28) * amp
    return wave.mean(-2)[:, None, :]


if __name__ == "__main__":
    # Small deterministic setup consistent with the module's constructor.
    spec_shape = (8, 32)          # (C, T)
    out_size = 128
    n_bands = 8
    C, T = spec_shape
    K = 5
    C2 = 30
    L2 = T - 2 * (K - 1)
    F = C2 * L2

    key = jax.random.PRNGKey(0)
    ks = jax.random.split(key, 7)
    conv1_w = jax.random.normal(ks[1], (C, C, K), jnp.float32) / math.sqrt(C * K)
    conv1_b = jax.random.normal(ks[2], (C,), jnp.float32) * 0.1
    conv2_w = jax.random.normal(ks[3], (C2, C, K), jnp.float32) / math.sqrt(C * K)
    conv2_b = jax.random.normal(ks[4], (C2,), jnp.float32) * 0.1
    lin_w = jax.random.normal(ks[5], (n_bands * 5, F), jnp.float32) / math.sqrt(F)
    lin_b = jax.random.normal(ks[6], (n_bands * 5,), jnp.float32) * 0.1

    # Hoisted out of the per-call path: built once per weight update.
    params = jax.block_until_ready(build_spec_to_wave_params(
        conv1_w, conv1_b, conv2_w, conv2_b, lin_w, lin_b,
        spec_shape=spec_shape, out_size=out_size, n_bands=n_bands))

    fn = jax.jit(functools.partial(spec_to_wave, out_size=out_size,
                                   n_bands=n_bands, batch_tile=128))

    # B=2 (single 8-row block) and B=200 (two 128-row blocks: exercises the
    # batch-tiled grid, weight residency and batch padding).
    for B in (2, 200):
        spec = jax.random.normal(ks[0], (B, C, T), jnp.float32)
        out = jax.block_until_ready(fn(spec, params))
        ref = reference_forward(spec, conv1_w, conv1_b, conv2_w, conv2_b,
                                lin_w, lin_b, out_size, n_bands)
        assert out.shape == (B, 1, out_size), out.shape
        err = float(jnp.max(jnp.abs(out - ref)))
        # freq is multiplied by 100*6.28 before sin(), so f32 rounding
        # differences in the linear output are phase-amplified; 2e-2 covers
        # that while still being ~5% of the signal magnitude.
        assert err < 2e-2, (B, err)

    print("KERNEL_OK")
</pallas_src>

<mosaic_0001>
module attributes {stable_mosaic.version = 11 : i64} {
  func.func @spec_to_wave_kernel(%arg0: i32, %arg1: memref<8x256xf32, #tpu.memory_space<vmem>>, %arg2: memref<256x256xf32, #tpu.memory_space<vmem>>, %arg3: memref<1x256xf32, #tpu.memory_space<vmem>>, %arg4: memref<256x768xf32, #tpu.memory_space<vmem>>, %arg5: memref<1x768xf32, #tpu.memory_space<vmem>>, %arg6: memref<768x128xf32, #tpu.memory_space<vmem>>, %arg7: memref<1x128xf32, #tpu.memory_space<vmem>>, %arg8: memref<128x3072xf32, #tpu.memory_space<vmem>>, %arg9: memref<8x128xf32, #tpu.memory_space<vmem>>) attributes {dimension_semantics = [#tpu.dimension_semantics<parallel>], iteration_bounds = array<i64: 1>, scalar_prefetch = 0 : i64, scratch_operands = 0 : i64, tpu.core_type = #tpu.core_type<tc>, window_params = [{transform_indices = @transform_0, window_bounds = array<i64: 8, 256>}, {pipeline_mode = #tpu.pipeline_mode<synchronous>, transform_indices = @transform_1, window_bounds = array<i64: 256, 256>}, {pipeline_mode = #tpu.pipeline_mode<synchronous>, transform_indices = @transform_2, window_bounds = array<i64: 1, 256>}, {pipeline_mode = #tpu.pipeline_mode<synchronous>, transform_indices = @transform_3, window_bounds = array<i64: 256, 768>}, {pipeline_mode = #tpu.pipeline_mode<synchronous>, transform_indices = @transform_4, window_bounds = array<i64: 1, 768>}, {pipeline_mode = #tpu.pipeline_mode<synchronous>, transform_indices = @transform_5, window_bounds = array<i64: 768, 128>}, {pipeline_mode = #tpu.pipeline_mode<synchronous>, transform_indices = @transform_6, window_bounds = array<i64: 1, 128>}, {pipeline_mode = #tpu.pipeline_mode<synchronous>, transform_indices = @transform_7, window_bounds = array<i64: 128, 3072>}, {transform_indices = @transform_8, window_bounds = array<i64: 8, 128>}]} {
    %c0 = arith.constant 0 : index
    %c0_0 = arith.constant 0 : index
    %0 = vector.load %arg1[%c0, %c0_0] : memref<8x256xf32, #tpu.memory_space<vmem>>, vector<8x256xf32>
    %c0_1 = arith.constant 0 : index
    %c0_2 = arith.constant 0 : index
    %1 = vector.load %arg2[%c0_1, %c0_2] : memref<256x256xf32, #tpu.memory_space<vmem>>, vector<256x256xf32>
    %cst = arith.constant dense<0.000000e+00> : vector<8x256xf32>
    %2 = tpu.matmul %0, %1, %cst {dimension_numbers = #tpu.dot_dimension_numbers<[1], [0], [0], [1], [0, 0, 1, 1], [], []>} : vector<8x256xf32>, vector<256x256xf32>, vector<8x256xf32> -> vector<8x256xf32>
    %c0_3 = arith.constant 0 : index
    %c0_4 = arith.constant 0 : index
    %3 = vector.load %arg3[%c0_3, %c0_4] : memref<1x256xf32, #tpu.memory_space<vmem>>, vector<1x256xf32>
    %4 = vector.broadcast %3 : vector<1x256xf32> to vector<8x256xf32>
    %5 = arith.addf %2, %4 : vector<8x256xf32>
    %cst_5 = arith.constant 0.000000e+00 : f32
    %6 = vector.broadcast %cst_5 : f32 to vector<8x256xf32>
    %7 = arith.maximumf %5, %6 : vector<8x256xf32>
    %c0_6 = arith.constant 0 : index
    %c0_7 = arith.constant 0 : index
    %8 = vector.load %arg4[%c0_6, %c0_7] : memref<256x768xf32, #tpu.memory_space<vmem>>, vector<256x768xf32>
    %cst_8 = arith.constant dense<0.000000e+00> : vector<8x768xf32>
    %9 = tpu.matmul %7, %8, %cst_8 {dimension_numbers = #tpu.dot_dimension_numbers<[1], [0], [0], [1], [0, 0, 1, 1], [], []>} : vector<8x256xf32>, vector<256x768xf32>, vector<8x768xf32> -> vector<8x768xf32>
    %c0_9 = arith.constant 0 : index
    %c0_10 = arith.constant 0 : index
    %10 = vector.load %arg5[%c0_9, %c0_10] : memref<1x768xf32, #tpu.memory_space<vmem>>, vector<1x768xf32>
    %11 = vector.broadcast %10 : vector<1x768xf32> to vector<8x768xf32>
    %12 = arith.addf %9, %11 : vector<8x768xf32>
    %cst_11 = arith.constant 0.000000e+00 : f32
    %13 = vector.broadcast %cst_11 : f32 to vector<8x768xf32>
    %14 = arith.maximumf %12, %13 : vector<8x768xf32>
    %c0_12 = arith.constant 0 : index
    %c0_13 = arith.constant 0 : index
    %15 = vector.load %arg6[%c0_12, %c0_13] : memref<768x128xf32, #tpu.memory_space<vmem>>, vector<768x128xf32>
    %cst_14 = arith.constant dense<0.000000e+00> : vector<8x128xf32>
    %16 = tpu.matmul %14, %15, %cst_14 {dimension_numbers = #tpu.dot_dimension_numbers<[1], [0], [0], [1], [0, 0, 1, 1], [], []>} : vector<8x768xf32>, vector<768x128xf32>, vector<8x128xf32> -> vector<8x128xf32>
    %c0_15 = arith.constant 0 : index
    %c0_16 = arith.constant 0 : index
    %17 = vector.load %arg7[%c0_15, %c0_16] : memref<1x128xf32, #tpu.memory_space<vmem>>, vector<1x128xf32>
    %18 = vector.broadcast %17 : vector<1x128xf32> to vector<8x128xf32>
    %19 = arith.addf %16, %18 : vector<8x128xf32>
    %c0_17 = arith.constant 0 : index
    %c0_18 = arith.constant 0 : index
    %20 = vector.load %arg8[%c0_17, %c0_18] : memref<128x3072xf32, #tpu.memory_space<vmem>>, vector<128x3072xf32>
    %cst_19 = arith.constant dense<0.000000e+00> : vector<8x3072xf32>
    %21 = tpu.matmul %19, %20, %cst_19 {dimension_numbers = #tpu.dot_dimension_numbers<[1], [0], [0], [1], [0, 0, 1, 1], [], []>} : vector<8x128xf32>, vector<128x3072xf32>, vector<8x3072xf32> -> vector<8x3072xf32>
    %22 = vector.extract_strided_slice %21 {offsets = [0, 0], sizes = [8, 1024], strides = [1, 1]} : vector<8x3072xf32> to vector<8x1024xf32>
    %23 = math.sin %22 : vector<8x1024xf32>
    %24 = vector.extract_strided_slice %21 {offsets = [0, 2048], sizes = [8, 1024], strides = [1, 1]} : vector<8x3072xf32> to vector<8x1024xf32>
    %25 = vector.extract_strided_slice %21 {offsets = [0, 1024], sizes = [8, 1024], strides = [1, 1]} : vector<8x3072xf32> to vector<8x1024xf32>
    %26 = math.sin %25 : vector<8x1024xf32>
    %27 = arith.mulf %24, %26 : vector<8x1024xf32>
    %28 = arith.mulf %23, %27 : vector<8x1024xf32>
    %29 = vector.extract_strided_slice %28 {offsets = [0, 0], sizes = [8, 128], strides = [1, 1]} : vector<8x1024xf32> to vector<8x128xf32>
    %30 = vector.extract_strided_slice %28 {offsets = [0, 128], sizes = [8, 128], strides = [1, 1]} : vector<8x1024xf32> to vector<8x128xf32>
    %31 = arith.addf %29, %30 : vector<8x128xf32>
    %32 = vector.extract_strided_slice %28 {offsets = [0, 256], sizes = [8, 128], strides = [1, 1]} : vector<8x1024xf32> to vector<8x128xf32>
    %33 = arith.addf %31, %32 : vector<8x128xf32>
    %34 = vector.extract_strided_slice %28 {offsets = [0, 384], sizes = [8, 128], strides = [1, 1]} : vector<8x1024xf32> to vector<8x128xf32>
    %35 = arith.addf %33, %34 : vector<8x128xf32>
    %36 = vector.extract_strided_slice %28 {offsets = [0, 512], sizes = [8, 128], strides = [1, 1]} : vector<8x1024xf32> to vector<8x128xf32>
    %37 = arith.addf %35, %36 : vector<8x128xf32>
    %38 = vector.extract_strided_slice %28 {offsets = [0, 640], sizes = [8, 128], strides = [1, 1]} : vector<8x1024xf32> to vector<8x128xf32>
    %39 = arith.addf %37, %38 : vector<8x128xf32>
    %40 = vector.extract_strided_slice %28 {offsets = [0, 768], sizes = [8, 128], strides = [1, 1]} : vector<8x1024xf32> to vector<8x128xf32>
    %41 = arith.addf %39, %40 : vector<8x128xf32>
    %42 = vector.extract_strided_slice %28 {offsets = [0, 896], sizes = [8, 128], strides = [1, 1]} : vector<8x1024xf32> to vector<8x128xf32>
    %43 = arith.addf %41, %42 : vector<8x128xf32>
    %c0_20 = arith.constant 0 : index
    %c0_21 = arith.constant 0 : index
    %44 = vector.load %arg9[%c0_20, %c0_21] : memref<8x128xf32, #tpu.memory_space<vmem>>, vector<8x128xf32>
    tpu.vector_store %arg9[%c0_20, %c0_21], %43 {strides = array<i32>} : memref<8x128xf32, #tpu.memory_space<vmem>>, vector<8x128xf32>,
    return
  }
  func.func @transform_0(%arg0: i32) -> (i32, i32) {
    %c0_i32 = arith.constant 0 : i32
    %c0_i32_0 = arith.constant 0 : i32
    return %arg0, %c0_i32 : i32, i32
  }
  func.func @transform_1(%arg0: i32) -> (i32, i32) {
    %c0_i32 = arith.constant 0 : i32
    %c0_i32_0 = arith.constant 0 : i32
    %c0_i32_1 = arith.constant 0 : i32
    return %c0_i32, %c0_i32_0 : i32, i32
  }
  func.func @transform_2(%arg0: i32) -> (i32, i32) {
    %c0_i32 = arith.constant 0 : i32
    %c0_i32_0 = arith.constant 0 : i32
    %c0_i32_1 = arith.constant 0 : i32
    return %c0_i32, %c0_i32_0 : i32, i32
  }
  func.func @transform_3(%arg0: i32) -> (i32, i32) {
    %c0_i32 = arith.constant 0 : i32
    %c0_i32_0 = arith.constant 0 : i32
    %c0_i32_1 = arith.constant 0 : i32
    return %c0_i32, %c0_i32_0 : i32, i32
  }
  func.func @transform_4(%arg0: i32) -> (i32, i32) {
    %c0_i32 = arith.constant 0 : i32
    %c0_i32_0 = arith.constant 0 : i32
    %c0_i32_1 = arith.constant 0 : i32
    return %c0_i32, %c0_i32_0 : i32, i32
  }
  func.func @transform_5(%arg0: i32) -> (i32, i32) {
    %c0_i32 = arith.constant 0 : i32
    %c0_i32_0 = arith.constant 0 : i32
    %c0_i32_1 = arith.constant 0 : i32
    return %c0_i32, %c0_i32_0 : i32, i32
  }
  func.func @transform_6(%arg0: i32) -> (i32, i32) {
    %c0_i32 = arith.constant 0 : i32
    %c0_i32_0 = arith.constant 0 : i32
    %c0_i32_1 = arith.constant 0 : i32
    return %c0_i32, %c0_i32_0 : i32, i32
  }
  func.func @transform_7(%arg0: i32) -> (i32, i32) {
    %c0_i32 = arith.constant 0 : i32
    %c0_i32_0 = arith.constant 0 : i32
    %c0_i32_1 = arith.constant 0 : i32
    return %c0_i32, %c0_i32_0 : i32, i32
  }
  func.func @transform_8(%arg0: i32) -> (i32, i32) {
    %c0_i32 = arith.constant 0 : i32
    %c0_i32_0 = arith.constant 0 : i32
    return %arg0, %c0_i32 : i32, i32
  }
}

</mosaic_0001>

<bundles_post_ra>
// kernel: spec_to_wave.1
= control target key start
LH: loop header
LB: loop body
LE: loop exit
PB: predicated region body
PF: predicated region fallthrough
CT: control target
= control target key end

     0   :  { %13 = vsyncpa [#allocation3], 0  ;;  %s7427_s0 = inlined_call_operand.vmem [shape: f32[8,256], index: 0, kind: input, shape index: {}]   ;;  %s7428_s1 = inlined_call_operand.hbm [shape: f32[256,256], index: 1, kind: input, shape index: {}]   ;;  %s7429_s2 = inlined_call_operand.hbm [shape: f32[1,256], index: 2, kind: input, shape index: {}]   ;;  %s7430_s3 = inlined_call_operand.hbm [shape: f32[256,768], index: 3, kind: input, shape index: {}]   ;;  %s7431_s4 = inlined_call_operand.hbm [shape: f32[1,768], index: 4, kind: input, shape index: {}]   ;;  %s7432_s5 = inlined_call_operand.hbm [shape: f32[768,128], index: 5, kind: input, shape index: {}]   ;;  %s7433_s6 = inlined_call_operand.hbm [shape: f32[1,128], index: 6, kind: input, shape index: {}]   ;;  %s7434_s7 = inlined_call_operand.hbm [shape: f32[128,3072], index: 7, kind: input, shape index: {}]   ;;  %s7435_s8 = inlined_call_operand.vmem [shape: f32[8,128], index: 8, kind: output, shape index: {}]  }
   0x1   :  { %14 = vsyncpa [#allocation5], 0 }
   0x2   :  { %15 = vsyncpa [#allocation8], 0  ;;  %s37_s29 = sshll.u32 %s7429_s2, 4  ;;  %s38_s29 = int_to_ptr.hbm [resolvable:$true] %s37_s29 }
   0x3   :  { %16 = vsyncpa [#allocation11], 0  ;;  %s4581_s30 = smov [#allocation4]   ;;  %s61_s12 = sshll.u32 %s7431_s4, 4  ;;  %s62_s12 = int_to_ptr.hbm [resolvable:$true] %s61_s12 }
   0x4   :  { %s39_s9 = sshll.u32 %s4581_s30, 4  ;;  %s4582_s13 = smov [#allocation7]   ;;  %s40_s9 = int_to_ptr.vmem [resolvable:$true] %s39_s9 }
   0x5   :  { %42 = dma.hbm_to_vmem [thread:$0]  %s38_s29, 32, %s40_s9, [#allocation5]  }
   0x6   :  { %s63_s14 = sshll.u32 %s4582_s13, 4  ;;  %s85_s17 = sshll.u32 %s7433_s6, 4  ;;  %s64_s14 = int_to_ptr.vmem [resolvable:$true] %s63_s14  ;;  %s86_s17 = int_to_ptr.hbm [resolvable:$true] %s85_s17 }
   0x7   :  { %66 = dma.hbm_to_vmem [thread:$0]  %s62_s12, 96, %s64_s14, [#allocation8]  }
   0x8   :  { %s23_s19 = sshll.u32 %s7428_s1, 4  ;;  %s4583_s20 = smov [#allocation10]   ;;  %s24_s19 = int_to_ptr.hbm [resolvable:$true] %s23_s19 }
   0x9   :  { %s87_s21 = sshll.u32 %s4583_s20, 4  ;;  %s4584_s4 = smov [#allocation2]   ;;  %s88_s21 = int_to_ptr.vmem [resolvable:$true] %s87_s21 }
   0xa   :  { %90 = dma.hbm_to_vmem [thread:$0]  %s86_s17, 16, %s88_s21, [#allocation11]  }
   0xb   :  { %s25_s22 = sshll.u32 %s4584_s4, 4  ;;  %s4585_s23 = smov 256   ;;  %s26_s22 = int_to_ptr.vmem [resolvable:$true] %s25_s22 }
   0xc   :  { %s4586_s24 = smov 16   ;;  %s47_s26 = sshll.u32 %s7430_s3, 4  ;;  %s48_s26 = int_to_ptr.hbm [resolvable:$true] %s47_s26 }
   0xd   :  { %31 = dma.hbm_to_vmem [thread:$0]  %s24_s19, 8192, %s26_s22, [#allocation3], %s4585_s23, %s4585_s23, %s4586_s24  }
   0xe   :  { %s4587_s27 = smov [#allocation6]   ;;  %s71_s30 = sshll.u32 %s7432_s5, 4  ;;  %s72_s30 = int_to_ptr.hbm [resolvable:$true] %s71_s30 }
   0xf   :  { %s49_s28 = sshll.u32 %s4587_s27, 4  ;;  %s4588_s9 = smov 768   ;;  %s50_s28 = int_to_ptr.vmem [resolvable:$true] %s49_s28 }
  0x10   :  { %s4589_s10 = smov 48   ;;  %s4590_s11 = smov [#allocation9]  }
  0x11   :  { %55 = dma.hbm_to_vmem [thread:$0]  %s48_s26, 24576, %s50_s28, [#allocation5], %s4588_s9, %s4588_s9, %s4589_s10  }
  0x12   :  { %s73_s12 = sshll.u32 %s4590_s11, 4  ;;  %s4591_s13 = smov 128   ;;  %s74_s12 = int_to_ptr.vmem [resolvable:$true] %s73_s12 }
  0x13   :  { %s4592_s14 = smov 8   ;;  %s95_s16 = sshll.u32 %s7434_s7, 4  ;;  %s96_s16 = int_to_ptr.hbm [resolvable:$true] %s95_s16 }
  0x14   :  { %79 = dma.hbm_to_vmem [thread:$0]  %s72_s30, 12288, %s74_s12, [#allocation8], %s4591_s13, %s4591_s13, %s4592_s14  }
  0x15   :  { %s4593_s17 = smov [#allocation12]   ;;  %s4594_s18 = smov 3072  }
  0x16   :  { %s97_s2 = sshll.u32 %s4593_s17, 4  ;;  %s4595_s5 = smov 192   ;;  %s98_s2 = int_to_ptr.vmem [resolvable:$true] %s97_s2 }
  0x17   :  { %103 = dma.hbm_to_vmem [thread:$0]  %s96_s16, 49152, %s98_s2, [#allocation11], %s4594_s18, %s4594_s18, %s4595_s5  }
  0x18   :  { %4573 = dma.done.wait [#allocation3], 8192  }
  0x19   :  { %4574 = vsyncadd [#allocation3], 4294959104 }
  0x1a   :  { %4575 = dma.done.wait [#allocation5], 24608  }
  0x1b   :  { %4576 = vsyncadd [#allocation5], 4294942688 }
  0x1c   :  { %4577 = dma.done.wait [#allocation8], 12384  }
  0x1d   :  { %4578 = vsyncadd [#allocation8], 4294954912 }
  0x1e   :  { %4579 = dma.done.wait [#allocation11], 49168  }
  0x1f   :  { %4580 = vsyncadd [#allocation11], 4294918128  ;;  %v164_v0 = vld [vmem:[#allocation2 + $0xf0] sm:$0xff]  ;;  %v165_v1 = vld [vmem:[#allocation2 + $0xf8] sm:$0xff] }
  0x20   :  { %v162_v2 = vld [vmem:[#allocation2 + $0xe0] sm:$0xff]  ;;  %204 = vmatpush.msra.mxu0 %v164_v0  ;;  %244 = vmatpush.msra.mxu2 %v165_v1  ;;  %v196_v3 = vld [vmem:[#allocation2 + $0x1f0] sm:$0xff]  ;;  %v163_v4 = vld [vmem:[#allocation2 + $0xe8] sm:$0xff] }
  0x21   :  { %v197_v5 = vld [vmem:[#allocation2 + $0x1f8] sm:$0xff]  ;;  %224 = vmatpush.msra.mxu1 %v196_v3  ;;  %v160_v6 = vld [vmem:[#allocation2 + $0xd0] sm:$0xff]  ;;  %v194_v7 = vld [vmem:[#allocation2 + $0x1e0] sm:$0xff] }
  0x22   :  { %264 = vmatpush.msra.mxu3 %v197_v5  ;;  %v161_v8 = vld [vmem:[#allocation2 + $0xd8] sm:$0xff]  ;;  %205 = vmatpush.msra.mxu0 %v162_v2  ;;  %v195_v9 = vld [vmem:[#allocation2 + $0x1e8] sm:$0xff]  ;;  %v192_v10 = vld [vmem:[#allocation2 + $0x1d0] sm:$0xff] }
  0x23   :  { %245 = vmatpush.msra.mxu2 %v163_v4  ;;  %225 = vmatpush.msra.mxu1 %v194_v7  ;;  %v158_v11 = vld [vmem:[#allocation2 + $0xc0] sm:$0xff]  ;;  %v159_v12 = vld [vmem:[#allocation2 + $0xc8] sm:$0xff]  ;;  %v193_v13 = vld [vmem:[#allocation2 + $0x1d8] sm:$0xff] }
  0x24   :  { %265 = vmatpush.msra.mxu3 %v195_v9  ;;  %206 = vmatpush.msra.mxu0 %v160_v6  ;;  %v190_v14 = vld [vmem:[#allocation2 + $0x1c0] sm:$0xff]  ;;  %v191_v15 = vld [vmem:[#allocation2 + $0x1c8] sm:$0xff]  ;;  %v156_v16 = vld [vmem:[#allocation2 + $0xb0] sm:$0xff] }
  0x25   :  { %246 = vmatpush.msra.mxu2 %v161_v8  ;;  %226 = vmatpush.msra.mxu1 %v192_v10  ;;  %v157_v17 = vld [vmem:[#allocation2 + $0xb8] sm:$0xff]  ;;  %v188_v18 = vld [vmem:[#allocation2 + $0x1b0] sm:$0xff]  ;;  %v154_v20 = vld [vmem:[#allocation2 + $0xa0] sm:$0xff] }
  0x26   :  { %266 = vmatpush.msra.mxu3 %v193_v13  ;;  %207 = vmatpush.msra.mxu0 %v158_v11  ;;  %v189_v19 = vld [vmem:[#allocation2 + $0x1b8] sm:$0xff]  ;;  %v155_v21 = vld [vmem:[#allocation2 + $0xa8] sm:$0xff]  ;;  %v186_v22 = vld [vmem:[#allocation2 + $0x1a0] sm:$0xff] }
  0x27   :  { %247 = vmatpush.msra.mxu2 %v159_v12  ;;  %227 = vmatpush.msra.mxu1 %v190_v14  ;;  %v187_v23 = vld [vmem:[#allocation2 + $0x1a8] sm:$0xff]  ;;  %v152_v24 = vld [vmem:[#allocation2 + $0x90] sm:$0xff]  ;;  %v153_v25 = vld [vmem:[#allocation2 + $0x98] sm:$0xff] }
  0x28   :  { %267 = vmatpush.msra.mxu3 %v191_v15  ;;  %208 = vmatpush.msra.mxu0 %v156_v16  ;;  %v184_v26 = vld [vmem:[#allocation2 + $0x190] sm:$0xff]  ;;  %v185_v27 = vld [vmem:[#allocation2 + $0x198] sm:$0xff]  ;;  %v150_v28 = vld [vmem:[#allocation2 + $0x80] sm:$0xff] }
  0x29   :  { %248 = vmatpush.msra.mxu2 %v157_v17  ;;  %228 = vmatpush.msra.mxu1 %v188_v18  ;;  %v151_v29 = vld [vmem:[#allocation2 + $0x88] sm:$0xff]  ;;  %v182_v30 = vld [vmem:[#allocation2 + $0x180] sm:$0xff]  ;;  %v148_v32 = vld [vmem:[#allocation2 + $0x70] sm:$0xff] }
  0x2a   :  { %268 = vmatpush.msra.mxu3 %v189_v19  ;;  %209 = vmatpush.msra.mxu0 %v154_v20  ;;  %v183_v31 = vld [vmem:[#allocation2 + $0x188] sm:$0xff]  ;;  %v149_v33 = vld [vmem:[#allocation2 + $0x78] sm:$0xff]  ;;  %v180_v34 = vld [vmem:[#allocation2 + $0x170] sm:$0xff] }
  0x2b   :  { %249 = vmatpush.msra.mxu2 %v155_v21  ;;  %229 = vmatpush.msra.mxu1 %v186_v22  ;;  %v181_v35 = vld [vmem:[#allocation2 + $0x178] sm:$0xff]  ;;  %v146_v36 = vld [vmem:[#allocation2 + $0x60] sm:$0xff]  ;;  %v147_v37 = vld [vmem:[#allocation2 + $0x68] sm:$0xff] }
  0x2c   :  { %269 = vmatpush.msra.mxu3 %v187_v23  ;;  %210 = vmatpush.msra.mxu0 %v152_v24  ;;  %v178_v38 = vld [vmem:[#allocation2 + $0x160] sm:$0xff]  ;;  %v179_v39 = vld [vmem:[#allocation2 + $0x168] sm:$0xff]  ;;  %v144_v40 = vld [vmem:[#allocation2 + $0x50] sm:$0xff] }
  0x2d   :  { %250 = vmatpush.msra.mxu2 %v153_v25  ;;  %230 = vmatpush.msra.mxu1 %v184_v26  ;;  %v145_v41 = vld [vmem:[#allocation2 + $0x58] sm:$0xff]  ;;  %v176_v42 = vld [vmem:[#allocation2 + $0x150] sm:$0xff]  ;;  %v142_v44 = vld [vmem:[#allocation2 + $0x40] sm:$0xff] }
  0x2e   :  { %270 = vmatpush.msra.mxu3 %v185_v27  ;;  %211 = vmatpush.msra.mxu0 %v150_v28  ;;  %v177_v43 = vld [vmem:[#allocation2 + $0x158] sm:$0xff]  ;;  %v143_v45 = vld [vmem:[#allocation2 + $0x48] sm:$0xff]  ;;  %v174_v46 = vld [vmem:[#allocation2 + $0x140] sm:$0xff] }
  0x2f   :  { %251 = vmatpush.msra.mxu2 %v151_v29  ;;  %231 = vmatpush.msra.mxu1 %v182_v30  ;;  %v175_v47 = vld [vmem:[#allocation2 + $0x148] sm:$0xff]  ;;  %v140_v48 = vld [vmem:[#allocation2 + $0x30] sm:$0xff]  ;;  %v141_v49 = vld [vmem:[#allocation2 + $0x38] sm:$0xff] }
  0x30   :  { %271 = vmatpush.msra.mxu3 %v183_v31  ;;  %212 = vmatpush.msra.mxu0 %v148_v32  ;;  %v172_v50 = vld [vmem:[#allocation2 + $0x130] sm:$0xff]  ;;  %v173_v51 = vld [vmem:[#allocation2 + $0x138] sm:$0xff]  ;;  %v138_v52 = vld [vmem:[#allocation2 + $0x20] sm:$0xff] }
  0x31   :  { %252 = vmatpush.msra.mxu2 %v149_v33  ;;  %232 = vmatpush.msra.mxu1 %v180_v34  ;;  %v139_v53 = vld [vmem:[#allocation2 + $0x28] sm:$0xff]  ;;  %v170_v54 = vld [vmem:[#allocation2 + $0x120] sm:$0xff]  ;;  %v136_v56 = vld [vmem:[#allocation2 + $0x10] sm:$0xff] }
  0x32   :  { %272 = vmatpush.msra.mxu3 %v181_v35  ;;  %213 = vmatpush.msra.mxu0 %v146_v36  ;;  %v171_v55 = vld [vmem:[#allocation2 + $0x128] sm:$0xff]  ;;  %v137_v57 = vld [vmem:[#allocation2 + $0x18] sm:$0xff]  ;;  %v168_v58 = vld [vmem:[#allocation2 + $0x110] sm:$0xff] }
  0x33   :  { %253 = vmatpush.msra.mxu2 %v147_v37  ;;  %233 = vmatpush.msra.mxu1 %v178_v38  ;;  %v169_v59 = vld [vmem:[#allocation2 + $0x118] sm:$0xff]  ;;  %v134_v60 = vld [vmem:[#allocation2] sm:$0xff]  ;;  %v135_v61 = vld [vmem:[#allocation2 + $0x8] sm:$0xff] }
  0x34   :  { %273 = vmatpush.msra.mxu3 %v179_v39  ;;  %214 = vmatpush.msra.mxu0 %v144_v40  ;;  %v132_v62 = vld [vmem:[%s7427_s0] sm:$0xff]  ;;  %v167_v0 = vld [vmem:[#allocation2 + $0x108] sm:$0xff]  ;;  %v376_v2 = vld [vmem:[#allocation6 + $0x2d0] sm:$0xff] }
  0x35   :  { %254 = vmatpush.msra.mxu2 %v145_v41  ;;  %234 = vmatpush.msra.mxu1 %v176_v42  ;;  %v166_v63 = vld [vmem:[#allocation2 + $0x100] sm:$0xff]  ;;  %v133_v1 = vld [vmem:[%s7427_s0 + $0x8] sm:$0xff]  ;;  %v472_v4 = vld [vmem:[#allocation6 + $0x5d0] sm:$0xff] }
  0x36   :  { %274 = vmatpush.msra.mxu3 %v177_v43  ;;  %215 = vmatpush.msra.mxu0 %v142_v44  ;;  %v377_v3 = vld [vmem:[#allocation6 + $0x2d8] sm:$0xff]  ;;  %v370_v6 = vld [vmem:[#allocation6 + $0x2a0] sm:$0xff]  ;;  %v371_v7 = vld [vmem:[#allocation6 + $0x2a8] sm:$0xff] }
  0x37   :  { %255 = vmatpush.msra.mxu2 %v143_v45  ;;  %235 = vmatpush.msra.mxu1 %v174_v46  ;;  %v473_v5 = vld [vmem:[#allocation6 + $0x5d8] sm:$0xff]  ;;  %v466_v8 = vld [vmem:[#allocation6 + $0x5a0] sm:$0xff]  ;;  %v467_v9 = vld [vmem:[#allocation6 + $0x5a8] sm:$0xff] }
  0x38   :  { %275 = vmatpush.msra.mxu3 %v175_v47  ;;  %216 = vmatpush.msra.mxu0 %v140_v48  ;;  %v364_v10 = vld [vmem:[#allocation6 + $0x270] sm:$0xff]  ;;  %v365_v11 = vld [vmem:[#allocation6 + $0x278] sm:$0xff]  ;;  %v358_v14 = vld [vmem:[#allocation6 + $0x240] sm:$0xff] }
  0x39   :  { %256 = vmatpush.msra.mxu2 %v141_v49  ;;  %236 = vmatpush.msra.mxu1 %v172_v50  ;;  %v460_v12 = vld [vmem:[#allocation6 + $0x570] sm:$0xff]  ;;  %v461_v13 = vld [vmem:[#allocation6 + $0x578] sm:$0xff]  ;;  %v359_v15 = vld [vmem:[#allocation6 + $0x248] sm:$0xff] }
  0x3a   :  { %276 = vmatpush.msra.mxu3 %v173_v51  ;;  %217 = vmatpush.msra.mxu0 %v138_v52  ;;  %v454_v16 = vld [vmem:[#allocation6 + $0x540] sm:$0xff]  ;;  %v455_v17 = vld [vmem:[#allocation6 + $0x548] sm:$0xff]  ;;  %v352_v18 = vld [vmem:[#allocation6 + $0x210] sm:$0xff] }
  0x3b   :  { %257 = vmatpush.msra.mxu2 %v139_v53  ;;  %237 = vmatpush.msra.mxu1 %v170_v54  ;;  %v353_v19 = vld [vmem:[#allocation6 + $0x218] sm:$0xff]  ;;  %v448_v20 = vld [vmem:[#allocation6 + $0x510] sm:$0xff]  ;;  %v346_v22 = vld [vmem:[#allocation6 + $0x1e0] sm:$0xff] }
  0x3c   :  { %277 = vmatpush.msra.mxu3 %v171_v55  ;;  %218 = vmatpush.msra.mxu0 %v136_v56  ;;  %v449_v21 = vld [vmem:[#allocation6 + $0x518] sm:$0xff]  ;;  %v347_v23 = vld [vmem:[#allocation6 + $0x1e8] sm:$0xff]  ;;  %v442_v24 = vld [vmem:[#allocation6 + $0x4e0] sm:$0xff] }
  0x3d   :  { %258 = vmatpush.msra.mxu2 %v137_v57  ;;  %238 = vmatpush.msra.mxu1 %v168_v58  ;;  %v443_v25 = vld [vmem:[#allocation6 + $0x4e8] sm:$0xff]  ;;  %v340_v26 = vld [vmem:[#allocation6 + $0x1b0] sm:$0xff]  ;;  %v341_v27 = vld [vmem:[#allocation6 + $0x1b8] sm:$0xff] }
  0x3e   :  { %278 = vmatpush.msra.mxu3 %v169_v59  ;;  %219 = vmatpush.msra.mxu0 %v134_v60  ;;  %v436_v28 = vld [vmem:[#allocation6 + $0x4b0] sm:$0xff]  ;;  %v437_v29 = vld [vmem:[#allocation6 + $0x4b8] sm:$0xff]  ;;  %v334_v30 = vld [vmem:[#allocation6 + $0x180] sm:$0xff] }
  0x3f   :  { %259 = vmatpush.msra.mxu2 %v135_v61  ;;  %220 = vmatmul.f32.vlgmr.msra.gmra.mxu0 %v132_v62  ;;  %v335_v31 = vld [vmem:[#allocation6 + $0x188] sm:$0xff]  ;;  %v430_v32 = vld [vmem:[#allocation6 + $0x480] sm:$0xff]  ;;  %v328_v34 = vld [vmem:[#allocation6 + $0x150] sm:$0xff] }
  0x40   :  { %260 = vmatmul.f32.vlgmr.msra.gmra.mxu2 %v132_v62  ;;  %239 = vmatpush.msra.mxu1 %v166_v63  ;;  %v431_v33 = vld [vmem:[#allocation6 + $0x488] sm:$0xff]  ;;  %v329_v35 = vld [vmem:[#allocation6 + $0x158] sm:$0xff]  ;;  %v424_v36 = vld [vmem:[#allocation6 + $0x450] sm:$0xff] }
  0x41   :  { %279 = vmatpush.msra.mxu3 %v167_v0  ;;  %240 = vmatmul.f32.vlgmr.msra.gmra.mxu1 %v133_v1  ;;  %v425_v37 = vld [vmem:[#allocation6 + $0x458] sm:$0xff]  ;;  %v322_v38 = vld [vmem:[#allocation6 + $0x120] sm:$0xff]  ;;  %v323_v39 = vld [vmem:[#allocation6 + $0x128] sm:$0xff] }
  0x42   :  { %280 = vmatmul.f32.vlgmr.msra.gmra.mxu3 %v133_v1  ;;  %492 = vmatpush.msrb.mxu0 %v376_v2  ;;  %v418_v40 = vld [vmem:[#allocation6 + $0x420] sm:$0xff]  ;;  %v419_v41 = vld [vmem:[#allocation6 + $0x428] sm:$0xff]  ;;  %v316_v42 = vld [vmem:[#allocation6 + $0xf0] sm:$0xff] }
  0x43   :  { %532 = vmatpush.msrb.mxu2 %v377_v3  ;;  %512 = vmatpush.msrb.mxu1 %v472_v4  ;;  %v317_v43 = vld [vmem:[#allocation6 + $0xf8] sm:$0xff]  ;;  %v412_v44 = vld [vmem:[#allocation6 + $0x3f0] sm:$0xff]  ;;  %v310_v46 = vld [vmem:[#allocation6 + $0xc0] sm:$0xff] }
  0x44   :  { %552 = vmatpush.msrb.mxu3 %v473_v5  ;;  %493 = vmatpush.msrb.mxu0 %v370_v6  ;;  %v413_v45 = vld [vmem:[#allocation6 + $0x3f8] sm:$0xff]  ;;  %v311_v47 = vld [vmem:[#allocation6 + $0xc8] sm:$0xff]  ;;  %v406_v48 = vld [vmem:[#allocation6 + $0x3c0] sm:$0xff] }
  0x45   :  { %533 = vmatpush.msrb.mxu2 %v371_v7  ;;  %513 = vmatpush.msrb.mxu1 %v466_v8  ;;  %v407_v49 = vld [vmem:[#allocation6 + $0x3c8] sm:$0xff]  ;;  %v304_v50 = vld [vmem:[#allocation6 + $0x90] sm:$0xff]  ;;  %v305_v51 = vld [vmem:[#allocation6 + $0x98] sm:$0xff] }
  0x46   :  { %553 = vmatpush.msrb.mxu3 %v467_v9  ;;  %494 = vmatpush.msrb.mxu0 %v364_v10  ;;  %v400_v52 = vld [vmem:[#allocation6 + $0x390] sm:$0xff]  ;;  %v401_v53 = vld [vmem:[#allocation6 + $0x398] sm:$0xff]  ;;  %v298_v54 = vld [vmem:[#allocation6 + $0x60] sm:$0xff] }
  0x47   :  { %534 = vmatpush.msrb.mxu2 %v365_v11  ;;  %514 = vmatpush.msrb.mxu1 %v460_v12  ;;  %v299_v55 = vld [vmem:[#allocation6 + $0x68] sm:$0xff]  ;;  %v394_v56 = vld [vmem:[#allocation6 + $0x360] sm:$0xff]  ;;  %v292_v58 = vld [vmem:[#allocation6 + $0x30] sm:$0xff] }
  0x48   :  { %554 = vmatpush.msrb.mxu3 %v461_v13  ;;  %495 = vmatpush.msrb.mxu0 %v358_v14  ;;  %v395_v57 = vld [vmem:[#allocation6 + $0x368] sm:$0xff]  ;;  %v293_v59 = vld [vmem:[#allocation6 + $0x38] sm:$0xff]  ;;  %v388_v60 = vld [vmem:[#allocation6 + $0x330] sm:$0xff] }
  0x49   :  { %535 = vmatpush.msrb.mxu2 %v359_v15  ;;  %515 = vmatpush.msrb.mxu1 %v454_v16  ;;  %v389_v61 = vld [vmem:[#allocation6 + $0x338] sm:$0xff]  ;;  %v286_v62 = vld [vmem:[#allocation6] sm:$0xff]  ;;  %v287_v63 = vld [vmem:[#allocation6 + $0x8] sm:$0xff] }
  0x4a   :  { %555 = vmatpush.msrb.mxu3 %v455_v17  ;;  %496 = vmatpush.msrb.mxu0 %v352_v18  ;;  %v378_v0 = vld [vmem:[#allocation6 + $0x2e0] sm:$0xff]  ;;  %v379_v1 = vld [vmem:[#allocation6 + $0x2e8] sm:$0xff]  ;;  %v372_v4 = vld [vmem:[#allocation6 + $0x2b0] sm:$0xff] }
  0x4b   :  { %536 = vmatpush.msrb.mxu2 %v353_v19  ;;  %516 = vmatpush.msrb.mxu1 %v448_v20  ;;  %v382_v2 = vld [vmem:[#allocation6 + $0x300] sm:$0xff]  ;;  %v383_v3 = vld [vmem:[#allocation6 + $0x308] sm:$0xff]  ;;  %v373_v5 = vld [vmem:[#allocation6 + $0x2b8] sm:$0xff] }
  0x4c   :  { %556 = vmatpush.msrb.mxu3 %v449_v21  ;;  %497 = vmatpush.msrb.mxu0 %v346_v22  ;;  %v474_v6 = vld [vmem:[#allocation6 + $0x5e0] sm:$0xff]  ;;  %v475_v7 = vld [vmem:[#allocation6 + $0x5e8] sm:$0xff]  ;;  %v468_v10 = vld [vmem:[#allocation6 + $0x5b0] sm:$0xff] }
  0x4d   :  { %537 = vmatpush.msrb.mxu2 %v347_v23  ;;  %517 = vmatpush.msrb.mxu1 %v442_v24  ;;  %v366_v8 = vld [vmem:[#allocation6 + $0x280] sm:$0xff]  ;;  %v367_v9 = vld [vmem:[#allocation6 + $0x288] sm:$0xff]  ;;  %v469_v11 = vld [vmem:[#allocation6 + $0x5b8] sm:$0xff] }
  0x4e   :  { %557 = vmatpush.msrb.mxu3 %v443_v25  ;;  %498 = vmatpush.msrb.mxu0 %v340_v26  ;;  %v360_v12 = vld [vmem:[#allocation6 + $0x250] sm:$0xff]  ;;  %v361_v13 = vld [vmem:[#allocation6 + $0x258] sm:$0xff]  ;;  %v462_v14 = vld [vmem:[#allocation6 + $0x580] sm:$0xff] }
  0x4f   :  { %538 = vmatpush.msrb.mxu2 %v341_v27  ;;  %518 = vmatpush.msrb.mxu1 %v436_v28  ;;  %v463_v15 = vld [vmem:[#allocation6 + $0x588] sm:$0xff]  ;;  %v354_v16 = vld [vmem:[#allocation6 + $0x220] sm:$0xff]  ;;  %v456_v18 = vld [vmem:[#allocation6 + $0x550] sm:$0xff] }
  0x50   :  { %558 = vmatpush.msrb.mxu3 %v437_v29  ;;  %499 = vmatpush.msrb.mxu0 %v334_v30  ;;  %v355_v17 = vld [vmem:[#allocation6 + $0x228] sm:$0xff]  ;;  %v457_v19 = vld [vmem:[#allocation6 + $0x558] sm:$0xff]  ;;  %v348_v20 = vld [vmem:[#allocation6 + $0x1f0] sm:$0xff] }
  0x51   :  { %539 = vmatpush.msrb.mxu2 %v335_v31  ;;  %519 = vmatpush.msrb.mxu1 %v430_v32  ;;  %v349_v21 = vld [vmem:[#allocation6 + $0x1f8] sm:$0xff]  ;;  %v450_v22 = vld [vmem:[#allocation6 + $0x520] sm:$0xff]  ;;  %v451_v23 = vld [vmem:[#allocation6 + $0x528] sm:$0xff] }
  0x52   :  { %559 = vmatpush.msrb.mxu3 %v431_v33  ;;  %500 = vmatpush.msrb.mxu0 %v328_v34  ;;  %v342_v24 = vld [vmem:[#allocation6 + $0x1c0] sm:$0xff]  ;;  %v343_v25 = vld [vmem:[#allocation6 + $0x1c8] sm:$0xff]  ;;  %v444_v26 = vld [vmem:[#allocation6 + $0x4f0] sm:$0xff] }
  0x53   :  { %540 = vmatpush.msrb.mxu2 %v329_v35  ;;  %520 = vmatpush.msrb.mxu1 %v424_v36  ;;  %v445_v27 = vld [vmem:[#allocation6 + $0x4f8] sm:$0xff]  ;;  %v336_v28 = vld [vmem:[#allocation6 + $0x190] sm:$0xff]  ;;  %v438_v30 = vld [vmem:[#allocation6 + $0x4c0] sm:$0xff] }
  0x54   :  { %560 = vmatpush.msrb.mxu3 %v425_v37  ;;  %501 = vmatpush.msrb.mxu0 %v322_v38  ;;  %v337_v29 = vld [vmem:[#allocation6 + $0x198] sm:$0xff]  ;;  %v439_v31 = vld [vmem:[#allocation6 + $0x4c8] sm:$0xff]  ;;  %v330_v32 = vld [vmem:[#allocation6 + $0x160] sm:$0xff] }
  0x55   :  { %541 = vmatpush.msrb.mxu2 %v323_v39  ;;  %521 = vmatpush.msrb.mxu1 %v418_v40  ;;  %v331_v33 = vld [vmem:[#allocation6 + $0x168] sm:$0xff]  ;;  %v432_v34 = vld [vmem:[#allocation6 + $0x490] sm:$0xff]  ;;  %v433_v35 = vld [vmem:[#allocation6 + $0x498] sm:$0xff] }
  0x56   :  { %561 = vmatpush.msrb.mxu3 %v419_v41  ;;  %502 = vmatpush.msrb.mxu0 %v316_v42  ;;  %v324_v36 = vld [vmem:[#allocation6 + $0x130] sm:$0xff]  ;;  %v325_v37 = vld [vmem:[#allocation6 + $0x138] sm:$0xff]  ;;  %v426_v38 = vld [vmem:[#allocation6 + $0x460] sm:$0xff] }
  0x57   :  { %542 = vmatpush.msrb.mxu2 %v317_v43  ;;  %522 = vmatpush.msrb.mxu1 %v412_v44  ;;  %v427_v39 = vld [vmem:[#allocation6 + $0x468] sm:$0xff]  ;;  %v318_v40 = vld [vmem:[#allocation6 + $0x100] sm:$0xff]  ;;  %v312_v42 = vld [vmem:[#allocation6 + $0xd0] sm:$0xff] }
  0x58   :  { %562 = vmatpush.msrb.mxu3 %v413_v45  ;;  %503 = vmatpush.msrb.mxu0 %v310_v46  ;;  %v319_v41 = vld [vmem:[#allocation6 + $0x108] sm:$0xff]  ;;  %v313_v43 = vld [vmem:[#allocation6 + $0xd8] sm:$0xff]  ;;  %v306_v44 = vld [vmem:[#allocation6 + $0xa0] sm:$0xff] }
  0x59   :  { %543 = vmatpush.msrb.mxu2 %v311_v47  ;;  %523 = vmatpush.msrb.mxu1 %v406_v48  ;;  %v420_v45 = vld [vmem:[#allocation6 + $0x430] sm:$0xff]  ;;  %v307_v46 = vld [vmem:[#allocation6 + $0xa8] sm:$0xff]  ;;  %v421_v47 = vld [vmem:[#allocation6 + $0x438] sm:$0xff] }
  0x5a   :  { %563 = vmatpush.msrb.mxu3 %v407_v49  ;;  %504 = vmatpush.msrb.mxu0 %v304_v50  ;;  %v300_v48 = vld [vmem:[#allocation6 + $0x70] sm:$0xff]  ;;  %v414_v49 = vld [vmem:[#allocation6 + $0x400] sm:$0xff]  ;;  %v301_v50 = vld [vmem:[#allocation6 + $0x78] sm:$0xff] }
  0x5b   :  { %544 = vmatpush.msrb.mxu2 %v305_v51  ;;  %524 = vmatpush.msrb.mxu1 %v400_v52  ;;  %v415_v51 = vld [vmem:[#allocation6 + $0x408] sm:$0xff]  ;;  %v294_v52 = vld [vmem:[#allocation6 + $0x40] sm:$0xff] }
  0x5c   :  { %564 = vmatpush.msrb.mxu3 %v401_v53  ;;  %505 = vmatpush.msrb.mxu0 %v298_v54  ;;  %v408_v53 = vld [vmem:[#allocation6 + $0x3d0] sm:$0xff]  ;;  %v295_v54 = vld [vmem:[#allocation6 + $0x48] sm:$0xff] }
  0x5d   :  { %545 = vmatpush.msrb.mxu2 %v299_v55  ;;  %525 = vmatpush.msrb.mxu1 %v394_v56  ;;  %v409_v55 = vld [vmem:[#allocation6 + $0x3d8] sm:$0xff]  ;;  %v288_v56 = vld [vmem:[#allocation6 + $0x10] sm:$0xff] }
  0x5e   :  { %565 = vmatpush.msrb.mxu3 %v395_v57  ;;  %506 = vmatpush.msrb.mxu0 %v292_v58  ;;  %v402_v57 = vld [vmem:[#allocation6 + $0x3a0] sm:$0xff]  ;;  %v289_v58 = vld [vmem:[#allocation6 + $0x18] sm:$0xff] }
  0x5f   :  { %546 = vmatpush.msrb.mxu2 %v293_v59  ;;  %526 = vmatpush.msrb.mxu1 %v388_v60  ;;  %v403_v59 = vld [vmem:[#allocation6 + $0x3a8] sm:$0xff]  ;;  %v396_v60 = vld [vmem:[#allocation6 + $0x370] sm:$0xff] }
  0x60   :  { %566 = vmatpush.msrb.mxu3 %v389_v61  ;;  %507 = vmatpush.msrb.mxu0 %v286_v62  ;;  %v397_v61 = vld [vmem:[#allocation6 + $0x378] sm:$0xff]  ;;  %v390_v62 = vld [vmem:[#allocation6 + $0x340] sm:$0xff] }
  0x61   :  { %547 = vmatpush.msrb.mxu2 %v287_v63  ;;  %527 = vmatpush.msrb.mxu1 %v382_v2  ;;  %v391_v63 = vld [vmem:[#allocation6 + $0x348] sm:$0xff]  ;;  %v198_v2 = vld [vmem:[#allocation4] sm:$0x3] }
  0x62   :  { %572 = vmatpush.msra.mxu0 %v378_v0  ;;  %567 = vmatpush.msrb.mxu3 %v383_v3  ;;  %v384_v0 = vld [vmem:[#allocation6 + $0x310] sm:$0xff]  ;;  %v200_v3 = vperm.slane %v198_v2, 0 }
  0x63   :  { %612 = vmatpush.msra.mxu2 %v379_v1  ;;  %592 = vmatpush.msra.mxu1 %v474_v6  ;;  %v385_v1 = vld [vmem:[#allocation6 + $0x318] sm:$0xff] }
  0x64   :  { %573 = vmatpush.msra.mxu0 %v372_v4  ;;  %632 = vmatpush.msra.mxu3 %v475_v7 }
  0x65   :  { %613 = vmatpush.msra.mxu2 %v373_v5  ;;  %593 = vmatpush.msra.mxu1 %v468_v10  ;;  %v380_v10 = vld [vmem:[#allocation6 + $0x2f0] sm:$0xff] }
  0x66   :  { %574 = vmatpush.msra.mxu0 %v366_v8  ;;  %633 = vmatpush.msra.mxu3 %v469_v11  ;;  %v201_v8 = vperm.slane %v198_v2, 1  ;;  %v381_v11 = vld [vmem:[#allocation6 + $0x2f8] sm:$0xff]  ;;  %v410_v2 = vld [vmem:[#allocation6 + $0x3e0] sm:$0xff] }
  0x67   :  { %614 = vmatpush.msra.mxu2 %v367_v9  ;;  %594 = vmatpush.msra.mxu1 %v462_v14  ;;  %v374_v14 = vld [vmem:[#allocation6 + $0x2c0] sm:$0xff] }
  0x68   :  { %575 = vmatpush.msra.mxu0 %v360_v12  ;;  %634 = vmatpush.msra.mxu3 %v463_v15  ;;  %v375_v15 = vld [vmem:[#allocation6 + $0x2c8] sm:$0xff] }
  0x69   :  { %615 = vmatpush.msra.mxu2 %v361_v13  ;;  %595 = vmatpush.msra.mxu1 %v456_v18  ;;  %v368_v18 = vld [vmem:[#allocation6 + $0x290] sm:$0xff] }
  0x6a   :  { %576 = vmatpush.msra.mxu0 %v354_v16  ;;  %635 = vmatpush.msra.mxu3 %v457_v19  ;;  %v369_v19 = vld [vmem:[#allocation6 + $0x298] sm:$0xff] }
  0x6b   :  { %616 = vmatpush.msra.mxu2 %v355_v17  ;;  %596 = vmatpush.msra.mxu1 %v450_v22  ;;  %v476_v22 = vld [vmem:[#allocation6 + $0x5f0] sm:$0xff] }
  0x6c   :  { %577 = vmatpush.msra.mxu0 %v348_v20  ;;  %636 = vmatpush.msra.mxu3 %v451_v23  ;;  %v363_v23 = vld [vmem:[#allocation6 + $0x268] sm:$0xff] }
  0x6d   :  { %617 = vmatpush.msra.mxu2 %v349_v21  ;;  %597 = vmatpush.msra.mxu1 %v444_v26  ;;  %v362_v21 = vld [vmem:[#allocation6 + $0x260] sm:$0xff] }
  0x6e   :  { %578 = vmatpush.msra.mxu0 %v342_v24  ;;  %637 = vmatpush.msra.mxu3 %v445_v27  ;;  %v477_v24 = vld [vmem:[#allocation6 + $0x5f8] sm:$0xff]  ;;  %v470_v26 = vld [vmem:[#allocation6 + $0x5c0] sm:$0xff] }
  0x6f   :  { %618 = vmatpush.msra.mxu2 %v343_v25  ;;  %598 = vmatpush.msra.mxu1 %v438_v30  ;;  %v356_v25 = vld [vmem:[#allocation6 + $0x230] sm:$0xff]  ;;  %v357_v27 = vld [vmem:[#allocation6 + $0x238] sm:$0xff] }
  0x70   :  { %579 = vmatpush.msra.mxu0 %v336_v28  ;;  %638 = vmatpush.msra.mxu3 %v439_v31  ;;  %v471_v28 = vld [vmem:[#allocation6 + $0x5c8] sm:$0xff]  ;;  %v464_v30 = vld [vmem:[#allocation6 + $0x590] sm:$0xff] }
  0x71   :  { %619 = vmatpush.msra.mxu2 %v337_v29  ;;  %599 = vmatpush.msra.mxu1 %v432_v34  ;;  %v350_v29 = vld [vmem:[#allocation6 + $0x200] sm:$0xff]  ;;  %v351_v31 = vld [vmem:[#allocation6 + $0x208] sm:$0xff] }
  0x72   :  { %580 = vmatpush.msra.mxu0 %v330_v32  ;;  %639 = vmatpush.msra.mxu3 %v433_v35  ;;  %v465_v32 = vld [vmem:[#allocation6 + $0x598] sm:$0xff]  ;;  %v458_v34 = vld [vmem:[#allocation6 + $0x560] sm:$0xff] }
  0x73   :  { %620 = vmatpush.msra.mxu2 %v331_v33  ;;  %600 = vmatpush.msra.mxu1 %v426_v38  ;;  %v344_v33 = vld [vmem:[#allocation6 + $0x1d0] sm:$0xff]  ;;  %v345_v35 = vld [vmem:[#allocation6 + $0x1d8] sm:$0xff] }
  0x74   :  { %581 = vmatpush.msra.mxu0 %v324_v36  ;;  %640 = vmatpush.msra.mxu3 %v427_v39  ;;  %v459_v36 = vld [vmem:[#allocation6 + $0x568] sm:$0xff]  ;;  %v452_v38 = vld [vmem:[#allocation6 + $0x530] sm:$0xff] }
  0x75   :  { %621 = vmatpush.msra.mxu2 %v325_v37  ;;  %601 = vmatpush.msra.mxu1 %v420_v45  ;;  %v338_v37 = vld [vmem:[#allocation6 + $0x1a0] sm:$0xff]  ;;  %v339_v39 = vld [vmem:[#allocation6 + $0x1a8] sm:$0xff] }
  0x76   :  { %582 = vmatpush.msra.mxu0 %v318_v40  ;;  %641 = vmatpush.msra.mxu3 %v421_v47  ;;  %v453_v40 = vld [vmem:[#allocation6 + $0x538] sm:$0xff]  ;;  %v326_v45 = vld [vmem:[#allocation6 + $0x140] sm:$0xff]  ;;  %v327_v47 = vld [vmem:[#allocation6 + $0x148] sm:$0xff] }
  0x77   :  { %622 = vmatpush.msra.mxu2 %v319_v41  ;;  %602 = vmatpush.msra.mxu1 %v414_v49  ;;  %v332_v41 = vld [vmem:[#allocation6 + $0x170] sm:$0xff] }
  0x78   :  { %583 = vmatpush.msra.mxu0 %v312_v42  ;;  %642 = vmatpush.msra.mxu3 %v415_v51  ;;  %v446_v42 = vld [vmem:[#allocation6 + $0x500] sm:$0xff]  ;;  %v320_v49 = vld [vmem:[#allocation6 + $0x110] sm:$0xff]  ;;  %v321_v51 = vld [vmem:[#allocation6 + $0x118] sm:$0xff] }
  0x79   :  { %623 = vmatpush.msra.mxu2 %v313_v43  ;;  %603 = vmatpush.msra.mxu1 %v408_v53  ;;  %v333_v43 = vld [vmem:[#allocation6 + $0x178] sm:$0xff]  ;;  %v314_v53 = vld [vmem:[#allocation6 + $0xe0] sm:$0xff] }
  0x7a   :  { %584 = vmatpush.msra.mxu0 %v306_v44  ;;  %643 = vmatpush.msra.mxu3 %v409_v55  ;;  %v447_v44 = vld [vmem:[#allocation6 + $0x508] sm:$0xff] }
  0x7b   :  { %624 = vmatpush.msra.mxu2 %v307_v46  ;;  %604 = vmatpush.msra.mxu1 %v402_v57  ;;  %v440_v46 = vld [vmem:[#allocation6 + $0x4d0] sm:$0xff]  ;;  %v315_v55 = vld [vmem:[#allocation6 + $0xe8] sm:$0xff] }
  0x7c   :  { %585 = vmatpush.msra.mxu0 %v300_v48  ;;  %644 = vmatpush.msra.mxu3 %v403_v59  ;;  %v441_v48 = vld [vmem:[#allocation6 + $0x4d8] sm:$0xff]  ;;  %v308_v57 = vld [vmem:[#allocation6 + $0xb0] sm:$0xff] }
  0x7d   :  { %625 = vmatpush.msra.mxu2 %v301_v50  ;;  %605 = vmatpush.msra.mxu1 %v396_v60  ;;  %v434_v50 = vld [vmem:[#allocation6 + $0x4a0] sm:$0xff]  ;;  %v309_v59 = vld [vmem:[#allocation6 + $0xb8] sm:$0xff]  ;;  %v423_v60 = vld [vmem:[#allocation6 + $0x448] sm:$0xff] }
  0x7e   :  { %586 = vmatpush.msra.mxu0 %v294_v52  ;;  %645 = vmatpush.msra.mxu3 %v397_v61  ;;  %v435_v52 = vld [vmem:[#allocation6 + $0x4a8] sm:$0xff]  ;;  %v302_v61 = vld [vmem:[#allocation6 + $0x80] sm:$0xff] }
  0x7f   :  { %626 = vmatpush.msra.mxu2 %v295_v54  ;;  %606 = vmatpush.msra.mxu1 %v390_v62  ;;  %v428_v54 = vld [vmem:[#allocation6 + $0x470] sm:$0xff] }
  0x80   :  { %587 = vmatpush.msra.mxu0 %v288_v56  ;;  %646 = vmatpush.msra.mxu3 %v391_v63  ;;  %v429_v56 = vld [vmem:[#allocation6 + $0x478] sm:$0xff]  ;;  %v416_v62 = vld [vmem:[#allocation6 + $0x410] sm:$0xff]  ;;  %v303_v63 = vld [vmem:[#allocation6 + $0x88] sm:$0xff] }
  0x81   :  { %627 = vmatpush.msra.mxu2 %v289_v58  ;;  %607 = vmatpush.msra.mxu1 %v384_v0  ;;  %v422_v58 = vld [vmem:[#allocation6 + $0x440] sm:$0xff]  ;;  %v417_v0 = vld [vmem:[#allocation6 + $0x418] sm:$0xff] }
  0x82   :  { %647 = vmatpush.msra.mxu3 %v385_v1  ;;  %v296_v1 = vld [vmem:[#allocation6 + $0x50] sm:$0xff] }
  0xbc   :  { %v221_v4 = vpop.f32.mrf.mxu0 }
  0xbd   :  { %v222_v5 = vadd.f32 %v221_v4, %v200_v3  ;;  %v297_v3 = vld [vmem:[#allocation6 + $0x58] sm:$0xff]  ;;  %v411_v4 = vld [vmem:[#allocation6 + $0x3e8] sm:$0xff] }
  0xbe   :  { %v241_v6 = vpop.f32.mrf.mxu1 }
  0xbf   :  { %v242_v7 = vadd.f32 %v241_v6, %v222_v5  ;;  %v290_v5 = vld [vmem:[#allocation6 + $0x20] sm:$0xff]  ;;  %v404_v6 = vld [vmem:[#allocation6 + $0x3b0] sm:$0xff] }
  0xc1   :  { %v4675_v9 = vmax.f32 %v242_v7, 0.0  ;;  %v291_v7 = vld [vmem:[#allocation6 + $0x28] sm:$0xff] }
  0xc3   :  { %v261_v12 = vpop.f32.mrf.mxu2  ;;  %508 = vmatmul.f32.vlgmr.msrb.gmra.mxu0 %v4675_v9  ;;  %548 = vmatmul.f32.vlgmr.msrb.gmra.mxu2 %v4675_v9 }
  0xc4   :  { %v262_v13 = vadd.f32 %v261_v12, %v201_v8  ;;  %652 = vmatpush.msrb.mxu0 %v380_v10  ;;  %692 = vmatpush.msrb.mxu2 %v381_v11  ;;  %v405_v8 = vld [vmem:[#allocation6 + $0x3b8] sm:$0xff]  ;;  %v398_v10 = vld [vmem:[#allocation6 + $0x380] sm:$0xff]  ;;  %v399_v11 = vld [vmem:[#allocation6 + $0x388] sm:$0xff] }
  0xc5   :  { %v281_v16 = vpop.f32.mrf.mxu3  ;;  %v753_v12 = vld [vmem:[#allocation9 + $0x78] sm:$0xff] }
  0xc6   :  { %v282_v17 = vadd.f32 %v281_v16, %v262_v13  ;;  %653 = vmatpush.msrb.mxu0 %v374_v14  ;;  %693 = vmatpush.msrb.mxu2 %v375_v15  ;;  %v785_v13 = vld [vmem:[#allocation9 + $0x178] sm:$0xff]  ;;  %v392_v14 = vld [vmem:[#allocation6 + $0x350] sm:$0xff] }
  0xc7   :  { %v393_v15 = vld [vmem:[#allocation6 + $0x358] sm:$0xff] }
  0xc8   :  { %v4679_v20 = vmax.f32 %v282_v17, 0.0  ;;  %654 = vmatpush.msrb.mxu0 %v368_v18  ;;  %694 = vmatpush.msrb.mxu2 %v369_v19  ;;  %v752_v16 = vld [vmem:[#allocation9 + $0x70] sm:$0xff]  ;;  %v386_v18 = vld [vmem:[#allocation6 + $0x320] sm:$0xff]  ;;  %v387_v19 = vld [vmem:[#allocation6 + $0x328] sm:$0xff] }
  0xc9   :  { %v784_v17 = vld [vmem:[#allocation9 + $0x170] sm:$0xff] }
  0xca   :  { %528 = vmatmul.f32.vlgmr.msrb.gmra.mxu1 %v4679_v20  ;;  %568 = vmatmul.f32.vlgmr.msrb.gmra.mxu3 %v4679_v20 }
  0xcb   :  { %655 = vmatpush.msrb.mxu0 %v362_v21  ;;  %672 = vmatpush.msrb.mxu1 %v476_v22  ;;  %v751_v21 = vld [vmem:[#allocation9 + $0x68] sm:$0xff]  ;;  %v769_v22 = vld [vmem:[#allocation9 + $0xf8] sm:$0xff] }
  0xcc   :  { %695 = vmatpush.msrb.mxu2 %v363_v23  ;;  %712 = vmatpush.msrb.mxu3 %v477_v24  ;;  %v783_v23 = vld [vmem:[#allocation9 + $0x168] sm:$0xff]  ;;  %v750_v24 = vld [vmem:[#allocation9 + $0x60] sm:$0xff] }
  0xcd   :  { %588 = vmatmul.f32.vlgmr.msra.gmra.mxu0 %v4675_v9  ;;  %628 = vmatmul.f32.vlgmr.msra.gmra.mxu2 %v4675_v9 }
  0xce   :  { %656 = vmatpush.msrb.mxu0 %v356_v25  ;;  %673 = vmatpush.msrb.mxu1 %v470_v26  ;;  %v768_v25 = vld [vmem:[#allocation9 + $0xf0] sm:$0xff]  ;;  %v782_v26 = vld [vmem:[#allocation9 + $0x160] sm:$0xff] }
  0xcf   :  { %696 = vmatpush.msrb.mxu2 %v357_v27  ;;  %713 = vmatpush.msrb.mxu3 %v471_v28  ;;  %v800_v27 = vld [vmem:[#allocation9 + $0x1f0] sm:$0xff]  ;;  %v749_v28 = vld [vmem:[#allocation9 + $0x58] sm:$0xff] }
  0xd0   :  { %657 = vmatpush.msrb.mxu0 %v350_v29  ;;  %674 = vmatpush.msrb.mxu1 %v464_v30  ;;  %v767_v29 = vld [vmem:[#allocation9 + $0xe8] sm:$0xff]  ;;  %v781_v30 = vld [vmem:[#allocation9 + $0x158] sm:$0xff] }
  0xd1   :  { %697 = vmatpush.msrb.mxu2 %v351_v31  ;;  %714 = vmatpush.msrb.mxu3 %v465_v32  ;;  %v799_v31 = vld [vmem:[#allocation9 + $0x1e8] sm:$0xff]  ;;  %v748_v32 = vld [vmem:[#allocation9 + $0x50] sm:$0xff] }
  0xd2   :  { %658 = vmatpush.msrb.mxu0 %v344_v33  ;;  %675 = vmatpush.msrb.mxu1 %v458_v34  ;;  %v766_v33 = vld [vmem:[#allocation9 + $0xe0] sm:$0xff]  ;;  %v747_v34 = vld [vmem:[#allocation9 + $0x48] sm:$0xff] }
  0xd3   :  { %698 = vmatpush.msrb.mxu2 %v345_v35  ;;  %715 = vmatpush.msrb.mxu3 %v459_v36  ;;  %v765_v35 = vld [vmem:[#allocation9 + $0xd8] sm:$0xff]  ;;  %v746_v36 = vld [vmem:[#allocation9 + $0x40] sm:$0xff] }
  0xd4   :  { %608 = vmatmul.f32.vlgmr.msra.gmra.mxu1 %v4679_v20  ;;  %648 = vmatmul.f32.vlgmr.msra.gmra.mxu3 %v4679_v20 }
  0xd5   :  { %659 = vmatpush.msrb.mxu0 %v338_v37  ;;  %676 = vmatpush.msrb.mxu1 %v452_v38  ;;  %v764_v37 = vld [vmem:[#allocation9 + $0xd0] sm:$0xff]  ;;  %v745_v38 = vld [vmem:[#allocation9 + $0x38] sm:$0xff] }
  0xd6   :  { %699 = vmatpush.msrb.mxu2 %v339_v39  ;;  %716 = vmatpush.msrb.mxu3 %v453_v40  ;;  %v763_v39 = vld [vmem:[#allocation9 + $0xc8] sm:$0xff]  ;;  %v744_v40 = vld [vmem:[#allocation9 + $0x30] sm:$0xff] }
  0xd7   :  { %660 = vmatpush.msrb.mxu0 %v332_v41  ;;  %677 = vmatpush.msrb.mxu1 %v446_v42  ;;  %v743_v41 = vld [vmem:[#allocation9 + $0x28] sm:$0xff]  ;;  %v762_v42 = vld [vmem:[#allocation9 + $0xc0] sm:$0xff] }
  0xd8   :  { %700 = vmatpush.msrb.mxu2 %v333_v43  ;;  %717 = vmatpush.msrb.mxu3 %v447_v44  ;;  %v779_v43 = vld [vmem:[#allocation9 + $0x148] sm:$0xff]  ;;  %v798_v44 = vld [vmem:[#allocation9 + $0x1e0] sm:$0xff] }
  0xd9   :  { %661 = vmatpush.msrb.mxu0 %v326_v45  ;;  %678 = vmatpush.msrb.mxu1 %v440_v46  ;;  %v742_v45 = vld [vmem:[#allocation9 + $0x20] sm:$0xff]  ;;  %v761_v46 = vld [vmem:[#allocation9 + $0xb8] sm:$0xff] }
  0xda   :  { %701 = vmatpush.msrb.mxu2 %v327_v47  ;;  %718 = vmatpush.msrb.mxu3 %v441_v48  ;;  %v778_v47 = vld [vmem:[#allocation9 + $0x140] sm:$0xff]  ;;  %v797_v48 = vld [vmem:[#allocation9 + $0x1d8] sm:$0xff] }
  0xdb   :  { %662 = vmatpush.msrb.mxu0 %v320_v49  ;;  %679 = vmatpush.msrb.mxu1 %v434_v50  ;;  %v741_v49 = vld [vmem:[#allocation9 + $0x18] sm:$0xff]  ;;  %v760_v50 = vld [vmem:[#allocation9 + $0xb0] sm:$0xff] }
  0xdc   :  { %702 = vmatpush.msrb.mxu2 %v321_v51  ;;  %719 = vmatpush.msrb.mxu3 %v435_v52  ;;  %v777_v51 = vld [vmem:[#allocation9 + $0x138] sm:$0xff]  ;;  %v796_v52 = vld [vmem:[#allocation9 + $0x1d0] sm:$0xff] }
  0xdd   :  { %663 = vmatpush.msrb.mxu0 %v314_v53  ;;  %680 = vmatpush.msrb.mxu1 %v428_v54  ;;  %v740_v53 = vld [vmem:[#allocation9 + $0x10] sm:$0xff]  ;;  %v759_v54 = vld [vmem:[#allocation9 + $0xa8] sm:$0xff] }
  0xde   :  { %703 = vmatpush.msrb.mxu2 %v315_v55  ;;  %720 = vmatpush.msrb.mxu3 %v429_v56  ;;  %v776_v55 = vld [vmem:[#allocation9 + $0x130] sm:$0xff]  ;;  %v795_v56 = vld [vmem:[#allocation9 + $0x1c8] sm:$0xff] }
  0xdf   :  { %664 = vmatpush.msrb.mxu0 %v308_v57  ;;  %681 = vmatpush.msrb.mxu1 %v422_v58  ;;  %v739_v57 = vld [vmem:[#allocation9 + $0x8] sm:$0xff]  ;;  %v758_v58 = vld [vmem:[#allocation9 + $0xa0] sm:$0xff] }
  0xe0   :  { %704 = vmatpush.msrb.mxu2 %v309_v59  ;;  %721 = vmatpush.msrb.mxu3 %v423_v60  ;;  %v775_v59 = vld [vmem:[#allocation9 + $0x128] sm:$0xff]  ;;  %v794_v60 = vld [vmem:[#allocation9 + $0x1c0] sm:$0xff] }
  0xe1   :  { %665 = vmatpush.msrb.mxu0 %v302_v61  ;;  %682 = vmatpush.msrb.mxu1 %v416_v62  ;;  %v738_v61 = vld [vmem:[#allocation9] sm:$0xff]  ;;  %v757_v62 = vld [vmem:[#allocation9 + $0x98] sm:$0xff] }
  0xe2   :  { %705 = vmatpush.msrb.mxu2 %v303_v63  ;;  %722 = vmatpush.msrb.mxu3 %v417_v0  ;;  %v774_v63 = vld [vmem:[#allocation9 + $0x120] sm:$0xff]  ;;  %v793_v0 = vld [vmem:[#allocation9 + $0x1b8] sm:$0xff] }
  0xe3   :  { %666 = vmatpush.msrb.mxu0 %v296_v1  ;;  %683 = vmatpush.msrb.mxu1 %v410_v2  ;;  %v817_v1 = vld [vmem:[#allocation9 + $0x278] sm:$0xff]  ;;  %v756_v2 = vld [vmem:[#allocation9 + $0x90] sm:$0xff] }
  0xe4   :  { %706 = vmatpush.msrb.mxu2 %v297_v3  ;;  %723 = vmatpush.msrb.mxu3 %v411_v4  ;;  %v773_v3 = vld [vmem:[#allocation9 + $0x118] sm:$0xff]  ;;  %v792_v4 = vld [vmem:[#allocation9 + $0x1b0] sm:$0xff] }
  0xe5   :  { %667 = vmatpush.msrb.mxu0 %v290_v5  ;;  %684 = vmatpush.msrb.mxu1 %v404_v6  ;;  %v816_v5 = vld [vmem:[#allocation9 + $0x270] sm:$0xff]  ;;  %v755_v6 = vld [vmem:[#allocation9 + $0x88] sm:$0xff] }
  0xe6   :  { %707 = vmatpush.msrb.mxu2 %v291_v7  ;;  %724 = vmatpush.msrb.mxu3 %v405_v8  ;;  %v772_v7 = vld [vmem:[#allocation9 + $0x110] sm:$0xff]  ;;  %v791_v8 = vld [vmem:[#allocation9 + $0x1a8] sm:$0xff] }
  0xe7   :  { %668 = vmatmul.f32.vlgmr.msrb.gmra.mxu0 %v4675_v9  ;;  %708 = vmatmul.f32.vlgmr.msrb.gmra.mxu2 %v4675_v9  ;;  %v801_v9 = vld [vmem:[#allocation9 + $0x1f8] sm:$0xff] }
  0xe8   :  { %685 = vmatpush.msrb.mxu1 %v398_v10  ;;  %725 = vmatpush.msrb.mxu3 %v399_v11  ;;  %v815_v10 = vld [vmem:[#allocation9 + $0x268] sm:$0xff]  ;;  %v754_v11 = vld [vmem:[#allocation9 + $0x80] sm:$0xff] }
  0xe9   :  { %838 = vmatpush.msra.mxu0 %v753_v12  ;;  %878 = vmatpush.msra.mxu2 %v785_v13  ;;  %v771_v12 = vld [vmem:[#allocation9 + $0x108] sm:$0xff]  ;;  %v790_v13 = vld [vmem:[#allocation9 + $0x1a0] sm:$0xff] }
  0xea   :  { %686 = vmatpush.msrb.mxu1 %v392_v14  ;;  %726 = vmatpush.msrb.mxu3 %v393_v15  ;;  %v814_v14 = vld [vmem:[#allocation9 + $0x260] sm:$0xff]  ;;  %v833_v15 = vld [vmem:[#allocation9 + $0x2f8] sm:$0xff] }
  0xeb   :  { %839 = vmatpush.msra.mxu0 %v752_v16  ;;  %879 = vmatpush.msra.mxu2 %v784_v17  ;;  %v770_v16 = vld [vmem:[#allocation9 + $0x100] sm:$0xff]  ;;  %v789_v17 = vld [vmem:[#allocation9 + $0x198] sm:$0xff] }
  0xec   :  { %687 = vmatpush.msrb.mxu1 %v386_v18  ;;  %727 = vmatpush.msrb.mxu3 %v387_v19  ;;  %v813_v18 = vld [vmem:[#allocation9 + $0x258] sm:$0xff]  ;;  %v832_v19 = vld [vmem:[#allocation9 + $0x2f0] sm:$0xff] }
  0xed   :  { %688 = vmatmul.f32.vlgmr.msrb.gmra.mxu1 %v4679_v20  ;;  %728 = vmatmul.f32.vlgmr.msrb.gmra.mxu3 %v4679_v20  ;;  %v780_v20 = vld [vmem:[#allocation9 + $0x150] sm:$0xff] }
  0xee   :  { %840 = vmatpush.msra.mxu0 %v751_v21  ;;  %858 = vmatpush.msra.mxu1 %v769_v22  ;;  %v788_v21 = vld [vmem:[#allocation9 + $0x190] sm:$0xff] }
  0xef   :  { %880 = vmatpush.msra.mxu2 %v783_v23  ;;  %898 = vmatpush.msra.mxu3 %v801_v9  ;;  %v812_v22 = vld [vmem:[#allocation9 + $0x250] sm:$0xff]  ;;  %v831_v23 = vld [vmem:[#allocation9 + $0x2e8] sm:$0xff] }
  0xf0   :  { %841 = vmatpush.msra.mxu0 %v750_v24  ;;  %859 = vmatpush.msra.mxu1 %v768_v25  ;;  %v787_v9 = vld [vmem:[#allocation9 + $0x188] sm:$0xff]  ;;  %v830_v25 = vld [vmem:[#allocation9 + $0x2e0] sm:$0xff] }
  0xf1   :  { %881 = vmatpush.msra.mxu2 %v782_v26  ;;  %899 = vmatpush.msra.mxu3 %v800_v27  ;;  %v811_v24 = vld [vmem:[#allocation9 + $0x248] sm:$0xff]  ;;  %v786_v26 = vld [vmem:[#allocation9 + $0x180] sm:$0xff] }
  0xf2   :  { %842 = vmatpush.msra.mxu0 %v749_v28  ;;  %860 = vmatpush.msra.mxu1 %v767_v29  ;;  %v810_v27 = vld [vmem:[#allocation9 + $0x240] sm:$0xff]  ;;  %v829_v28 = vld [vmem:[#allocation9 + $0x2d8] sm:$0xff] }
  0xf3   :  { %882 = vmatpush.msra.mxu2 %v781_v30  ;;  %900 = vmatpush.msra.mxu3 %v799_v31  ;;  %v4691_v29 = vld [vmem:[#allocation7] sm:$0x3f]  ;;  %v828_v31 = vld [vmem:[#allocation9 + $0x2d0] sm:$0xff] }
  0xf4   :  { %843 = vmatpush.msra.mxu0 %v748_v32  ;;  %861 = vmatpush.msra.mxu1 %v766_v33  ;;  %v809_v30 = vld [vmem:[#allocation9 + $0x238] sm:$0xff]  ;;  %v480_v32 = vperm.slane %v4691_v29, 0  ;;  %v808_v33 = vld [vmem:[#allocation9 + $0x230] sm:$0xff] }
  0xf5   :  { %883 = vmatpush.msra.mxu2 %v780_v20  ;;  %901 = vmatpush.msra.mxu3 %v798_v44  ;;  %v827_v20 = vld [vmem:[#allocation9 + $0x2c8] sm:$0xff] }
  0xf6   :  { %844 = vmatpush.msra.mxu0 %v747_v34  ;;  %862 = vmatpush.msra.mxu1 %v765_v35  ;;  %v807_v35 = vld [vmem:[#allocation9 + $0x228] sm:$0xff] }
  0xf7   :  { %884 = vmatpush.msra.mxu2 %v779_v43  ;;  %902 = vmatpush.msra.mxu3 %v797_v48 }
  0xf8   :  { %845 = vmatpush.msra.mxu0 %v746_v36  ;;  %863 = vmatpush.msra.mxu1 %v764_v37  ;;  %v826_v36 = vld [vmem:[#allocation9 + $0x2c0] sm:$0xff] }
  0xf9   :  { %885 = vmatpush.msra.mxu2 %v778_v47  ;;  %903 = vmatpush.msra.mxu3 %v796_v52  ;;  %v823_v47 = vld [vmem:[#allocation9 + $0x2a8] sm:$0xff]  ;;  %v482_v52 = vperm.slane %v4691_v29, 2 }
  0xfa   :  { %846 = vmatpush.msra.mxu0 %v745_v38  ;;  %864 = vmatpush.msra.mxu1 %v763_v39  ;;  %v806_v38 = vld [vmem:[#allocation9 + $0x220] sm:$0xff]  ;;  %v825_v39 = vld [vmem:[#allocation9 + $0x2b8] sm:$0xff] }
  0xfb   :  { %886 = vmatpush.msra.mxu2 %v777_v51  ;;  %904 = vmatpush.msra.mxu3 %v795_v56  ;;  %v822_v51 = vld [vmem:[#allocation9 + $0x2a0] sm:$0xff]  ;;  %v821_v56 = vld [vmem:[#allocation9 + $0x298] sm:$0xff] }
  0xfc   :  { %847 = vmatpush.msra.mxu0 %v744_v40  ;;  %865 = vmatpush.msra.mxu1 %v762_v42  ;;  %v481_v40 = vperm.slane %v4691_v29, 1  ;;  %v824_v42 = vld [vmem:[#allocation9 + $0x2b0] sm:$0xff] }
  0xfd   :  { %887 = vmatpush.msra.mxu2 %v776_v55  ;;  %905 = vmatpush.msra.mxu3 %v794_v60  ;;  %v802_v55 = vld [vmem:[#allocation9 + $0x200] sm:$0xff] }
  0xfe   :  { %848 = vmatpush.msra.mxu0 %v743_v41  ;;  %866 = vmatpush.msra.mxu1 %v761_v46  ;;  %v805_v41 = vld [vmem:[#allocation9 + $0x218] sm:$0xff]  ;;  %v804_v46 = vld [vmem:[#allocation9 + $0x210] sm:$0xff] }
  0xff   :  { %888 = vmatpush.msra.mxu2 %v775_v59  ;;  %906 = vmatpush.msra.mxu3 %v793_v0  ;;  %v483_v0 = vperm.slane %v4691_v29, 3 }
 0x100   :  { %849 = vmatpush.msra.mxu0 %v742_v45  ;;  %867 = vmatpush.msra.mxu1 %v760_v50  ;;  %v803_v50 = vld [vmem:[#allocation9 + $0x208] sm:$0xff] }
 0x101   :  { %889 = vmatpush.msra.mxu2 %v774_v63  ;;  %907 = vmatpush.msra.mxu3 %v792_v4  ;;  %v1318_v4 = vld [vmem:[#allocation12 + $0xb40] sm:$0xff] }
 0x102   :  { %850 = vmatpush.msra.mxu0 %v741_v49  ;;  %868 = vmatpush.msra.mxu1 %v759_v54 }
 0x103   :  { %890 = vmatpush.msra.mxu2 %v773_v3  ;;  %908 = vmatpush.msra.mxu3 %v791_v8  ;;  %v1321_v8 = vld [vmem:[#allocation12 + $0xb58] sm:$0xff] }
 0x104   :  { %851 = vmatpush.msra.mxu0 %v740_v53  ;;  %869 = vmatpush.msra.mxu1 %v758_v58  ;;  %v820_v58 = vld [vmem:[#allocation9 + $0x290] sm:$0xff] }
 0x105   :  { %891 = vmatpush.msra.mxu2 %v772_v7  ;;  %909 = vmatpush.msra.mxu3 %v790_v13  ;;  %v1296_v13 = vld [vmem:[#allocation12 + $0xa90] sm:$0xff] }
 0x106   :  { %852 = vmatpush.msra.mxu0 %v739_v57  ;;  %870 = vmatpush.msra.mxu1 %v757_v62  ;;  %v819_v62 = vld [vmem:[#allocation9 + $0x288] sm:$0xff] }
 0x107   :  { %892 = vmatpush.msra.mxu2 %v771_v12  ;;  %910 = vmatpush.msra.mxu3 %v789_v17  ;;  %v1271_v17 = vld [vmem:[#allocation12 + $0x9c8] sm:$0xff] }
 0x108   :  { %853 = vmatpush.msra.mxu0 %v738_v61  ;;  %871 = vmatpush.msra.mxu1 %v756_v2  ;;  %v818_v2 = vld [vmem:[#allocation9 + $0x280] sm:$0xff] }
 0x109   :  { %893 = vmatpush.msra.mxu2 %v770_v16  ;;  %911 = vmatpush.msra.mxu3 %v788_v21  ;;  %v1270_v16 = vld [vmem:[#allocation12 + $0x9c0] sm:$0xff] }
 0x10a   :  { %918 = vmatpush.msrb.mxu0 %v817_v1  ;;  %872 = vmatpush.msra.mxu1 %v755_v6  ;;  %v1320_v6 = vld [vmem:[#allocation12 + $0xb50] sm:$0xff] }
 0x10b   :  { %912 = vmatpush.msra.mxu3 %v787_v9  ;;  %1342 = vmatpush.msrb.mxu2 %v1318_v4  ;;  %v1248_v9 = vld [vmem:[#allocation12 + $0x910] sm:$0xff]  ;;  %v1057_v4 = vld [vmem:[#allocation12 + $0x318] sm:$0xff] }
 0x10c   :  { %919 = vmatpush.msrb.mxu0 %v816_v5  ;;  %873 = vmatpush.msra.mxu1 %v754_v11  ;;  %v1319_v5 = vld [vmem:[#allocation12 + $0xb48] sm:$0xff] }
 0x10d   :  { %913 = vmatpush.msra.mxu3 %v786_v26  ;;  %v1295_v11 = vld [vmem:[#allocation12 + $0xa88] sm:$0xff] }
 0x10e   :  { %920 = vmatpush.msrb.mxu0 %v815_v10  ;;  %938 = vmatpush.msrb.mxu1 %v833_v15  ;;  %v1294_v10 = vld [vmem:[#allocation12 + $0xa80] sm:$0xff]  ;;  %v1223_v26 = vld [vmem:[#allocation12 + $0x848] sm:$0xff] }
 0x10f   :  { %1362 = vmatpush.msrb.mxu3 %v1319_v5  ;;  %1343 = vmatpush.msrb.mxu2 %v1294_v10  ;;  %v1030_v5 = vld [vmem:[#allocation12 + $0x240] sm:$0xff]  ;;  %v1007_v10 = vld [vmem:[#allocation12 + $0x188] sm:$0xff] }
 0x110   :  { %921 = vmatpush.msrb.mxu0 %v814_v14  ;;  %939 = vmatpush.msrb.mxu1 %v832_v19  ;;  %v1297_v14 = vld [vmem:[#allocation12 + $0xa98] sm:$0xff] }
 0x111   :  { %1363 = vmatpush.msrb.mxu3 %v1295_v11  ;;  %v1273_v19 = vld [vmem:[#allocation12 + $0x9d8] sm:$0xff]  ;;  %1344 = vmatpush.msrb.mxu2 %v1270_v16  ;;  %v1008_v11 = vld [vmem:[#allocation12 + $0x190] sm:$0xff] }
 0x112   :  { %922 = vmatpush.msrb.mxu0 %v813_v18  ;;  %940 = vmatpush.msrb.mxu1 %v831_v23  ;;  %v1272_v18 = vld [vmem:[#allocation12 + $0x9d0] sm:$0xff]  ;;  %v1247_v23 = vld [vmem:[#allocation12 + $0x908] sm:$0xff]  ;;  %v985_v16 = vld [vmem:[#allocation12 + $0xd8] sm:$0xff] }
 0x113   :  { %1364 = vmatpush.msrb.mxu3 %v1271_v17  ;;  %v958_v17 = vld [vmem:[#allocation12] sm:$0xff] }
 0x114   :  { %923 = vmatpush.msrb.mxu0 %v812_v22  ;;  %941 = vmatpush.msrb.mxu1 %v830_v25  ;;  %v1246_v22 = vld [vmem:[#allocation12 + $0x900] sm:$0xff] }
 0x115   :  { %v1222_v25 = vld [vmem:[#allocation12 + $0x840] sm:$0xff]  ;;  %1345 = vmatpush.msrb.mxu2 %v1246_v22  ;;  %1365 = vmatpush.msrb.mxu3 %v1247_v23  ;;  %v1323_v23 = vld [vmem:[#allocation12 + $0xb68] sm:$0xff] }
 0x116   :  { %924 = vmatpush.msrb.mxu0 %v811_v24  ;;  %942 = vmatpush.msrb.mxu1 %v829_v28  ;;  %v1249_v24 = vld [vmem:[#allocation12 + $0x918] sm:$0xff]  ;;  %v1322_v22 = vld [vmem:[#allocation12 + $0xb60] sm:$0xff] }
 0x117   :  { %v1225_v28 = vld [vmem:[#allocation12 + $0x858] sm:$0xff]  ;;  %1346 = vmatpush.msrb.mxu2 %v1222_v25  ;;  %1366 = vmatpush.msrb.mxu3 %v1223_v26  ;;  %v1298_v25 = vld [vmem:[#allocation12 + $0xaa0] sm:$0xff]  ;;  %v1299_v26 = vld [vmem:[#allocation12 + $0xaa8] sm:$0xff] }
 0x118   :  { %925 = vmatpush.msrb.mxu0 %v810_v27  ;;  %943 = vmatpush.msrb.mxu1 %v828_v31  ;;  %v1224_v27 = vld [vmem:[#allocation12 + $0x850] sm:$0xff]  ;;  %v1199_v31 = vld [vmem:[#allocation12 + $0x788] sm:$0xff] }
 0x119   :  { %1367 = vmatpush.msrb.mxu3 %v1199_v31  ;;  %v1275_v31 = vld [vmem:[#allocation12 + $0x9e8] sm:$0xff] }
 0x11a   :  { %926 = vmatpush.msrb.mxu0 %v809_v30  ;;  %944 = vmatpush.msrb.mxu1 %v827_v20  ;;  %v1198_v30 = vld [vmem:[#allocation12 + $0x780] sm:$0xff] }
 0x11b   :  { %v1174_v20 = vld [vmem:[#allocation12 + $0x6c0] sm:$0xff]  ;;  %1347 = vmatpush.msrb.mxu2 %v1198_v30 }
 0x11c   :  { %927 = vmatpush.msrb.mxu0 %v808_v33  ;;  %945 = vmatpush.msrb.mxu1 %v826_v36  ;;  %v1201_v33 = vld [vmem:[#allocation12 + $0x798] sm:$0xff]  ;;  %v1274_v30 = vld [vmem:[#allocation12 + $0x9e0] sm:$0xff] }
 0x11d   :  { %v1177_v36 = vld [vmem:[#allocation12 + $0x6d8] sm:$0xff]  ;;  %1348 = vmatpush.msrb.mxu2 %v1174_v20  ;;  %v1250_v20 = vld [vmem:[#allocation12 + $0x920] sm:$0xff] }
 0x11e   :  { %928 = vmatpush.msrb.mxu0 %v807_v35  ;;  %946 = vmatpush.msrb.mxu1 %v825_v39  ;;  %v1176_v35 = vld [vmem:[#allocation12 + $0x6d0] sm:$0xff] }
 0x11f   :  { %v1152_v39 = vld [vmem:[#allocation12 + $0x610] sm:$0xff] }
 0x120   :  { %929 = vmatpush.msrb.mxu0 %v806_v38  ;;  %947 = vmatpush.msrb.mxu1 %v824_v42  ;;  %v1151_v38 = vld [vmem:[#allocation12 + $0x608] sm:$0xff] }
 0x121   :  { %v1127_v42 = vld [vmem:[#allocation12 + $0x548] sm:$0xff] }
 0x122   :  { %930 = vmatpush.msrb.mxu0 %v805_v41  ;;  %948 = vmatpush.msrb.mxu1 %v823_v47  ;;  %v1126_v41 = vld [vmem:[#allocation12 + $0x540] sm:$0xff] }
 0x123   :  { %v1102_v47 = vld [vmem:[#allocation12 + $0x480] sm:$0xff] }
 0x124   :  { %931 = vmatpush.msrb.mxu0 %v804_v46  ;;  %949 = vmatpush.msrb.mxu1 %v822_v51  ;;  %v1078_v51 = vld [vmem:[#allocation12 + $0x3c0] sm:$0xff] }
 0x126   :  { %932 = vmatpush.msrb.mxu0 %v803_v50  ;;  %950 = vmatpush.msrb.mxu1 %v821_v56  ;;  %v1105_v50 = vld [vmem:[#allocation12 + $0x498] sm:$0xff] }
 0x128   :  { %933 = vmatpush.msrb.mxu0 %v802_v55  ;;  %951 = vmatpush.msrb.mxu1 %v820_v58  ;;  %v1081_v55 = vld [vmem:[#allocation12 + $0x3d8] sm:$0xff]  ;;  %v485_v58 = vperm.slane %v4691_v29, 5 }
 0x12a   :  { %952 = vmatpush.msrb.mxu1 %v819_v62 }
 0x12c   :  { %953 = vmatpush.msrb.mxu1 %v818_v2  ;;  %v1055_v2 = vld [vmem:[#allocation12 + $0x308] sm:$0xff] }
 0x140   :  { %v509_v34 = vpop.f32.mrf.mxu0 }
 0x141   :  { %v510_v37 = vadd.f32 %v509_v34, %v480_v32  ;;  %v1200_v32 = vld [vmem:[#allocation12 + $0x790] sm:$0xff]  ;;  %v1175_v34 = vld [vmem:[#allocation12 + $0x6c8] sm:$0xff] }
 0x142   :  { %1368 = vmatpush.msrb.mxu3 %v1175_v34  ;;  %v1251_v34 = vld [vmem:[#allocation12 + $0x928] sm:$0xff] }
 0x144   :  { %1369 = vmatpush.msrb.mxu3 %v1151_v38  ;;  %v1227_v38 = vld [vmem:[#allocation12 + $0x868] sm:$0xff] }
 0x146   :  { %v549_v45 = vpop.f32.mrf.mxu2  ;;  %1370 = vmatpush.msrb.mxu3 %v1127_v42  ;;  %v1203_v42 = vld [vmem:[#allocation12 + $0x7a8] sm:$0xff] }
 0x147   :  { %v529_v43 = vpop.f32.mrf.mxu1  ;;  %v550_v49 = vadd.f32 %v549_v45, %v481_v40  ;;  %v1153_v40 = vld [vmem:[#allocation12 + $0x618] sm:$0xff] }
 0x148   :  { %v530_v44 = vadd.f32 %v529_v43, %v510_v37  ;;  %v1150_v37 = vld [vmem:[#allocation12 + $0x600] sm:$0xff]  ;;  %v484_v43 = vperm.slane %v4691_v29, 4  ;;  %v1129_v45 = vld [vmem:[#allocation12 + $0x558] sm:$0xff]  ;;  %v1031_v29 = vld [vmem:[#allocation12 + $0x248] sm:$0xff] }
 0x149   :  { %1349 = vmatpush.msrb.mxu2 %v1150_v37  ;;  %v1226_v37 = vld [vmem:[#allocation12 + $0x860] sm:$0xff] }
 0x14a   :  { %v732_v48 = vmax.f32 %v530_v44, 0.0  ;;  %v589_v53 = vpop.f32.mrf.mxu0  ;;  %v1128_v44 = vld [vmem:[#allocation12 + $0x550] sm:$0xff] }
 0x14b   :  { %v590_v59 = vadd.f32 %v589_v53, %v482_v52  ;;  %1350 = vmatpush.msrb.mxu2 %v1126_v41  ;;  %v1079_v52 = vld [vmem:[#allocation12 + $0x3c8] sm:$0xff]  ;;  %v1202_v41 = vld [vmem:[#allocation12 + $0x7a0] sm:$0xff] }
 0x14c   :  { %854 = vmatmul.f32.vlgmr.msra.gmra.mxu0 %v732_v48  ;;  %v1103_v48 = vld [vmem:[#allocation12 + $0x488] sm:$0xff] }
 0x14d   :  { %v569_v54 = vpop.f32.mrf.mxu3  ;;  %1382 = vmatpush.msra.mxu0 %v1320_v6  ;;  %1351 = vmatpush.msrb.mxu2 %v1102_v47  ;;  %v1032_v6 = vld [vmem:[#allocation12 + $0x250] sm:$0xff] }
 0x14e   :  { %v570_v57 = vadd.f32 %v569_v54, %v550_v49  ;;  %v1104_v49 = vld [vmem:[#allocation12 + $0x490] sm:$0xff]  ;;  %1371 = vmatpush.msrb.mxu3 %v1103_v48  ;;  %v1181_v48 = vld [vmem:[#allocation12 + $0x6f8] sm:$0xff] }
 0x14f   :  { %1383 = vmatpush.msra.mxu0 %v1296_v13  ;;  %v1080_v54 = vld [vmem:[#allocation12 + $0x3d0] sm:$0xff]  ;;  %1352 = vmatpush.msrb.mxu2 %v1078_v51  ;;  %v982_v13 = vld [vmem:[#allocation12 + $0xc0] sm:$0xff] }
 0x150   :  { %v733_v60 = vmax.f32 %v570_v57, 0.0  ;;  %v629_v1 = vpop.f32.mrf.mxu2  ;;  %1372 = vmatpush.msrb.mxu3 %v1079_v52  ;;  %v1180_v47 = vld [vmem:[#allocation12 + $0x6f0] sm:$0xff]  ;;  %v1157_v52 = vld [vmem:[#allocation12 + $0x638] sm:$0xff] }
 0x151   :  { %v609_v61 = vpop.f32.mrf.mxu1  ;;  %v630_v7 = vadd.f32 %v629_v1, %v483_v0  ;;  %1384 = vmatpush.msra.mxu0 %v1272_v18  ;;  %v1054_v1 = vld [vmem:[#allocation12 + $0x300] sm:$0xff]  ;;  %v959_v18 = vld [vmem:[#allocation12 + $0x8] sm:$0xff]  ;;  %v1156_v51 = vld [vmem:[#allocation12 + $0x630] sm:$0xff] }
 0x152   :  { %v610_v63 = vadd.f32 %v609_v61, %v590_v59  ;;  %874 = vmatmul.f32.vlgmr.msra.gmra.mxu1 %v733_v60  ;;  %1353 = vmatpush.msrb.mxu2 %v1054_v1  ;;  %v1058_v1 = vld [vmem:[#allocation12 + $0x320] sm:$0xff] }
 0x153   :  { %1402 = vmatpush.msra.mxu1 %v1321_v8  ;;  %1385 = vmatpush.msra.mxu0 %v1248_v9  ;;  %v1006_v8 = vld [vmem:[#allocation12 + $0x180] sm:$0xff]  ;;  %v1324_v9 = vld [vmem:[#allocation12 + $0xb70] sm:$0xff] }
 0x154   :  { %v734_v3 = vmax.f32 %v610_v63, 0.0  ;;  %1373 = vmatpush.msrb.mxu3 %v1055_v2  ;;  %1354 = vmatpush.msrb.mxu2 %v1030_v5  ;;  %v1059_v2 = vld [vmem:[#allocation12 + $0x328] sm:$0xff]  ;;  %v1034_v5 = vld [vmem:[#allocation12 + $0x260] sm:$0xff] }
 0x155   :  { %1403 = vmatpush.msra.mxu1 %v1297_v14  ;;  %1386 = vmatpush.msra.mxu0 %v1224_v27  ;;  %v983_v14 = vld [vmem:[#allocation12 + $0xc8] sm:$0xff]  ;;  %v1300_v27 = vld [vmem:[#allocation12 + $0xab0] sm:$0xff] }
 0x156   :  { %894 = vmatmul.f32.vlgmr.msra.gmra.mxu2 %v734_v3  ;;  %v1056_v3 = vld [vmem:[#allocation12 + $0x310] sm:$0xff]  ;;  %1374 = vmatpush.msrb.mxu3 %v1031_v29  ;;  %v1035_v29 = vld [vmem:[#allocation12 + $0x268] sm:$0xff] }
 0x157   :  { %v649_v12 = vpop.f32.mrf.mxu3  ;;  %1404 = vmatpush.msra.mxu1 %v1273_v19  ;;  %1387 = vmatpush.msra.mxu0 %v1200_v32  ;;  %v960_v19 = vld [vmem:[#allocation12 + $0x10] sm:$0xff] }
 0x158   :  { %v650_v15 = vadd.f32 %v649_v12, %v630_v7  ;;  %v1033_v7 = vld [vmem:[#allocation12 + $0x258] sm:$0xff]  ;;  %1355 = vmatpush.msrb.mxu2 %v1006_v8  ;;  %1375 = vmatpush.msrb.mxu3 %v1007_v10  ;;  %v1276_v32 = vld [vmem:[#allocation12 + $0x9f0] sm:$0xff]  ;;  %v1010_v8 = vld [vmem:[#allocation12 + $0x1a0] sm:$0xff] }
 0x159   :  { %1405 = vmatpush.msra.mxu1 %v1249_v24  ;;  %1388 = vmatpush.msra.mxu0 %v1176_v35  ;;  %v1009_v12 = vld [vmem:[#allocation12 + $0x198] sm:$0xff]  ;;  %v1252_v35 = vld [vmem:[#allocation12 + $0x930] sm:$0xff]  ;;  %v1011_v10 = vld [vmem:[#allocation12 + $0x1a8] sm:$0xff] }
 0x15a   :  { %v735_v21 = vmax.f32 %v650_v15, 0.0  ;;  %v984_v15 = vld [vmem:[#allocation12 + $0xd0] sm:$0xff]  ;;  %1356 = vmatpush.msrb.mxu2 %v982_v13  ;;  %1376 = vmatpush.msrb.mxu3 %v983_v14  ;;  %v1325_v24 = vld [vmem:[#allocation12 + $0xb78] sm:$0xff]  ;;  %v986_v13 = vld [vmem:[#allocation12 + $0xe0] sm:$0xff] }
 0x15b   :  { %1406 = vmatpush.msra.mxu1 %v1225_v28  ;;  %1389 = vmatpush.msra.mxu0 %v1152_v39  ;;  %v1301_v28 = vld [vmem:[#allocation12 + $0xab8] sm:$0xff]  ;;  %v1228_v39 = vld [vmem:[#allocation12 + $0x870] sm:$0xff]  ;;  %v987_v14 = vld [vmem:[#allocation12 + $0xe8] sm:$0xff] }
 0x15c   :  { %914 = vmatmul.f32.vlgmr.msra.gmra.mxu3 %v735_v21  ;;  %v961_v21 = vld [vmem:[#allocation12 + $0x18] sm:$0xff]  ;;  %1357 = vmatpush.msrb.mxu2 %v958_v17  ;;  %v962_v17 = vld [vmem:[#allocation12 + $0x20] sm:$0xff] }
 0x15d   :  { %1407 = vmatpush.msra.mxu1 %v1201_v33  ;;  %1390 = vmatpush.msra.mxu0 %v1128_v44  ;;  %v1277_v33 = vld [vmem:[#allocation12 + $0x9f8] sm:$0xff] }
 0x15e   :  { %1377 = vmatpush.msrb.mxu3 %v959_v18  ;;  %1422 = vmatpush.msra.mxu2 %v1322_v22  ;;  %v1205_v44 = vld [vmem:[#allocation12 + $0x7b8] sm:$0xff]  ;;  %v963_v18 = vld [vmem:[#allocation12 + $0x28] sm:$0xff] }
 0x15f   :  { %1408 = vmatpush.msra.mxu1 %v1177_v36  ;;  %1391 = vmatpush.msra.mxu0 %v1104_v49  ;;  %v1253_v36 = vld [vmem:[#allocation12 + $0x938] sm:$0xff]  ;;  %v1154_v49 = vld [vmem:[#allocation12 + $0x620] sm:$0xff] }
 0x160   :  { %1442 = vmatpush.msra.mxu3 %v1323_v23  ;;  %1423 = vmatpush.msra.mxu2 %v1298_v25  ;;  %v4404_v22 = vld [vmem:[#allocation10] ss:$0 sm:$0xff] }
 0x161   :  { %1409 = vmatpush.msra.mxu1 %v1153_v40  ;;  %1392 = vmatpush.msra.mxu0 %v1080_v54  ;;  %v1229_v40 = vld [vmem:[#allocation12 + $0x878] sm:$0xff]  ;;  %v1131_v54 = vld [vmem:[#allocation12 + $0x568] sm:$0xff] }
 0x162   :  { %1443 = vmatpush.msra.mxu3 %v1299_v26  ;;  %1424 = vmatpush.msra.mxu2 %v1274_v30 }
 0x163   :  { %1410 = vmatpush.msra.mxu1 %v1129_v45  ;;  %1393 = vmatpush.msra.mxu0 %v1056_v3  ;;  %v1178_v45 = vld [vmem:[#allocation12 + $0x6e0] sm:$0xff]  ;;  %v1060_v3 = vld [vmem:[#allocation12 + $0x330] sm:$0xff] }
 0x164   :  { %v669_v46 = vpop.f32.mrf.mxu0  ;;  %1444 = vmatpush.msra.mxu3 %v1275_v31  ;;  %1425 = vmatpush.msra.mxu2 %v1250_v20 }
 0x165   :  { %v670_v53 = vadd.f32 %v669_v46, %v484_v43  ;;  %1411 = vmatpush.msra.mxu1 %v1105_v50  ;;  %1394 = vmatpush.msra.mxu0 %v1032_v6  ;;  %v1204_v43 = vld [vmem:[#allocation12 + $0x7b0] sm:$0xff]  ;;  %v1179_v46 = vld [vmem:[#allocation12 + $0x6e8] sm:$0xff] }
 0x166   :  { %1445 = vmatpush.msra.mxu3 %v1251_v34  ;;  %1426 = vmatpush.msra.mxu2 %v1226_v37  ;;  %v1155_v50 = vld [vmem:[#allocation12 + $0x628] sm:$0xff]  ;;  %v1036_v6 = vld [vmem:[#allocation12 + $0x270] sm:$0xff]  ;;  %v1326_v34 = vld [vmem:[#allocation12 + $0xb80] sm:$0xff] }
 0x167   :  { %1412 = vmatpush.msra.mxu1 %v1081_v55  ;;  %1395 = vmatpush.msra.mxu0 %v1008_v11  ;;  %v1132_v55 = vld [vmem:[#allocation12 + $0x570] sm:$0xff]  ;;  %v1329_v37 = vld [vmem:[#allocation12 + $0xb98] sm:$0xff] }
 0x168   :  { %1446 = vmatpush.msra.mxu3 %v1227_v38  ;;  %1427 = vmatpush.msra.mxu2 %v1202_v41  ;;  %v1012_v11 = vld [vmem:[#allocation12 + $0x1b0] sm:$0xff]  ;;  %v1302_v38 = vld [vmem:[#allocation12 + $0xac0] sm:$0xff]  ;;  %v1305_v41 = vld [vmem:[#allocation12 + $0xad8] sm:$0xff] }
 0x169   :  { %1413 = vmatpush.msra.mxu1 %v1057_v4  ;;  %1396 = vmatpush.msra.mxu0 %v984_v15  ;;  %v1061_v4 = vld [vmem:[#allocation12 + $0x338] sm:$0xff]  ;;  %v988_v15 = vld [vmem:[#allocation12 + $0xf0] sm:$0xff] }
 0x16a   :  { %v689_v56 = vpop.f32.mrf.mxu1  ;;  %v709_v59 = vpop.f32.mrf.mxu2  ;;  %1447 = vmatpush.msra.mxu3 %v1203_v42  ;;  %1428 = vmatpush.msra.mxu2 %v1178_v45  ;;  %v1278_v42 = vld [vmem:[#allocation12 + $0xa00] sm:$0xff]  ;;  %v1281_v45 = vld [vmem:[#allocation12 + $0xa18] sm:$0xff] }
 0x16b   :  { %v690_v57 = vadd.f32 %v689_v56, %v670_v53  ;;  %v710_v61 = vadd.f32 %v709_v59, %v485_v58  ;;  %1414 = vmatpush.msra.mxu1 %v1033_v7  ;;  %1397 = vmatpush.msra.mxu0 %v960_v19  ;;  %v1130_v53 = vld [vmem:[#allocation12 + $0x560] sm:$0xff]  ;;  %v1133_v56 = vld [vmem:[#allocation12 + $0x578] sm:$0xff]  ;;  %v1107_v58 = vld [vmem:[#allocation12 + $0x4a8] sm:$0xff] }
 0x16c   :  { %1448 = vmatpush.msra.mxu3 %v1179_v46  ;;  %1429 = vmatpush.msra.mxu2 %v1154_v49  ;;  %v1108_v59 = vld [vmem:[#allocation12 + $0x4b0] sm:$0xff]  ;;  %v1037_v7 = vld [vmem:[#allocation12 + $0x278] sm:$0xff]  ;;  %v1254_v46 = vld [vmem:[#allocation12 + $0x940] sm:$0xff] }
 0x16d   :  { %v736_v60 = vmax.f32 %v690_v57, 0.0  ;;  %1415 = vmatpush.msra.mxu1 %v1009_v12  ;;  %v1106_v57 = vld [vmem:[#allocation12 + $0x4a0] sm:$0xff]  ;;  %v1013_v12 = vld [vmem:[#allocation12 + $0x1b8] sm:$0xff]  ;;  %v964_v19 = vld [vmem:[#allocation12 + $0x30] sm:$0xff] }
 0x16e   :  { %1449 = vmatpush.msra.mxu3 %v1155_v50  ;;  %1430 = vmatpush.msra.mxu2 %v1130_v53  ;;  %v1257_v49 = vld [vmem:[#allocation12 + $0x958] sm:$0xff]  ;;  %v1230_v50 = vld [vmem:[#allocation12 + $0x880] sm:$0xff] }
 0x16f   :  { %934 = vmatmul.f32.vlgmr.msrb.gmra.mxu0 %v736_v60  ;;  %1416 = vmatpush.msra.mxu1 %v985_v16  ;;  %v1109_v60 = vld [vmem:[#allocation12 + $0x4b8] sm:$0xff] }
 0x170   :  { %v729_v62 = vpop.f32.mrf.mxu3  ;;  %1462 = vmatpush.msrb.mxu0 %v1324_v9  ;;  %1450 = vmatpush.msra.mxu3 %v1131_v54  ;;  %v989_v16 = vld [vmem:[#allocation12 + $0xf8] sm:$0xff]  ;;  %v1206_v54 = vld [vmem:[#allocation12 + $0x7c0] sm:$0xff] }
 0x171   :  { %v730_v63 = vadd.f32 %v729_v62, %v710_v61  ;;  %1417 = vmatpush.msra.mxu1 %v961_v21  ;;  %v1082_v61 = vld [vmem:[#allocation12 + $0x3e0] sm:$0xff]  ;;  %v1083_v62 = vld [vmem:[#allocation12 + $0x3e8] sm:$0xff]  ;;  %1431 = vmatpush.msra.mxu2 %v1106_v57  ;;  %v965_v21 = vld [vmem:[#allocation12 + $0x38] sm:$0xff] }
 0x172   :  { %1463 = vmatpush.msrb.mxu0 %v1300_v27  ;;  %1451 = vmatpush.msra.mxu3 %v1107_v58  ;;  %v1233_v53 = vld [vmem:[#allocation12 + $0x898] sm:$0xff]  ;;  %v1182_v58 = vld [vmem:[#allocation12 + $0x700] sm:$0xff] }
 0x173   :  { %v737_v0 = vmax.f32 %v730_v63, 0.0  ;;  %v1084_v63 = vld [vmem:[#allocation12 + $0x3f0] sm:$0xff]  ;;  %1432 = vmatpush.msra.mxu2 %v1082_v61  ;;  %v1209_v57 = vld [vmem:[#allocation12 + $0x7d8] sm:$0xff] }
 0x174   :  { %1464 = vmatpush.msrb.mxu0 %v1276_v32  ;;  %1452 = vmatpush.msra.mxu3 %v1083_v62  ;;  %v1185_v61 = vld [vmem:[#allocation12 + $0x718] sm:$0xff]  ;;  %v1158_v62 = vld [vmem:[#allocation12 + $0x640] sm:$0xff] }
 0x175   :  { %954 = vmatmul.f32.vlgmr.msrb.gmra.mxu1 %v737_v0  ;;  %v1085_v0 = vld [vmem:[#allocation12 + $0x3f8] sm:$0xff]  ;;  %1433 = vmatpush.msra.mxu2 %v1058_v1 }
 0x176   :  { %1482 = vmatpush.msrb.mxu1 %v1325_v24  ;;  %1465 = vmatpush.msrb.mxu0 %v1252_v35  ;;  %v1327_v35 = vld [vmem:[#allocation12 + $0xb88] sm:$0xff]  ;;  %v1161_v1 = vld [vmem:[#allocation12 + $0x658] sm:$0xff] }
 0x177   :  { %1453 = vmatpush.msra.mxu3 %v1059_v2  ;;  %1434 = vmatpush.msra.mxu2 %v1034_v5  ;;  %v1134_v2 = vld [vmem:[#allocation12 + $0x580] sm:$0xff]  ;;  %v1137_v5 = vld [vmem:[#allocation12 + $0x598] sm:$0xff] }
 0x178   :  { %1483 = vmatpush.msrb.mxu1 %v1301_v28  ;;  %1466 = vmatpush.msrb.mxu0 %v1228_v39  ;;  %v1303_v39 = vld [vmem:[#allocation12 + $0xac8] sm:$0xff] }
 0x179   :  { %1454 = vmatpush.msra.mxu3 %v1035_v29  ;;  %1435 = vmatpush.msra.mxu2 %v1010_v8  ;;  %v1110_v29 = vld [vmem:[#allocation12 + $0x4c0] sm:$0xff]  ;;  %v1113_v8 = vld [vmem:[#allocation12 + $0x4d8] sm:$0xff] }
 0x17a   :  { %1484 = vmatpush.msrb.mxu1 %v1277_v33  ;;  %1467 = vmatpush.msrb.mxu0 %v1204_v43  ;;  %v1279_v43 = vld [vmem:[#allocation12 + $0xa08] sm:$0xff] }
 0x17b   :  { %1455 = vmatpush.msra.mxu3 %v1011_v10  ;;  %1436 = vmatpush.msra.mxu2 %v986_v13  ;;  %v1086_v10 = vld [vmem:[#allocation12 + $0x400] sm:$0xff]  ;;  %v1089_v13 = vld [vmem:[#allocation12 + $0x418] sm:$0xff] }
 0x17c   :  { %1485 = vmatpush.msrb.mxu1 %v1253_v36  ;;  %1468 = vmatpush.msrb.mxu0 %v1180_v47  ;;  %v1328_v36 = vld [vmem:[#allocation12 + $0xb90] sm:$0xff]  ;;  %v1255_v47 = vld [vmem:[#allocation12 + $0x948] sm:$0xff] }
 0x17d   :  { %1456 = vmatpush.msra.mxu3 %v987_v14  ;;  %1437 = vmatpush.msra.mxu2 %v962_v17  ;;  %v1062_v14 = vld [vmem:[#allocation12 + $0x340] sm:$0xff]  ;;  %v1065_v17 = vld [vmem:[#allocation12 + $0x358] sm:$0xff] }
 0x17e   :  { %1486 = vmatpush.msrb.mxu1 %v1229_v40  ;;  %1469 = vmatpush.msrb.mxu0 %v1156_v51  ;;  %v1304_v40 = vld [vmem:[#allocation12 + $0xad0] sm:$0xff]  ;;  %v1231_v51 = vld [vmem:[#allocation12 + $0x888] sm:$0xff] }
 0x17f   :  { %1457 = vmatpush.msra.mxu3 %v963_v18  ;;  %v1038_v18 = vld [vmem:[#allocation12 + $0x280] sm:$0xff] }
 0x180   :  { %1487 = vmatpush.msrb.mxu1 %v1205_v44  ;;  %1470 = vmatpush.msrb.mxu0 %v1132_v55  ;;  %v1280_v44 = vld [vmem:[#allocation12 + $0xa10] sm:$0xff]  ;;  %v1207_v55 = vld [vmem:[#allocation12 + $0x7c8] sm:$0xff] }
 0x182   :  { %1488 = vmatpush.msrb.mxu1 %v1181_v48  ;;  %1471 = vmatpush.msrb.mxu0 %v1108_v59  ;;  %v1256_v48 = vld [vmem:[#allocation12 + $0x950] sm:$0xff]  ;;  %v1183_v59 = vld [vmem:[#allocation12 + $0x708] sm:$0xff] }
 0x184   :  { %1489 = vmatpush.msrb.mxu1 %v1157_v52  ;;  %1472 = vmatpush.msrb.mxu0 %v1084_v63  ;;  %v1232_v52 = vld [vmem:[#allocation12 + $0x890] sm:$0xff]  ;;  %v1159_v63 = vld [vmem:[#allocation12 + $0x648] sm:$0xff] }
 0x186   :  { %1490 = vmatpush.msrb.mxu1 %v1133_v56  ;;  %1473 = vmatpush.msrb.mxu0 %v1060_v3  ;;  %v1208_v56 = vld [vmem:[#allocation12 + $0x7d0] sm:$0xff]  ;;  %v1135_v3 = vld [vmem:[#allocation12 + $0x588] sm:$0xff] }
 0x188   :  { %1491 = vmatpush.msrb.mxu1 %v1109_v60  ;;  %1474 = vmatpush.msrb.mxu0 %v1036_v6  ;;  %v1184_v60 = vld [vmem:[#allocation12 + $0x710] sm:$0xff]  ;;  %v1111_v6 = vld [vmem:[#allocation12 + $0x4c8] sm:$0xff] }
 0x18a   :  { %1492 = vmatpush.msrb.mxu1 %v1085_v0  ;;  %1475 = vmatpush.msrb.mxu0 %v1012_v11  ;;  %v1160_v0 = vld [vmem:[#allocation12 + $0x650] sm:$0xff]  ;;  %v1087_v11 = vld [vmem:[#allocation12 + $0x408] sm:$0xff] }
 0x18c   :  { %1493 = vmatpush.msrb.mxu1 %v1061_v4  ;;  %1476 = vmatpush.msrb.mxu0 %v988_v15  ;;  %v1136_v4 = vld [vmem:[#allocation12 + $0x590] sm:$0xff]  ;;  %v1063_v15 = vld [vmem:[#allocation12 + $0x348] sm:$0xff] }
 0x18e   :  { %1494 = vmatpush.msrb.mxu1 %v1037_v7  ;;  %1477 = vmatpush.msrb.mxu0 %v964_v19  ;;  %v1112_v7 = vld [vmem:[#allocation12 + $0x4d0] sm:$0xff]  ;;  %v1039_v19 = vld [vmem:[#allocation12 + $0x288] sm:$0xff] }
 0x190   :  { %1495 = vmatpush.msrb.mxu1 %v1013_v12  ;;  %v1088_v12 = vld [vmem:[#allocation12 + $0x410] sm:$0xff] }
 0x192   :  { %1496 = vmatpush.msrb.mxu1 %v989_v16  ;;  %v1064_v16 = vld [vmem:[#allocation12 + $0x350] sm:$0xff] }
 0x194   :  { %1497 = vmatpush.msrb.mxu1 %v965_v21  ;;  %v1040_v21 = vld [vmem:[#allocation12 + $0x290] sm:$0xff] }
 0x1c9   :  { %v855_v23 = vpop.f32.mrf.mxu0 }
 0x1ca   :  { %v856_v24 = vadd.f32 %v4404_v22, %v855_v23  ;;  %v1041_v22 = vld [vmem:[#allocation12 + $0x298] sm:$0xff]  ;;  %v1014_v23 = vld [vmem:[#allocation12 + $0x1c0] sm:$0xff] }
 0x1cf   :  { %v875_v9 = vpop.f32.mrf.mxu1 }
 0x1d0   :  { %v876_v26 = vadd.f32 %v875_v9, %v856_v24  ;;  %v1015_v9 = vld [vmem:[#allocation12 + $0x1c8] sm:$0xff]  ;;  %v1016_v24 = vld [vmem:[#allocation12 + $0x1d0] sm:$0xff] }
 0x1d9   :  { %v895_v25 = vpop.f32.mrf.mxu2 }
 0x1da   :  { %v896_v28 = vadd.f32 %v895_v25, %v876_v26  ;;  %v1017_v25 = vld [vmem:[#allocation12 + $0x1d8] sm:$0xff]  ;;  %v990_v26 = vld [vmem:[#allocation12 + $0x100] sm:$0xff] }
 0x1df   :  { %v915_v27 = vpop.f32.mrf.mxu3 }
 0x1e0   :  { %v916_v31 = vadd.f32 %v915_v27, %v896_v28  ;;  %v991_v27 = vld [vmem:[#allocation12 + $0x108] sm:$0xff]  ;;  %v992_v28 = vld [vmem:[#allocation12 + $0x110] sm:$0xff] }
 0x1ec   :  { %v935_v30 = vpop.f32.mrf.mxu0 }
 0x1ed   :  { %v936_v32 = vadd.f32 %v935_v30, %v916_v31  ;;  %v993_v30 = vld [vmem:[#allocation12 + $0x118] sm:$0xff]  ;;  %v966_v31 = vld [vmem:[#allocation12 + $0x40] sm:$0xff] }
 0x1f2   :  { %v955_v33 = vpop.f32.mrf.mxu1 }
 0x1f3   :  { %v4699_v20 = vadd.f32 %v955_v33, %v936_v32  ;;  %v967_v32 = vld [vmem:[#allocation12 + $0x48] sm:$0xff]  ;;  %v968_v33 = vld [vmem:[#allocation12 + $0x50] sm:$0xff] }
 0x1f5   :  { %1358 = vmatmul.f32.vlgmr.msrb.gmra.mxu2 %v4699_v20  ;;  %1378 = vmatmul.f32.vlgmr.msrb.gmra.mxu3 %v4699_v20 }
 0x1f6   :  { %1398 = vmatmul.f32.vlgmr.msra.gmra.mxu0 %v4699_v20  ;;  %1418 = vmatmul.f32.vlgmr.msra.gmra.mxu1 %v4699_v20 }
 0x1f7   :  { %1502 = vmatpush.msrb.mxu2 %v1326_v34  ;;  %1522 = vmatpush.msrb.mxu3 %v1327_v35  ;;  %v969_v34 = vld [vmem:[#allocation12 + $0x58] sm:$0xff]  ;;  %v1330_v35 = vld [vmem:[#allocation12 + $0xba0] sm:$0xff] }
 0x1f8   :  { %1542 = vmatpush.msra.mxu0 %v1328_v36  ;;  %1562 = vmatpush.msra.mxu1 %v1329_v37  ;;  %v1331_v36 = vld [vmem:[#allocation12 + $0xba8] sm:$0xff]  ;;  %v1332_v37 = vld [vmem:[#allocation12 + $0xbb0] sm:$0xff] }
 0x1f9   :  { %1503 = vmatpush.msrb.mxu2 %v1302_v38  ;;  %1523 = vmatpush.msrb.mxu3 %v1303_v39  ;;  %v1333_v38 = vld [vmem:[#allocation12 + $0xbb8] sm:$0xff]  ;;  %v1306_v39 = vld [vmem:[#allocation12 + $0xae0] sm:$0xff] }
 0x1fa   :  { %1543 = vmatpush.msra.mxu0 %v1304_v40  ;;  %1563 = vmatpush.msra.mxu1 %v1305_v41  ;;  %v1307_v40 = vld [vmem:[#allocation12 + $0xae8] sm:$0xff]  ;;  %v1308_v41 = vld [vmem:[#allocation12 + $0xaf0] sm:$0xff] }
 0x1fb   :  { %1504 = vmatpush.msrb.mxu2 %v1278_v42  ;;  %1524 = vmatpush.msrb.mxu3 %v1279_v43  ;;  %v1309_v42 = vld [vmem:[#allocation12 + $0xaf8] sm:$0xff]  ;;  %v1282_v43 = vld [vmem:[#allocation12 + $0xa20] sm:$0xff] }
 0x1fc   :  { %1544 = vmatpush.msra.mxu0 %v1280_v44  ;;  %1564 = vmatpush.msra.mxu1 %v1281_v45  ;;  %v1283_v44 = vld [vmem:[#allocation12 + $0xa28] sm:$0xff]  ;;  %v1284_v45 = vld [vmem:[#allocation12 + $0xa30] sm:$0xff] }
 0x1fd   :  { %1505 = vmatpush.msrb.mxu2 %v1254_v46  ;;  %1525 = vmatpush.msrb.mxu3 %v1255_v47  ;;  %v1285_v46 = vld [vmem:[#allocation12 + $0xa38] sm:$0xff]  ;;  %v1258_v47 = vld [vmem:[#allocation12 + $0x960] sm:$0xff] }
 0x1fe   :  { %1545 = vmatpush.msra.mxu0 %v1256_v48  ;;  %1565 = vmatpush.msra.mxu1 %v1257_v49  ;;  %v1259_v48 = vld [vmem:[#allocation12 + $0x968] sm:$0xff]  ;;  %v1260_v49 = vld [vmem:[#allocation12 + $0x970] sm:$0xff] }
 0x1ff   :  { %1438 = vmatmul.f32.vlgmr.msra.gmra.mxu2 %v4699_v20  ;;  %1458 = vmatmul.f32.vlgmr.msra.gmra.mxu3 %v4699_v20 }
 0x200   :  { %1478 = vmatmul.f32.vlgmr.msrb.gmra.mxu0 %v4699_v20  ;;  %1498 = vmatmul.f32.vlgmr.msrb.gmra.mxu1 %v4699_v20 }
 0x201   :  { %1506 = vmatpush.msrb.mxu2 %v1230_v50  ;;  %1526 = vmatpush.msrb.mxu3 %v1231_v51  ;;  %v1261_v50 = vld [vmem:[#allocation12 + $0x978] sm:$0xff]  ;;  %v1234_v51 = vld [vmem:[#allocation12 + $0x8a0] sm:$0xff] }
 0x202   :  { %1546 = vmatpush.msra.mxu0 %v1232_v52  ;;  %1566 = vmatpush.msra.mxu1 %v1233_v53  ;;  %v1235_v52 = vld [vmem:[#allocation12 + $0x8a8] sm:$0xff]  ;;  %v1236_v53 = vld [vmem:[#allocation12 + $0x8b0] sm:$0xff] }
 0x203   :  { %1507 = vmatpush.msrb.mxu2 %v1206_v54  ;;  %1527 = vmatpush.msrb.mxu3 %v1207_v55  ;;  %v1237_v54 = vld [vmem:[#allocation12 + $0x8b8] sm:$0xff]  ;;  %v1210_v55 = vld [vmem:[#allocation12 + $0x7e0] sm:$0xff] }
 0x204   :  { %1547 = vmatpush.msra.mxu0 %v1208_v56  ;;  %1567 = vmatpush.msra.mxu1 %v1209_v57  ;;  %v1211_v56 = vld [vmem:[#allocation12 + $0x7e8] sm:$0xff]  ;;  %v1212_v57 = vld [vmem:[#allocation12 + $0x7f0] sm:$0xff] }
 0x205   :  { %1508 = vmatpush.msrb.mxu2 %v1182_v58  ;;  %1528 = vmatpush.msrb.mxu3 %v1183_v59  ;;  %v1213_v58 = vld [vmem:[#allocation12 + $0x7f8] sm:$0xff]  ;;  %v1186_v59 = vld [vmem:[#allocation12 + $0x720] sm:$0xff] }
 0x206   :  { %1548 = vmatpush.msra.mxu0 %v1184_v60  ;;  %1568 = vmatpush.msra.mxu1 %v1185_v61  ;;  %v1187_v60 = vld [vmem:[#allocation12 + $0x728] sm:$0xff]  ;;  %v1188_v61 = vld [vmem:[#allocation12 + $0x730] sm:$0xff] }
 0x207   :  { %1509 = vmatpush.msrb.mxu2 %v1158_v62  ;;  %1529 = vmatpush.msrb.mxu3 %v1159_v63  ;;  %v1189_v62 = vld [vmem:[#allocation12 + $0x738] sm:$0xff]  ;;  %v1162_v63 = vld [vmem:[#allocation12 + $0x660] sm:$0xff] }
 0x208   :  { %1549 = vmatpush.msra.mxu0 %v1160_v0  ;;  %1569 = vmatpush.msra.mxu1 %v1161_v1  ;;  %v1163_v0 = vld [vmem:[#allocation12 + $0x668] sm:$0xff]  ;;  %v1164_v1 = vld [vmem:[#allocation12 + $0x670] sm:$0xff] }
 0x209   :  { %1510 = vmatpush.msrb.mxu2 %v1134_v2  ;;  %1530 = vmatpush.msrb.mxu3 %v1135_v3  ;;  %v1165_v2 = vld [vmem:[#allocation12 + $0x678] sm:$0xff]  ;;  %v1138_v3 = vld [vmem:[#allocation12 + $0x5a0] sm:$0xff] }
 0x20a   :  { %1550 = vmatpush.msra.mxu0 %v1136_v4  ;;  %1570 = vmatpush.msra.mxu1 %v1137_v5  ;;  %v1139_v4 = vld [vmem:[#allocation12 + $0x5a8] sm:$0xff]  ;;  %v1140_v5 = vld [vmem:[#allocation12 + $0x5b0] sm:$0xff] }
 0x20b   :  { %1511 = vmatpush.msrb.mxu2 %v1110_v29  ;;  %1531 = vmatpush.msrb.mxu3 %v1111_v6  ;;  %v1141_v29 = vld [vmem:[#allocation12 + $0x5b8] sm:$0xff]  ;;  %v1114_v6 = vld [vmem:[#allocation12 + $0x4e0] sm:$0xff] }
 0x20c   :  { %1551 = vmatpush.msra.mxu0 %v1112_v7  ;;  %1571 = vmatpush.msra.mxu1 %v1113_v8  ;;  %v1115_v7 = vld [vmem:[#allocation12 + $0x4e8] sm:$0xff]  ;;  %v1116_v8 = vld [vmem:[#allocation12 + $0x4f0] sm:$0xff] }
 0x20d   :  { %1512 = vmatpush.msrb.mxu2 %v1086_v10  ;;  %1532 = vmatpush.msrb.mxu3 %v1087_v11  ;;  %v1117_v10 = vld [vmem:[#allocation12 + $0x4f8] sm:$0xff]  ;;  %v1090_v11 = vld [vmem:[#allocation12 + $0x420] sm:$0xff] }
 0x20e   :  { %1552 = vmatpush.msra.mxu0 %v1088_v12  ;;  %1572 = vmatpush.msra.mxu1 %v1089_v13  ;;  %v1091_v12 = vld [vmem:[#allocation12 + $0x428] sm:$0xff]  ;;  %v1092_v13 = vld [vmem:[#allocation12 + $0x430] sm:$0xff] }
 0x20f   :  { %1513 = vmatpush.msrb.mxu2 %v1062_v14  ;;  %1533 = vmatpush.msrb.mxu3 %v1063_v15  ;;  %v1093_v14 = vld [vmem:[#allocation12 + $0x438] sm:$0xff]  ;;  %v1066_v15 = vld [vmem:[#allocation12 + $0x360] sm:$0xff] }
 0x210   :  { %1553 = vmatpush.msra.mxu0 %v1064_v16  ;;  %1573 = vmatpush.msra.mxu1 %v1065_v17  ;;  %v1067_v16 = vld [vmem:[#allocation12 + $0x368] sm:$0xff]  ;;  %v1068_v17 = vld [vmem:[#allocation12 + $0x370] sm:$0xff] }
 0x211   :  { %1514 = vmatpush.msrb.mxu2 %v1038_v18  ;;  %1534 = vmatpush.msrb.mxu3 %v1039_v19  ;;  %v1069_v18 = vld [vmem:[#allocation12 + $0x378] sm:$0xff]  ;;  %v1042_v19 = vld [vmem:[#allocation12 + $0x2a0] sm:$0xff] }
 0x212   :  { %1554 = vmatpush.msra.mxu0 %v1040_v21  ;;  %1574 = vmatpush.msra.mxu1 %v1041_v22  ;;  %v1043_v21 = vld [vmem:[#allocation12 + $0x2a8] sm:$0xff]  ;;  %v1044_v22 = vld [vmem:[#allocation12 + $0x2b0] sm:$0xff] }
 0x213   :  { %1515 = vmatpush.msrb.mxu2 %v1014_v23  ;;  %1535 = vmatpush.msrb.mxu3 %v1015_v9  ;;  %v1045_v23 = vld [vmem:[#allocation12 + $0x2b8] sm:$0xff]  ;;  %v1018_v9 = vld [vmem:[#allocation12 + $0x1e0] sm:$0xff] }
 0x214   :  { %1555 = vmatpush.msra.mxu0 %v1016_v24  ;;  %1575 = vmatpush.msra.mxu1 %v1017_v25  ;;  %v1019_v24 = vld [vmem:[#allocation12 + $0x1e8] sm:$0xff]  ;;  %v1020_v25 = vld [vmem:[#allocation12 + $0x1f0] sm:$0xff] }
 0x215   :  { %1516 = vmatpush.msrb.mxu2 %v990_v26  ;;  %1536 = vmatpush.msrb.mxu3 %v991_v27  ;;  %v1021_v26 = vld [vmem:[#allocation12 + $0x1f8] sm:$0xff]  ;;  %v994_v27 = vld [vmem:[#allocation12 + $0x120] sm:$0xff] }
 0x216   :  { %1556 = vmatpush.msra.mxu0 %v992_v28  ;;  %1576 = vmatpush.msra.mxu1 %v993_v30  ;;  %v995_v28 = vld [vmem:[#allocation12 + $0x128] sm:$0xff]  ;;  %v996_v30 = vld [vmem:[#allocation12 + $0x130] sm:$0xff] }
 0x217   :  { %1517 = vmatpush.msrb.mxu2 %v966_v31  ;;  %1537 = vmatpush.msrb.mxu3 %v967_v32  ;;  %v997_v31 = vld [vmem:[#allocation12 + $0x138] sm:$0xff]  ;;  %v970_v32 = vld [vmem:[#allocation12 + $0x60] sm:$0xff] }
 0x218   :  { %1557 = vmatpush.msra.mxu0 %v968_v33  ;;  %1577 = vmatpush.msra.mxu1 %v969_v34  ;;  %v971_v33 = vld [vmem:[#allocation12 + $0x68] sm:$0xff]  ;;  %v972_v34 = vld [vmem:[#allocation12 + $0x70] sm:$0xff] }
 0x219   :  { %1518 = vmatmul.f32.vlgmr.msrb.gmra.mxu2 %v4699_v20  ;;  %1538 = vmatmul.f32.vlgmr.msrb.gmra.mxu3 %v4699_v20 }
 0x21a   :  { %1558 = vmatmul.f32.vlgmr.msra.gmra.mxu0 %v4699_v20  ;;  %1578 = vmatmul.f32.vlgmr.msra.gmra.mxu1 %v4699_v20 }
 0x21b   :  { %1582 = vmatpush.msra.mxu2 %v1330_v35  ;;  %1602 = vmatpush.msra.mxu3 %v1331_v36  ;;  %v973_v35 = vld [vmem:[#allocation12 + $0x78] sm:$0xff]  ;;  %v1334_v36 = vld [vmem:[#allocation12 + $0xbc0] sm:$0xff] }
 0x21c   :  { %1622 = vmatpush.msrb.mxu0 %v1332_v37  ;;  %1642 = vmatpush.msrb.mxu1 %v1333_v38  ;;  %v1335_v37 = vld [vmem:[#allocation12 + $0xbc8] sm:$0xff]  ;;  %v1336_v38 = vld [vmem:[#allocation12 + $0xbd0] sm:$0xff] }
 0x21d   :  { %1583 = vmatpush.msra.mxu2 %v1306_v39  ;;  %1603 = vmatpush.msra.mxu3 %v1307_v40  ;;  %v1337_v39 = vld [vmem:[#allocation12 + $0xbd8] sm:$0xff]  ;;  %v1310_v40 = vld [vmem:[#allocation12 + $0xb00] sm:$0xff] }
 0x21e   :  { %1623 = vmatpush.msrb.mxu0 %v1308_v41  ;;  %1643 = vmatpush.msrb.mxu1 %v1309_v42  ;;  %v1311_v41 = vld [vmem:[#allocation12 + $0xb08] sm:$0xff]  ;;  %v1312_v42 = vld [vmem:[#allocation12 + $0xb10] sm:$0xff] }
 0x21f   :  { %1584 = vmatpush.msra.mxu2 %v1282_v43  ;;  %1604 = vmatpush.msra.mxu3 %v1283_v44  ;;  %v1313_v43 = vld [vmem:[#allocation12 + $0xb18] sm:$0xff]  ;;  %v1286_v44 = vld [vmem:[#allocation12 + $0xa40] sm:$0xff] }
 0x220   :  { %1624 = vmatpush.msrb.mxu0 %v1284_v45  ;;  %1644 = vmatpush.msrb.mxu1 %v1285_v46  ;;  %v1287_v45 = vld [vmem:[#allocation12 + $0xa48] sm:$0xff]  ;;  %v1288_v46 = vld [vmem:[#allocation12 + $0xa50] sm:$0xff] }
 0x221   :  { %1585 = vmatpush.msra.mxu2 %v1258_v47  ;;  %1605 = vmatpush.msra.mxu3 %v1259_v48  ;;  %v1289_v47 = vld [vmem:[#allocation12 + $0xa58] sm:$0xff]  ;;  %v1262_v48 = vld [vmem:[#allocation12 + $0x980] sm:$0xff] }
 0x222   :  { %1625 = vmatpush.msrb.mxu0 %v1260_v49  ;;  %1645 = vmatpush.msrb.mxu1 %v1261_v50  ;;  %v1263_v49 = vld [vmem:[#allocation12 + $0x988] sm:$0xff]  ;;  %v1264_v50 = vld [vmem:[#allocation12 + $0x990] sm:$0xff] }
 0x223   :  { %1586 = vmatpush.msra.mxu2 %v1234_v51  ;;  %1606 = vmatpush.msra.mxu3 %v1235_v52  ;;  %v1265_v51 = vld [vmem:[#allocation12 + $0x998] sm:$0xff]  ;;  %v1238_v52 = vld [vmem:[#allocation12 + $0x8c0] sm:$0xff] }
 0x224   :  { %1626 = vmatpush.msrb.mxu0 %v1236_v53  ;;  %1646 = vmatpush.msrb.mxu1 %v1237_v54  ;;  %v1239_v53 = vld [vmem:[#allocation12 + $0x8c8] sm:$0xff]  ;;  %v1240_v54 = vld [vmem:[#allocation12 + $0x8d0] sm:$0xff] }
 0x225   :  { %1587 = vmatpush.msra.mxu2 %v1210_v55  ;;  %1607 = vmatpush.msra.mxu3 %v1211_v56  ;;  %v1241_v55 = vld [vmem:[#allocation12 + $0x8d8] sm:$0xff]  ;;  %v1214_v56 = vld [vmem:[#allocation12 + $0x800] sm:$0xff] }
 0x226   :  { %1627 = vmatpush.msrb.mxu0 %v1212_v57  ;;  %1647 = vmatpush.msrb.mxu1 %v1213_v58  ;;  %v1215_v57 = vld [vmem:[#allocation12 + $0x808] sm:$0xff]  ;;  %v1216_v58 = vld [vmem:[#allocation12 + $0x810] sm:$0xff] }
 0x227   :  { %1588 = vmatpush.msra.mxu2 %v1186_v59  ;;  %1608 = vmatpush.msra.mxu3 %v1187_v60  ;;  %v1217_v59 = vld [vmem:[#allocation12 + $0x818] sm:$0xff]  ;;  %v1190_v60 = vld [vmem:[#allocation12 + $0x740] sm:$0xff] }
 0x228   :  { %1628 = vmatpush.msrb.mxu0 %v1188_v61  ;;  %1648 = vmatpush.msrb.mxu1 %v1189_v62  ;;  %v1191_v61 = vld [vmem:[#allocation12 + $0x748] sm:$0xff]  ;;  %v1192_v62 = vld [vmem:[#allocation12 + $0x750] sm:$0xff] }
 0x229   :  { %1589 = vmatpush.msra.mxu2 %v1162_v63  ;;  %1609 = vmatpush.msra.mxu3 %v1163_v0  ;;  %v1193_v63 = vld [vmem:[#allocation12 + $0x758] sm:$0xff]  ;;  %v1166_v0 = vld [vmem:[#allocation12 + $0x680] sm:$0xff] }
 0x22a   :  { %1629 = vmatpush.msrb.mxu0 %v1164_v1  ;;  %1649 = vmatpush.msrb.mxu1 %v1165_v2  ;;  %v1167_v1 = vld [vmem:[#allocation12 + $0x688] sm:$0xff]  ;;  %v1168_v2 = vld [vmem:[#allocation12 + $0x690] sm:$0xff] }
 0x22b   :  { %1590 = vmatpush.msra.mxu2 %v1138_v3  ;;  %1610 = vmatpush.msra.mxu3 %v1139_v4  ;;  %v1169_v3 = vld [vmem:[#allocation12 + $0x698] sm:$0xff]  ;;  %v1142_v4 = vld [vmem:[#allocation12 + $0x5c0] sm:$0xff] }
 0x22c   :  { %1630 = vmatpush.msrb.mxu0 %v1140_v5  ;;  %1650 = vmatpush.msrb.mxu1 %v1141_v29  ;;  %v1143_v5 = vld [vmem:[#allocation12 + $0x5c8] sm:$0xff]  ;;  %v1144_v29 = vld [vmem:[#allocation12 + $0x5d0] sm:$0xff] }
 0x22d   :  { %1591 = vmatpush.msra.mxu2 %v1114_v6  ;;  %1611 = vmatpush.msra.mxu3 %v1115_v7  ;;  %v1145_v6 = vld [vmem:[#allocation12 + $0x5d8] sm:$0xff]  ;;  %v1118_v7 = vld [vmem:[#allocation12 + $0x500] sm:$0xff] }
 0x22e   :  { %1631 = vmatpush.msrb.mxu0 %v1116_v8  ;;  %1651 = vmatpush.msrb.mxu1 %v1117_v10  ;;  %v1119_v8 = vld [vmem:[#allocation12 + $0x508] sm:$0xff]  ;;  %v1120_v10 = vld [vmem:[#allocation12 + $0x510] sm:$0xff] }
 0x22f   :  { %1592 = vmatpush.msra.mxu2 %v1090_v11  ;;  %1612 = vmatpush.msra.mxu3 %v1091_v12  ;;  %v1121_v11 = vld [vmem:[#allocation12 + $0x518] sm:$0xff]  ;;  %v1094_v12 = vld [vmem:[#allocation12 + $0x440] sm:$0xff] }
 0x230   :  { %1632 = vmatpush.msrb.mxu0 %v1092_v13  ;;  %1652 = vmatpush.msrb.mxu1 %v1093_v14  ;;  %v1095_v13 = vld [vmem:[#allocation12 + $0x448] sm:$0xff]  ;;  %v1096_v14 = vld [vmem:[#allocation12 + $0x450] sm:$0xff] }
 0x231   :  { %1593 = vmatpush.msra.mxu2 %v1066_v15  ;;  %1613 = vmatpush.msra.mxu3 %v1067_v16  ;;  %v1097_v15 = vld [vmem:[#allocation12 + $0x458] sm:$0xff]  ;;  %v1070_v16 = vld [vmem:[#allocation12 + $0x380] sm:$0xff] }
 0x232   :  { %1633 = vmatpush.msrb.mxu0 %v1068_v17  ;;  %1653 = vmatpush.msrb.mxu1 %v1069_v18  ;;  %v1071_v17 = vld [vmem:[#allocation12 + $0x388] sm:$0xff]  ;;  %v1072_v18 = vld [vmem:[#allocation12 + $0x390] sm:$0xff] }
 0x233   :  { %1594 = vmatpush.msra.mxu2 %v1042_v19  ;;  %1614 = vmatpush.msra.mxu3 %v1043_v21  ;;  %v1073_v19 = vld [vmem:[#allocation12 + $0x398] sm:$0xff]  ;;  %v1046_v21 = vld [vmem:[#allocation12 + $0x2c0] sm:$0xff] }
 0x234   :  { %1634 = vmatpush.msrb.mxu0 %v1044_v22  ;;  %1654 = vmatpush.msrb.mxu1 %v1045_v23  ;;  %v1047_v22 = vld [vmem:[#allocation12 + $0x2c8] sm:$0xff]  ;;  %v1048_v23 = vld [vmem:[#allocation12 + $0x2d0] sm:$0xff] }
 0x235   :  { %1595 = vmatpush.msra.mxu2 %v1018_v9  ;;  %1615 = vmatpush.msra.mxu3 %v1019_v24  ;;  %v1049_v9 = vld [vmem:[#allocation12 + $0x2d8] sm:$0xff]  ;;  %v1022_v24 = vld [vmem:[#allocation12 + $0x200] sm:$0xff] }
 0x236   :  { %1635 = vmatpush.msrb.mxu0 %v1020_v25  ;;  %1655 = vmatpush.msrb.mxu1 %v1021_v26  ;;  %v1023_v25 = vld [vmem:[#allocation12 + $0x208] sm:$0xff]  ;;  %v1024_v26 = vld [vmem:[#allocation12 + $0x210] sm:$0xff] }
 0x237   :  { %1596 = vmatpush.msra.mxu2 %v994_v27  ;;  %1616 = vmatpush.msra.mxu3 %v995_v28  ;;  %v1025_v27 = vld [vmem:[#allocation12 + $0x218] sm:$0xff]  ;;  %v998_v28 = vld [vmem:[#allocation12 + $0x140] sm:$0xff] }
 0x238   :  { %1636 = vmatpush.msrb.mxu0 %v996_v30  ;;  %1656 = vmatpush.msrb.mxu1 %v997_v31  ;;  %v999_v30 = vld [vmem:[#allocation12 + $0x148] sm:$0xff]  ;;  %v1000_v31 = vld [vmem:[#allocation12 + $0x150] sm:$0xff] }
 0x239   :  { %1597 = vmatpush.msra.mxu2 %v970_v32  ;;  %1617 = vmatpush.msra.mxu3 %v971_v33  ;;  %v1001_v32 = vld [vmem:[#allocation12 + $0x158] sm:$0xff]  ;;  %v974_v33 = vld [vmem:[#allocation12 + $0x80] sm:$0xff] }
 0x23a   :  { %1637 = vmatpush.msrb.mxu0 %v972_v34  ;;  %1657 = vmatpush.msrb.mxu1 %v973_v35  ;;  %v975_v34 = vld [vmem:[#allocation12 + $0x88] sm:$0xff]  ;;  %v976_v35 = vld [vmem:[#allocation12 + $0x90] sm:$0xff] }
 0x23b   :  { %1598 = vmatmul.f32.vlgmr.msra.gmra.mxu2 %v4699_v20  ;;  %1618 = vmatmul.f32.vlgmr.msra.gmra.mxu3 %v4699_v20 }
 0x23c   :  { %1638 = vmatmul.f32.vlgmr.msrb.gmra.mxu0 %v4699_v20  ;;  %1658 = vmatmul.f32.vlgmr.msrb.gmra.mxu1 %v4699_v20 }
 0x23d   :  { %1662 = vmatpush.msrb.mxu2 %v1334_v36  ;;  %1682 = vmatpush.msrb.mxu3 %v1335_v37  ;;  %v977_v36 = vld [vmem:[#allocation12 + $0x98] sm:$0xff]  ;;  %v1338_v37 = vld [vmem:[#allocation12 + $0xbe0] sm:$0xff] }
 0x23e   :  { %1702 = vmatpush.msra.mxu0 %v1336_v38  ;;  %1722 = vmatpush.msra.mxu1 %v1337_v39  ;;  %v1339_v38 = vld [vmem:[#allocation12 + $0xbe8] sm:$0xff]  ;;  %v1340_v39 = vld [vmem:[#allocation12 + $0xbf0] sm:$0xff] }
 0x23f   :  { %1663 = vmatpush.msrb.mxu2 %v1310_v40  ;;  %1683 = vmatpush.msrb.mxu3 %v1311_v41  ;;  %v1341_v40 = vld [vmem:[#allocation12 + $0xbf8] sm:$0xff]  ;;  %v1314_v41 = vld [vmem:[#allocation12 + $0xb20] sm:$0xff] }
 0x240   :  { %1703 = vmatpush.msra.mxu0 %v1312_v42  ;;  %1723 = vmatpush.msra.mxu1 %v1313_v43  ;;  %v1315_v42 = vld [vmem:[#allocation12 + $0xb28] sm:$0xff]  ;;  %v1316_v43 = vld [vmem:[#allocation12 + $0xb30] sm:$0xff] }
 0x241   :  { %1664 = vmatpush.msrb.mxu2 %v1286_v44  ;;  %1684 = vmatpush.msrb.mxu3 %v1287_v45  ;;  %v1317_v44 = vld [vmem:[#allocation12 + $0xb38] sm:$0xff]  ;;  %v1290_v45 = vld [vmem:[#allocation12 + $0xa60] sm:$0xff] }
 0x242   :  { %1704 = vmatpush.msra.mxu0 %v1288_v46  ;;  %1724 = vmatpush.msra.mxu1 %v1289_v47  ;;  %v1291_v46 = vld [vmem:[#allocation12 + $0xa68] sm:$0xff]  ;;  %v1292_v47 = vld [vmem:[#allocation12 + $0xa70] sm:$0xff] }
 0x243   :  { %1665 = vmatpush.msrb.mxu2 %v1262_v48  ;;  %1685 = vmatpush.msrb.mxu3 %v1263_v49  ;;  %v1293_v48 = vld [vmem:[#allocation12 + $0xa78] sm:$0xff]  ;;  %v1266_v49 = vld [vmem:[#allocation12 + $0x9a0] sm:$0xff] }
 0x244   :  { %1705 = vmatpush.msra.mxu0 %v1264_v50  ;;  %1725 = vmatpush.msra.mxu1 %v1265_v51  ;;  %v1267_v50 = vld [vmem:[#allocation12 + $0x9a8] sm:$0xff]  ;;  %v1268_v51 = vld [vmem:[#allocation12 + $0x9b0] sm:$0xff] }
 0x245   :  { %1666 = vmatpush.msrb.mxu2 %v1238_v52  ;;  %1686 = vmatpush.msrb.mxu3 %v1239_v53  ;;  %v1269_v52 = vld [vmem:[#allocation12 + $0x9b8] sm:$0xff]  ;;  %v1242_v53 = vld [vmem:[#allocation12 + $0x8e0] sm:$0xff] }
 0x246   :  { %1706 = vmatpush.msra.mxu0 %v1240_v54  ;;  %1726 = vmatpush.msra.mxu1 %v1241_v55  ;;  %v1243_v54 = vld [vmem:[#allocation12 + $0x8e8] sm:$0xff]  ;;  %v1244_v55 = vld [vmem:[#allocation12 + $0x8f0] sm:$0xff] }
 0x247   :  { %1667 = vmatpush.msrb.mxu2 %v1214_v56  ;;  %1687 = vmatpush.msrb.mxu3 %v1215_v57  ;;  %v1245_v56 = vld [vmem:[#allocation12 + $0x8f8] sm:$0xff]  ;;  %v1218_v57 = vld [vmem:[#allocation12 + $0x820] sm:$0xff] }
 0x248   :  { %1707 = vmatpush.msra.mxu0 %v1216_v58  ;;  %1727 = vmatpush.msra.mxu1 %v1217_v59  ;;  %v1219_v58 = vld [vmem:[#allocation12 + $0x828] sm:$0xff]  ;;  %v1220_v59 = vld [vmem:[#allocation12 + $0x830] sm:$0xff] }
 0x249   :  { %1668 = vmatpush.msrb.mxu2 %v1190_v60  ;;  %1688 = vmatpush.msrb.mxu3 %v1191_v61  ;;  %v1221_v60 = vld [vmem:[#allocation12 + $0x838] sm:$0xff]  ;;  %v1194_v61 = vld [vmem:[#allocation12 + $0x760] sm:$0xff] }
 0x24a   :  { %1708 = vmatpush.msra.mxu0 %v1192_v62  ;;  %1728 = vmatpush.msra.mxu1 %v1193_v63  ;;  %v1195_v62 = vld [vmem:[#allocation12 + $0x768] sm:$0xff]  ;;  %v1196_v63 = vld [vmem:[#allocation12 + $0x770] sm:$0xff] }
 0x24b   :  { %1669 = vmatpush.msrb.mxu2 %v1166_v0  ;;  %1689 = vmatpush.msrb.mxu3 %v1167_v1  ;;  %v1197_v0 = vld [vmem:[#allocation12 + $0x778] sm:$0xff]  ;;  %v1170_v1 = vld [vmem:[#allocation12 + $0x6a0] sm:$0xff] }
 0x24c   :  { %1709 = vmatpush.msra.mxu0 %v1168_v2  ;;  %1729 = vmatpush.msra.mxu1 %v1169_v3  ;;  %v1171_v2 = vld [vmem:[#allocation12 + $0x6a8] sm:$0xff]  ;;  %v1172_v3 = vld [vmem:[#allocation12 + $0x6b0] sm:$0xff] }
 0x24d   :  { %1670 = vmatpush.msrb.mxu2 %v1142_v4  ;;  %1690 = vmatpush.msrb.mxu3 %v1143_v5  ;;  %v1173_v4 = vld [vmem:[#allocation12 + $0x6b8] sm:$0xff]  ;;  %v1146_v5 = vld [vmem:[#allocation12 + $0x5e0] sm:$0xff] }
 0x24e   :  { %1710 = vmatpush.msra.mxu0 %v1144_v29  ;;  %1730 = vmatpush.msra.mxu1 %v1145_v6  ;;  %v1147_v29 = vld [vmem:[#allocation12 + $0x5e8] sm:$0xff]  ;;  %v1148_v6 = vld [vmem:[#allocation12 + $0x5f0] sm:$0xff] }
 0x24f   :  { %1671 = vmatpush.msrb.mxu2 %v1118_v7  ;;  %1691 = vmatpush.msrb.mxu3 %v1119_v8  ;;  %v1149_v7 = vld [vmem:[#allocation12 + $0x5f8] sm:$0xff]  ;;  %v1122_v8 = vld [vmem:[#allocation12 + $0x520] sm:$0xff] }
 0x250   :  { %1711 = vmatpush.msra.mxu0 %v1120_v10  ;;  %1731 = vmatpush.msra.mxu1 %v1121_v11  ;;  %v1123_v10 = vld [vmem:[#allocation12 + $0x528] sm:$0xff]  ;;  %v1124_v11 = vld [vmem:[#allocation12 + $0x530] sm:$0xff] }
 0x251   :  { %1672 = vmatpush.msrb.mxu2 %v1094_v12  ;;  %1692 = vmatpush.msrb.mxu3 %v1095_v13  ;;  %v1125_v12 = vld [vmem:[#allocation12 + $0x538] sm:$0xff]  ;;  %v1098_v13 = vld [vmem:[#allocation12 + $0x460] sm:$0xff] }
 0x252   :  { %1712 = vmatpush.msra.mxu0 %v1096_v14  ;;  %1732 = vmatpush.msra.mxu1 %v1097_v15  ;;  %v1099_v14 = vld [vmem:[#allocation12 + $0x468] sm:$0xff]  ;;  %v1100_v15 = vld [vmem:[#allocation12 + $0x470] sm:$0xff] }
 0x253   :  { %1673 = vmatpush.msrb.mxu2 %v1070_v16  ;;  %1693 = vmatpush.msrb.mxu3 %v1071_v17  ;;  %v1101_v16 = vld [vmem:[#allocation12 + $0x478] sm:$0xff]  ;;  %v1074_v17 = vld [vmem:[#allocation12 + $0x3a0] sm:$0xff] }
 0x254   :  { %1713 = vmatpush.msra.mxu0 %v1072_v18  ;;  %1733 = vmatpush.msra.mxu1 %v1073_v19  ;;  %v1075_v18 = vld [vmem:[#allocation12 + $0x3a8] sm:$0xff]  ;;  %v1076_v19 = vld [vmem:[#allocation12 + $0x3b0] sm:$0xff] }
 0x255   :  { %1674 = vmatpush.msrb.mxu2 %v1046_v21  ;;  %1694 = vmatpush.msrb.mxu3 %v1047_v22  ;;  %v1077_v21 = vld [vmem:[#allocation12 + $0x3b8] sm:$0xff] }
 0x256   :  { %1714 = vmatpush.msra.mxu0 %v1048_v23  ;;  %1734 = vmatpush.msra.mxu1 %v1049_v9  ;;  %v1050_v9 = vld [vmem:[#allocation12 + $0x2e0] sm:$0xff] }
 0x257   :  { %1675 = vmatpush.msrb.mxu2 %v1022_v24  ;;  %1695 = vmatpush.msrb.mxu3 %v1023_v25  ;;  %v1051_v24 = vld [vmem:[#allocation12 + $0x2e8] sm:$0xff] }
 0x258   :  { %1715 = vmatpush.msra.mxu0 %v1024_v26  ;;  %1735 = vmatpush.msra.mxu1 %v1025_v27  ;;  %v1052_v26 = vld [vmem:[#allocation12 + $0x2f0] sm:$0xff]  ;;  %v1053_v27 = vld [vmem:[#allocation12 + $0x2f8] sm:$0xff] }
 0x259   :  { %1676 = vmatpush.msrb.mxu2 %v998_v28  ;;  %1696 = vmatpush.msrb.mxu3 %v999_v30  ;;  %v1026_v30 = vld [vmem:[#allocation12 + $0x220] sm:$0xff] }
 0x25a   :  { %1716 = vmatpush.msra.mxu0 %v1000_v31  ;;  %1736 = vmatpush.msra.mxu1 %v1001_v32  ;;  %v1027_v31 = vld [vmem:[#allocation12 + $0x228] sm:$0xff] }
 0x25b   :  { %1677 = vmatpush.msrb.mxu2 %v974_v33  ;;  %1697 = vmatpush.msrb.mxu3 %v975_v34  ;;  %v1028_v33 = vld [vmem:[#allocation12 + $0x230] sm:$0xff]  ;;  %v1029_v34 = vld [vmem:[#allocation12 + $0x238] sm:$0xff] }
 0x25c   :  { %1717 = vmatpush.msra.mxu0 %v976_v35  ;;  %1737 = vmatpush.msra.mxu1 %v977_v36  ;;  %v1002_v36 = vld [vmem:[#allocation12 + $0x160] sm:$0xff] }
 0x25d   :  { %1678 = vmatmul.f32.vlgmr.msrb.gmra.mxu2 %v4699_v20  ;;  %1698 = vmatmul.f32.vlgmr.msrb.gmra.mxu3 %v4699_v20 }
 0x25e   :  { %1718 = vmatmul.f32.vlgmr.msra.gmra.mxu0 %v4699_v20  ;;  %1738 = vmatmul.f32.vlgmr.msra.gmra.mxu1 %v4699_v20 }
 0x25f   :  { %1742 = vmatpush.msra.mxu2 %v1338_v37  ;;  %1762 = vmatpush.msra.mxu3 %v1339_v38  ;;  %v1003_v37 = vld [vmem:[#allocation12 + $0x168] sm:$0xff] }
 0x260   :  { %1782 = vmatpush.msrb.mxu0 %v1340_v39  ;;  %1802 = vmatpush.msrb.mxu1 %v1341_v40  ;;  %v1004_v40 = vld [vmem:[#allocation12 + $0x170] sm:$0xff] }
 0x261   :  { %1743 = vmatpush.msra.mxu2 %v1314_v41  ;;  %1763 = vmatpush.msra.mxu3 %v1315_v42  ;;  %v1005_v41 = vld [vmem:[#allocation12 + $0x178] sm:$0xff] }
 0x262   :  { %1783 = vmatpush.msrb.mxu0 %v1316_v43  ;;  %1803 = vmatpush.msrb.mxu1 %v1317_v44  ;;  %v978_v43 = vld [vmem:[#allocation12 + $0xa0] sm:$0xff]  ;;  %v979_v44 = vld [vmem:[#allocation12 + $0xa8] sm:$0xff] }
 0x263   :  { %1744 = vmatpush.msra.mxu2 %v1290_v45  ;;  %1764 = vmatpush.msra.mxu3 %v1291_v46  ;;  %v980_v46 = vld [vmem:[#allocation12 + $0xb0] sm:$0xff] }
 0x264   :  { %1784 = vmatpush.msrb.mxu0 %v1292_v47  ;;  %1804 = vmatpush.msrb.mxu1 %v1293_v48  ;;  %v981_v47 = vld [vmem:[#allocation12 + $0xb8] sm:$0xff] }
 0x265   :  { %1745 = vmatpush.msra.mxu2 %v1266_v49  ;;  %1765 = vmatpush.msra.mxu3 %v1267_v50 }
 0x266   :  { %1785 = vmatpush.msrb.mxu0 %v1268_v51  ;;  %1805 = vmatpush.msrb.mxu1 %v1269_v52 }
 0x267   :  { %1746 = vmatpush.msra.mxu2 %v1242_v53  ;;  %1766 = vmatpush.msra.mxu3 %v1243_v54 }
 0x268   :  { %1786 = vmatpush.msrb.mxu0 %v1244_v55  ;;  %1806 = vmatpush.msrb.mxu1 %v1245_v56  ;;  %v7455_v55 = vmov 683565275  }
 0x269   :  { %1747 = vmatpush.msra.mxu2 %v1218_v57  ;;  %1767 = vmatpush.msra.mxu3 %v1219_v58  ;;  %v7453_v57 = vmov 2475754826  }
 0x26a   :  { %1787 = vmatpush.msrb.mxu0 %v1220_v59  ;;  %1807 = vmatpush.msrb.mxu1 %v1221_v60 }
 0x26b   :  { %1748 = vmatpush.msra.mxu2 %v1194_v61  ;;  %1768 = vmatpush.msra.mxu3 %v1195_v62  ;;  %v7450_v61 = vmov 2131351028  }
 0x26c   :  { %1788 = vmatpush.msrb.mxu0 %v1196_v63  ;;  %1808 = vmatpush.msrb.mxu1 %v1197_v0  ;;  %v7448_v63 = vmov 2102212464  }
 0x26d   :  { %1749 = vmatpush.msra.mxu2 %v1170_v1  ;;  %1769 = vmatpush.msra.mxu3 %v1171_v2  ;;  %v7444_v2 = vmov 920167782  }
 0x26e   :  { %1789 = vmatpush.msrb.mxu0 %v1172_v3  ;;  %1809 = vmatpush.msrb.mxu1 %v1173_v4 }
 0x26f   :  { %1750 = vmatpush.msra.mxu2 %v1146_v5  ;;  %1770 = vmatpush.msra.mxu3 %v1147_v29  ;;  %v7446_v5 = vmov 1326507024  }
 0x270   :  { %1790 = vmatpush.msrb.mxu0 %v1148_v6  ;;  %1810 = vmatpush.msrb.mxu1 %v1149_v7 }
 0x271   :  { %1751 = vmatpush.msra.mxu2 %v1122_v8  ;;  %1771 = vmatpush.msra.mxu3 %v1123_v10 }
 0x272   :  { %1791 = vmatpush.msrb.mxu0 %v1124_v11  ;;  %1811 = vmatpush.msrb.mxu1 %v1125_v12 }
 0x273   :  { %1752 = vmatpush.msra.mxu2 %v1098_v13  ;;  %1772 = vmatpush.msra.mxu3 %v1099_v14  ;;  %v4721_v22 = vpop.f32.mrf.mxu0  ;;  %v4723_v23 = vpop.f32.mrf.mxu1 }
 0x274   :  { %7548 = vst [vmem:[#allocation17_spill] sm:$0xff] %v4721_v22  ;;  %1792 = vmatpush.msrb.mxu0 %v1100_v15  ;;  %1812 = vmatpush.msrb.mxu1 %v1101_v16  ;;  %v2135_v25 = vand.u32 2139095040, %v4721_v22  ;;  %v2290_v28 = vand.u32 2139095040, %v4723_v23  ;;  %v2132_v38 = vand.u32 2147483647, %v4721_v22 }
 0x275   :  { %7549 = vst [vmem:[#allocation18_spill] sm:$0xff] %v4723_v23  ;;  %1753 = vmatpush.msra.mxu2 %v1074_v17  ;;  %1773 = vmatpush.msra.mxu3 %v1075_v18  ;;  %v7440_v16 = vand.u32 2147483647, %v4723_v23 }
 0x276   :  { %1793 = vmatpush.msrb.mxu0 %v1076_v19  ;;  %1813 = vmatpush.msrb.mxu1 %v1077_v21  ;;  %v2136_v32 = vshrl.u32 %v2135_v25, 23  ;;  %v2291_v35 = vshrl.u32 %v2290_v28, 23  ;;  %v2139_v49 = vand.u32 8388607, %v2132_v38 }
 0x277   :  { %1754 = vmatpush.msra.mxu2 %v1050_v9  ;;  %1774 = vmatpush.msra.mxu3 %v1051_v24 }
 0x278   :  { %1794 = vmatpush.msrb.mxu0 %v1052_v26  ;;  %1814 = vmatpush.msrb.mxu1 %v1053_v27  ;;  %v4340_v39 = vadd.s32 4294967169, %v2136_v32  ;;  %v4343_v42 = vadd.s32 4294967169, %v2291_v35  ;;  %v2140_v52 = vor.u32 8388608, %v2139_v49  ;;  %v4784_v24 = vpop.f32.mrf.mxu2 }
 0x279   :  { %1755 = vmatpush.msra.mxu2 %v1026_v30  ;;  %1775 = vmatpush.msra.mxu3 %v1027_v31  ;;  %7550 = vst [vmem:[#allocation19_spill] sm:$0xff] %v4784_v24 }
 0x27a   :  { %1795 = vmatpush.msrb.mxu0 %v1028_v33  ;;  %1815 = vmatpush.msrb.mxu1 %v1029_v34  ;;  %v2142_v45 = vadd.s32 1, %v4340_v39  ;;  %v2297_v48 = vadd.s32 1, %v4343_v42  ;;  %v4759_v10 = vshll.u32 %v2140_v52, 8  ;;  %v4795_v34 = vand.u32 8388607, %v7440_v16 }
 0x27b   :  { %1756 = vmatpush.msra.mxu2 %v1002_v36  ;;  %1776 = vmatpush.msra.mxu3 %v1003_v37  ;;  %v1825_v36 = vand.u32 2139095040, %v4784_v24 }
 0x27c   :  { %1796 = vmatpush.msrb.mxu0 %v1004_v40  ;;  %1816 = vmatpush.msrb.mxu1 %v1005_v41  ;;  %vm2143_vm0 = vcmp.gt.s32.totalorder %v2142_v45, 0  ;;  %vm2298_vm1 = vcmp.gt.s32.totalorder %v2297_v48, 0  ;;  %v2181_v9 = vand.u32 65535, %v4759_v10  ;;  %v2182_v27 = vshrl.u32 %v4759_v10, 16 }
 0x27d   :  { %1757 = vmatpush.msra.mxu2 %v978_v43  ;;  %1777 = vmatpush.msra.mxu3 %v979_v44  ;;  %v2144_v50 = vsel %vm2143_vm0, %v2142_v45, 0  ;;  %v2299_v59 = vsel %vm2298_vm1, %v2297_v48, 0 }
 0x27e   :  { %1797 = vmatpush.msrb.mxu0 %v980_v46  ;;  %1817 = vmatpush.msrb.mxu1 %v981_v47  ;;  %v2146_v51 = vand.u32 31, %v2144_v50  ;;  %v4736_v54 = vshrl.u32 %v2144_v50, 5  ;;  %v2301_v13 = vand.u32 31, %v2299_v59  ;;  %v4797_v35 = vshrl.u32 %v2299_v59, 5 }
 0x27f   :  { %1758 = vmatmul.f32.vlgmr.msra.gmra.mxu2 %v4699_v20  ;;  %1778 = vmatmul.f32.vlgmr.msra.gmra.mxu3 %v4699_v20 }
 0x280   :  { %1798 = vmatmul.f32.vlgmr.msrb.gmra.mxu0 %v4699_v20  ;;  %1818 = vmatmul.f32.vlgmr.msrb.gmra.mxu1 %v4699_v20  ;;  %v4734_v53 = vsub.s32 32, %v2146_v51  ;;  %v2149_v56 = vshll.u32 %v7455_v55, %v2146_v51  ;;  %v2152_v58 = vshll.u32 %v7453_v57, %v2146_v51  ;;  %v2155_v20 = vshll.u32 %v7450_v61, %v2146_v51 }
 0x281   :  { %v2158_v1 = vshll.u32 %v7448_v63, %v2146_v51  ;;  %v2161_v4 = vshll.u32 %v7444_v2, %v2146_v51  ;;  %vm2164_vm2 = vcmp.lt.s32.totalorder %v4736_v54, 1  ;;  %vm2167_vm3 = vcmp.lt.s32.totalorder %v4736_v54, 4 }
 0x282   :  { %v2150_v60 = vshrl.u32 %v7453_v57, %v4734_v53  ;;  %v2153_v62 = vshrl.u32 %v7450_v61, %v4734_v53  ;;  %v2156_v0 = vshrl.u32 %v7448_v63, %v4734_v53  ;;  %v2159_v3 = vshrl.u32 %v7444_v2, %v4734_v53 }
 0x283   :  { %v2162_v29 = vshrl.u32 %v7446_v5, %v4734_v53  ;;  %vm2166_vm4 = vcmp.lt.s32.totalorder %v4736_v54, 3  ;;  %vm2165_vm5 = vcmp.lt.s32.totalorder %v4736_v54, 2  ;;  %v4791_v28 = vsub.s32 32, %v2301_v13 }
 0x284   :  { %v4753_v6 = vor.u32 %v2150_v60, %v2149_v56  ;;  %v4755_v7 = vor.u32 %v2153_v62, %v2152_v58  ;;  %v4757_v8 = vor.u32 %v2156_v0, %v2155_v20  ;;  %v2160_v11 = vor.u32 %v2159_v3, %v2158_v1 }
 0x285   :  { %v2163_v12 = vor.u32 %v2162_v29, %v2161_v4  ;;  %v2304_v40 = vshll.u32 %v7455_v55, %v2301_v13  ;;  %v2307_v41 = vshll.u32 %v7453_v57, %v2301_v13  ;;  %v2305_v44 = vshrl.u32 %v7453_v57, %v4791_v28 }
 0x286   :  { %v2172_v14 = vsel %vm2164_vm2, %v4753_v6, %v4755_v7  ;;  %v2176_v15 = vsel %vm2164_vm2, %v4755_v7, %v4757_v8  ;;  %v2173_v17 = vsel %vm2167_vm3, %v2160_v11, 920167782  ;;  %v2308_v45 = vshrl.u32 %v7450_v61, %v4791_v28 }
 0x287   :  { %v2177_v18 = vsel %vm2167_vm3, %v2163_v12, 1326507024  ;;  %v2174_v19 = vsel %vm2166_vm4, %v4757_v8, %v2173_v17  ;;  %v2310_v48 = vshll.u32 %v7450_v61, %v2301_v13  ;;  %v2311_v49 = vshrl.u32 %v7448_v63, %v4791_v28 }
 0x288   :  { %v2178_v21 = vsel %vm2166_vm4, %v2160_v11, %v2177_v18  ;;  %v2175_v25 = vsel %vm2165_vm5, %v2172_v14, %v2174_v19  ;;  %v7442_v62 = vmov 0   ;;  %v2314_v1 = vshrl.u32 %v7444_v2, %v4791_v28 }
 0x289   :  { %v2179_v26 = vsel %vm2165_vm5, %v2176_v15, %v2178_v21  ;;  %v2205_v32 = vand.u32 65535, %v2175_v25  ;;  %v2206_v33 = vshrl.u32 %v2175_v25, 16  ;;  %v2313_v29 = vshll.u32 %v7448_v63, %v2301_v13 }
 0x28a   :  { %v2183_v30 = vand.u32 65535, %v2179_v26  ;;  %v2184_v31 = vshrl.u32 %v2179_v26, 16  ;;  %v2316_v14 = vshll.u32 %v7444_v2, %v2301_v13  ;;  %v2317_v19 = vshrl.u32 %v7446_v5, %v4791_v28 }
 0x28b   :  { %v2208_v42 = vmul.u32 %v2206_v33, %v2181_v9  ;;  %v4802_v43 = vmul.u32 %v2205_v32, %v2182_v27  ;;  %v2207_v51 = vmul.u32 %v2205_v32, %v2181_v9  ;;  %v2210_v52 = vmul.u32 %v2206_v33, %v2182_v27 }
 0x28c   :  { %v2186_v37 = vmul.u32 %v2184_v31, %v2181_v9  ;;  %v2187_v39 = vmul.u32 %v2183_v30, %v2182_v27  ;;  %v2185_v46 = vmul.u32 %v2183_v30, %v2181_v9  ;;  %v2188_v50 = vmul.u32 %v2184_v31, %v2182_v27 }
 0x28d   :  { %v2211_v56 = vshll.u32 %v2208_v42, 16  ;;  %v2213_v60 = vshll.u32 %v4802_v43, 16  ;;  %v2315_v18 = vor.u32 %v2314_v1, %v2313_v29  ;;  %v2212_v9 = vshrl.u32 %v2208_v42, 16 }
 0x28e   :  { %v2189_v47 = vshll.u32 %v2186_v37, 16  ;;  %v2191_v58 = vshll.u32 %v2187_v39, 16  ;;  %v2190_v21 = vshrl.u32 %v2186_v37, 16  ;;  %v4822_v26 = vor.u32 %v2305_v44, %v2304_v40 }
 0x28f   :  { %vm2215_vm7 = vc.u32 %v2207_v51, %v2211_v56  ;;  %v2217_v0 = vadd.s32 %v2211_v56, %v2207_v51  ;;  %v4824_v27 = vor.u32 %v2308_v45, %v2307_v41  ;;  %v4826_v30 = vor.u32 %v2311_v49, %v2310_v48 }
 0x290   :  { %vm2193_vm6 = vc.u32 %v2185_v46, %v2189_v47  ;;  %v2195_v59 = vadd.s32 %v2189_v47, %v2185_v46  ;;  %v2216_v4 = vsel %vm2215_vm7, 1, %v7442_v62  ;;  %v2318_v31 = vor.u32 %v2317_v19, %v2316_v14 }
 0x291   :  { %v2194_v20 = vsel %vm2193_vm6, 1, %v7442_v62  ;;  %v2218_v12 = vadd.s32 %v2216_v4, %v2210_v52  ;;  %vm2219_vm9 = vc.u32 %v2217_v0, %v2213_v60  ;;  %vm2322_vm10 = vcmp.lt.s32.totalorder %v4797_v35, 4 }
 0x292   :  { %v2196_v3 = vadd.s32 %v2194_v20, %v2188_v50  ;;  %vm2197_vm8 = vc.u32 %v2195_v59, %v2191_v58  ;;  %v2220_v17 = vsel %vm2219_vm9, 1, %v7442_v62  ;;  %v2328_v33 = vsel %vm2322_vm10, %v2315_v18, 920167782 }
 0x293   :  { %v2198_v11 = vsel %vm2197_vm8, 1, %v7442_v62  ;;  %v2222_v25 = vadd.s32 %v2220_v17, %v2218_v12  ;;  %v2214_v46 = vshrl.u32 %v4802_v43, 16  ;;  %v2295_v37 = vor.u32 8388608, %v4795_v34 }
 0x294   :  { %v2200_v15 = vadd.s32 %v2198_v11, %v2196_v3  ;;  %v1826_v42 = vshrl.u32 %v1825_v36, 23  ;;  %v2192_v47 = vshrl.u32 %v2187_v39, 16  ;;  %vm2319_vm11 = vcmp.lt.s32.totalorder %v4797_v35, 1 }
 0x295   :  { %v2223_v32 = vadd.s32 %v2222_v25, %v2212_v9  ;;  %vm2321_vm12 = vcmp.lt.s32.totalorder %v4797_v35, 3  ;;  %v2332_v40 = vsel %vm2322_vm10, %v2318_v31, 1326507024  ;;  %v2169_v41 = vsel %vm2167_vm3, %v4757_v8, 2102212464 }
 0x296   :  { %v2201_v13 = vadd.s32 %v2200_v15, %v2190_v21  ;;  %v2327_v43 = vsel %vm2319_vm11, %v4822_v26, %v4824_v27  ;;  %v2329_v34 = vsel %vm2321_vm12, %v4826_v30, %v2328_v33  ;;  %v2148_v36 = vshrl.u32 %v7455_v55, %v4734_v53 }
 0x297   :  { %v2224_v44 = vadd.s32 %v2223_v32, %v2214_v46  ;;  %v2331_v8 = vsel %vm2319_vm11, %v4824_v27, %v4826_v30  ;;  %v2333_v45 = vsel %vm2321_vm12, %v2315_v18, %v2332_v40  ;;  %vm2320_vm13 = vcmp.lt.s32.totalorder %v4797_v35, 2 }
 0x298   :  { %v4849_v39 = vadd.s32 %v2201_v13, %v2192_v47  ;;  %v4334_v48 = vadd.s32 4294967169, %v1826_v42  ;;  %v2168_v49 = vsel %vm2164_vm2, %v2148_v36, %v4753_v6  ;;  %v2170_v53 = vsel %vm2166_vm4, %v4755_v7, %v2169_v41 }
 0x299   :  { %v4864_v50 = vadd.s32 %v2217_v0, %v2213_v60  ;;  %v2330_v51 = vsel %vm2320_vm13, %v2327_v43, %v2329_v34  ;;  %v2228_v52 = vadd.s32 1, %v2224_v44  ;;  %v2334_v56 = vsel %vm2320_vm13, %v2331_v8, %v2333_v45 }
 0x29a   :  { %v4870_v58 = vshll.u32 %v2295_v37, 8  ;;  %v2171_v6 = vsel %vm2165_vm5, %v2168_v49, %v2170_v53  ;;  %v2361_v59 = vshrl.u32 %v2330_v51, 16  ;;  %v2339_v20 = vshrl.u32 %v2334_v56, 16 }
 0x29b   :  { %vm2227_vm14 = vc.u32 %v4849_v39, %v4864_v50  ;;  %v1832_v7 = vadd.s32 1, %v4334_v48  ;;  %v2225_v1 = vmul.u32 %v4759_v10, %v2171_v6  ;;  %v2338_v11 = vand.u32 65535, %v2334_v56 }
 0x29c   :  { %v2229_v60 = vsel %vm2227_vm14, %v2228_v52, %v2224_v44  ;;  %v2336_v0 = vand.u32 65535, %v4870_v58  ;;  %v2360_v12 = vand.u32 65535, %v2330_v51  ;;  %v2337_v54 = vshrl.u32 %v4870_v58, 16 }
 0x29d   :  { %v2230_v4 = vadd.s32 %v2229_v60, %v2225_v1  ;;  %vm1833_vm15 = vcmp.gt.s32.totalorder %v1832_v7, 0  ;;  %v7439_v25 = vand.u32 2147483647, %v4784_v24 }
 0x29e   :  { %v4878_v3 = vmul.u32 %v2361_v59, %v2336_v0  ;;  %v4880_v29 = vmul.u32 %v2339_v20, %v2336_v0  ;;  %v1834_v14 = vsel %vm1833_vm15, %v1832_v7, 0  ;;  %v4885_v21 = vmul.u32 %v2338_v11, %v2337_v54 }
 0x29f   :  { %v2231_v17 = vadd.s32 536870912, %v2230_v4  ;;  %v1836_v19 = vand.u32 31, %v1834_v14  ;;  %v2362_v10 = vmul.u32 %v2360_v12, %v2336_v0  ;;  %v4887_v9 = vmul.u32 %v2360_v12, %v2337_v54 }
 0x2a0   :  { %v2366_v15 = vshll.u32 %v4878_v3, 16  ;;  %v2344_v18 = vshll.u32 %v4880_v29, 16  ;;  %v2340_v31 = vmul.u32 %v2338_v11, %v2336_v0  ;;  %v2346_v46 = vshll.u32 %v4885_v21, 16 }
 0x2a1   :  { %v4890_v13 = vsub.s32 32, %v1836_v19  ;;  %v4894_v33 = vshrl.u32 %v2231_v17, 30  ;;  %v2368_v37 = vshll.u32 %v4887_v9, 16  ;;  %v1829_v42 = vand.u32 8388607, %v7439_v25 }
 0x2a2   :  { %vm2370_vm0 = vc.u32 %v2362_v10, %v2366_v15  ;;  %v4892_v32 = vadd.s32 %v2366_v15, %v2362_v10  ;;  %vm2348_vm1 = vc.u32 %v2340_v31, %v2344_v18  ;;  %v2350_v40 = vadd.s32 %v2344_v18, %v2340_v31 }
 0x2a3   :  { %v1849_v47 = vshrl.u32 %v7444_v2, %v4890_v13  ;;  %v2371_v41 = vsel %vm2370_vm0, 1, %v7442_v62  ;;  %v1843_v44 = vshrl.u32 %v7450_v61, %v4890_v13  ;;  %v1846_v43 = vshrl.u32 %v7448_v63, %v4890_v13 }
 0x2a4   :  { %v2349_v34 = vsel %vm2348_vm1, 1, %v7442_v62  ;;  %vm4911_vm2 = vc.u32 %v4892_v32, %v2368_v37  ;;  %v1840_v8 = vshrl.u32 %v7453_v57, %v4890_v13  ;;  %v1848_v45 = vshll.u32 %v7448_v63, %v1836_v19 }
 0x2a5   :  { %v2233_v48 = vshll.u32 %v4894_v33, 30  ;;  %v4919_v49 = vshrl.u32 %v1834_v14, 5  ;;  %v1842_v53 = vshll.u32 %v7453_v57, %v1836_v19  ;;  %v1845_v51 = vshll.u32 %v7450_v61, %v1836_v19 }
 0x2a6   :  { %v1839_v52 = vshll.u32 %v7455_v55, %v1836_v19  ;;  %v1850_v56 = vor.u32 %v1849_v47, %v1848_v45  ;;  %v1851_v6 = vshll.u32 %v7444_v2, %v1836_v19  ;;  %v1852_v7 = vshrl.u32 %v7446_v5, %v4890_v13 }
 0x2a7   :  { %v2343_v60 = vmul.u32 %v2339_v20, %v2337_v54  ;;  %v2365_v0 = vmul.u32 %v2361_v59, %v2337_v54  ;;  %v4927_v1 = vor.u32 %v1843_v44, %v1842_v53  ;;  %v4929_v11 = vor.u32 %v1846_v43, %v1845_v51 }
 0x2a8   :  { %vm2352_vm3 = vc.u32 %v2350_v40, %v2346_v46  ;;  %v1830_v12 = vor.u32 8388608, %v1829_v42  ;;  %v4931_v14 = vor.u32 %v1840_v8, %v1839_v52  ;;  %v1853_v15 = vor.u32 %v1852_v7, %v1851_v6 }
 0x2a9   :  { %v2351_v17 = vadd.s32 %v2349_v34, %v2343_v60  ;;  %v2373_v18 = vadd.s32 %v2371_v41, %v2365_v0  ;;  %v2375_v19 = vsel %vm4911_vm2, 1, %v7442_v62  ;;  %vm1857_vm4 = vcmp.lt.s32.totalorder %v4919_v49, 4 }
 0x2aa   :  { %v4937_v10 = vsub.s32 %v2230_v4, %v2233_v48  ;;  %vm1854_vm5 = vcmp.lt.s32.totalorder %v4919_v49, 1  ;;  %v1863_v59 = vsel %vm1857_vm4, %v1850_v56, 920167782  ;;  %v1867_v20 = vsel %vm1857_vm4, %v1853_v15, 1326507024 }
 0x2ab   :  { %v2353_v54 = vsel %vm2352_vm3, 1, %v7442_v62  ;;  %vm1856_vm6 = vcmp.lt.s32.totalorder %v4919_v49, 3  ;;  %v1866_v31 = vsel %vm1854_vm5, %v4927_v1, %v4929_v11  ;;  %v1862_v4 = vsel %vm1854_vm5, %v4931_v14, %v4927_v1 }
 0x2ac   :  { %v1864_v46 = vsel %vm1856_vm6, %v4929_v11, %v1863_v59  ;;  %v1868_v42 = vsel %vm1856_vm6, %v1850_v56, %v1867_v20  ;;  %v2377_v47 = vadd.s32 %v2375_v19, %v2373_v18  ;;  %vm1855_vm7 = vcmp.lt.s32.totalorder %v4919_v49, 2 }
 0x2ad   :  { %v4960_v40 = vshll.u32 %v1830_v12, 8  ;;  %v2236_v41 = vsub.s32 0, %v4937_v10  ;;  %v2355_v44 = vadd.s32 %v2353_v54, %v2351_v17  ;;  %v1869_v43 = vsel %vm1855_vm7, %v1866_v31, %v1868_v42  ;;  %v4981_v17 = vpop.f32.mrf.mxu3 }
 0x2ae   :  { %vm2235_vm8 = vcmp.lt.s32.totalorder %v4937_v10, 0  ;;  %v2367_v34 = vshrl.u32 %v4878_v3, 16  ;;  %v1865_v36 = vsel %vm1855_vm7, %v1862_v4, %v1864_v46  ;;  %v1874_v8 = vshrl.u32 %v1869_v43, 16  ;;  %7553 = vst [vmem:[#allocation20_spill] sm:$0xff] %v4981_v17 }
 0x2af   :  { %v2345_v45 = vshrl.u32 %v4880_v29, 16  ;;  %v1871_v53 = vand.u32 65535, %v4960_v40  ;;  %v2237_v51 = vsel %vm2235_vm8, %v2236_v41, %v4937_v10  ;;  %v1896_v56 = vshrl.u32 %v1865_v36, 16 }
 0x2b0   :  { %v2378_v48 = vadd.s32 %v2377_v47, %v2367_v34  ;;  %v2369_v6 = vshrl.u32 %v4887_v9, 16  ;;  %v2303_v3 = vshrl.u32 %v7455_v55, %v4791_v28  ;;  %v2347_v60 = vshrl.u32 %v4885_v21, 16 }
 0x2b1   :  { %v2356_v52 = vadd.s32 %v2355_v44, %v2345_v45  ;;  %v4973_v7 = vmul.u32 %v1874_v8, %v1871_v53  ;;  %v2238_v0 = vclz %v2237_v51  ;;  %v2324_v29 = vsel %vm2322_vm10, %v4826_v30, 2102212464 }
 0x2b2   :  { %v2379_v12 = vadd.s32 %v2378_v48, %v2369_v6  ;;  %v1873_v15 = vand.u32 65535, %v1869_v43  ;;  %v4985_v19 = vmul.u32 %v1896_v56, %v1871_v53  ;;  %v2323_v59 = vsel %vm2319_vm11, %v2303_v3, %v4822_v26 }
 0x2b3   :  { %v4983_v18 = vadd.s32 %v2356_v52, %v2347_v60  ;;  %v1872_v28 = vshrl.u32 %v4960_v40, 16  ;;  %v1879_v21 = vshll.u32 %v4973_v7, 16  ;;  %v2325_v30 = vsel %vm2321_vm12, %v4824_v27, %v2324_v29 }
 0x2b4   :  { %v4998_v20 = vadd.s32 %v4892_v32, %v2368_v37  ;;  %v1895_v54 = vand.u32 65535, %v1865_v36  ;;  %v1980_v31 = vand.u32 2139095040, %v4981_v17  ;;  %v4341_v4 = vadd.s32 4294967294, %v2238_v0 }
 0x2b5   :  { %v2383_v46 = vadd.s32 1, %v2379_v12  ;;  %v1875_v42 = vmul.u32 %v1873_v15, %v1871_v53  ;;  %v5001_v26 = vmul.u32 %v1873_v15, %v1872_v28  ;;  %v1901_v47 = vshll.u32 %v4985_v19, 16 }
 0x2b6   :  { %vm2382_vm9 = vc.u32 %v4983_v18, %v4998_v20  ;;  %v2326_v27 = vsel %vm2320_vm13, %v2323_v59, %v2325_v30  ;;  %v1897_v32 = vmul.u32 %v1895_v54, %v1871_v53  ;;  %v5008_v37 = vmul.u32 %v1895_v54, %v1872_v28 }
 0x2b7   :  { %vm1883_vm10 = vc.u32 %v1875_v42, %v1879_v21  ;;  %v1885_v9 = vadd.s32 %v1879_v21, %v1875_v42  ;;  %vm4342_vm11 = vcmp.lt.s32.totalorder %v4341_v4, 0  ;;  %v2384_v41 = vsel %vm2382_vm9, %v2383_v46, %v2379_v12 }
 0x2b8   :  { %v1881_v44 = vshll.u32 %v5001_v26, 16  ;;  %v1981_v43 = vshrl.u32 %v1980_v31, 23  ;;  %v2380_v34 = vmul.u32 %v4870_v58, %v2326_v27  ;;  %v1884_v36 = vsel %vm1883_vm10, 1, %v7442_v62  ;;  %v5029_v31 = vpop.f32.mrf.mxu0 }
 0x2b9   :  { %vm1905_vm12 = vc.u32 %v1897_v32, %v1901_v47  ;;  %v5013_v45 = vadd.s32 %v1901_v47, %v1897_v32  ;;  %v1878_v48 = vmul.u32 %v1874_v8, %v1872_v28  ;;  %v5015_v35 = vsel %vm4342_vm11, 0, %v4341_v4  ;;  %7554 = vst [vmem:[#allocation21_spill] sm:$0xff] %v5029_v31 }
 0x2ba   :  { %vm1887_vm14 = vc.u32 %v1885_v9, %v1881_v44  ;;  %v5017_v51 = vadd.s32 %v2384_v41, %v2380_v34  ;;  %v1903_v53 = vshll.u32 %v5008_v37, 16  ;;  %v4337_v52 = vadd.s32 4294967169, %v1981_v43 }
 0x2bb   :  { %v1886_v6 = vadd.s32 %v1884_v36, %v1878_v48  ;;  %v1906_v3 = vsel %vm1905_vm12, 1, %v7442_v62  ;;  %v1888_v60 = vsel %vm1887_vm14, 1, %v7442_v62  ;;  %v1900_v58 = vmul.u32 %v1896_v56, %v1872_v28 }
 0x2bc   :  { %vm1909_vm13 = vc.u32 %v5013_v45, %v1903_v53  ;;  %v1987_v0 = vadd.s32 1, %v4337_v52  ;;  %v2246_v8 = vsub.s32 4294967266, %v5015_v35  ;;  %v2386_v29 = vadd.s32 536870912, %v5017_v51 }
 0x2bd   :  { %v1908_v12 = vadd.s32 %v1906_v3, %v1900_v58  ;;  %v7438_v15 = vand.u32 2147483647, %v4981_v17  ;;  %v1890_v59 = vadd.s32 %v1888_v60, %v1886_v6  ;;  %v1910_v21 = vsel %vm1909_vm13, 1, %v7442_v62 }
 0x2be   :  { %vm1988_vm15 = vcmp.gt.s32.totalorder %v1987_v0, 0  ;;  %v5031_v56 = vadd.s32 127, %v2246_v8  ;;  %v1838_v28 = vshrl.u32 %v7455_v55, %v4890_v13  ;;  %v1880_v4 = vshrl.u32 %v4973_v7, 16 }
 0x2bf   :  { %v1989_v30 = vsel %vm1988_vm15, %v1987_v0, 0  ;;  %v5036_v46 = vshrl.u32 %v2386_v29, 30  ;;  %v1912_v42 = vadd.s32 %v1910_v21, %v1908_v12  ;;  %v1984_v47 = vand.u32 8388607, %v7438_v15 }
 0x2c0   :  { %v1991_v54 = vand.u32 31, %v1989_v30  ;;  %v1859_v9 = vsel %vm1857_vm4, %v4929_v11, 2102212464  ;;  %v1891_v32 = vadd.s32 %v1890_v59, %v1880_v4  ;;  %v1902_v41 = vshrl.u32 %v4985_v19, 16 }
 0x2c1   :  { %v2755_v44 = vand.u32 2139095040, %v5029_v31  ;;  %v1985_v6 = vor.u32 8388608, %v1984_v47  ;;  %v5060_v3 = vshrl.u32 %v1989_v30, 5  ;;  %v1882_v12 = vshrl.u32 %v5001_v26, 16 }
 0x2c2   :  { %v5040_v27 = vsub.s32 32, %v1991_v54  ;;  %v1994_v13 = vshll.u32 %v7455_v55, %v1991_v54  ;;  %v1997_v43 = vshll.u32 %v7453_v57, %v1991_v54  ;;  %v2003_v34 = vshll.u32 %v7448_v63, %v1991_v54 }
 0x2c3   :  { %v1913_v52 = vadd.s32 %v1912_v42, %v1902_v41  ;;  %v2000_v60 = vshll.u32 %v7450_v61, %v1991_v54  ;;  %v2006_v29 = vshll.u32 %v7444_v2, %v1991_v54  ;;  %v1904_v59 = vshrl.u32 %v5008_v37, 16 }
 0x2c4   :  { %v1995_v7 = vshrl.u32 %v7453_v57, %v5040_v27  ;;  %v1998_v36 = vshrl.u32 %v7450_v61, %v5040_v27  ;;  %v2001_v11 = vshrl.u32 %v7448_v63, %v5040_v27  ;;  %v2004_v19 = vshrl.u32 %v7444_v2, %v5040_v27 }
 0x2c5   :  { %v2007_v48 = vshrl.u32 %v7446_v5, %v5040_v27  ;;  %v2756_v4 = vshrl.u32 %v2755_v44, 23  ;;  %v2388_v42 = vshll.u32 %v5036_v46, 30  ;;  %v1858_v30 = vsel %vm1854_vm5, %v1838_v28, %v4931_v14 }
 0x2c6   :  { %v5063_v58 = vor.u32 %v1995_v7, %v1994_v13  ;;  %v5065_v0 = vor.u32 %v1998_v36, %v1997_v43  ;;  %v2005_v8 = vor.u32 %v2004_v19, %v2003_v34  ;;  %v5070_v21 = vor.u32 %v2001_v11, %v2000_v60 }
 0x2c7   :  { %v1860_v47 = vsel %vm1856_vm6, %v4927_v1, %v1859_v9  ;;  %v2008_v41 = vor.u32 %v2007_v48, %v2006_v29  ;;  %v5079_v13 = vadd.s32 %v1891_v32, %v1882_v12  ;;  %v1914_v54 = vadd.s32 %v1913_v52, %v1904_v59 }
 0x2c8   :  { %vm2009_vm0 = vcmp.lt.s32.totalorder %v5060_v3, 1  ;;  %vm2012_vm1 = vcmp.lt.s32.totalorder %v5060_v3, 4  ;;  %vm2011_vm2 = vcmp.lt.s32.totalorder %v5060_v3, 3  ;;  %v5090_v28 = vshll.u32 %v1985_v6, 8 }
 0x2c9   :  { %v2017_v26 = vsel %vm2009_vm0, %v5063_v58, %v5065_v0  ;;  %v2018_v14 = vsel %vm2012_vm1, %v2005_v8, 920167782  ;;  %vm2010_vm3 = vcmp.lt.s32.totalorder %v5060_v3, 2  ;;  %v2021_v9 = vsel %vm2009_vm0, %v5065_v0, %v5070_v21 }
 0x2ca   :  { %v2019_v1 = vsel %vm2011_vm2, %v5070_v21, %v2018_v14  ;;  %v4352_v32 = vadd.s32 4294967169, %v2756_v4  ;;  %v5101_v44 = vsub.s32 %v5017_v51, %v2388_v42  ;;  %v5106_v7 = vadd.s32 %v5013_v45, %v1903_v53 }
 0x2cb   :  { %v2020_v43 = vsel %vm2010_vm3, %v2017_v26, %v2019_v1  ;;  %v2022_v34 = vsel %vm2012_vm1, %v2008_v41, 1326507024  ;;  %v1861_v36 = vsel %vm1855_vm7, %v1858_v30, %v1860_v47  ;;  %v1918_v11 = vadd.s32 1, %v1914_v54 }
 0x2cc   :  { %v2023_v19 = vsel %vm2011_vm2, %v2005_v8, %v2022_v34  ;;  %v2051_v51 = vshrl.u32 %v2020_v43, 16  ;;  %vm1917_vm4 = vc.u32 %v5079_v13, %v5106_v7  ;;  %v2026_v45 = vand.u32 65535, %v5090_v28 }
 0x2cd   :  { %v2024_v37 = vsel %vm2010_vm3, %v2021_v9, %v2023_v19  ;;  %v2050_v53 = vand.u32 65535, %v2020_v43  ;;  %v2027_v48 = vshrl.u32 %v5090_v28, 16  ;;  %v2762_v49 = vadd.s32 1, %v4352_v32 }
 0x2ce   :  { %v2028_v52 = vand.u32 65535, %v2024_v37  ;;  %v2029_v6 = vshrl.u32 %v2024_v37, 16  ;;  %v2226_v60 = vadd.s32 %v4864_v50, %v4849_v39  ;;  %v2242_v8 = vsub.s32 32, %v5015_v35 }
 0x2cf   :  { %v2053_v29 = vmul.u32 %v2051_v51, %v2026_v45  ;;  %v2248_v12 = vshll.u32 %v5031_v56, 23  ;;  %v1919_v59 = vsel %vm1917_vm4, %v1918_v11, %v1914_v54  ;;  %vm2390_vm5 = vcmp.lt.s32.totalorder %v5101_v44, 0 }
 0x2d0   :  { %v2031_v4 = vmul.u32 %v2029_v6, %v2026_v45  ;;  %v5126_v42 = vmul.u32 %v2028_v52, %v2027_v48  ;;  %v2391_v30 = vsub.s32 0, %v5101_v44  ;;  %v1915_v47 = vmul.u32 %v4960_v40, %v1861_v36 }
 0x2d1   :  { %v5131_v41 = vmul.u32 %v2050_v53, %v2027_v48  ;;  %v2030_v26 = vmul.u32 %v2028_v52, %v2026_v45  ;;  %v7437_v39 = vand.u32 2147483647, %v5029_v31  ;;  %vm2763_vm6 = vcmp.gt.s32.totalorder %v2762_v49, 0 }
 0x2d2   :  { %v2034_v14 = vshll.u32 %v2031_v4, 16  ;;  %v5134_v50 = vadd.s32 %v1919_v59, %v1915_v47  ;;  %v2052_v56 = vmul.u32 %v2050_v53, %v2026_v45  ;;  %v2055_v54 = vmul.u32 %v2051_v51, %v2027_v48 }
 0x2d3   :  { %v2056_v1 = vshll.u32 %v2053_v29, 16  ;;  %v2033_v9 = vmul.u32 %v2029_v6, %v2027_v48  ;;  %v2036_v32 = vshll.u32 %v5126_v42, 16  ;;  %v2058_v40 = vshll.u32 %v5131_v41, 16 }
 0x2d4   :  { %vm2038_vm7 = vc.u32 %v2030_v26, %v2034_v14  ;;  %v2040_v43 = vadd.s32 %v2034_v14, %v2030_v26  ;;  %v2764_v36 = vsel %vm2763_vm6, %v2762_v49, 0  ;;  %v1921_v45 = vadd.s32 536870912, %v5134_v50 }
 0x2d5   :  { %v2039_v34 = vsel %vm2038_vm7, 1, %v7442_v62  ;;  %vm2060_vm8 = vc.u32 %v2052_v56, %v2056_v1  ;;  %v2062_v37 = vadd.s32 %v2056_v1, %v2052_v56  ;;  %v2243_v48 = vshll.u32 %v4937_v10, %v5015_v35 }
 0x2d6   :  { %v2041_v11 = vadd.s32 %v2039_v34, %v2033_v9  ;;  %vm2042_vm9 = vc.u32 %v2040_v43, %v2036_v32  ;;  %v2061_v19 = vsel %vm2060_vm8, 1, %v7442_v62  ;;  %v2244_v52 = vshrl.u32 %v2226_v60, %v2242_v8 }
 0x2d7   :  { %v2043_v51 = vsel %vm2042_vm9, 1, %v7442_v62  ;;  %v2063_v53 = vadd.s32 %v2061_v19, %v2055_v54  ;;  %vm2064_vm10 = vc.u32 %v2062_v37, %v2058_v40  ;;  %v5144_v59 = vor.u32 4788187, %v2248_v12 }
 0x2d8   :  { %v2045_v6 = vadd.s32 %v2043_v51, %v2041_v11  ;;  %v2392_v49 = vsel %vm2390_vm5, %v2391_v30, %v5101_v44  ;;  %v2065_v47 = vsel %vm2064_vm10, 1, %v7442_v62  ;;  %v2766_v26 = vand.u32 31, %v2764_v36 }
 0x2d9   :  { %v2035_v14 = vshrl.u32 %v2031_v4, 16  ;;  %v2057_v56 = vshrl.u32 %v2053_v29, 16  ;;  %v2067_v1 = vadd.s32 %v2065_v47, %v2063_v53  ;;  %v2759_v54 = vand.u32 8388607, %v7437_v39 }
 0x2da   :  { %v5152_v9 = vshrl.u32 %v1921_v45, 30  ;;  %v1993_v10 = vshrl.u32 %v7455_v55, %v5040_v27  ;;  %v2014_v35 = vsel %vm2012_vm1, %v5070_v21, 2102212464  ;;  %v5159_v60 = vsub.s32 32, %v2766_v26 }
 0x2db   :  { %v2037_v8 = vshrl.u32 %v5126_v42, 16  ;;  %v2046_v12 = vadd.s32 %v2045_v6, %v2035_v14  ;;  %v2059_v29 = vshrl.u32 %v5131_v41, 16  ;;  %v2068_v4 = vadd.s32 %v2067_v1, %v2057_v56 }
 0x2dc   :  { %v2769_v30 = vshll.u32 %v7455_v55, %v2766_v26  ;;  %v2770_v32 = vshrl.u32 %v7453_v57, %v5159_v60  ;;  %v2772_v43 = vshll.u32 %v7453_v57, %v2766_v26  ;;  %v2773_v27 = vshrl.u32 %v7450_v61, %v5159_v60 }
 0x2dd   :  { %v5169_v34 = vshrl.u32 %v2764_v36, 5  ;;  %v2775_v21 = vshll.u32 %v7450_v61, %v2766_v26  ;;  %v2776_v42 = vshrl.u32 %v7448_v63, %v5159_v60  ;;  %v2778_v41 = vshll.u32 %v7448_v63, %v2766_v26 }
 0x2de   :  { %v2069_v11 = vadd.s32 %v2068_v4, %v2059_v29  ;;  %v5175_v19 = vor.u32 %v2770_v32, %v2769_v30  ;;  %v5177_v45 = vor.u32 %v2773_v27, %v2772_v43  ;;  %v2779_v51 = vshrl.u32 %v7444_v2, %v5159_v60 }
 0x2df   :  { %v2013_v36 = vsel %vm2009_vm0, %v1993_v10, %v5063_v58  ;;  %v2015_v53 = vsel %vm2011_vm2, %v5065_v0, %v2014_v35  ;;  %v5187_v6 = vadd.s32 %v2046_v12, %v2037_v8  ;;  %v2760_v47 = vor.u32 8388608, %v2759_v54 }
 0x2e0   :  { %v5189_v14 = vor.u32 %v2776_v42, %v2775_v21  ;;  %v2780_v56 = vor.u32 %v2779_v51, %v2778_v41  ;;  %v2781_v1 = vshll.u32 %v7444_v2, %v2766_v26  ;;  %v2782_v29 = vshrl.u32 %v7446_v5, %v5159_v60 }
 0x2e1   :  { %v2393_v4 = vclz %v2392_v49  ;;  %v1923_v30 = vshll.u32 %v5152_v9, 30  ;;  %v5195_v32 = vadd.s32 %v2062_v37, %v2058_v40  ;;  %vm2784_vm11 = vcmp.lt.s32.totalorder %v5169_v34, 1 }
 0x2e2   :  { %v2073_v58 = vadd.s32 1, %v2069_v11  ;;  %v2783_v0 = vor.u32 %v2782_v29, %v2781_v1  ;;  %vm2787_vm12 = vcmp.lt.s32.totalorder %v5169_v34, 4  ;;  %v2792_v54 = vsel %vm2784_vm11, %v5175_v19, %v5177_v45 }
 0x2e3   :  { %v2016_v26 = vsel %vm2010_vm3, %v2013_v36, %v2015_v53  ;;  %vm2072_vm14 = vc.u32 %v5187_v6, %v5195_v32  ;;  %vm2786_vm13 = vcmp.lt.s32.totalorder %v5169_v34, 3  ;;  %v2793_v40 = vsel %vm2787_vm12, %v2780_v56, 920167782 }
 0x2e4   :  { %vm2785_vm15 = vcmp.lt.s32.totalorder %v5169_v34, 2  ;;  %v2794_v37 = vsel %vm2786_vm13, %v5189_v14, %v2793_v40  ;;  %v2796_v3 = vsel %vm2784_vm11, %v5177_v45, %v5189_v14  ;;  %v5218_v49 = vshll.u32 %v2760_v47, 8 }
 0x2e5   :  { %v2245_v10 = vor.u32 %v2244_v52, %v2243_v48  ;;  %v2795_v35 = vsel %vm2785_vm15, %v2792_v54, %v2794_v37  ;;  %v2797_v8 = vsel %vm2787_vm12, %v2783_v0, 1326507024  ;;  %v4344_v12 = vadd.s32 4294967294, %v2393_v4 }
 0x2e6   :  { %v5225_v43 = vsub.s32 %v5134_v50, %v1923_v30  ;;  %v2074_v27 = vsel %vm2072_vm14, %v2073_v58, %v2069_v11  ;;  %v2798_v21 = vsel %vm2786_vm13, %v2780_v56, %v2797_v8  ;;  %v2070_v42 = vmul.u32 %v5090_v28, %v2016_v26 }
 0x2e7   :  { %v2799_v41 = vsel %vm2785_vm15, %v2796_v3, %v2798_v21  ;;  %v2826_v48 = vshrl.u32 %v2795_v35, 16  ;;  %v2250_v52 = vand.u32 2147483647, %v5144_v59  ;;  %v2801_v51 = vand.u32 65535, %v5218_v49 }
 0x2e8   :  { %v2803_v36 = vand.u32 65535, %v2799_v41  ;;  %v2825_v53 = vand.u32 65535, %v2795_v35  ;;  %v2075_v47 = vadd.s32 %v2074_v27, %v2070_v42  ;;  %v2802_v50 = vshrl.u32 %v5218_v49, 16 }
 0x2e9   :  { %v2804_v1 = vshrl.u32 %v2799_v41, 16  ;;  %v2252_v11 = vcvt.s32.f32 %v2245_v10  ;;  %vm4345_vm0 = vcmp.lt.s32.totalorder %v4344_v12, 0  ;;  %v1926_v56 = vsub.s32 0, %v5225_v43 }
 0x2ea   :  { %v2828_v29 = vmul.u32 %v2826_v48, %v2801_v51  ;;  %vm1925_vm1 = vcmp.lt.s32.totalorder %v5225_v43, 0  ;;  %v2807_v4 = vmul.u32 %v2803_v36, %v2802_v50  ;;  %v5237_v58 = vmul.u32 %v2825_v53, %v2802_v50 }
 0x2eb   :  { %v2806_v28 = vmul.u32 %v2804_v1, %v2801_v51  ;;  %v2253_v30 = vmul.f32 %v2252_v11, %v2250_v52  ;;  %v5239_v59 = vsel %vm4345_vm0, 0, %v4344_v12  ;;  %v2076_v0 = vadd.s32 536870912, %v2075_v47  ;;  %v5244_v12 = vpop.f32.mrf.mxu1 }
 0x2ec   :  { %v2805_v54 = vmul.u32 %v2803_v36, %v2801_v51  ;;  %v1927_v40 = vsel %vm1925_vm1, %v1926_v56, %v5225_v43  ;;  %v2808_v37 = vmul.u32 %v2804_v1, %v2802_v50  ;;  %v2827_v3 = vmul.u32 %v2825_v53, %v2801_v51  ;;  %7555 = vst [vmem:[#allocation22_spill] sm:$0xff] %v5244_v12 }
 0x2ed   :  { %v2809_v26 = vshll.u32 %v2806_v28, 16  ;;  %v2831_v10 = vshll.u32 %v2828_v29, 16  ;;  %v2811_v35 = vshll.u32 %v2807_v4, 16  ;;  %v2830_v27 = vmul.u32 %v2826_v48, %v2802_v50 }
 0x2ee   :  { %v2833_v42 = vshll.u32 %v5237_v58, 16  ;;  %v5246_v52 = vshrl.u32 %v2076_v0, 30  ;;  %v2254_v51 = vxor.u32 2147483648, %v2253_v30  ;;  %v2401_v48 = vsub.s32 4294967266, %v5239_v59 }
 0x2ef   :  { %vm2813_vm2 = vc.u32 %v2805_v54, %v2809_v26  ;;  %v2815_v8 = vadd.s32 %v2809_v26, %v2805_v54  ;;  %vm2835_vm3 = vc.u32 %v2827_v3, %v2831_v10  ;;  %v2837_v41 = vadd.s32 %v2831_v10, %v2827_v3 }
 0x2f0   :  { %v2814_v21 = vsel %vm2813_vm2, 1, %v7442_v62  ;;  %v2836_v1 = vsel %vm2835_vm3, 1, %v7442_v62  ;;  %v2910_v54 = vand.u32 2139095040, %v5244_v12  ;;  %v1928_v26 = vclz %v1927_v40 }
 0x2f1   :  { %v2816_v36 = vadd.s32 %v2814_v21, %v2808_v37  ;;  %vm2817_vm4 = vc.u32 %v2815_v8, %v2811_v35  ;;  %v2838_v11 = vadd.s32 %v2836_v1, %v2830_v27  ;;  %vm2839_vm5 = vc.u32 %v2837_v41, %v2833_v42 }
 0x2f2   :  { %v2818_v53 = vsel %vm2817_vm4, 1, %v7442_v62  ;;  %v2840_v56 = vsel %vm2839_vm5, 1, %v7442_v62  ;;  %v2810_v3 = vshrl.u32 %v2806_v28, 16  ;;  %v2832_v0 = vshrl.u32 %v2828_v29, 16 }
 0x2f3   :  { %v2820_v50 = vadd.s32 %v2818_v53, %v2816_v36  ;;  %v2842_v10 = vadd.s32 %v2840_v56, %v2838_v11  ;;  %vm5255_vm6 = vcmp.le.f32.partialorder %v2132_v38, 0.7853982  ;;  %v7556_v37 = vmov 0 }
 0x2f4   :  { %v7557_v37 = vsel %vm5255_vm6, 4294967295, %v7556_v37  ;;  %vm2134_vm7 = vcmp.lt.s32.totalorder %v4721_v22, 0  ;;  %v2078_v35 = vshll.u32 %v5246_v52, 30  ;;  %v2911_v36 = vshrl.u32 %v2910_v54, 23 }
 0x2f5   :  { %7558 = vst [vmem:[#allocation23_spill] sm:$0xff] %v7557_v37  ;;  %v2255_v8 = vsel %vm2134_vm7, %v2254_v51, %v2253_v30  ;;  %v2821_v27 = vadd.s32 %v2820_v50, %v2810_v3  ;;  %v2843_v21 = vadd.s32 %v2842_v10, %v2832_v0  ;;  %v2397_v28 = vsub.s32 32, %v5239_v59 }
 0x2f6   :  { %v2402_v29 = vadd.s32 127, %v2401_v48  ;;  %v2789_v38 = vsel %vm2787_vm12, %v5189_v14, 2102212464  ;;  %v2834_v40 = vshrl.u32 %v5237_v58, 16  ;;  %v4335_v1 = vadd.s32 4294967294, %v1928_v26 }
 0x2f7   :  { %v2768_v53 = vshrl.u32 %v7455_v55, %v5159_v60  ;;  %v2812_v11 = vshrl.u32 %v2807_v4, 16  ;;  %v4355_v56 = vadd.s32 4294967169, %v2911_v36  ;;  %v2256_v30 = vsub.s32 4, %v4894_v33  ;;  %v5315_v36 = vpop.f32.mrf.mxu2 }
 0x2f8   :  { %v2381_v51 = vadd.s32 %v4998_v20, %v4983_v18  ;;  %v5273_v50 = vsub.s32 %v2075_v47, %v2078_v35  ;;  %v2844_v48 = vadd.s32 %v2843_v21, %v2834_v40  ;;  %v2790_v58 = vsel %vm2786_vm13, %v5177_v45, %v2789_v38  ;;  %7561 = vst [vmem:[#allocation26_spill] sm:$0xff] %v5315_v36 }
 0x2f9   :  { %v2788_v14 = vsel %vm2784_vm11, %v2768_v53, %v5175_v19  ;;  %v5281_v54 = vadd.s32 %v2821_v27, %v2812_v11  ;;  %v2917_v60 = vadd.s32 1, %v4355_v56  ;;  %v5286_v4 = vsel %vm5255_vm6, %v4721_v22, %v2255_v8 }
 0x2fa   :  { %v2398_v18 = vshll.u32 %v5101_v44, %v5239_v59  ;;  %v2399_v20 = vshrl.u32 %v2381_v51, %v2397_v28  ;;  %v2403_v47 = vshll.u32 %v2402_v29, 23  ;;  %vm4336_vm8 = vcmp.lt.s32.totalorder %v4335_v1, 0 }
 0x2fb   :  { %v5290_v26 = vadd.s32 %v2837_v41, %v2833_v42  ;;  %v7436_v19 = vand.u32 2147483647, %v5244_v12  ;;  %vm2918_vm9 = vcmp.gt.s32.totalorder %v2917_v60, 0  ;;  %v2081_v45 = vsub.s32 0, %v5273_v50 }
 0x2fc   :  { %v2791_v3 = vsel %vm2785_vm15, %v2788_v14, %v2790_v58  ;;  %v2848_v0 = vadd.s32 1, %v2844_v48  ;;  %v2919_v10 = vsel %vm2918_vm9, %v2917_v60, 0  ;;  %vm2080_vm10 = vcmp.lt.s32.totalorder %v5273_v50, 0 }
 0x2fd   :  { %vm2847_vm11 = vc.u32 %v5281_v54, %v5290_v26  ;;  %v2921_v44 = vand.u32 31, %v2919_v10  ;;  %v5302_v59 = vsel %vm2134_vm7, %v2256_v30, %v4894_v33  ;;  %v5306_v42 = vmul.f32 %v5286_v4, %v5286_v4 }
 0x2fe   :  { %7559 = vst [vmem:[#allocation24_spill] sm:$0xff] %v5302_v59  ;;  %v2400_v41 = vor.u32 %v2399_v20, %v2398_v18  ;;  %v2411_v34 = vsub.s32 4, %v5036_v46  ;;  %v2404_v35 = vor.u32 4788187, %v2403_v47  ;;  %v5310_v8 = vsel %vm4336_vm8, 0, %v4335_v1 }
 0x2ff   :  { %7560 = vst [vmem:[#allocation25_spill] sm:$0xff] %v5306_v42  ;;  %v2845_v27 = vmul.u32 %v5218_v49, %v2791_v3  ;;  %v5313_v21 = vsub.s32 32, %v2921_v44  ;;  %v2082_v33 = vsel %vm2080_vm10, %v2081_v45, %v5273_v50  ;;  %v2849_v28 = vsel %vm2847_vm11, %v2848_v0, %v2844_v48 }
 0x300   :  { %v2914_v29 = vand.u32 8388607, %v7436_v19  ;;  %v2924_v38 = vshll.u32 %v7455_v55, %v2921_v44  ;;  %v2927_v1 = vshll.u32 %v7453_v57, %v2921_v44  ;;  %v5328_v11 = vshrl.u32 %v2919_v10, 5 }
 0x301   :  { %v2925_v40 = vshrl.u32 %v7453_v57, %v5313_v21  ;;  %v2928_v49 = vshrl.u32 %v7450_v61, %v5313_v21  ;;  %v2931_v53 = vshrl.u32 %v7448_v63, %v5313_v21  ;;  %v2933_v56 = vshll.u32 %v7448_v63, %v2921_v44 }
 0x302   :  { %v2934_v30 = vshrl.u32 %v7444_v2, %v5313_v21  ;;  %v2445_v51 = vand.u32 2139095040, %v5315_v36  ;;  %v5334_v48 = vadd.s32 %v2849_v28, %v2845_v27  ;;  %v2930_v60 = vshll.u32 %v7450_v61, %v2921_v44 }
 0x303   :  { %v5336_v14 = vor.u32 %v2925_v40, %v2924_v38  ;;  %v5338_v58 = vor.u32 %v2928_v49, %v2927_v1  ;;  %v2405_v18 = vand.u32 2147483647, %v2404_v35  ;;  %v2407_v20 = vcvt.s32.f32 %v2400_v41 }
 0x304   :  { %v2915_v47 = vor.u32 8388608, %v2914_v29  ;;  %v2935_v45 = vor.u32 %v2934_v30, %v2933_v56  ;;  %v1916_v3 = vadd.s32 %v5106_v7, %v5079_v13  ;;  %v5343_v0 = vor.u32 %v2931_v53, %v2930_v60 }
 0x305   :  { %v2936_v10 = vshll.u32 %v7444_v2, %v2921_v44  ;;  %v2937_v27 = vshrl.u32 %v7446_v5, %v5313_v21  ;;  %v1936_v28 = vsub.s32 4294967266, %v5310_v8  ;;  %v2083_v38 = vclz %v2082_v33 }
 0x306   :  { %vm2939_vm12 = vcmp.lt.s32.totalorder %v5328_v11, 1  ;;  %v2446_v40 = vshrl.u32 %v2445_v51, 23  ;;  %vm2289_vm14 = vcmp.lt.s32.totalorder %v4723_v23, 0  ;;  %v2851_v41 = vadd.s32 536870912, %v5334_v48 }
 0x307   :  { %v2938_v35 = vor.u32 %v2937_v27, %v2936_v10  ;;  %vm2942_vm13 = vcmp.lt.s32.totalorder %v5328_v11, 4  ;;  %v2947_v13 = vsel %vm2939_vm12, %v5336_v14, %v5338_v58  ;;  %v2408_v7 = vmul.f32 %v2407_v20, %v2405_v18 }
 0x308   :  { %vm2941_vm15 = vcmp.lt.s32.totalorder %v5328_v11, 3  ;;  %v2948_v44 = vsel %vm2942_vm13, %v2935_v45, 920167782  ;;  %v5360_v33 = vshll.u32 %v2915_v47, 8  ;;  %v1932_v29 = vsub.s32 32, %v5310_v8 }
 0x309   :  { %vm2940_vm0 = vcmp.lt.s32.totalorder %v5328_v11, 2  ;;  %v2949_v1 = vsel %vm2941_vm15, %v5343_v0, %v2948_v44  ;;  %v2951_v49 = vsel %vm2939_vm12, %v5338_v58, %v5343_v0  ;;  %v1937_v53 = vadd.s32 127, %v1936_v28 }
 0x30a   :  { %v4338_v56 = vadd.s32 4294967294, %v2083_v38  ;;  %v2950_v30 = vsel %vm2940_vm0, %v2947_v13, %v2949_v1  ;;  %v2952_v51 = vsel %vm2942_vm13, %v2938_v35, 1326507024  ;;  %v5375_v60 = vshrl.u32 %v2851_v41, 30 }
 0x30b   :  { %v2953_v18 = vsel %vm2941_vm15, %v2935_v45, %v2952_v51  ;;  %v2981_v20 = vshrl.u32 %v2950_v30, 16  ;;  %v4346_v47 = vadd.s32 4294967169, %v2446_v40  ;;  %v2268_v10 = vmul.f32 -0.00019511016, %v5306_v42 }
 0x30c   :  { %v2409_v27 = vxor.u32 2147483648, %v2408_v7  ;;  %v2954_v28 = vsel %vm2940_vm0, %v2951_v49, %v2953_v18  ;;  %v2956_v38 = vand.u32 65535, %v5360_v33  ;;  %v1934_v44 = vshrl.u32 %v1916_v3, %v1932_v29 }
 0x30d   :  { %v2958_v13 = vand.u32 65535, %v2954_v28  ;;  %v2959_v1 = vshrl.u32 %v2954_v28, 16  ;;  %v2980_v19 = vand.u32 65535, %v2950_v30  ;;  %v1938_v35 = vshll.u32 %v1937_v53, 23 }
 0x30e   :  { %v2957_v45 = vshrl.u32 %v5360_v33, 16  ;;  %v2983_v40 = vmul.u32 %v2981_v20, %v2956_v38  ;;  %v1933_v51 = vshll.u32 %v5225_v43, %v5310_v8  ;;  %vm4339_vm1 = vcmp.lt.s32.totalorder %v4338_v56, 0 }
 0x30f   :  { %v2853_v49 = vshll.u32 %v5375_v60, 30  ;;  %v2452_v18 = vadd.s32 1, %v4346_v47  ;;  %v5390_v39 = vadd.f32 0.008332121, %v2268_v10  ;;  %v5397_v3 = vsel %vm2289_vm14, %v2411_v34, %v5036_v46 }
 0x310   :  { %7562 = vst [vmem:[#allocation27_spill] sm:$0xff] %v5397_v3  ;;  %v2961_v29 = vmul.u32 %v2959_v1, %v2956_v38  ;;  %v5399_v53 = vmul.u32 %v2958_v13, %v2957_v45  ;;  %v5403_v30 = vsel %vm2289_vm14, %v2409_v27, %v2408_v7  ;;  %v5405_v43 = vor.u32 %v1934_v44, %v1933_v51 }
 0x311   :  { %v5407_v8 = vmul.u32 %v2980_v19, %v2957_v45  ;;  %v2986_v47 = vshll.u32 %v2983_v40, 16  ;;  %v5409_v10 = vor.u32 4788187, %v1938_v35  ;;  %v5411_v28 = vsel %vm4339_vm1, 0, %v4338_v56 }
 0x312   :  { %v2960_v41 = vmul.u32 %v2958_v13, %v2956_v38  ;;  %v2964_v15 = vshll.u32 %v2961_v29, 16  ;;  %v5414_v46 = vsub.s32 %v5334_v48, %v2853_v49  ;;  %v2982_v34 = vmul.u32 %v2980_v19, %v2956_v38 }
 0x313   :  { %v7441_v25 = vand.u32 2147483647, %v5315_v36  ;;  %vm2453_vm2 = vcmp.gt.s32.totalorder %v2452_v18, 0  ;;  %v2963_v7 = vmul.u32 %v2959_v1, %v2957_v45  ;;  %v2966_v27 = vshll.u32 %v5399_v53, 16 }
 0x314   :  { %vm2968_vm3 = vc.u32 %v2960_v41, %v2964_v15  ;;  %v2970_v44 = vadd.s32 %v2964_v15, %v2960_v41  ;;  %v2985_v35 = vmul.u32 %v2981_v20, %v2957_v45  ;;  %v2988_v56 = vshll.u32 %v5407_v8, 16 }
 0x315   :  { %v2969_v51 = vsel %vm2968_vm3, 1, %v7442_v62  ;;  %vm2990_vm4 = vc.u32 %v2982_v34, %v2986_v47  ;;  %v2992_v49 = vadd.s32 %v2986_v47, %v2982_v34  ;;  %v2449_v1 = vand.u32 8388607, %v7441_v25 }
 0x316   :  { %v2971_v13 = vadd.s32 %v2969_v51, %v2963_v7  ;;  %vm2972_vm5 = vc.u32 %v2970_v44, %v2966_v27  ;;  %v2991_v48 = vsel %vm2990_vm4, 1, %v7442_v62  ;;  %v2454_v16 = vsel %vm2453_vm2, %v2452_v18, 0 }
 0x317   :  { %v2973_v19 = vsel %vm2972_vm5, 1, %v7442_v62  ;;  %v2993_v38 = vadd.s32 %v2991_v48, %v2985_v35  ;;  %v2856_v41 = vsub.s32 0, %v5414_v46  ;;  %vm2994_vm7 = vc.u32 %v2992_v49, %v2988_v56 }
 0x318   :  { %vm2855_vm8 = vcmp.lt.s32.totalorder %v5414_v46, 0  ;;  %v2923_v45 = vshrl.u32 %v7455_v55, %v5313_v21  ;;  %v2995_v47 = vsel %vm2994_vm7, 1, %v7442_v62  ;;  %v2456_v34 = vand.u32 31, %v2454_v16 }
 0x319   :  { %v2091_v27 = vsub.s32 4294967266, %v5411_v28  ;;  %v2975_v18 = vadd.s32 %v2973_v19, %v2971_v13  ;;  %v2997_v44 = vadd.s32 %v2995_v47, %v2993_v38  ;;  %v2987_v35 = vshrl.u32 %v2983_v40, 16 }
 0x31a   :  { %v2943_v51 = vsel %vm2939_vm12, %v2923_v45, %v5336_v14  ;;  %v2450_v48 = vor.u32 8388608, %v2449_v1  ;;  %v5437_v25 = vsub.s32 32, %v2456_v34  ;;  %v2857_v20 = vsel %vm2855_vm8, %v2856_v41, %v5414_v46 }
 0x31b   :  { %v2944_v21 = vsel %vm2942_vm13, %v5343_v0, 2102212464  ;;  %v2965_v62 = vshrl.u32 %v2961_v29, 16  ;;  %v2459_v7 = vshll.u32 %v7455_v55, %v2456_v34  ;;  %v2998_v15 = vadd.s32 %v2997_v44, %v2987_v35 }
 0x31c   :  { %v2460_v13 = vshrl.u32 %v7453_v57, %v5437_v25  ;;  %v2462_v19 = vshll.u32 %v7453_v57, %v2456_v34  ;;  %v2463_v14 = vshrl.u32 %v7450_v61, %v5437_v25  ;;  %v2967_v40 = vshrl.u32 %v5399_v53, 16 }
 0x31d   :  { %v2976_v38 = vadd.s32 %v2975_v18, %v2965_v62  ;;  %v2989_v1 = vshrl.u32 %v5407_v8, 16  ;;  %v5451_v41 = vshrl.u32 %v2454_v16, 5  ;;  %v2465_v45 = vshll.u32 %v7450_v61, %v2456_v34 }
 0x31e   :  { %v5453_v0 = vor.u32 %v2460_v13, %v2459_v7  ;;  %v5455_v29 = vor.u32 %v2463_v14, %v2462_v19  ;;  %v2466_v47 = vshrl.u32 %v7448_v63, %v5437_v25  ;;  %v2468_v44 = vshll.u32 %v7448_v63, %v2456_v34 }
 0x31f   :  { %v2469_v35 = vshrl.u32 %v7444_v2, %v5437_v25  ;;  %v2471_v62 = vshll.u32 %v7444_v2, %v2456_v34  ;;  %v2472_v16 = vshrl.u32 %v7446_v5, %v5437_v25  ;;  %v2858_v53 = vclz %v2857_v20 }
 0x320   :  { %v2945_v8 = vsel %vm2941_vm15, %v5338_v58, %v2944_v21  ;;  %v2999_v7 = vadd.s32 %v2998_v15, %v2989_v1  ;;  %v5469_v18 = vor.u32 %v2466_v47, %v2465_v45  ;;  %v7563_v13 = vand.u32 2147483647, %v4723_v23 }
 0x321   :  { %v7564_v19 = vmov 0  ;;  %v5477_v14 = vadd.s32 %v2976_v38, %v2967_v40  ;;  %v2470_v34 = vor.u32 %v2469_v35, %v2468_v44  ;;  %v2473_v2 = vor.u32 %v2472_v16, %v2471_v62 }
 0x322   :  { %vm5473_vm9 = vcmp.le.f32.partialorder %v7563_v13, 0.7853982  ;;  %vm2474_vm10 = vcmp.lt.s32.totalorder %v5451_v41, 1  ;;  %v5480_v20 = vadd.s32 %v2992_v49, %v2988_v56  ;;  %vm2477_vm11 = vcmp.lt.s32.totalorder %v5451_v41, 4 }
 0x323   :  { %v7565_v19 = vsel %vm5473_vm9, 4294967295, %v7564_v19  ;;  %v2482_v58 = vsel %vm2474_vm10, %v5453_v0, %v5455_v29  ;;  %v5487_v15 = vshll.u32 %v2450_v48, 8  ;;  %vm2476_vm12 = vcmp.lt.s32.totalorder %v5451_v41, 3 }
 0x324   :  { %7566 = vst [vmem:[#allocation28_spill] sm:$0xff] %v7565_v19  ;;  %v2483_v21 = vsel %vm2477_vm11, %v2470_v34, 920167782  ;;  %v2486_v56 = vsel %vm2474_vm10, %v5455_v29, %v5469_v18  ;;  %v2487_v49 = vsel %vm2477_vm11, %v2473_v2, 1326507024  ;;  %v2092_v40 = vadd.s32 127, %v2091_v27 }
 0x325   :  { %v3003_v38 = vadd.s32 1, %v2999_v7  ;;  %vm2475_vm14 = vcmp.lt.s32.totalorder %v5451_v41, 2  ;;  %v2484_v48 = vsel %vm2476_vm12, %v5469_v18, %v2483_v21  ;;  %v2071_v1 = vadd.s32 %v5195_v32, %v5187_v6 }
 0x326   :  { %vm3002_vm13 = vc.u32 %v5477_v14, %v5480_v20  ;;  %v2485_v45 = vsel %vm2475_vm14, %v2482_v58, %v2484_v48  ;;  %v2488_v2 = vsel %vm2476_vm12, %v2470_v34, %v2487_v49  ;;  %v4353_v27 = vadd.s32 4294967294, %v2858_v53 }
 0x327   :  { %v2946_v47 = vsel %vm2940_vm0, %v2943_v51, %v2945_v8  ;;  %v2489_v44 = vsel %vm2475_vm14, %v2486_v56, %v2488_v2  ;;  %v2491_v35 = vand.u32 65535, %v5487_v15  ;;  %v2492_v6 = vshrl.u32 %v5487_v15, 16 }
 0x328   :  { %v2493_v32 = vand.u32 65535, %v2489_v44  ;;  %v2494_v62 = vshrl.u32 %v2489_v44, 16  ;;  %v2516_v16 = vshrl.u32 %v2485_v45, 16  ;;  %vm1824_vm15 = vcmp.lt.s32.totalorder %v4784_v24, 0 }
 0x329   :  { %v7567_v13 = vand.u32 2147483647, %v5409_v10  ;;  %v7568_v34 = vcvt.s32.f32 %v5405_v43  ;;  %v7569_v11 = vsub.s32 32, %v5411_v28  ;;  %v2093_v8 = vshll.u32 %v2092_v40, 23 }
 0x32a   :  { %v3004_v58 = vsel %vm3002_vm13, %v3003_v38, %v2999_v7  ;;  %v3000_v21 = vmul.u32 %v5360_v33, %v2946_v47  ;;  %v2496_v56 = vmul.u32 %v2494_v62, %v2491_v35  ;;  %v5524_v49 = vmul.u32 %v2493_v32, %v2492_v6 }
 0x32b   :  { %v1943_v53 = vmul.f32 %v7568_v34, %v7567_v13  ;;  %v2089_v51 = vshrl.u32 %v2071_v1, %v7569_v11  ;;  %v2515_v48 = vand.u32 65535, %v2485_v45  ;;  %v2270_v2 = vmul.f32 %v5390_v39, %v5306_v42 }
 0x32c   :  { %v5532_v43 = vsel %vm5473_vm9, %v4723_v23, %v5403_v30  ;;  %v2088_v10 = vshll.u32 %v5273_v50, %v5411_v28  ;;  %v2518_v40 = vmul.u32 %v2516_v16, %v2491_v35  ;;  %vm4354_vm0 = vcmp.lt.s32.totalorder %v4353_v27, 0 }
 0x32d   :  { %v5536_v7 = vadd.s32 %v3004_v58, %v3000_v21  ;;  %v2495_v33 = vmul.u32 %v2493_v32, %v2491_v35  ;;  %v2499_v38 = vshll.u32 %v2496_v56, 16  ;;  %v7570_v1 = vand.u32 2147483647, %v4784_v24 }
 0x32e   :  { %v7571_v45 = vmov 0  ;;  %v1944_v39 = vxor.u32 2147483648, %v1943_v53  ;;  %v2090_v47 = vor.u32 %v2089_v51, %v2088_v10  ;;  %v2094_v44 = vor.u32 4788187, %v2093_v8  ;;  %v5550_v10 = vpop.f32.mrf.mxu3 }
 0x32f   :  { %vm5540_vm1 = vcmp.le.f32.partialorder %v7570_v1, 0.7853982  ;;  %v2498_v30 = vmul.u32 %v2494_v62, %v2492_v6  ;;  %v2501_v13 = vshll.u32 %v5524_v49, 16  ;;  %vm2503_vm2 = vc.u32 %v2495_v33, %v2499_v38  ;;  %7575 = vst [vmem:[#allocation30_spill] sm:$0xff] %v5550_v10 }
 0x330   :  { %v7572_v45 = vsel %vm5540_vm1, 4294967295, %v7571_v45  ;;  %v2505_v50 = vadd.s32 %v2499_v38, %v2495_v33  ;;  %v2519_v28 = vmul.u32 %v2515_v48, %v2492_v6  ;;  %v5545_v34 = vsel %vm4354_vm0, 0, %v4353_v27 }
 0x331   :  { %7573 = vst [vmem:[#allocation29_spill] sm:$0xff] %v7572_v45  ;;  %v7574_v11 = vmov 0   ;;  %v2517_v58 = vmul.u32 %v2515_v48, %v2491_v35  ;;  %v2521_v21 = vshll.u32 %v2518_v40, 16  ;;  %v3006_v1 = vadd.s32 536870912, %v5536_v7 }
 0x332   :  { %v2504_v32 = vsel %vm2503_vm2, 1, %v7574_v11  ;;  %vm2507_vm3 = vc.u32 %v2505_v50, %v2501_v13  ;;  %v2520_v63 = vmul.u32 %v2516_v16, %v2492_v6  ;;  %v2523_v8 = vshll.u32 %v2519_v28, 16 }
 0x333   :  { %v2506_v5 = vadd.s32 %v2504_v32, %v2498_v30  ;;  %v2508_v51 = vsel %vm2507_vm3, 1, %v7574_v11  ;;  %vm2525_vm4 = vc.u32 %v2517_v58, %v2521_v21  ;;  %v2527_v62 = vadd.s32 %v2521_v21, %v2517_v58 }
 0x334   :  { %v2271_v33 = vadd.f32 -0.16666654, %v2270_v2  ;;  %v5554_v27 = vmul.f32 %v5532_v43, %v5532_v43  ;;  %v1945_v35 = vsel %vm1824_vm15, %v1944_v39, %v1943_v53  ;;  %v2526_v48 = vsel %vm2525_vm4, 1, %v7574_v11 }
 0x335   :  { %v2095_v38 = vand.u32 2147483647, %v2094_v44  ;;  %v2510_v30 = vadd.s32 %v2508_v51, %v2506_v5  ;;  %v2528_v6 = vadd.s32 %v2526_v48, %v2520_v63  ;;  %vm2529_vm5 = vc.u32 %v2527_v62, %v2523_v8 }
 0x336   :  { %7576 = vst [vmem:[#allocation31_spill] sm:$0xff] %v5554_v27  ;;  %v2097_v16 = vcvt.s32.f32 %v2090_v47  ;;  %v2866_v13 = vsub.s32 4294967266, %v5545_v34  ;;  %v2530_v50 = vsel %vm2529_vm5, 1, %v7574_v11  ;;  %v2600_v2 = vand.u32 2139095040, %v5550_v10 }
 0x337   :  { %v5562_v32 = vshrl.u32 %v3006_v1, 30  ;;  %v2500_v58 = vshrl.u32 %v2496_v56, 16  ;;  %v2522_v21 = vshrl.u32 %v2518_v40, 16  ;;  %v2532_v61 = vadd.s32 %v2530_v50, %v2528_v6 }
 0x338   :  { %v2272_v53 = vmul.f32 %v2271_v33, %v5306_v42  ;;  %v2423_v63 = vmul.f32 -0.00019511016, %v5554_v27  ;;  %v5572_v39 = vsel %vm5540_vm1, %v4784_v24, %v1945_v35  ;;  %vm1979_vm7 = vcmp.lt.s32.totalorder %v4981_v17, 0 }
 0x339   :  { %7577 = vst [vmem:[#allocation32_spill] sm:$0xff] %v5562_v32  ;;  %v2098_v47 = vmul.f32 %v2097_v16, %v2095_v38  ;;  %v2511_v44 = vadd.s32 %v2510_v30, %v2500_v58  ;;  %v2533_v56 = vadd.s32 %v2532_v61, %v2522_v21  ;;  %v2601_v40 = vshrl.u32 %v2600_v2, 23 }
 0x33a   :  { %v2862_v1 = vsub.s32 32, %v5545_v34  ;;  %v2867_v51 = vadd.s32 127, %v2866_v13  ;;  %v2479_v33 = vsel %vm2477_vm11, %v5469_v18, 2102212464  ;;  %v2524_v48 = vshrl.u32 %v2519_v28, 16 }
 0x33b   :  { %v3008_v6 = vshll.u32 %v5562_v32, 30  ;;  %v2458_v35 = vshrl.u32 %v7455_v55, %v5437_v25  ;;  %v2502_v50 = vshrl.u32 %v5524_v49, 16  ;;  %v4349_v5 = vadd.s32 4294967169, %v2601_v40 }
 0x33c   :  { %v2273_v38 = vadd.f32 1.0, %v2272_v53  ;;  %v2424_v30 = vadd.f32 0.008332121, %v2423_v63  ;;  %v2846_v61 = vadd.s32 %v5290_v26, %v5281_v54  ;;  %v2534_v16 = vadd.s32 %v2533_v56, %v2524_v48 }
 0x33d   :  { %v2478_v13 = vsel %vm2474_vm10, %v2458_v35, %v5453_v0  ;;  %v2480_v18 = vsel %vm2476_vm12, %v5455_v29, %v2479_v33  ;;  %v5591_v28 = vadd.s32 %v2511_v44, %v2502_v50  ;;  %v2607_v25 = vadd.s32 1, %v4349_v5 }
 0x33e   :  { %v5595_v49 = vmul.f32 %v5572_v39, %v5572_v39  ;;  %v2099_v2 = vxor.u32 2147483648, %v2098_v47  ;;  %v2864_v58 = vshrl.u32 %v2846_v61, %v2862_v1  ;;  %v7452_v54 = vand.u32 2147483647, %v5550_v10 }
 0x33f   :  { %v2868_v26 = vshll.u32 %v2867_v51, 23  ;;  %v5599_v21 = vsub.s32 %v5536_v7, %v3008_v6  ;;  %v5601_v0 = vadd.s32 %v2527_v62, %v2523_v8  ;;  %vm2608_vm8 = vcmp.gt.s32.totalorder %v2607_v25, 0  ;;  %v5626_v51 = vpop.f32.mrf.mxu0 }
 0x340   :  { %7578 = vst [vmem:[#allocation33_spill] sm:$0xff] %v5595_v49  ;;  %v2863_v29 = vshll.u32 %v5414_v46, %v5545_v34  ;;  %v2481_v53 = vsel %vm2475_vm14, %v2478_v13, %v2480_v18  ;;  %v2538_v5 = vadd.s32 1, %v2534_v16  ;;  %v2609_v63 = vsel %vm2608_vm8, %v2607_v25, 0 }
 0x341   :  { %v5608_v44 = vmul.f32 %v2273_v38, %v5286_v4  ;;  %v7580_v56 = vand.u32 2147483647, %v4981_v17  ;;  %v7581_v40 = vmov 0  ;;  %vm2537_vm11 = vc.u32 %v5591_v28, %v5601_v0  ;;  %7584 = vst [vmem:[#allocation36_spill] sm:$0xff] %v5626_v51 }
 0x342   :  { %v2611_v7 = vand.u32 31, %v2609_v63  ;;  %v2425_v46 = vmul.f32 %v2424_v30, %v5554_v27  ;;  %v1958_v41 = vmul.f32 -0.00019511016, %v5595_v49  ;;  %v2100_v34 = vsel %vm1979_vm7, %v2099_v2, %v2098_v47 }
 0x343   :  { %7579 = vst [vmem:[#allocation34_spill] sm:$0xff] %v5608_v44  ;;  %vm5612_vm10 = vcmp.le.f32.partialorder %v7580_v56, 0.7853982  ;;  %v2865_v8 = vor.u32 %v2864_v58, %v2863_v29  ;;  %v2869_v4 = vor.u32 4788187, %v2868_v26  ;;  %vm3010_vm12 = vcmp.lt.s32.totalorder %v5599_v21, 0 }
 0x344   :  { %v7582_v40 = vsel %vm5612_vm10, 4294967295, %v7581_v40  ;;  %v2535_v62 = vmul.u32 %v5487_v15, %v2481_v53  ;;  %v5624_v1 = vsub.s32 32, %v2611_v7  ;;  %v3011_v33 = vsub.s32 0, %v5599_v21 }
 0x345   :  { %7583 = vst [vmem:[#allocation35_spill] sm:$0xff] %v7582_v40  ;;  %v2539_v48 = vsel %vm2537_vm11, %v2538_v5, %v2534_v16  ;;  %v2604_v6 = vand.u32 8388607, %v7452_v54  ;;  %v2614_v35 = vshll.u32 %v7455_v55, %v2611_v7  ;;  %v2617_v50 = vshll.u32 %v7453_v57, %v2611_v7 }
 0x346   :  { %v2615_v47 = vshrl.u32 %v7453_v57, %v5624_v1  ;;  %v7585_v38 = vmov 2131351028   ;;  %v7586_v30 = vmov 2102212464   ;;  %v5639_v13 = vshrl.u32 %v2609_v63, 5 }
 0x347   :  { %v2618_v15 = vshrl.u32 %v7585_v38, %v5624_v1  ;;  %v2621_v61 = vshrl.u32 %v7586_v30, %v5624_v1  ;;  %v2623_v16 = vshll.u32 %v7586_v30, %v2611_v7  ;;  %v7587_v18 = vmov 920167782  }
 0x348   :  { %v2624_v25 = vshrl.u32 %v7587_v18, %v5624_v1  ;;  %v3375_v2 = vand.u32 2139095040, %v5626_v51  ;;  %v5645_v58 = vadd.s32 %v2539_v48, %v2535_v62  ;;  %v5647_v26 = vor.u32 %v2615_v47, %v2614_v35 }
 0x349   :  { %v5649_v29 = vor.u32 %v2618_v15, %v2617_v50  ;;  %v2620_v53 = vshll.u32 %v7585_v38, %v2611_v7  ;;  %v1959_v5 = vadd.f32 0.008332121, %v1958_v41  ;;  %v2870_v56 = vand.u32 2147483647, %v2869_v4 }
 0x34a   :  { %v2605_v54 = vor.u32 8388608, %v2604_v6  ;;  %v2625_v63 = vor.u32 %v2624_v25, %v2623_v16  ;;  %v5655_v57 = vsel %vm5612_vm10, %v4981_v17, %v2100_v34  ;;  %v2626_v23 = vshll.u32 %v7587_v18, %v2611_v7 }
 0x34b   :  { %v2622_v55 = vor.u32 %v2621_v61, %v2620_v53  ;;  %v7588_v62 = vmov 1326507024   ;;  %v2872_v35 = vcvt.s32.f32 %v2865_v8  ;;  %v3012_v47 = vsel %vm3010_vm12, %v3011_v33, %v5599_v21 }
 0x34c   :  { %v2627_v48 = vshrl.u32 %v7588_v62, %v5624_v1  ;;  %vm2629_vm14 = vcmp.lt.s32.totalorder %v5639_v13, 1  ;;  %v3376_v41 = vshrl.u32 %v3375_v2, 23  ;;  %v2541_v4 = vadd.s32 536870912, %v5645_v58 }
 0x34d   :  { %vm2632_vm13 = vcmp.lt.s32.totalorder %v5639_v13, 4  ;;  %v2637_v7 = vsel %vm2629_vm14, %v5647_v26, %v5649_v29  ;;  %vm2754_vm0 = vcmp.lt.s32.totalorder %v5029_v31, 0  ;;  %v2873_v34 = vmul.f32 %v2872_v35, %v2870_v56 }
 0x34e   :  { %v2628_v6 = vor.u32 %v2627_v48, %v2626_v23  ;;  %vm2631_vm2 = vcmp.lt.s32.totalorder %v5639_v13, 3  ;;  %v2638_v8 = vsel %vm2632_vm13, %v2625_v63, 920167782  ;;  %v5674_v33 = vshll.u32 %v2605_v54, 8 }
 0x34f   :  { %v3013_v50 = vclz %v3012_v47  ;;  %vm2630_vm3 = vcmp.lt.s32.totalorder %v5639_v13, 2  ;;  %v2639_v23 = vsel %vm2631_vm2, %v2622_v55, %v2638_v8  ;;  %v2641_v15 = vsel %vm2629_vm14, %v5649_v29, %v2622_v55 }
 0x350   :  { %v2426_v61 = vadd.f32 -0.16666654, %v2425_v46  ;;  %v1960_v16 = vmul.f32 %v1959_v5, %v5595_v49  ;;  %v2640_v25 = vsel %vm2630_vm3, %v2637_v7, %v2639_v23  ;;  %v2642_v54 = vsel %vm2632_vm13, %v2628_v6, 1326507024 }
 0x351   :  { %v5687_v2 = vshrl.u32 %v2541_v4, 30  ;;  %v2643_v53 = vsel %vm2631_vm2, %v2625_v63, %v2642_v54  ;;  %v2671_v56 = vshrl.u32 %v2640_v25, 16  ;;  %v4364_v48 = vadd.s32 4294967169, %v3376_v41 }
 0x352   :  { %v5693_v35 = vmul.f32 %v5655_v57, %v5655_v57  ;;  %v2874_v46 = vxor.u32 2147483648, %v2873_v34  ;;  %v2644_v5 = vsel %vm2630_vm3, %v2641_v15, %v2643_v53  ;;  %v2646_v47 = vand.u32 65535, %v5674_v33 }
 0x353   :  { %7589 = vst [vmem:[#allocation37_spill] sm:$0xff] %v5687_v2  ;;  %v4356_v7 = vadd.s32 4294967294, %v3013_v50  ;;  %v2648_v8 = vand.u32 65535, %v2644_v5  ;;  %v2649_v6 = vshrl.u32 %v2644_v5, 16  ;;  %v2670_v4 = vand.u32 65535, %v2640_v25 }
 0x354   :  { %7590 = vst [vmem:[#allocation38_spill] sm:$0xff] %v5693_v35  ;;  %v2647_v63 = vshrl.u32 %v5674_v33, 16  ;;  %v2673_v54 = vmul.u32 %v2671_v56, %v2646_v47  ;;  %v5702_v3 = vmul.f32 %v2426_v61, %v5554_v27  ;;  %v5704_v19 = vadd.f32 -0.16666654, %v1960_v16 }
 0x355   :  { %v2543_v15 = vshll.u32 %v5687_v2, 30  ;;  %v3382_v53 = vadd.s32 1, %v4364_v48  ;;  %v5709_v5 = vmul.f32 -0.00019511016, %v5693_v35  ;;  %v2651_v25 = vmul.u32 %v2649_v6, %v2646_v47 }
 0x356   :  { %v2652_v23 = vmul.u32 %v2648_v8, %v2647_v63  ;;  %v5713_v22 = vsel %vm2754_vm0, %v2874_v46, %v2873_v34  ;;  %vm4357_vm4 = vcmp.lt.s32.totalorder %v4356_v7, 0  ;;  %v2674_v41 = vmul.u32 %v2670_v4, %v2647_v63 }
 0x357   :  { %v2676_v61 = vshll.u32 %v2673_v54, 16  ;;  %v7591_v16 = vmov 683565275   ;;  %v2650_v59 = vmul.u32 %v2648_v8, %v2646_v47  ;;  %v2654_v37 = vshll.u32 %v2651_v25, 16 }
 0x358   :  { %v2613_v44 = vshrl.u32 %v7591_v16, %v5624_v1  ;;  %v7592_v48 = vand.u32 2147483647, %v5626_v51  ;;  %v5720_v27 = vsub.s32 %v5645_v58, %v2543_v15  ;;  %v2634_v42 = vsel %vm2632_vm13, %v2622_v55, 2102212464 }
 0x359   :  { %v2672_v2 = vmul.u32 %v2670_v4, %v2646_v47  ;;  %vm3383_vm5 = vcmp.gt.s32.totalorder %v3382_v53, 0  ;;  %v2653_v34 = vmul.u32 %v2649_v6, %v2647_v63  ;;  %v2656_v46 = vshll.u32 %v2652_v23, 16 }
 0x35a   :  { %v3379_v50 = vand.u32 8388607, %v7592_v48  ;;  %vm2658_vm8 = vc.u32 %v2650_v59, %v2654_v37  ;;  %v2660_v10 = vadd.s32 %v2654_v37, %v2650_v59  ;;  %v2675_v1 = vmul.u32 %v2671_v56, %v2647_v63 }
 0x35b   :  { %v2659_v36 = vsel %vm2658_vm8, 1, %v7574_v11  ;;  %v2678_v8 = vshll.u32 %v2674_v41, 16  ;;  %vm2680_vm11 = vc.u32 %v2672_v2, %v2676_v61  ;;  %v2682_v58 = vadd.s32 %v2676_v61, %v2672_v2 }
 0x35c   :  { %v2661_v32 = vadd.s32 %v2659_v36, %v2653_v34  ;;  %vm2662_vm12 = vc.u32 %v2660_v10, %v2656_v46  ;;  %v2681_v48 = vsel %vm2680_vm11, 1, %v7574_v11  ;;  %v2633_v55 = vsel %vm2629_vm14, %v2613_v44, %v5647_v26 }
 0x35d   :  { %v2663_v47 = vsel %vm2662_vm12, 1, %v7574_v11  ;;  %v2683_v6 = vadd.s32 %v2681_v48, %v2675_v1  ;;  %v3384_v4 = vsel %vm3383_vm5, %v3382_v53, 0  ;;  %v2635_v37 = vsel %vm2631_vm2, %v5649_v29, %v2634_v42 }
 0x35e   :  { %v2655_v59 = vshrl.u32 %v2651_v25, 16  ;;  %v2665_v56 = vadd.s32 %v2663_v47, %v2661_v32  ;;  %vm2684_vm13 = vc.u32 %v2682_v58, %v2678_v8  ;;  %v5735_v36 = vsel %vm4357_vm4, 0, %v4356_v7 }
 0x35f   :  { %v2685_v10 = vsel %vm2684_vm13, 1, %v7574_v11  ;;  %v3380_v2 = vor.u32 8388608, %v3379_v50  ;;  %v3386_v63 = vand.u32 31, %v3384_v4  ;;  %v2657_v44 = vshrl.u32 %v2652_v23, 16 }
 0x360   :  { %v2666_v26 = vadd.s32 %v2665_v56, %v2655_v59  ;;  %v2677_v15 = vshrl.u32 %v2673_v54, 16  ;;  %v2687_v61 = vadd.s32 %v2685_v10, %v2683_v6  ;;  %vm2545_vm14 = vcmp.lt.s32.totalorder %v5720_v27, 0 }
 0x361   :  { %v2546_v53 = vsub.s32 0, %v5720_v27  ;;  %v2636_v42 = vsel %vm2630_vm3, %v2633_v55, %v2635_v37  ;;  %v5742_v32 = vsub.s32 32, %v3386_v63  ;;  %v2679_v7 = vshrl.u32 %v2674_v41, 16 }
 0x362   :  { %v5744_v29 = vadd.s32 %v2666_v26, %v2657_v44  ;;  %v5746_v25 = vadd.s32 %v2682_v58, %v2678_v8  ;;  %v2688_v50 = vadd.s32 %v2687_v61, %v2677_v15  ;;  %v7594_v23 = vand.u32 2147483647, %v5029_v31 }
 0x363   :  { %v7595_v54 = vmov 0  ;;  %v3389_v34 = vshll.u32 %v7591_v16, %v3386_v63  ;;  %v7598_v46 = vmov 2475754826   ;;  %v3393_v48 = vshrl.u32 %v7585_v38, %v5742_v32 }
 0x364   :  { %7593 = vst [vmem:[#allocation39_spill] sm:$0xff] %v5746_v25  ;;  %vm5750_vm2 = vcmp.le.f32.partialorder %v7594_v23, 0.7853982  ;;  %v3390_v13 = vshrl.u32 %v7598_v46, %v5742_v32  ;;  %v3392_v1 = vshll.u32 %v7598_v46, %v3386_v63  ;;  %v2689_v41 = vadd.s32 %v2688_v50, %v2679_v7 }
 0x365   :  { %v7596_v54 = vsel %vm5750_vm2, 4294967295, %v7595_v54  ;;  %v5760_v8 = vshrl.u32 %v3384_v4, 5  ;;  %v3395_v58 = vshll.u32 %v7585_v38, %v3386_v63  ;;  %v3398_v55 = vshll.u32 %v7586_v30, %v3386_v63 }
 0x366   :  { %7597 = vst [vmem:[#allocation40_spill] sm:$0xff] %v7596_v54  ;;  %vm2692_vm3 = vc.u32 %v5744_v29, %v5746_v25  ;;  %v5766_v47 = vor.u32 %v3390_v13, %v3389_v34  ;;  %v5768_v6 = vor.u32 %v3393_v48, %v3392_v1  ;;  %v3396_v37 = vshrl.u32 %v7586_v30, %v5742_v32 }
 0x367   :  { %v2693_v59 = vadd.s32 1, %v2689_v41  ;;  %v3399_v56 = vshrl.u32 %v7587_v18, %v5742_v32  ;;  %v3401_v4 = vshll.u32 %v7587_v18, %v3386_v63  ;;  %v3402_v10 = vshrl.u32 %v7588_v62, %v5742_v32 }
 0x368   :  { %v3021_v44 = vsub.s32 4294967266, %v5735_v36  ;;  %v2690_v26 = vmul.u32 %v5674_v33, %v2636_v42  ;;  %v5779_v15 = vor.u32 %v3396_v37, %v3395_v58  ;;  %v5781_v61 = vshll.u32 %v3380_v2, 8 }
 0x369   :  { %v2694_v7 = vsel %vm2692_vm3, %v2693_v59, %v2689_v41  ;;  %v3400_v50 = vor.u32 %v3399_v56, %v3398_v55  ;;  %v3403_v23 = vor.u32 %v3402_v10, %v3401_v4  ;;  %vm3404_vm4 = vcmp.lt.s32.totalorder %v5760_v8, 1 }
 0x36a   :  { %v2547_v63 = vsel %vm2545_vm14, %v2546_v53, %v5720_v27  ;;  %v2695_v34 = vadd.s32 %v2694_v7, %v2690_v26  ;;  %vm3407_vm5 = vcmp.lt.s32.totalorder %v5760_v8, 4  ;;  %v3412_v33 = vsel %vm3404_vm4, %v5766_v47, %v5768_v6 }
 0x36b   :  { %vm3406_vm8 = vcmp.lt.s32.totalorder %v5760_v8, 3  ;;  %v3413_v2 = vsel %vm3407_vm5, %v3400_v50, 920167782  ;;  %v3416_v42 = vsel %vm3404_vm4, %v5768_v6, %v5779_v15  ;;  %v3417_v53 = vsel %vm3407_vm5, %v3403_v23, 1326507024 }
 0x36c   :  { %v2114_v13 = vadd.f32 0.008332121, %v5709_v5  ;;  %v2696_v1 = vadd.s32 536870912, %v2695_v34  ;;  %vm3405_vm11 = vcmp.lt.s32.totalorder %v5760_v8, 2  ;;  %v3414_v48 = vsel %vm3406_vm8, %v5779_v15, %v3413_v2 }
 0x36d   :  { %v7599_v41 = vsub.s32 4, %v5152_v9  ;;  %v5817_v55 = vsel %vm5750_vm2, %v5029_v31, %v5713_v22  ;;  %v3415_v5 = vsel %vm3405_vm11, %v3412_v33, %v3414_v48  ;;  %v3418_v37 = vsel %vm3406_vm8, %v3400_v50, %v3417_v53 }
 0x36e   :  { %7601 = vst [vmem:[#allocation42_spill] sm:$0xff] %v5817_v55  ;;  %v3022_v59 = vadd.s32 127, %v3021_v44  ;;  %v2548_v56 = vclz %v2547_v63  ;;  %v3419_v4 = vsel %vm3405_vm11, %v3416_v42, %v3418_v37  ;;  %v5826_v10 = vshrl.u32 %v2696_v1, 30 }
 0x36f   :  { %v5811_v58 = vsel %vm1824_vm15, %v7599_v41, %v5152_v9  ;;  %v3421_v9 = vand.u32 65535, %v5781_v61  ;;  %v3423_v26 = vand.u32 65535, %v3419_v4  ;;  %v3424_v7 = vshrl.u32 %v3419_v4, 16 }
 0x370   :  { %7600 = vst [vmem:[#allocation41_spill] sm:$0xff] %v5811_v58  ;;  %v3446_v23 = vshrl.u32 %v3415_v5, 16  ;;  %v2428_v22 = vadd.f32 1.0, %v5702_v3  ;;  %v1962_v33 = vmul.f32 %v5704_v19, %v5595_v49  ;;  %v7603_v50 = vsub.s32 4, %v5246_v52 }
 0x371   :  { %7602 = vst [vmem:[#allocation43_spill] sm:$0xff] %v5826_v10  ;;  %v2115_v63 = vmul.f32 %v2114_v13, %v5693_v35  ;;  %v5841_v2 = vmul.f32 %v5817_v55, %v5817_v55  ;;  %v3422_v42 = vshrl.u32 %v5781_v61, 16  ;;  %v5844_v53 = vmul.u32 %v3424_v7, %v3421_v9 }
 0x372   :  { %v5836_v44 = vsel %vm1979_vm7, %v7603_v50, %v5246_v52  ;;  %v3445_v3 = vand.u32 65535, %v3415_v5  ;;  %v3017_v19 = vsub.s32 32, %v5735_v36  ;;  %v3023_v1 = vshll.u32 %v3022_v59, 23 }
 0x373   :  { %7604 = vst [vmem:[#allocation44_spill] sm:$0xff] %v5836_v44  ;;  %v4347_v48 = vadd.s32 4294967294, %v2548_v56  ;;  %v5847_v41 = vmul.u32 %v3446_v23, %v3421_v9  ;;  %v2698_v52 = vshll.u32 %v5826_v10, 30  ;;  %v3425_v37 = vmul.u32 %v3423_v26, %v3421_v9 }
 0x374   :  { %7605 = vst [vmem:[#allocation45_spill] sm:$0xff] %v5841_v2  ;;  %v5850_v4 = vmul.u32 %v3423_v26, %v3422_v42  ;;  %v3429_v13 = vshll.u32 %v5844_v53, 16  ;;  %v1963_v50 = vadd.f32 1.0, %v1962_v33  ;;  %v2116_v17 = vadd.f32 -0.16666654, %v2115_v63 }
 0x375   :  { %v2876_v24 = vsub.s32 4, %v5375_v60  ;;  %v3001_v5 = vadd.s32 %v5480_v20, %v5477_v14  ;;  %v2888_v49 = vmul.f32 -0.00019511016, %v5841_v2  ;;  %v5857_v56 = vmul.u32 %v3445_v3, %v3422_v42  ;;  %v5865_v14 = vpop.f32.mrf.mxu1 }
 0x376   :  { %vm3433_vm15 = vc.u32 %v3425_v37, %v3429_v13  ;;  %v3435_v59 = vadd.s32 %v3429_v13, %v3425_v37  ;;  %v3018_v51 = vshll.u32 %v5599_v21, %v5735_v36  ;;  %v3447_v10 = vmul.u32 %v3445_v3, %v3421_v9  ;;  %7606 = vst [vmem:[#allocation46_spill] sm:$0xff] %v5865_v14 }
 0x377   :  { %v3019_v26 = vshrl.u32 %v3001_v5, %v3017_v19  ;;  %v3451_v55 = vshll.u32 %v5847_v41, 16  ;;  %v3024_v33 = vor.u32 4788187, %v3023_v1  ;;  %vm4348_vm7 = vcmp.lt.s32.totalorder %v4347_v48, 0 }
 0x378   :  { %v5862_v63 = vsub.s32 %v2695_v34, %v2698_v52  ;;  %v3431_v25 = vshll.u32 %v5850_v4, 16  ;;  %v3434_v20 = vsel %vm3433_vm15, 1, %v7574_v11  ;;  %v3453_v37 = vshll.u32 %v5857_v56, 16 }
 0x379   :  { %vm3455_vm12 = vc.u32 %v3447_v10, %v3451_v55  ;;  %v5869_v13 = vadd.s32 %v3451_v55, %v3447_v10  ;;  %v3428_v21 = vmul.u32 %v3424_v7, %v3422_v42  ;;  %v3450_v36 = vmul.u32 %v3446_v23, %v3422_v42 }
 0x37a   :  { %vm3437_vm13 = vc.u32 %v3435_v59, %v3431_v25  ;;  %v3456_v9 = vsel %vm3455_vm12, 1, %v7574_v11  ;;  %v3020_v3 = vor.u32 %v3019_v26, %v3018_v51  ;;  %v5872_v19 = vsel %vm4348_vm7, 0, %v4347_v48 }
 0x37b   :  { %vm3459_vm14 = vc.u32 %v5869_v13, %v3453_v37  ;;  %v3530_v34 = vand.u32 2139095040, %v5865_v14  ;;  %v3025_v1 = vand.u32 2147483647, %v3024_v33  ;;  %v2701_v52 = vsub.s32 0, %v5862_v63 }
 0x37c   :  { %v3436_v5 = vadd.s32 %v3434_v20, %v3428_v21  ;;  %v3458_v55 = vadd.s32 %v3456_v9, %v3450_v36  ;;  %vm2700_vm3 = vcmp.lt.s32.totalorder %v5862_v63, 0  ;;  %v3438_v25 = vsel %vm3437_vm13, 1, %v7574_v11 }
 0x37d   :  { %v3460_v10 = vsel %vm3459_vm14, 1, %v7574_v11  ;;  %v3531_v51 = vshrl.u32 %v3530_v34, 23  ;;  %v5883_v7 = vmul.f32 %v2428_v22, %v5532_v43  ;;  %v5891_v42 = vsel %vm2754_vm0, %v2876_v24, %v5375_v60 }
 0x37e   :  { %7608 = vst [vmem:[#allocation48_spill] sm:$0xff] %v5891_v42  ;;  %v2556_v48 = vsub.s32 4294967266, %v5872_v19  ;;  %v2117_v26 = vmul.f32 %v2116_v17, %v5693_v35  ;;  %v3027_v33 = vcvt.s32.f32 %v3020_v3  ;;  %v5899_v22 = vmul.f32 %v1963_v50, %v5572_v39 }
 0x37f   :  { %7607 = vst [vmem:[#allocation47_spill] sm:$0xff] %v5883_v7  ;;  %v4367_v43 = vadd.s32 4294967169, %v3531_v51  ;;  %v2702_v20 = vsel %vm2700_vm3, %v2701_v52, %v5862_v63  ;;  %v3440_v21 = vadd.s32 %v3438_v25, %v3436_v5  ;;  %v3462_v36 = vadd.s32 %v3460_v10, %v3458_v55 }
 0x380   :  { %7609 = vst [vmem:[#allocation49_spill] sm:$0xff] %v5899_v22  ;;  %v2889_v60 = vadd.f32 0.008332121, %v2888_v49  ;;  %v5905_v9 = vmul.f32 %v3027_v33, %v3025_v1  ;;  %v2552_v59 = vsub.s32 32, %v5872_v19  ;;  %v2557_v17 = vadd.s32 127, %v2556_v48 }
 0x381   :  { %v3537_v34 = vadd.s32 1, %v4367_v43  ;;  %v3430_v3 = vshrl.u32 %v5844_v53, 16  ;;  %v3452_v39 = vshrl.u32 %v5847_v41, 16  ;;  %v5910_v50 = vadd.f32 1.0, %v2117_v26 }
 0x382   :  { %v2536_v52 = vadd.s32 %v5601_v0, %v5591_v28  ;;  %v2703_v5 = vclz %v2702_v20  ;;  %v7490_v49 = vand.u32 2147483647, %v5865_v14  ;;  %v2890_v10 = vmul.f32 %v2889_v60, %v5841_v2 }
 0x383   :  { %vm3538_vm0 = vcmp.gt.s32.totalorder %v3537_v34, 0  ;;  %v3441_v55 = vadd.s32 %v3440_v21, %v3430_v3  ;;  %v3463_v25 = vadd.s32 %v3462_v36, %v3452_v39  ;;  %v3029_v51 = vxor.u32 2147483648, %v5905_v9 }
 0x384   :  { %v3539_v1 = vsel %vm3538_vm0, %v3537_v34, 0  ;;  %v2553_v53 = vshll.u32 %v5720_v27, %v5872_v19  ;;  %v2554_v48 = vshrl.u32 %v2536_v52, %v2552_v59  ;;  %v2558_v26 = vshll.u32 %v2557_v17, 23 }
 0x385   :  { %v3541_v41 = vand.u32 31, %v3539_v1  ;;  %v3432_v33 = vshrl.u32 %v5850_v4, 16  ;;  %v3454_v28 = vshrl.u32 %v5857_v56, 16  ;;  %v4350_v0 = vadd.s32 4294967294, %v2703_v5 }
 0x386   :  { %v3388_v43 = vshrl.u32 %v7591_v16, %v5742_v32  ;;  %v3409_v20 = vsel %vm3407_vm5, %v5779_v15, 2102212464  ;;  %v3534_v19 = vand.u32 8388607, %v7490_v49  ;;  %v5940_v34 = vshrl.u32 %v3539_v1, 5 }
 0x387   :  { %v5926_v21 = vsub.s32 32, %v3541_v41  ;;  %v5928_v36 = vadd.s32 %v3441_v55, %v3432_v33  ;;  %v3464_v27 = vadd.s32 %v3463_v25, %v3454_v28  ;;  %v3544_v4 = vshll.u32 %v7591_v16, %v3541_v41 }
 0x388   :  { %v3547_v60 = vshll.u32 %v7598_v46, %v3541_v41  ;;  %v3553_v17 = vshll.u32 %v7586_v30, %v3541_v41  ;;  %vm2909_vm5 = vcmp.lt.s32.totalorder %v5244_v12, 0  ;;  %v3550_v55 = vshll.u32 %v7585_v38, %v3541_v41 }
 0x389   :  { %v3545_v59 = vshrl.u32 %v7598_v46, %v5926_v21  ;;  %v3548_v32 = vshrl.u32 %v7585_v38, %v5926_v21  ;;  %v3551_v15 = vshrl.u32 %v7586_v30, %v5926_v21  ;;  %v3554_v3 = vshrl.u32 %v7587_v18, %v5926_v21 }
 0x38a   :  { %v3557_v39 = vshrl.u32 %v7588_v62, %v5926_v21  ;;  %v3556_v25 = vshll.u32 %v7587_v18, %v3541_v41  ;;  %v3408_v1 = vsel %vm3404_vm4, %v3388_v43, %v5766_v47  ;;  %v3410_v33 = vsel %vm3406_vm8, %v5768_v6, %v3409_v20 }
 0x38b   :  { %v5948_v52 = vor.u32 %v3545_v59, %v3544_v4  ;;  %v5950_v5 = vor.u32 %v3548_v32, %v3547_v60  ;;  %v3535_v28 = vor.u32 8388608, %v3534_v19  ;;  %v3555_v24 = vor.u32 %v3554_v3, %v3553_v17 }
 0x38c   :  { %vm4351_vm15 = vcmp.lt.s32.totalorder %v4350_v0, 0  ;;  %v5963_v4 = vadd.s32 %v5869_v13, %v3453_v37  ;;  %v5965_v59 = vor.u32 %v3551_v15, %v3550_v55  ;;  %v3558_v60 = vor.u32 %v3557_v39, %v3556_v25  ;;  %v5983_v13 = vpop.f32.mrf.mxu2 }
 0x38d   :  { %v2555_v41 = vor.u32 %v2554_v48, %v2553_v53  ;;  %v3468_v32 = vadd.s32 1, %v3464_v27  ;;  %vm3559_vm7 = vcmp.lt.s32.totalorder %v5940_v34, 1  ;;  %vm3562_vm4 = vcmp.lt.s32.totalorder %v5940_v34, 4  ;;  %7614 = vst [vmem:[#allocation51_spill] sm:$0xff] %v5983_v13 }
 0x38e   :  { %v7610_v47 = vand.u32 2147483647, %v5244_v12  ;;  %v7611_v6 = vmov 0  ;;  %v2559_v43 = vor.u32 4788187, %v2558_v26  ;;  %vm3467_vm12 = vc.u32 %v5928_v36, %v5963_v4 }
 0x38f   :  { %v3567_v56 = vsel %vm3559_vm7, %v5948_v52, %v5950_v5  ;;  %v3568_v37 = vsel %vm3562_vm4, %v3555_v24, 920167782  ;;  %v5985_v53 = vsel %vm4351_vm15, 0, %v4350_v0  ;;  %v3411_v48 = vsel %vm3405_vm11, %v3408_v1, %v3410_v33 }
 0x390   :  { %vm5971_vm8 = vcmp.le.f32.partialorder %v7610_v47, 0.7853982  ;;  %vm3561_vm13 = vcmp.lt.s32.totalorder %v5940_v34, 3  ;;  %v5990_v26 = vshll.u32 %v3535_v28, 8  ;;  %vm7497_vm14 = vcmp.lt.s32.totalorder %v5940_v34, 2 }
 0x391   :  { %v7612_v6 = vsel %vm5971_vm8, 4294967295, %v7611_v6  ;;  %v3569_v20 = vsel %vm3561_vm13, %v5965_v59, %v3568_v37  ;;  %v3571_v19 = vsel %vm3559_vm7, %v5950_v5, %v5965_v59  ;;  %v3572_v0 = vsel %vm3562_vm4, %v3558_v60, 1326507024 }
 0x392   :  { %7613 = vst [vmem:[#allocation50_spill] sm:$0xff] %v7612_v6  ;;  %v3469_v8 = vsel %vm3467_vm12, %v3468_v32, %v3464_v27  ;;  %v3570_v15 = vsel %vm7497_vm14, %v3567_v56, %v3569_v20  ;;  %v3573_v17 = vsel %vm3561_vm13, %v3555_v24, %v3572_v0  ;;  %v3065_v3 = vand.u32 2139095040, %v5983_v13 }
 0x393   :  { %v2891_v39 = vadd.f32 -0.16666654, %v2890_v10  ;;  %v3465_v55 = vmul.u32 %v5781_v61, %v3411_v48  ;;  %v3574_v25 = vsel %vm7497_vm14, %v3571_v19, %v3573_v17  ;;  %v3601_v1 = vshrl.u32 %v3570_v15, 16 }
 0x394   :  { %v3030_v27 = vsel %vm2909_vm5, %v3029_v51, %v5905_v9  ;;  %v2560_v33 = vand.u32 2147483647, %v2559_v43  ;;  %v3576_v28 = vand.u32 65535, %v5990_v26  ;;  %v3579_v60 = vshrl.u32 %v3574_v25, 16  ;;  %v7616_v43 = vld [vmem:[#allocation32_spill] sm:$0xff] }
 0x395   :  { %v2562_v24 = vcvt.s32.f32 %v2555_v41  ;;  %v2711_v32 = vsub.s32 4294967266, %v5985_v53  ;;  %v6017_v10 = vadd.s32 %v3469_v8, %v3465_v55  ;;  %v3578_v61 = vand.u32 65535, %v3574_v25  ;;  %v7617_v8 = vld [vmem:[#allocation26_spill] sm:$0xff] }
 0x396   :  { %v6019_v47 = vmul.u32 %v3579_v60, %v3576_v28  ;;  %v3600_v56 = vand.u32 65535, %v3570_v15  ;;  %v6021_v37 = vmul.u32 %v3601_v1, %v3576_v28  ;;  %v3066_v48 = vshrl.u32 %v3065_v3, 23 }
 0x397   :  { %v6025_v20 = vmul.f32 %v5910_v50, %v5655_v57  ;;  %v2892_v9 = vmul.f32 %v2891_v39, %v5841_v2  ;;  %v2707_v51 = vsub.s32 32, %v5985_v53  ;;  %v3577_v41 = vshrl.u32 %v5990_v26, 16  ;;  %v7618_v57 = vld [vmem:[#allocation39_spill] sm:$0xff] }
 0x398   :  { %v3031_v19 = vsub.s32 4, %v7616_v43  ;;  %v6034_v0 = vsel %vm5971_vm8, %v5244_v12, %v3030_v27  ;;  %vm2444_vm11 = vcmp.lt.s32.totalorder %v7617_v8, 0  ;;  %v2563_v15 = vmul.f32 %v2562_v24, %v2560_v33 }
 0x399   :  { %7615 = vst [vmem:[#allocation52_spill] sm:$0xff] %v6025_v20  ;;  %v3584_v17 = vshll.u32 %v6019_v47, 16  ;;  %v2691_v50 = vadd.s32 %v7618_v57, %v5744_v29  ;;  %v2712_v3 = vadd.s32 127, %v2711_v32  ;;  %v3471_v39 = vadd.s32 536870912, %v6017_v10 }
 0x39a   :  { %v6041_v55 = vmul.u32 %v3578_v61, %v3577_v41  ;;  %v3580_v25 = vmul.u32 %v3578_v61, %v3576_v28  ;;  %v6043_v23 = vmul.u32 %v3600_v56, %v3577_v41  ;;  %v3606_v49 = vshll.u32 %v6021_v37, 16 }
 0x39b   :  { %v4358_v27 = vadd.s32 4294967169, %v3066_v48  ;;  %v6046_v31 = vadd.f32 1.0, %v2892_v9  ;;  %v6050_v33 = vmul.f32 %v6034_v0, %v6034_v0  ;;  %v7620_v24 = vand.u32 2147483647, %v7617_v8 }
 0x39c   :  { %v7621_v29 = vmov 0  ;;  %v2709_v32 = vshrl.u32 %v2691_v50, %v2707_v51  ;;  %v2564_v57 = vxor.u32 2147483648, %v2563_v15  ;;  %vm3588_vm0 = vc.u32 %v3580_v25, %v3584_v17 }
 0x39d   :  { %7619 = vst [vmem:[#allocation32_spill] sm:$0xff] %v6050_v33  ;;  %vm6054_vm3 = vcmp.le.f32.partialorder %v7620_v24, 0.7853982  ;;  %v3590_v42 = vadd.s32 %v3584_v17, %v3580_v25  ;;  %v3602_v54 = vmul.u32 %v3600_v56, %v3576_v28  ;;  %v2708_v48 = vshll.u32 %v5862_v63, %v5985_v53 }
 0x39e   :  { %v7622_v29 = vsel %vm6054_vm3, 4294967295, %v7621_v29  ;;  %v2713_v9 = vshll.u32 %v2712_v3, 23  ;;  %v6061_v20 = vshrl.u32 %v3471_v39, 30  ;;  %v3586_v44 = vshll.u32 %v6041_v55, 16 }
 0x39f   :  { %7623 = vst [vmem:[#allocation39_spill] sm:$0xff] %v7622_v29  ;;  %v7498_v24 = vshll.u32 %v6043_v23, 16  ;;  %vm3610_vm15 = vc.u32 %v3602_v54, %v3606_v49  ;;  %v6065_v40 = vadd.s32 %v3606_v49, %v3602_v54  ;;  %v3072_v51 = vadd.s32 1, %v4358_v27 }
 0x3a0   :  { %v6067_v50 = vor.u32 %v2709_v32, %v2708_v48  ;;  %v3589_v61 = vsel %vm3588_vm0, 1, %v7574_v11  ;;  %v3611_v28 = vsel %vm3610_vm15, 1, %v7574_v11  ;;  %v7624_v56 = vand.u32 2147483647, %v5983_v13  ;;  %v7634_v13 = vld [vmem:[#allocation37_spill] sm:$0xff] }
 0x3a1   :  { %v3583_v53 = vmul.u32 %v3579_v60, %v3577_v41  ;;  %vm3592_vm12 = vc.u32 %v3590_v42, %v3586_v44  ;;  %v3605_v17 = vmul.u32 %v3601_v1, %v3577_v41  ;;  %vm3614_vm14 = vc.u32 %v6065_v40, %v7498_v24 }
 0x3a2   :  { %v3069_v63 = vand.u32 8388607, %v7624_v56  ;;  %v2565_v54 = vsel %vm2444_vm11, %v2564_v57, %v2563_v15  ;;  %v6078_v49 = vor.u32 4788187, %v2713_v9  ;;  %v3473_v3 = vshll.u32 %v6061_v20, 30 }
 0x3a3   :  { %vm3073_vm0 = vcmp.gt.s32.totalorder %v3072_v51, 0  ;;  %v6084_v39 = vsel %vm2909_vm5, %v3031_v19, %v7616_v43  ;;  %v3591_v60 = vadd.s32 %v3589_v61, %v3583_v53  ;;  %v3613_v44 = vadd.s32 %v3611_v28, %v3605_v17 }
 0x3a4   :  { %7625 = vst [vmem:[#allocation53_spill] sm:$0xff] %v6084_v39  ;;  %v3074_v42 = vsel %vm3073_vm0, %v3072_v51, 0  ;;  %v3543_v1 = vshrl.u32 %v7591_v16, %v5926_v21  ;;  %v3593_v41 = vsel %vm3592_vm12, 1, %v7574_v11  ;;  %v3615_v15 = vsel %vm3614_vm14, 1, %v7574_v11 }
 0x3a5   :  { %v3076_v25 = vand.u32 31, %v3074_v42  ;;  %v3043_v27 = vmul.f32 -0.00019511016, %v6050_v33  ;;  %v6094_v32 = vsel %vm6054_vm3, %v7617_v8, %v2565_v54  ;;  %v2717_v43 = vcvt.s32.f32 %v6067_v50 }
 0x3a6   :  { %v3070_v19 = vor.u32 8388608, %v3069_v63  ;;  %v2715_v61 = vand.u32 2147483647, %v6078_v49  ;;  %v6099_v57 = vsub.s32 %v6017_v10, %v3473_v3  ;;  %v3563_v21 = vsel %vm3559_vm7, %v3543_v1, %v5948_v52 }
 0x3a7   :  { %v6104_v48 = vsub.s32 32, %v3076_v25  ;;  %v3564_v9 = vsel %vm3562_vm4, %v5965_v59, 2102212464  ;;  %v3595_v51 = vadd.s32 %v3593_v41, %v3591_v60  ;;  %v3617_v28 = vadd.s32 %v3615_v15, %v3613_v44 }
 0x3a8   :  { %v6109_v56 = vshrl.u32 %v3074_v42, 5  ;;  %v3079_v50 = vshll.u32 %v7591_v16, %v3076_v25  ;;  %v3082_v63 = vshll.u32 %v7598_v46, %v3076_v25  ;;  %v3085_v53 = vshll.u32 %v7585_v38, %v3076_v25 }
 0x3a9   :  { %v3080_v10 = vshrl.u32 %v7598_v46, %v6104_v48  ;;  %v3083_v52 = vshrl.u32 %v7585_v38, %v6104_v48  ;;  %v3086_v17 = vshrl.u32 %v7586_v30, %v6104_v48  ;;  %v3088_v59 = vshll.u32 %v7586_v30, %v3076_v25 }
 0x3aa   :  { %v3089_v54 = vshrl.u32 %v7587_v18, %v6104_v48  ;;  %v3091_v60 = vshll.u32 %v7587_v18, %v3076_v25  ;;  %v3092_v44 = vshrl.u32 %v7588_v62, %v6104_v48  ;;  %v3476_v42 = vsub.s32 0, %v6099_v57 }
 0x3ab   :  { %v6123_v49 = vor.u32 %v3080_v10, %v3079_v50  ;;  %v6125_v3 = vor.u32 %v3083_v52, %v3082_v63  ;;  %v3607_v1 = vshrl.u32 %v6021_v37, 16  ;;  %v6132_v41 = vor.u32 %v3086_v17, %v3085_v53 }
 0x3ac   :  { %v3090_v15 = vor.u32 %v3089_v54, %v3088_v59  ;;  %v3585_v24 = vshrl.u32 %v6019_v47, 16  ;;  %v3093_v12 = vor.u32 %v3092_v44, %v3091_v60  ;;  %vm3094_vm5 = vcmp.lt.s32.totalorder %v6109_v56, 1 }
 0x3ad   :  { %v6136_v50 = vshll.u32 %v3070_v19, 8  ;;  %v3565_v25 = vsel %vm3561_vm13, %v5950_v5, %v3564_v9  ;;  %v3618_v10 = vadd.s32 %v3617_v28, %v3607_v1  ;;  %vm3097_vm7 = vcmp.lt.s32.totalorder %v6109_v56, 4 }
 0x3ae   :  { %v3102_v37 = vsel %vm3094_vm5, %v6123_v49, %v6125_v3  ;;  %v3596_v63 = vadd.s32 %v3595_v51, %v3585_v24  ;;  %vm7513_vm4 = vcmp.lt.s32.totalorder %v6109_v56, 3  ;;  %v3103_v47 = vsel %vm3097_vm7, %v3090_v15, 920167782 }
 0x3af   :  { %v3106_v19 = vsel %vm3094_vm5, %v6125_v3, %v6132_v41  ;;  %v3609_v5 = vshrl.u32 %v6043_v23, 16  ;;  %vm7505_vm13 = vcmp.lt.s32.totalorder %v6109_v56, 2  ;;  %v3104_v9 = vsel %vm7513_vm4, %v6132_v41, %v3103_v47 }
 0x3b0   :  { %v3107_v24 = vsel %vm3097_vm7, %v3093_v12, 1326507024  ;;  %v3587_v51 = vshrl.u32 %v6041_v55, 16  ;;  %v3105_v28 = vsel %vm7505_vm13, %v3102_v37, %v3104_v9  ;;  %v3111_v53 = vand.u32 65535, %v6136_v50 }
 0x3b1   :  { %v3108_v52 = vsel %vm7513_vm4, %v3090_v15, %v3107_v24  ;;  %v3619_v17 = vadd.s32 %v3618_v10, %v3609_v5  ;;  %v3135_v54 = vand.u32 65535, %v3105_v28  ;;  %v3136_v60 = vshrl.u32 %v3105_v28, 16  ;;  %v6178_v10 = vpop.f32.mrf.mxu3  ;;  %v7629_v28 = vld [vmem:[#allocation30_spill] sm:$0xff] }
 0x3b2   :  { %v3109_v59 = vsel %vm7505_vm13, %v3106_v19, %v3108_v52  ;;  %v3044_v44 = vadd.f32 0.008332121, %v3043_v27  ;;  %vm3475_vm14 = vcmp.lt.s32.totalorder %v6099_v57, 0  ;;  %v6169_v12 = vadd.s32 %v3596_v63, %v3587_v51 }
 0x3b3   :  { %v3114_v55 = vshrl.u32 %v3109_v59, 16  ;;  %v6173_v1 = vmul.f32 %v6094_v32, %v6094_v32  ;;  %v2718_v37 = vmul.f32 %v2717_v43, %v2715_v61  ;;  %v3112_v15 = vshrl.u32 %v6136_v50, 16 }
 0x3b4   :  { %v6176_v47 = vmul.u32 %v3136_v60, %v3111_v53  ;;  %vm7627_vm15 = vcmp.lt.s32.totalorder %v5940_v34, 2  ;;  %v7628_v27 = vshll.u32 %v6043_v23, 16  ;;  %v3113_v5 = vand.u32 65535, %v3109_v59 }
 0x3b5   :  { %7626 = vst [vmem:[#allocation54_spill] sm:$0xff] %v6173_v1  ;;  %v3566_v19 = vsel %vm7627_vm15, %v3563_v21, %v3565_v25  ;;  %v6187_v9 = vmul.u32 %v3114_v55, %v3111_v53  ;;  %v3477_v24 = vsel %vm3475_vm14, %v3476_v42, %v6099_v57  ;;  %v3623_v43 = vadd.s32 1, %v3619_v17 }
 0x3b6   :  { %v6185_v63 = vadd.s32 %v6065_v40, %v7628_v27  ;;  %v6190_v61 = vmul.u32 %v3135_v54, %v3112_v15  ;;  %v3141_v51 = vshll.u32 %v6176_v47, 16  ;;  %v7630_v52 = vand.u32 2147483647, %v7629_v28 }
 0x3b7   :  { %v7631_v34 = vmov 0  ;;  %v3119_v40 = vshll.u32 %v6187_v9, 16  ;;  %v3137_v23 = vmul.u32 %v3135_v54, %v3111_v53  ;;  %v3220_v21 = vand.u32 2139095040, %v6178_v10 }
 0x3b8   :  { %vm6195_vm12 = vcmp.le.f32.partialorder %v7630_v52, 0.7853982  ;;  %vm3622_vm0 = vc.u32 %v6169_v12, %v6185_v63  ;;  %v3045_v42 = vmul.f32 %v3044_v44, %v6050_v33  ;;  %v2578_v25 = vmul.f32 -0.00019511016, %v6173_v1 }
 0x3b9   :  { %v7632_v34 = vsel %vm6195_vm12, 4294967295, %v7631_v34  ;;  %vm2599_vm14 = vcmp.lt.s32.totalorder %v7629_v28, 0  ;;  %v2719_v59 = vxor.u32 2147483648, %v2718_v37  ;;  %v3478_v27 = vclz %v3477_v24 }
 0x3ba   :  { %7633 = vst [vmem:[#allocation55_spill] sm:$0xff] %v7632_v34  ;;  %v3115_v52 = vmul.u32 %v3113_v5, %v3111_v53  ;;  %v6206_v22 = vmul.u32 %v3113_v5, %v3112_v15  ;;  %vm3145_vm15 = vc.u32 %v3137_v23, %v3141_v51  ;;  %v3620_v2 = vmul.u32 %v5990_v26, %v3566_v19 }
 0x3bb   :  { %v3624_v58 = vsel %vm3622_vm0, %v3623_v43, %v3619_v17  ;;  %v7515_v45 = vshll.u32 %v6190_v61, 16  ;;  %v6210_v54 = vadd.s32 %v3141_v51, %v3137_v23  ;;  %v3146_v44 = vsel %vm3145_vm15, 1, %v7574_v11 }
 0x3bc   :  { %vm3123_vm13 = vc.u32 %v3115_v52, %v3119_v40  ;;  %v3125_v35 = vadd.s32 %v3119_v40, %v3115_v52  ;;  %v3221_v7 = vshrl.u32 %v3220_v21, 23  ;;  %v2566_v14 = vsub.s32 4, %v7634_v13 }
 0x3bd   :  { %v2720_v53 = vsel %vm2599_vm14, %v2719_v59, %v2718_v37  ;;  %v3140_v5 = vmul.u32 %v3136_v60, %v3112_v15  ;;  %vm3149_vm4 = vc.u32 %v6210_v54, %v7515_v45  ;;  %v4365_v26 = vadd.s32 4294967294, %v3478_v27  ;;  %v7635_v59 = vld [vmem:[#allocation42_spill] sm:$0xff] }
 0x3be   :  { %v6219_v17 = vadd.s32 %v3624_v58, %v3620_v2  ;;  %v3121_v19 = vshll.u32 %v6206_v22, 16  ;;  %v4361_v24 = vadd.s32 4294967169, %v3221_v7  ;;  %v3046_v43 = vadd.f32 -0.16666654, %v3045_v42 }
 0x3bf   :  { %v2579_v51 = vadd.f32 0.008332121, %v2578_v25  ;;  %v3124_v40 = vsel %vm3123_vm13, 1, %v7574_v11  ;;  %v3148_v23 = vadd.s32 %v3146_v44, %v3140_v5  ;;  %v3118_v21 = vmul.u32 %v3114_v55, %v3112_v15 }
 0x3c0   :  { %vm3127_vm0 = vc.u32 %v3125_v35, %v3121_v19  ;;  %v3150_v37 = vsel %vm3149_vm4, 1, %v7574_v11  ;;  %v3227_v60 = vadd.s32 1, %v4361_v24  ;;  %v6226_v52 = vmul.f32 %v6046_v31, %v7635_v59 }
 0x3c1   :  { %v6234_v2 = vsel %vm6195_vm12, %v7629_v28, %v2720_v53  ;;  %v7514_v7 = vand.u32 2147483647, %v6178_v10  ;;  %vm4366_vm13 = vcmp.lt.s32.totalorder %v4365_v26, 0  ;;  %v3626_v35 = vadd.s32 536870912, %v6219_v17 }
 0x3c2   :  { %7636 = vst [vmem:[#allocation37_spill] sm:$0xff] %v6226_v52  ;;  %v3126_v55 = vadd.s32 %v3124_v40, %v3118_v21  ;;  %vm3228_vm4 = vcmp.gt.s32.totalorder %v3227_v60, 0  ;;  %v6241_v31 = vsel %vm2444_vm11, %v2566_v14, %v7634_v13  ;;  %v3128_v15 = vsel %vm3127_vm0, 1, %v7574_v11 }
 0x3c3   :  { %7637 = vst [vmem:[#allocation42_spill] sm:$0xff] %v6241_v31  ;;  %v3152_v42 = vadd.s32 %v3150_v37, %v3148_v23  ;;  %v3229_v25 = vsel %vm3228_vm4, %v3227_v60, 0  ;;  %v6245_v27 = vmul.f32 %v3046_v43, %v6050_v33  ;;  %v2580_v44 = vmul.f32 %v2579_v51, %v6173_v1  ;;  %v6403_v31 = vpop.f32.mrf.mxu1 }
 0x3c4   :  { %v6250_v53 = vmul.f32 %v6234_v2, %v6234_v2  ;;  %v3231_v5 = vand.u32 31, %v3229_v25  ;;  %v6252_v19 = vsel %vm4366_vm13, 0, %v4365_v26  ;;  %v3078_v14 = vshrl.u32 %v7591_v16, %v6104_v48 }
 0x3c5   :  { %v3099_v13 = vsel %vm3097_vm7, %v6132_v41, 2102212464  ;;  %v3142_v24 = vshrl.u32 %v6176_v47, 16  ;;  %v6260_v43 = vshrl.u32 %v3626_v35, 30  ;;  %v3130_v40 = vadd.s32 %v3128_v15, %v3126_v55 }
 0x3c6   :  { %7638 = vst [vmem:[#allocation56_spill] sm:$0xff] %v6250_v53  ;;  %v3224_v51 = vand.u32 8388607, %v7514_v7  ;;  %v6264_v23 = vsub.s32 32, %v3231_v5  ;;  %v3120_v26 = vshrl.u32 %v6187_v9, 16  ;;  %v3144_v21 = vshrl.u32 %v6190_v61, 16 }
 0x3c7   :  { %v3153_v37 = vadd.s32 %v3152_v42, %v3142_v24  ;;  %v6268_v48 = vshrl.u32 %v3229_v25, 5  ;;  %v3234_v60 = vshll.u32 %v7591_v16, %v3231_v5  ;;  %v3237_v47 = vshll.u32 %v7598_v46, %v3231_v5 }
 0x3c8   :  { %v3235_v41 = vshrl.u32 %v7598_v46, %v6264_v23  ;;  %v3238_v59 = vshrl.u32 %v7585_v38, %v6264_v23  ;;  %v3240_v35 = vshll.u32 %v7585_v38, %v3231_v5  ;;  %v3241_v9 = vshrl.u32 %v7586_v30, %v6264_v23 }
 0x3c9   :  { %v3243_v55 = vshll.u32 %v7586_v30, %v3231_v5  ;;  %v3244_v15 = vshrl.u32 %v7587_v18, %v6264_v23  ;;  %v3131_v42 = vadd.s32 %v3130_v40, %v3120_v26  ;;  %v3247_v58 = vshrl.u32 %v7588_v62, %v6264_v23 }
 0x3ca   :  { %v6282_v25 = vor.u32 %v3235_v41, %v3234_v60  ;;  %v6284_v24 = vor.u32 %v3238_v59, %v3237_v47  ;;  %v3225_v7 = vor.u32 8388608, %v3224_v51  ;;  %v6288_v45 = vor.u32 %v3241_v9, %v3240_v35 }
 0x3cb   :  { %v3245_v8 = vor.u32 %v3244_v15, %v3243_v55  ;;  %v3246_v39 = vshll.u32 %v7587_v18, %v3231_v5  ;;  %v3628_v6 = vshll.u32 %v6260_v43, 30  ;;  %v3098_v52 = vsel %vm3094_vm5, %v3078_v14, %v6123_v49 }
 0x3cc   :  { %vm7639_vm11 = vcmp.lt.s32.totalorder %v6109_v56, 3  ;;  %v3122_v26 = vshrl.u32 %v6206_v22, 16  ;;  %v3154_v60 = vadd.s32 %v3153_v37, %v3144_v21  ;;  %vm3249_vm7 = vcmp.lt.s32.totalorder %v6268_v48, 1 }
 0x3cd   :  { %v3100_v40 = vsel %vm7639_vm11, %v6125_v3, %v3099_v13  ;;  %v3248_v41 = vor.u32 %v3247_v58, %v3246_v39  ;;  %vm3252_vm15 = vcmp.lt.s32.totalorder %v6268_v48, 4  ;;  %vm3251_vm0 = vcmp.lt.s32.totalorder %v6268_v48, 3 }
 0x3ce   :  { %v6301_v51 = vadd.s32 %v3131_v42, %v3122_v26  ;;  %v3257_v49 = vsel %vm3249_vm7, %v6282_v25, %v6284_v24  ;;  %v3258_v3 = vsel %vm3252_vm15, %v3245_v8, 920167782  ;;  %v2581_v5 = vadd.f32 -0.16666654, %v2580_v44 }
 0x3cf   :  { %v2733_v22 = vmul.f32 -0.00019511016, %v6250_v53  ;;  %v3259_v39 = vsel %vm3251_vm0, %v6288_v45, %v3258_v3  ;;  %v6314_v58 = vshll.u32 %v3225_v7, 8  ;;  %v3486_v14 = vsub.s32 4294967266, %v6252_v19 }
 0x3d0   :  { %v7640_v13 = vshll.u32 %v6190_v61, 16  ;;  %vm7522_vm5 = vcmp.lt.s32.totalorder %v6268_v48, 2  ;;  %v3261_v44 = vsel %vm3249_vm7, %v6284_v24, %v6288_v45  ;;  %vm7641_vm13 = vcmp.lt.s32.totalorder %v6109_v56, 2 }
 0x3d1   :  { %v3101_v37 = vsel %vm7641_vm13, %v3098_v52, %v3100_v40  ;;  %v3158_v47 = vadd.s32 1, %v3154_v60  ;;  %v3260_v7 = vsel %vm7522_vm5, %v3257_v49, %v3259_v39  ;;  %v3262_v61 = vsel %vm3252_vm15, %v3248_v41, 1326507024  ;;  %v7642_v40 = vld [vmem:[#allocation43_spill] sm:$0xff] }
 0x3d2   :  { %v6320_v21 = vadd.s32 %v6210_v54, %v7640_v13  ;;  %v6334_v54 = vsub.s32 %v6219_v17, %v3628_v6  ;;  %v3263_v59 = vsel %vm3251_vm0, %v3245_v8, %v3262_v61  ;;  %v3290_v35 = vand.u32 65535, %v3260_v7 }
 0x3d3   :  { %v3264_v56 = vsel %vm7522_vm5, %v3261_v44, %v3263_v59  ;;  %v3266_v52 = vand.u32 65535, %v6314_v58  ;;  %v3267_v9 = vshrl.u32 %v6314_v58, 16  ;;  %v3291_v55 = vshrl.u32 %v3260_v7, 16  ;;  %v6354_v7 = vpop.f32.mrf.mxu0 }
 0x3d4   :  { %vm3157_vm4 = vc.u32 %v6301_v51, %v6320_v21  ;;  %v3048_v15 = vadd.f32 1.0, %v6245_v27  ;;  %v2582_v6 = vmul.f32 %v2581_v5, %v6173_v1  ;;  %v3268_v17 = vand.u32 65535, %v3264_v56 }
 0x3d5   :  { %v3269_v42 = vshrl.u32 %v3264_v56, 16  ;;  %v2721_v26 = vsub.s32 4, %v7642_v40  ;;  %v3159_v41 = vsel %vm3157_vm4, %v3158_v47, %v3154_v60  ;;  %v6347_v49 = vmul.u32 %v3291_v55, %v3266_v52 }
 0x3d6   :  { %v6349_v8 = vmul.u32 %v3290_v35, %v3267_v9  ;;  %v2734_v3 = vadd.f32 0.008332121, %v2733_v22  ;;  %v3155_v39 = vmul.u32 %v6136_v50, %v3101_v37  ;;  %v6352_v44 = vmul.u32 %v3268_v17, %v3267_v9 }
 0x3d7   :  { %v3271_v13 = vmul.u32 %v3269_v42, %v3266_v52  ;;  %v3487_v27 = vadd.s32 127, %v3486_v14  ;;  %vm3630_vm11 = vcmp.lt.s32.totalorder %v6334_v54, 0  ;;  %v3292_v5 = vmul.u32 %v3290_v35, %v3266_v52 }
 0x3d8   :  { %v3296_v61 = vshll.u32 %v6347_v49, 16  ;;  %v3631_v60 = vsub.s32 0, %v6334_v54  ;;  %v6359_v47 = vadd.s32 %v3159_v41, %v3155_v39  ;;  %v3270_v59 = vmul.u32 %v3268_v17, %v3266_v52 }
 0x3d9   :  { %v3274_v56 = vshll.u32 %v3271_v13, 16  ;;  %v7524_v22 = vshll.u32 %v6349_v8, 16  ;;  %v3995_v37 = vand.u32 2139095040, %v6354_v7  ;;  %v3276_v14 = vshll.u32 %v6352_v44, 16 }
 0x3da   :  { %vm3300_vm13 = vc.u32 %v3292_v5, %v3296_v61  ;;  %v6362_v50 = vadd.s32 %v3296_v61, %v3292_v5  ;;  %v6370_v41 = vsel %vm2599_vm14, %v2721_v26, %v7642_v40  ;;  %v3273_v52 = vmul.u32 %v3269_v42, %v3267_v9 }
 0x3db   :  { %vm3278_vm4 = vc.u32 %v3270_v59, %v3274_v56  ;;  %v3280_v1 = vadd.s32 %v3274_v56, %v3270_v59  ;;  %v3301_v35 = vsel %vm3300_vm13, 1, %v7574_v11  ;;  %7643 = vst [vmem:[#allocation43_spill] sm:$0xff] %v6370_v41  ;;  %v3295_v39 = vmul.u32 %v3291_v55, %v3267_v9 }
 0x3dc   :  { %v3279_v17 = vsel %vm3278_vm4, 1, %v7574_v11  ;;  %v3632_v5 = vsel %vm3630_vm11, %v3631_v60, %v6334_v54  ;;  %v3161_v61 = vadd.s32 536870912, %v6359_v47  ;;  %vm3304_vm13 = vc.u32 %v6362_v50, %v7524_v22 }
 0x3dd   :  { %vm3282_vm5 = vc.u32 %v3280_v1, %v3276_v14  ;;  %v2735_v59 = vmul.f32 %v2734_v3, %v6250_v53  ;;  %v3482_v40 = vsub.s32 32, %v6252_v19  ;;  %v3281_v26 = vadd.s32 %v3279_v17, %v3273_v52 }
 0x3de   :  { %v3303_v42 = vadd.s32 %v3301_v35, %v3295_v39  ;;  %v3488_v56 = vshll.u32 %v3487_v27, 23  ;;  %v3283_v9 = vsel %vm3282_vm5, 1, %v7574_v11  ;;  %v3305_v55 = vsel %vm3304_vm13, 1, %v7574_v11 }
 0x3df   :  { %v3996_v28 = vshrl.u32 %v3995_v37, 23  ;;  %v6385_v60 = vmul.f32 %v3048_v15, %v6034_v0  ;;  %v6390_v14 = vadd.f32 1.0, %v2582_v6  ;;  %v3633_v3 = vclz %v3632_v5 }
 0x3e0   :  { %v3466_v52 = vadd.s32 %v5963_v4, %v5928_v36  ;;  %v6394_v35 = vshrl.u32 %v3161_v61, 30  ;;  %v7526_v27 = vand.u32 2147483647, %v6354_v7  ;;  %v3496_v15 = vsub.s32 4, %v6061_v20 }
 0x3e1   :  { %7644 = vst [vmem:[#allocation57_spill] sm:$0xff] %v6385_v60  ;;  %v4376_v17 = vadd.s32 4294967169, %v3996_v28  ;;  %v3285_v37 = vadd.s32 %v3283_v9, %v3281_v26  ;;  %v3307_v39 = vadd.s32 %v3305_v55, %v3303_v42  ;;  %v2736_v1 = vadd.f32 -0.16666654, %v2735_v59 }
 0x3e2   :  { %v3484_v6 = vshrl.u32 %v3466_v52, %v3482_v40  ;;  %v6401_v22 = vor.u32 4788187, %v3488_v56  ;;  %v3483_v36 = vshll.u32 %v6099_v57, %v6252_v19  ;;  %v4368_v4 = vadd.s32 4294967294, %v3633_v3 }
 0x3e3   :  { %v4002_v5 = vadd.s32 1, %v4376_v17  ;;  %v3275_v28 = vshrl.u32 %v3271_v13, 16  ;;  %v3297_v61 = vshrl.u32 %v6347_v49, 16  ;;  %v3163_v0 = vshll.u32 %v6394_v35, 30 }
 0x3e4   :  { %v3233_v26 = vshrl.u32 %v7591_v16, %v6264_v23  ;;  %v3999_v59 = vand.u32 8388607, %v7526_v27  ;;  %v4150_v9 = vand.u32 2139095040, %v6403_v31  ;;  %v6415_v57 = vmul.f32 %v2736_v1, %v6250_v53 }
 0x3e5   :  { %vm4003_vm14 = vcmp.gt.s32.totalorder %v4002_v5, 0  ;;  %v3286_v40 = vadd.s32 %v3285_v37, %v3275_v28  ;;  %v3308_v42 = vadd.s32 %v3307_v39, %v3297_v61  ;;  %v6417_v19 = vor.u32 %v3484_v6, %v3483_v36 }
 0x3e6   :  { %v4004_v56 = vsel %vm4003_vm14, %v4002_v5, 0  ;;  %vm4369_vm5 = vcmp.lt.s32.totalorder %v4368_v4, 0  ;;  %v3253_v23 = vsel %vm3249_vm7, %v3233_v26, %v6282_v25  ;;  %v3277_v55 = vshrl.u32 %v6352_v44, 16 }
 0x3e7   :  { %v4006_v13 = vand.u32 31, %v4004_v56  ;;  %v3299_v3 = vshrl.u32 %v6349_v8, 16  ;;  %v6426_v52 = vsub.s32 %v6359_v47, %v3163_v0  ;;  %v3254_v1 = vsel %vm3252_vm15, %v6288_v45, 2102212464 }
 0x3e8   :  { %v4000_v17 = vor.u32 8388608, %v3999_v59  ;;  %v6433_v39 = vadd.s32 %v3286_v40, %v3277_v55  ;;  %v6435_v5 = vshrl.u32 %v4004_v56, 5  ;;  %v4151_v25 = vshrl.u32 %v4150_v9, 23 }
 0x3e9   :  { %v6431_v37 = vsub.s32 32, %v4006_v13  ;;  %v3309_v6 = vadd.s32 %v3308_v42, %v3299_v3  ;;  %v4009_v44 = vshll.u32 %v7591_v16, %v4006_v13  ;;  %v4012_v47 = vshll.u32 %v7598_v46, %v4006_v13 }
 0x3ea   :  { %v4015_v45 = vshll.u32 %v7585_v38, %v4006_v13  ;;  %v4018_v61 = vshll.u32 %v7586_v30, %v4006_v13  ;;  %v4021_v42 = vshll.u32 %v7587_v18, %v4006_v13  ;;  %v3255_v9 = vsel %vm3251_vm0, %v6284_v24, %v3254_v1 }
 0x3eb   :  { %v4010_v36 = vshrl.u32 %v7598_v46, %v6431_v37  ;;  %v4013_v0 = vshrl.u32 %v7585_v38, %v6431_v37  ;;  %v4016_v28 = vshrl.u32 %v7586_v30, %v6431_v37  ;;  %v4019_v26 = vshrl.u32 %v7587_v18, %v6431_v37 }
 0x3ec   :  { %v4022_v56 = vshrl.u32 %v7588_v62, %v6431_v37  ;;  %v7645_v55 = vshll.u32 %v6349_v8, 16  ;;  %vm3165_vm15 = vcmp.lt.s32.totalorder %v6426_v52, 0  ;;  %v3166_v13 = vsub.s32 0, %v6426_v52 }
 0x3ed   :  { %v6449_v59 = vor.u32 %v4010_v36, %v4009_v44  ;;  %v6451_v40 = vor.u32 %v4013_v0, %v4012_v47  ;;  %v6464_v27 = vor.u32 %v4016_v28, %v4015_v45  ;;  %v4020_v44 = vor.u32 %v4019_v26, %v4018_v61  ;;  %v7646_v36 = vld [vmem:[#allocation36_spill] sm:$0xff] }
 0x3ee   :  { %v6462_v3 = vadd.s32 %v6362_v50, %v7645_v55  ;;  %v4023_v47 = vor.u32 %v4022_v56, %v4021_v42  ;;  %v6469_v0 = vshll.u32 %v4000_v17, 8  ;;  %v3313_v24 = vadd.s32 1, %v3309_v6 }
 0x3ef   :  { %vm4024_vm11 = vcmp.lt.s32.totalorder %v6435_v5, 1  ;;  %vm4027_vm4 = vcmp.lt.s32.totalorder %v6435_v5, 4  ;;  %vm4026_vm13 = vcmp.lt.s32.totalorder %v6435_v5, 3  ;;  %v4379_v1 = vadd.s32 4294967169, %v4151_v25 }
 0x3f0   :  { %vm3312_vm0 = vc.u32 %v6433_v39, %v6462_v3  ;;  %v4032_v8 = vsel %vm4024_vm11, %v6449_v59, %v6451_v40  ;;  %v4033_v50 = vsel %vm4027_vm4, %v4020_v44, 920167782  ;;  %vm7647_vm14 = vcmp.lt.s32.totalorder %v6268_v48, 2 }
 0x3f1   :  { %v3256_v17 = vsel %vm7647_vm14, %v3253_v23, %v3255_v9  ;;  %vm4025_vm7 = vcmp.lt.s32.totalorder %v6435_v5, 2  ;;  %v4034_v45 = vsel %vm4026_vm13, %v6464_v27, %v4033_v50  ;;  %v4036_v28 = vsel %vm4024_vm11, %v6451_v40, %v6464_v27 }
 0x3f2   :  { %v6493_v61 = vsel %vm4369_vm5, 0, %v4368_v4  ;;  %v3167_v25 = vsel %vm3165_vm15, %v3166_v13, %v6426_v52  ;;  %v4035_v48 = vsel %vm4025_vm7, %v4032_v8, %v4034_v45  ;;  %v4037_v23 = vsel %vm4027_vm4, %v4023_v47, 1326507024 }
 0x3f3   :  { %v3314_v26 = vsel %vm3312_vm0, %v3313_v24, %v3309_v6  ;;  %v4038_v42 = vsel %vm4026_vm13, %v4020_v44, %v4037_v23  ;;  %v4041_v4 = vand.u32 65535, %v6469_v0  ;;  %v4066_v56 = vshrl.u32 %v4035_v48, 16 }
 0x3f4   :  { %v3310_v9 = vmul.u32 %v6314_v58, %v3256_v17  ;;  %v4039_v55 = vsel %vm4025_vm7, %v4036_v28, %v4038_v42  ;;  %v4042_v13 = vshrl.u32 %v6469_v0, 16  ;;  %v4157_v8 = vadd.s32 1, %v4379_v1 }
 0x3f5   :  { %v4043_v50 = vand.u32 65535, %v4039_v55  ;;  %v4044_v47 = vshrl.u32 %v4039_v55, 16  ;;  %v4065_v45 = vand.u32 65535, %v4035_v48  ;;  %v6512_v49 = vmul.u32 %v4066_v56, %v4041_v4 }
 0x3f6   :  { %v6516_v6 = vmul.f32 %v6390_v14, %v6094_v32  ;;  %v3492_v44 = vcvt.s32.f32 %v6417_v19  ;;  %v3168_v24 = vclz %v3167_v25  ;;  %v6519_v23 = vadd.s32 %v3314_v26, %v3310_v9 }
 0x3f7   :  { %v2738_v58 = vadd.f32 1.0, %v6415_v57  ;;  %vm7649_vm5 = vcmp.lt.s32.totalorder %v7646_v36, 0  ;;  %v6529_v17 = vmul.u32 %v4044_v47, %v4041_v4  ;;  %v6531_v28 = vmul.u32 %v4043_v50, %v4042_v13 }
 0x3f8   :  { %7648 = vst [vmem:[#allocation58_spill] sm:$0xff] %v6516_v6  ;;  %v6527_v1 = vsel %vm7649_vm5, %v3496_v15, %v6061_v20  ;;  %v7651_v32 = vand.u32 2147483647, %v6401_v22  ;;  %v3637_v19 = vsub.s32 32, %v6493_v61  ;;  %v4071_v25 = vshll.u32 %v6512_v49, 16 }
 0x3f9   :  { %7650 = vst [vmem:[#allocation59_spill] sm:$0xff] %v6527_v1  ;;  %vm4158_vm15 = vcmp.gt.s32.totalorder %v4157_v8, 0  ;;  %v4045_v57 = vmul.u32 %v4043_v50, %v4041_v4  ;;  %v4049_v48 = vshll.u32 %v6529_v17, 16  ;;  %v4067_v26 = vmul.u32 %v4065_v45, %v4041_v4 }
 0x3fa   :  { %v6535_v14 = vmul.f32 %v3492_v44, %v7651_v32  ;;  %v6540_v42 = vmul.u32 %v4065_v45, %v4042_v13  ;;  %v3641_v20 = vsub.s32 4294967266, %v6493_v61  ;;  %v4359_v15 = vadd.s32 4294967294, %v3168_v24 }
 0x3fb   :  { %v3316_v9 = vadd.s32 536870912, %v6519_v23  ;;  %v4051_v55 = vshll.u32 %v6531_v28, 16  ;;  %vm4053_vm0 = vc.u32 %v4045_v57, %v4049_v48  ;;  %v4055_v44 = vadd.s32 %v4049_v48, %v4045_v57 }
 0x3fc   :  { %vm4075_vm14 = vc.u32 %v4067_v26, %v4071_v25  ;;  %v4054_v32 = vsel %vm4053_vm0, 1, %v7574_v11  ;;  %v4070_v50 = vmul.u32 %v4066_v56, %v4042_v13  ;;  %v4159_v4 = vsel %vm4158_vm15, %v4157_v8, 0 }
 0x3fd   :  { %v4076_v41 = vsel %vm4075_vm14, 1, %v7574_v11  ;;  %v4048_v45 = vmul.u32 %v4044_v47, %v4042_v13  ;;  %vm4057_vm5 = vc.u32 %v4055_v44, %v4051_v55  ;;  %v7531_v24 = vshll.u32 %v6540_v42, 16 }
 0x3fe   :  { %v6550_v34 = vadd.s32 %v4071_v25, %v4067_v26  ;;  %v3621_v22 = vadd.s32 %v6185_v63, %v6169_v12  ;;  %v6554_v6 = vadd.s32 127, %v3641_v20  ;;  %v4078_v57 = vadd.s32 %v4076_v41, %v4070_v50 }
 0x3ff   :  { %v7652_v48 = vand.u32 2147483647, %v6403_v31  ;;  %vm4360_vm0 = vcmp.lt.s32.totalorder %v4359_v15, 0  ;;  %v4056_v56 = vadd.s32 %v4054_v32, %v4048_v45  ;;  %v4161_v13 = vand.u32 31, %v4159_v4 }
 0x400   :  { %vm4079_vm15 = vc.u32 %v6550_v34, %v7531_v24  ;;  %v6562_v8 = vmul.f32 %v2738_v58, %v6234_v2  ;;  %v4058_v12 = vsel %vm4057_vm5, 1, %v7574_v11  ;;  %v6569_v25 = vshrl.u32 %v3621_v22, %v3637_v19 }
 0x401   :  { %v4154_v29 = vand.u32 8388607, %v7652_v48  ;;  %v4080_v63 = vsel %vm4079_vm15, 1, %v7574_v11  ;;  %v6571_v26 = vshrl.u32 %v3316_v9, 30  ;;  %v6573_v20 = vsub.s32 32, %v4161_v13 }
 0x402   :  { %7653 = vst [vmem:[#allocation60_spill] sm:$0xff] %v6562_v8  ;;  %v3643_v55 = vshll.u32 %v6554_v6, 23  ;;  %v6576_v44 = vsel %vm4360_vm0, 0, %v4359_v15  ;;  %v4082_v2 = vadd.s32 %v4080_v63, %v4078_v57  ;;  %v4060_v32 = vadd.s32 %v4058_v12, %v4056_v56 }
 0x403   :  { %v4155_v58 = vor.u32 8388608, %v4154_v29  ;;  %v4072_v50 = vshrl.u32 %v6512_v49, 16  ;;  %v4164_v45 = vshll.u32 %v7591_v16, %v4161_v13  ;;  %v4165_v48 = vshrl.u32 %v7598_v46, %v6573_v20 }
 0x404   :  { %v4167_v19 = vshll.u32 %v7598_v46, %v4161_v13  ;;  %v4168_v9 = vshrl.u32 %v7585_v38, %v6573_v20  ;;  %v4171_v6 = vshrl.u32 %v7586_v30, %v6573_v20  ;;  %v4174_v15 = vshrl.u32 %v7587_v18, %v6573_v20 }
 0x405   :  { %v3318_v29 = vshll.u32 %v6571_v26, 30  ;;  %v6590_v22 = vshrl.u32 %v4159_v4, 5  ;;  %v4170_v49 = vshll.u32 %v7585_v38, %v4161_v13  ;;  %v4173_v57 = vshll.u32 %v7586_v30, %v4161_v13 }
 0x406   :  { %v4050_v56 = vshrl.u32 %v6529_v17, 16  ;;  %v4083_v12 = vadd.s32 %v4082_v2, %v4072_v50  ;;  %v6595_v63 = vor.u32 %v4165_v48, %v4164_v45  ;;  %v6597_v41 = vor.u32 %v4168_v9, %v4167_v19 }
 0x407   :  { %v6599_v47 = vor.u32 %v4171_v6, %v4170_v49  ;;  %v4175_v24 = vor.u32 %v4174_v15, %v4173_v57  ;;  %v4176_v8 = vshll.u32 %v7587_v18, %v4161_v13  ;;  %v4177_v4 = vshrl.u32 %v7588_v62, %v6573_v20 }
 0x408   :  { %v4008_v60 = vshrl.u32 %v7591_v16, %v6431_v37  ;;  %v4061_v53 = vadd.s32 %v4060_v32, %v4050_v56  ;;  %v4074_v33 = vshrl.u32 %v6540_v42, 16  ;;  %v6607_v17 = vshll.u32 %v4155_v58, 8 }
 0x409   :  { %v6610_v2 = vsub.s32 %v6519_v23, %v3318_v29  ;;  %v4029_v50 = vsel %vm4027_vm4, %v6464_v27, 2102212464  ;;  %v4178_v45 = vor.u32 %v4177_v4, %v4176_v8  ;;  %vm4179_vm14 = vcmp.lt.s32.totalorder %v6590_v22, 1 }
 0x40a   :  { %v4052_v13 = vshrl.u32 %v6531_v28, 16  ;;  %v4084_v48 = vadd.s32 %v4083_v12, %v4074_v33  ;;  %vm4182_vm5 = vcmp.lt.s32.totalorder %v6590_v22, 4  ;;  %v4187_v37 = vsel %vm4179_vm14, %v6595_v63, %v6597_v41 }
 0x40b   :  { %vm4181_vm0 = vcmp.lt.s32.totalorder %v6590_v22, 3  ;;  %v4188_v23 = vsel %vm4182_vm5, %v4175_v24, 920167782  ;;  %v4191_v27 = vsel %vm4179_vm14, %v6597_v41, %v6599_v47  ;;  %v4192_v33 = vsel %vm4182_vm5, %v4178_v45, 1326507024 }
 0x40c   :  { %v6631_v28 = vadd.s32 %v4061_v53, %v4052_v13  ;;  %vm4180_vm4 = vcmp.lt.s32.totalorder %v6590_v22, 2  ;;  %v4189_v8 = vsel %vm4181_vm0, %v6599_v47, %v4188_v23  ;;  %v4193_v58 = vsel %vm4181_vm0, %v4175_v24, %v4192_v33 }
 0x40d   :  { %v4028_v32 = vsel %vm4024_vm11, %v4008_v60, %v6449_v59  ;;  %v4030_v19 = vsel %vm4026_vm13, %v6451_v40, %v4029_v50  ;;  %v4190_v53 = vsel %vm4180_vm4, %v4187_v37, %v4189_v8  ;;  %v4194_v9 = vsel %vm4180_vm4, %v4191_v27, %v4193_v58 }
 0x40e   :  { %v7654_v6 = vshll.u32 %v6540_v42, 16  ;;  %v4196_v24 = vand.u32 65535, %v6607_v17  ;;  %v4198_v29 = vand.u32 65535, %v4194_v9  ;;  %v4199_v49 = vshrl.u32 %v4194_v9, 16  ;;  %v6662_v42 = vpop.f32.mrf.mxu2 }
 0x40f   :  { %v4088_v60 = vadd.s32 1, %v4084_v48  ;;  %v4197_v59 = vshrl.u32 %v6607_v17, 16  ;;  %v4220_v57 = vand.u32 65535, %v4190_v53  ;;  %v4221_v40 = vshrl.u32 %v4190_v53, 16 }
 0x410   :  { %v6652_v15 = vadd.s32 %v6550_v34, %v7654_v6  ;;  %v3156_v56 = vadd.s32 %v6320_v21, %v6301_v51  ;;  %v4031_v12 = vsel %vm4025_vm7, %v4028_v32, %v4030_v19  ;;  %v4201_v34 = vmul.u32 %v4199_v49, %v4196_v24 }
 0x411   :  { %v6664_v4 = vor.u32 4788187, %v3643_v55  ;;  %v3172_v50 = vsub.s32 32, %v6576_v44  ;;  %v4202_v45 = vmul.u32 %v4198_v29, %v4197_v59  ;;  %v4223_v13 = vmul.u32 %v4221_v40, %v4196_v24 }
 0x412   :  { %vm4087_vm11 = vc.u32 %v6631_v28, %v6652_v15  ;;  %v3176_v37 = vsub.s32 4294967266, %v6576_v44  ;;  %vm3320_vm13 = vcmp.lt.s32.totalorder %v6610_v2, 0  ;;  %v4200_v51 = vmul.u32 %v4198_v29, %v4196_v24 }
 0x413   :  { %v4204_v21 = vshll.u32 %v4201_v34, 16  ;;  %v4085_v5 = vmul.u32 %v6469_v0, %v4031_v12  ;;  %v4089_v23 = vsel %vm4087_vm11, %v4088_v60, %v4084_v48  ;;  %v4224_v27 = vmul.u32 %v4220_v57, %v4197_v59 }
 0x414   :  { %v3685_v33 = vand.u32 2139095040, %v6662_v42  ;;  %v4203_v8 = vmul.u32 %v4199_v49, %v4197_v59  ;;  %v4206_v58 = vshll.u32 %v4202_v45, 16  ;;  %v3321_v32 = vsub.s32 0, %v6610_v2 }
 0x415   :  { %vm4208_vm7 = vc.u32 %v4200_v51, %v4204_v21  ;;  %v4210_v55 = vadd.s32 %v4204_v21, %v4200_v51  ;;  %v4222_v53 = vmul.u32 %v4220_v57, %v4196_v24  ;;  %v4226_v9 = vshll.u32 %v4223_v13, 16 }
 0x416   :  { %v4209_v19 = vsel %vm4208_vm7, 1, %v7574_v11  ;;  %v6673_v6 = vadd.s32 %v4089_v23, %v4085_v5  ;;  %v4225_v1 = vmul.u32 %v4221_v40, %v4197_v59  ;;  %v4228_v48 = vshll.u32 %v4224_v27, 16 }
 0x417   :  { %v4211_v29 = vadd.s32 %v4209_v19, %v4203_v8  ;;  %vm4212_vm15 = vc.u32 %v4210_v55, %v4206_v58  ;;  %vm4230_vm11 = vc.u32 %v4222_v53, %v4226_v9  ;;  %v4232_v60 = vadd.s32 %v4226_v9, %v4222_v53 }
 0x418   :  { %v4213_v0 = vsel %vm4212_vm15, 1, %v7574_v11  ;;  %v4205_v49 = vshrl.u32 %v4201_v34, 16  ;;  %v4231_v51 = vsel %vm4230_vm11, 1, %v7574_v11  ;;  %v3686_v21 = vshrl.u32 %v3685_v33, 23 }
 0x419   :  { %v4215_v12 = vadd.s32 %v4213_v0, %v4211_v29  ;;  %v3322_v24 = vsel %vm3320_vm13, %v3321_v32, %v6610_v2  ;;  %v4163_v57 = vshrl.u32 %v7591_v16, %v6573_v20  ;;  %v4233_v5 = vadd.s32 %v4231_v51, %v4225_v1 }
 0x41a   :  { %vm4234_vm7 = vc.u32 %v4232_v60, %v4228_v48  ;;  %v4184_v59 = vsel %vm4182_vm5, %v6599_v47, 2102212464  ;;  %v4370_v23 = vadd.s32 4294967169, %v3686_v21  ;;  %v4091_v8 = vadd.s32 536870912, %v6673_v6 }
 0x41b   :  { %v4216_v40 = vadd.s32 %v4215_v12, %v4205_v49  ;;  %v4235_v34 = vsel %vm4234_vm7, 1, %v7574_v11  ;;  %v4207_v33 = vshrl.u32 %v4202_v45, 16  ;;  %v4227_v58 = vshrl.u32 %v4223_v13, 16 }
 0x41c   :  { %v4237_v55 = vadd.s32 %v4235_v34, %v4233_v5  ;;  %v3173_v32 = vshll.u32 %v6426_v52, %v6576_v44  ;;  %v3174_v19 = vshrl.u32 %v3156_v56, %v3172_v50  ;;  %v4183_v1 = vsel %vm4179_vm14, %v4163_v57, %v6595_v63 }
 0x41d   :  { %v3692_v20 = vadd.s32 1, %v4370_v23  ;;  %v4185_v47 = vsel %vm4181_vm0, %v6597_v41, %v4184_v59  ;;  %v6695_v53 = vadd.s32 %v4216_v40, %v4207_v33  ;;  %v4229_v9 = vshrl.u32 %v4224_v27, 16 }
 0x41e   :  { %v4238_v29 = vadd.s32 %v4237_v55, %v4227_v58  ;;  %v3177_v45 = vadd.s32 127, %v3176_v37  ;;  %v3323_v13 = vclz %v3322_v24  ;;  %v7538_v0 = vand.u32 2147483647, %v6662_v42 }
 0x41f   :  { %vm3693_vm5 = vcmp.gt.s32.totalorder %v3692_v20, 0  ;;  %v7655_v52 = vand.u32 2147483647, %v7646_v36  ;;  %v7656_v44 = vmov 0  ;;  %v6704_v63 = vshrl.u32 %v4091_v8, 30 }
 0x420   :  { %v6706_v56 = vadd.s32 %v4232_v60, %v4228_v48  ;;  %v4239_v41 = vadd.s32 %v4238_v29, %v4229_v9  ;;  %v3694_v50 = vsel %vm3693_vm5, %v3692_v20, 0  ;;  %v7659_v27 = vxor.u32 2147483648, %v6535_v14 }
 0x421   :  { %vm6700_vm13 = vcmp.le.f32.partialorder %v7655_v52, 0.7853982  ;;  %vm7660_vm14 = vcmp.lt.s32.totalorder %v7646_v36, 0  ;;  %v7661_v49 = vshll.u32 %v6334_v54, %v6493_v61  ;;  %v4186_v51 = vsel %vm4180_vm4, %v4183_v1, %v4185_v47 }
 0x422   :  { %v7657_v44 = vsel %vm6700_vm13, 4294967295, %v7656_v44  ;;  %v3495_v37 = vsel %vm7660_vm14, %v7659_v27, %v6535_v14  ;;  %v3696_v21 = vand.u32 31, %v3694_v50  ;;  %v3645_v48 = vand.u32 2147483647, %v6664_v4 }
 0x423   :  { %7658 = vst [vmem:[#allocation61_spill] sm:$0xff] %v7657_v44  ;;  %v3640_v12 = vor.u32 %v6569_v25, %v7661_v49  ;;  %v3175_v60 = vor.u32 %v3174_v19, %v3173_v32  ;;  %vm4242_vm0 = vc.u32 %v6695_v53, %v6706_v56  ;;  %v4243_v24 = vadd.s32 1, %v4239_v41 }
 0x424   :  { %v3178_v57 = vshll.u32 %v3177_v45, 23  ;;  %v4362_v5 = vadd.s32 4294967294, %v3323_v13  ;;  %v3689_v14 = vand.u32 8388607, %v7538_v0  ;;  %v6724_v59 = vsub.s32 32, %v3696_v21 }
 0x425   :  { %v4093_v54 = vshll.u32 %v6704_v63, 30  ;;  %v4240_v61 = vmul.u32 %v6607_v17, %v4186_v51  ;;  %v6728_v25 = vshrl.u32 %v3694_v50, 5  ;;  %v3699_v22 = vshll.u32 %v7591_v16, %v3696_v21 }
 0x426   :  { %v4244_v4 = vsel %vm4242_vm0, %v4243_v24, %v4239_v41  ;;  %v3700_v40 = vshrl.u32 %v7598_v46, %v6724_v59  ;;  %v3702_v34 = vshll.u32 %v7598_v46, %v3696_v21  ;;  %v3703_v23 = vshrl.u32 %v7585_v38, %v6724_v59 }
 0x427   :  { %v3705_v8 = vshll.u32 %v7585_v38, %v3696_v21  ;;  %v3706_v33 = vshrl.u32 %v7586_v30, %v6724_v59  ;;  %v3708_v17 = vshll.u32 %v7586_v30, %v3696_v21  ;;  %v3709_v58 = vshrl.u32 %v7587_v18, %v6724_v59 }
 0x428   :  { %v3690_v55 = vor.u32 8388608, %v3689_v14  ;;  %v6742_v32 = vor.u32 %v3700_v40, %v3699_v22  ;;  %v6744_v19 = vor.u32 %v3703_v23, %v3702_v34  ;;  %v3712_v1 = vshrl.u32 %v7588_v62, %v6724_v59 }
 0x429   :  { %v6748_v20 = vadd.s32 %v4244_v4, %v4240_v61  ;;  %v3707_v47 = vor.u32 %v3706_v33, %v3705_v8  ;;  %v3710_v9 = vor.u32 %v3709_v58, %v3708_v17  ;;  %v3711_v29 = vshll.u32 %v7587_v18, %v3696_v21  ;;  %v6791_v61 = vpop.f32.mrf.mxu3 }
 0x42a   :  { %v6754_v45 = vsel %vm6700_vm13, %v7646_v36, %v3495_v37  ;;  %v3647_v13 = vcvt.s32.f32 %v3640_v12  ;;  %v3179_v52 = vor.u32 4788187, %v3178_v57  ;;  %vm4363_vm4 = vcmp.lt.s32.totalorder %v4362_v5, 0 }
 0x42b   :  { %v6757_v41 = vsub.s32 %v6673_v6, %v4093_v54  ;;  %v3713_v50 = vor.u32 %v3712_v1, %v3711_v29  ;;  %vm3714_vm15 = vcmp.lt.s32.totalorder %v6728_v25, 1  ;;  %vm3717_vm11 = vcmp.lt.s32.totalorder %v6728_v25, 4 }
 0x42c   :  { %vm3716_vm7 = vcmp.lt.s32.totalorder %v6728_v25, 3  ;;  %v3722_v27 = vsel %vm3714_vm15, %v6742_v32, %v6744_v19  ;;  %v3723_v37 = vsel %vm3717_vm11, %v3710_v9, 920167782  ;;  %v6768_v49 = vshll.u32 %v3690_v55, 8 }
 0x42d   :  { %v6770_v12 = vmul.f32 %v3647_v13, %v3645_v48  ;;  %v3182_v6 = vcvt.s32.f32 %v3175_v60  ;;  %v4246_v51 = vadd.s32 536870912, %v6748_v20  ;;  %v3724_v21 = vsel %vm3716_vm7, %v3707_v47, %v3723_v37 }
 0x42e   :  { %v3180_v24 = vand.u32 2147483647, %v3179_v52  ;;  %v6777_v57 = vadd.s32 %v6462_v3, %v6433_v39  ;;  %vm3715_vm5 = vcmp.lt.s32.totalorder %v6728_v25, 2  ;;  %v3726_v14 = vsel %vm3714_vm15, %v6744_v19, %v3707_v47 }
 0x42f   :  { %v6784_v48 = vsel %vm4363_vm4, 0, %v4362_v5  ;;  %vm4095_vm14 = vcmp.lt.s32.totalorder %v6757_v41, 0  ;;  %v3725_v60 = vsel %vm3715_vm5, %v3722_v27, %v3724_v21  ;;  %v3727_v54 = vsel %vm3717_vm11, %v3713_v50, 1326507024 }
 0x430   :  { %v4096_v39 = vsub.s32 0, %v6757_v41  ;;  %v3728_v3 = vsel %vm3716_vm7, %v3710_v9, %v3727_v54  ;;  %v3731_v22 = vand.u32 65535, %v6768_v49  ;;  %v3755_v4 = vand.u32 65535, %v3725_v60 }
 0x431   :  { %v6797_v5 = vshrl.u32 %v4246_v51, 30  ;;  %v3729_v40 = vsel %vm3715_vm5, %v3726_v14, %v3728_v3  ;;  %v3732_v34 = vshrl.u32 %v6768_v49, 16  ;;  %v3756_v23 = vshrl.u32 %v3725_v60, 16 }
 0x432   :  { %v6802_v8 = vmul.f32 %v3182_v6, %v3180_v24  ;;  %v3733_v33 = vand.u32 65535, %v3729_v40  ;;  %v3734_v17 = vshrl.u32 %v3729_v40, 16  ;;  %v3840_v58 = vand.u32 2139095040, %v6791_v61 }
 0x433   :  { %v3327_v55 = vsub.s32 32, %v6784_v48  ;;  %v3331_v1 = vsub.s32 4294967266, %v6784_v48  ;;  %v3758_v9 = vmul.u32 %v3756_v23, %v3731_v22  ;;  %v3759_v29 = vmul.u32 %v3755_v4, %v3732_v34 }
 0x434   :  { %v4097_v13 = vsel %vm4095_vm14, %v4096_v39, %v6757_v41  ;;  %v3698_v52 = vshrl.u32 %v7591_v16, %v6724_v59  ;;  %v3736_v50 = vmul.u32 %v3734_v17, %v3731_v22  ;;  %v3737_v27 = vmul.u32 %v3733_v33, %v3732_v34 }
 0x435   :  { %v4248_v37 = vshll.u32 %v6797_v5, 30  ;;  %v3719_v6 = vsel %vm3717_vm11, %v3707_v47, 2102212464  ;;  %v3757_v51 = vmul.u32 %v3755_v4, %v3731_v22  ;;  %v3761_v21 = vshll.u32 %v3758_v9, 16 }
 0x436   :  { %v3735_v24 = vmul.u32 %v3733_v33, %v3731_v22  ;;  %v3739_v14 = vshll.u32 %v3736_v50, 16  ;;  %v3760_v60 = vmul.u32 %v3756_v23, %v3732_v34  ;;  %v3841_v54 = vshrl.u32 %v3840_v58, 23 }
 0x437   :  { %v3738_v3 = vmul.u32 %v3734_v17, %v3732_v34  ;;  %v3763_v40 = vshll.u32 %v3759_v29, 16  ;;  %vm3765_vm0 = vc.u32 %v3757_v51, %v3761_v21  ;;  %v3767_v39 = vadd.s32 %v3761_v21, %v3757_v51 }
 0x438   :  { %v3741_v0 = vshll.u32 %v3737_v27, 16  ;;  %vm3743_vm4 = vc.u32 %v3735_v24, %v3739_v14  ;;  %v3745_v59 = vadd.s32 %v3739_v14, %v3735_v24  ;;  %v3766_v36 = vsel %vm3765_vm0, 1, %v7574_v11 }
 0x439   :  { %v4098_v44 = vclz %v4097_v13  ;;  %v3718_v47 = vsel %vm3714_vm15, %v3698_v52, %v6742_v32  ;;  %v3720_v22 = vsel %vm3716_vm7, %v6744_v19, %v3719_v6  ;;  %v3744_v4 = vsel %vm3743_vm4, 1, %v7574_v11 }
 0x43a   :  { %v3746_v34 = vadd.s32 %v3744_v4, %v3738_v3  ;;  %vm3747_vm11 = vc.u32 %v3745_v59, %v3741_v0  ;;  %v3768_v23 = vadd.s32 %v3766_v36, %v3760_v60  ;;  %vm3769_vm14 = vc.u32 %v3767_v39, %v3763_v40 }
 0x43b   :  { %v6824_v33 = vsub.s32 %v6748_v20, %v4248_v37  ;;  %v3748_v17 = vsel %vm3747_vm11, 1, %v7574_v11  ;;  %v3762_v58 = vshrl.u32 %v3758_v9, 16  ;;  %v3770_v13 = vsel %vm3769_vm14, 1, %v7574_v11 }
 0x43c   :  { %v3740_v51 = vshrl.u32 %v3736_v50, 16  ;;  %v3750_v32 = vadd.s32 %v3748_v17, %v3746_v34  ;;  %v3772_v52 = vadd.s32 %v3770_v13, %v3768_v23  ;;  %v4373_v21 = vadd.s32 4294967169, %v3841_v54 }
 0x43d   :  { %v3332_v24 = vadd.s32 127, %v3331_v1  ;;  %v4377_v19 = vadd.s32 4294967294, %v4098_v44  ;;  %v3742_v6 = vshrl.u32 %v3737_v27, 16  ;;  %v7541_v14 = vand.u32 2147483647, %v6791_v61 }
 0x43e   :  { %v3751_v0 = vadd.s32 %v3750_v32, %v3740_v51  ;;  %v3764_v36 = vshrl.u32 %v3759_v29, 16  ;;  %v3773_v60 = vadd.s32 %v3772_v52, %v3762_v58  ;;  %v3847_v3 = vadd.s32 1, %v4373_v21 }
 0x43f   :  { %v3329_v20 = vshrl.u32 %v6777_v57, %v3327_v55  ;;  %vm4250_vm15 = vcmp.lt.s32.totalorder %v6824_v33, 0  ;;  %v4251_v9 = vsub.s32 0, %v6824_v33  ;;  %v3721_v50 = vsel %vm3715_vm5, %v3718_v47, %v3720_v22 }
 0x440   :  { %v6834_v37 = vadd.s32 %v3751_v0, %v3742_v6  ;;  %v6836_v1 = vadd.s32 %v3767_v39, %v3763_v40  ;;  %v3774_v44 = vadd.s32 %v3773_v60, %v3764_v36  ;;  %vm3848_vm7 = vcmp.gt.s32.totalorder %v3847_v3, 0 }
 0x441   :  { %v6840_v29 = vmul.f32 %v6754_v45, %v6754_v45  ;;  %v3328_v57 = vshll.u32 %v6610_v2, %v6784_v48  ;;  %v3333_v55 = vshll.u32 %v3332_v24, 23  ;;  %v3849_v27 = vsel %vm3848_vm7, %v3847_v3, 0  ;;  %v7662_v48 = vld [vmem:[#allocation46_spill] sm:$0xff] }
 0x442   :  { %vm4378_vm0 = vcmp.lt.s32.totalorder %v4377_v19, 0  ;;  %vm3777_vm4 = vc.u32 %v6834_v37, %v6836_v1  ;;  %v3778_v25 = vadd.s32 1, %v3774_v44  ;;  %v3844_v54 = vand.u32 8388607, %v7541_v14 }
 0x443   :  { %v4252_v39 = vsel %vm4250_vm15, %v4251_v9, %v6824_v33  ;;  %v3775_v59 = vmul.u32 %v6768_v49, %v3721_v50  ;;  %v3851_v47 = vand.u32 31, %v3849_v27  ;;  %v6855_v22 = vor.u32 %v3329_v20, %v3328_v57 }
 0x444   :  { %v3779_v4 = vsel %vm3777_vm4, %v3778_v25, %v3774_v44  ;;  %v6857_v34 = vor.u32 4788187, %v3333_v55  ;;  %v6859_v23 = vsel %vm4378_vm0, 0, %v4377_v19  ;;  %v4253_v13 = vclz %v4252_v39 }
 0x445   :  { %v3780_v17 = vadd.s32 %v3779_v4, %v3775_v59  ;;  %v6861_v58 = vsub.s32 32, %v3851_v47  ;;  %v3845_v51 = vor.u32 8388608, %v3844_v54  ;;  %v6863_v32 = vshrl.u32 %v3849_v27, 5 }
 0x446   :  { %v3854_v49 = vshll.u32 %v7591_v16, %v3851_v47  ;;  %v3857_v24 = vshll.u32 %v7598_v46, %v3851_v47  ;;  %v3860_v6 = vshll.u32 %v7585_v38, %v3851_v47  ;;  %v3863_v36 = vshll.u32 %v7586_v30, %v3851_v47 }
 0x447   :  { %v3781_v52 = vadd.s32 536870912, %v3780_v17  ;;  %v3855_v21 = vshrl.u32 %v7598_v46, %v6861_v58  ;;  %v3858_v19 = vshrl.u32 %v7585_v38, %v6861_v58  ;;  %v3861_v0 = vshrl.u32 %v7586_v30, %v6861_v58 }
 0x448   :  { %v3864_v60 = vshrl.u32 %v7587_v18, %v6861_v58  ;;  %v3866_v9 = vshll.u32 %v7587_v18, %v3851_v47  ;;  %v3867_v46 = vshrl.u32 %v7588_v62, %v6861_v58  ;;  %v4380_v50 = vadd.s32 4294967294, %v4253_v13 }
 0x449   :  { %v6877_v3 = vshrl.u32 %v3781_v52, 30  ;;  %v6879_v20 = vor.u32 %v3855_v21, %v3854_v49  ;;  %v6884_v44 = vor.u32 %v3858_v19, %v3857_v24  ;;  %v3862_v38 = vor.u32 %v3861_v0, %v3860_v6 }
 0x44a   :  { %v3865_v57 = vor.u32 %v3864_v60, %v3863_v36  ;;  %v3868_v30 = vor.u32 %v3867_v46, %v3866_v9  ;;  %vm7544_vm5 = vcmp.lt.s32.totalorder %v6863_v32, 1  ;;  %vm3872_vm11 = vcmp.lt.s32.totalorder %v6863_v32, 4 }
 0x44b   :  { %v3783_v55 = vshll.u32 %v6877_v3, 30  ;;  %vm7543_vm14 = vcmp.lt.s32.totalorder %v6863_v32, 3  ;;  %v3877_v18 = vsel %vm7544_vm5, %v6879_v20, %v6884_v44  ;;  %v6896_v27 = vshll.u32 %v3845_v51, 8 }
 0x44c   :  { %v3878_v62 = vsel %vm3872_vm11, %v3865_v57, 920167782  ;;  %vm7542_vm15 = vcmp.lt.s32.totalorder %v6863_v32, 2  ;;  %v3881_v39 = vsel %vm7544_vm5, %v6884_v44, %v3862_v38  ;;  %v4106_v47 = vsub.s32 4294967266, %v6859_v23 }
 0x44d   :  { %v6898_v25 = vsub.s32 %v3780_v17, %v3783_v55  ;;  %v3879_v54 = vsel %vm7543_vm14, %v3862_v38, %v3878_v62  ;;  %v3882_v17 = vsel %vm3872_vm11, %v3868_v30, 1326507024  ;;  %v3886_v21 = vand.u32 65535, %v6896_v27 }
 0x44e   :  { %v3880_v4 = vsel %vm7542_vm15, %v3877_v18, %v3879_v54  ;;  %v3883_v51 = vsel %vm7543_vm14, %v3865_v57, %v3882_v17  ;;  %v3887_v24 = vshrl.u32 %v6896_v27, 16  ;;  %vm4381_vm0 = vcmp.lt.s32.totalorder %v4380_v50, 0 }
 0x44f   :  { %vm3785_vm7 = vcmp.lt.s32.totalorder %v6898_v25, 0  ;;  %v3786_v13 = vsub.s32 0, %v6898_v25  ;;  %v3910_v49 = vand.u32 65535, %v3880_v4  ;;  %v3884_v52 = vsel %vm7542_vm15, %v3881_v39, %v3883_v51 }
 0x450   :  { %v3911_v6 = vshrl.u32 %v3880_v4, 16  ;;  %v3888_v0 = vand.u32 65535, %v3884_v52  ;;  %v3889_v36 = vshrl.u32 %v3884_v52, 16  ;;  %v3335_v60 = vand.u32 2147483647, %v6857_v34 }
 0x451   :  { %v3787_v19 = vsel %vm3785_vm7, %v3786_v13, %v6898_v25  ;;  %v3914_v55 = vmul.u32 %v3910_v49, %v3887_v24  ;;  %v4086_v57 = vadd.s32 %v6652_v15, %v6631_v28  ;;  %v4102_v30 = vsub.s32 32, %v6859_v23 }
 0x452   :  { %v3788_v9 = vclz %v3787_v19  ;;  %v3913_v46 = vmul.u32 %v3911_v6, %v3886_v21  ;;  %v3891_v18 = vmul.u32 %v3889_v36, %v3886_v21  ;;  %v3892_v62 = vmul.u32 %v3888_v0, %v3887_v24 }
 0x453   :  { %v4107_v54 = vadd.s32 127, %v4106_v47  ;;  %v6925_v39 = vsel %vm4381_vm0, 0, %v4380_v50  ;;  %v3912_v4 = vmul.u32 %v3910_v49, %v3886_v21  ;;  %v3890_v13 = vmul.u32 %v3888_v0, %v3886_v21 }
 0x454   :  { %v3916_v17 = vshll.u32 %v3913_v46, 16  ;;  %v3893_v51 = vmul.u32 %v3889_v36, %v3887_v24  ;;  %v3894_v52 = vshll.u32 %v3891_v18, 16  ;;  %v3915_v14 = vmul.u32 %v3911_v6, %v3887_v24  ;;  %v7663_v24 = vld [vmem:[#allocation51_spill] sm:$0xff] }
 0x455   :  { %v4371_v34 = vadd.s32 4294967294, %v3788_v9  ;;  %v3918_v19 = vshll.u32 %v3914_v55, 16  ;;  %v3896_v28 = vshll.u32 %v3892_v62, 16  ;;  %v4108_v47 = vshll.u32 %v4107_v54, 23 }
 0x456   :  { %vm3920_vm4 = vc.u32 %v3912_v4, %v3916_v17  ;;  %v3922_v40 = vadd.s32 %v3916_v17, %v3912_v4  ;;  %vm3898_vm15 = vc.u32 %v3890_v13, %v3894_v52  ;;  %v3900_v15 = vadd.s32 %v3894_v52, %v3890_v13 }
 0x457   :  { %v3921_v2 = vsel %vm3920_vm4, 1, %v7574_v11  ;;  %v4261_v50 = vsub.s32 4294967266, %v6925_v39  ;;  %v3874_v49 = vsel %vm3872_vm11, %v3862_v38, 2102212464  ;;  %v3899_v21 = vsel %vm3898_vm15, 1, %v7574_v11 }
 0x458   :  { %vm3064_vm0 = vcmp.lt.s32.totalorder %v7663_v24, 0  ;;  %v3901_v6 = vadd.s32 %v3899_v21, %v3893_v51  ;;  %vm3902_vm14 = vc.u32 %v3900_v15, %v3896_v28  ;;  %v3923_v0 = vadd.s32 %v3921_v2, %v3915_v14 }
 0x459   :  { %vm3924_vm5 = vc.u32 %v3922_v40, %v3918_v19  ;;  %vm4372_vm7 = vcmp.lt.s32.totalorder %v4371_v34, 0  ;;  %v3853_v36 = vshrl.u32 %v7591_v16, %v6861_v58  ;;  %v3903_v9 = vsel %vm3902_vm14, 1, %v7574_v11 }
 0x45a   :  { %v3925_v54 = vsel %vm3924_vm5, 1, %v7574_v11  ;;  %v3895_v4 = vshrl.u32 %v3891_v18, 16  ;;  %v3905_v17 = vadd.s32 %v3903_v9, %v3901_v6  ;;  %v3917_v13 = vshrl.u32 %v3913_v46, 16  ;;  %v7673_v9 = vld [vmem:[#allocation25_spill] sm:$0xff] }
 0x45b   :  { %v3927_v38 = vadd.s32 %v3925_v54, %v3923_v0  ;;  %v7664_v52 = vand.u32 2147483647, %v7662_v48  ;;  %v7667_v14 = vand.u32 2147483647, %v7663_v24  ;;  %v4262_v16 = vadd.s32 127, %v4261_v50 }
 0x45c   :  { %vm7670_vm5 = vcmp.lt.s32.totalorder %v6863_v32, 1  ;;  %vm7671_vm14 = vcmp.lt.s32.totalorder %v6863_v32, 3  ;;  %v3897_v46 = vshrl.u32 %v3892_v62, 16  ;;  %v6956_v18 = vsel %vm4372_vm7, 0, %v4371_v34 }
 0x45d   :  { %vm6940_vm11 = vcmp.le.f32.partialorder %v7664_v52, 0.7853982  ;;  %vm6946_vm15 = vcmp.le.f32.partialorder %v7667_v14, 0.7853982  ;;  %v3873_v11 = vsel %vm7670_vm5, %v3853_v36, %v6879_v20  ;;  %v3875_v58 = vsel %vm7671_vm14, %v6884_v44, %v3874_v49 }
 0x45e   :  { %v3906_v51 = vadd.s32 %v3905_v17, %v3895_v4  ;;  %v3919_v28 = vshrl.u32 %v3914_v55, 16  ;;  %v3928_v15 = vadd.s32 %v3927_v38, %v3917_v13  ;;  %vm3219_vm4 = vcmp.lt.s32.totalorder %v6178_v10, 0 }
 0x45f   :  { %v7672_v21 = vcvt.s32.f32 %v6855_v22  ;;  %v4104_v50 = vshrl.u32 %v4086_v57, %v4102_v30  ;;  %v4257_v0 = vsub.s32 32, %v6925_v39  ;;  %v2261_v20 = vmul.f32 -0.001358992, %v7673_v9 }
 0x460   :  { %vm7674_vm5 = vcmp.lt.s32.totalorder %v6863_v32, 2  ;;  %v6965_v44 = vadd.s32 %v3906_v51, %v3897_v46  ;;  %v6967_v62 = vadd.s32 %v3922_v40, %v3918_v19  ;;  %v3929_v34 = vadd.s32 %v3928_v15, %v3919_v28 }
 0x461   :  { %v3338_v6 = vmul.f32 %v7672_v21, %v3335_v60  ;;  %v3876_v36 = vsel %vm7674_vm5, %v3873_v11, %v3875_v58  ;;  %v7675_v55 = vxor.u32 2147483648, %v6770_v12  ;;  %vm7676_vm7 = vcmp.lt.s32.totalorder %v7662_v48, 0 }
 0x462   :  { %v4103_v60 = vshll.u32 %v6757_v41, %v6859_v23  ;;  %v4109_v57 = vor.u32 4788187, %v4108_v47  ;;  %v3796_v30 = vsub.s32 4294967266, %v6956_v18  ;;  %v7677_v32 = vand.u32 2147483647, %v6178_v10 }
 0x463   :  { %v3650_v22 = vsel %vm7676_vm7, %v7675_v55, %v6770_v12  ;;  %v4241_v40 = vadd.s32 %v6706_v56, %v6695_v53  ;;  %v4263_v19 = vshll.u32 %v4262_v16, 23  ;;  %vm3932_vm5 = vc.u32 %v6965_v44, %v6967_v62 }
 0x464   :  { %vm6979_vm14 = vcmp.le.f32.partialorder %v7677_v32, 0.7853982  ;;  %v3933_v12 = vadd.s32 1, %v3929_v34  ;;  %v7680_v41 = vxor.u32 2147483648, %v6802_v8  ;;  %v4105_v47 = vor.u32 %v4104_v50, %v4103_v60 }
 0x465   :  { %v3930_v54 = vmul.u32 %v6896_v27, %v3876_v36  ;;  %v2262_v4 = vadd.f32 0.041655596, %v2261_v20  ;;  %v7681_v17 = vsub.s32 4, %v6260_v43  ;;  %v3339_v56 = vxor.u32 2147483648, %v3338_v6 }
 0x466   :  { %v3185_v23 = vsel %vm3064_vm0, %v7680_v41, %v6802_v8  ;;  %v4259_v13 = vshrl.u32 %v4241_v40, %v4257_v0  ;;  %v3934_v38 = vsel %vm3932_vm5, %v3933_v12, %v3929_v34  ;;  %v3186_v52 = vsub.s32 4, %v6394_v35 }
 0x467   :  { %v6998_v53 = vsel %vm7676_vm7, %v7681_v17, %v6260_v43  ;;  %v4110_v14 = vand.u32 2147483647, %v4109_v57  ;;  %v3797_v16 = vadd.s32 127, %v3796_v30  ;;  %v3935_v11 = vadd.s32 %v3934_v38, %v3930_v54 }
 0x468   :  { %v7004_v8 = vsel %vm6940_vm11, %v7662_v48, %v3650_v22  ;;  %v7009_v27 = vsel %vm6946_vm15, %v7663_v24, %v3185_v23  ;;  %v4258_v43 = vshll.u32 %v6824_v33, %v6925_v39  ;;  %v4264_v58 = vor.u32 4788187, %v4263_v19 }
 0x469   :  { %v4112_v46 = vcvt.s32.f32 %v4105_v47  ;;  %v3792_v51 = vsub.s32 32, %v6956_v18  ;;  %v3936_v28 = vadd.s32 536870912, %v3935_v11  ;;  %v2263_v15 = vmul.f32 %v2262_v4, %v7673_v9 }
 0x46a   :  { %v3340_v21 = vsel %vm3219_vm4, %v3339_v56, %v3338_v6  ;;  %v3341_v50 = vsub.s32 4, %v6571_v26  ;;  %vm3994_vm5 = vcmp.lt.s32.totalorder %v6354_v7, 0  ;;  %v4260_v0 = vor.u32 %v4259_v13, %v4258_v43  ;;  %v7685_v13 = vld [vmem:[#allocation31_spill] sm:$0xff]  ;;  %v7687_v43 = vld [vmem:[#allocation24_spill] sm:$0xff] }
 0x46b   :  { %v3508_v20 = vmul.f32 -0.00019511016, %v6840_v29  ;;  %v4113_v36 = vmul.f32 %v4112_v46, %v4110_v14  ;;  %v3776_v33 = vadd.s32 %v6836_v1, %v6834_v37  ;;  %v3798_v39 = vshll.u32 %v3797_v16, 23 }
 0x46c   :  { %v7022_v34 = vshrl.u32 %v3936_v28, 30  ;;  %v7026_v55 = vmul.f32 %v7004_v8, %v7004_v8  ;;  %v7031_v6 = vsel %vm3064_vm0, %v3186_v52, %v6394_v35  ;;  %v4265_v22 = vand.u32 2147483647, %v4264_v58 }
 0x46d   :  { %v3509_v60 = vadd.f32 0.008332121, %v3508_v20  ;;  %v7036_v57 = vsel %vm6979_vm14, %v6178_v10, %v3340_v21  ;;  %v3794_v37 = vshrl.u32 %v3776_v33, %v3792_v51  ;;  %v2264_v30 = vadd.f32 -0.4999988, %v2263_v15 }
 0x46e   :  { %v3938_v1 = vshll.u32 %v7022_v34, 30  ;;  %v7041_v32 = vmul.f32 %v7009_v27, %v7009_v27  ;;  %v7046_v35 = vsel %vm3219_vm4, %v3341_v50, %v6571_v26  ;;  %v4267_v40 = vcvt.s32.f32 %v4260_v0 }
 0x46f   :  { %v3501_v19 = vmul.f32 -0.001358992, %v6840_v29  ;;  %v7682_v12 = vand.u32 2147483647, %v6354_v7  ;;  %v4114_v23 = vxor.u32 2147483648, %v4113_v36  ;;  %v3793_v47 = vshll.u32 %v6898_v25, %v6956_v18 }
 0x470   :  { %v3799_v54 = vor.u32 4788187, %v3798_v39  ;;  %v7057_v4 = vsub.s32 %v3935_v11, %v3938_v1  ;;  %v7061_v26 = vmul.f32 %v7036_v57, %v7036_v57  ;;  %v4268_v17 = vmul.f32 %v4267_v40, %v4265_v22 }
 0x471   :  { %vm7051_vm0 = vcmp.le.f32.partialorder %v7682_v12, 0.7853982  ;;  %v3510_v56 = vmul.f32 %v3509_v60, %v6840_v29  ;;  %v2416_v38 = vmul.f32 -0.001358992, %v7685_v13  ;;  %v3795_v52 = vor.u32 %v3794_v37, %v3793_v47  ;;  %v7692_v47 = vld [vmem:[#allocation34_spill] sm:$0xff] }
 0x472   :  { %vm3940_vm7 = vcmp.lt.s32.totalorder %v7057_v4, 0  ;;  %v3941_v14 = vsub.s32 0, %v7057_v4  ;;  %v2265_v25 = vmul.f32 %v2264_v30, %v7673_v9  ;;  %v4116_v18 = vsub.s32 4, %v6704_v63 }
 0x473   :  { %v4271_v16 = vsub.s32 4, %v6797_v5  ;;  %v7688_v58 = vsel %vm5255_vm6, 0, %v7687_v43  ;;  %v3502_v51 = vadd.f32 0.041655596, %v3501_v19  ;;  %v4115_v28 = vsel %vm3994_vm5, %v4114_v23, %v4113_v36 }
 0x474   :  { %v2276_v46 = vadd.s32 3, %v7688_v58  ;;  %v7689_v15 = vand.u32 2147483647, %v6403_v31  ;;  %v3800_v9 = vand.u32 2147483647, %v3799_v54  ;;  %v3942_v50 = vsel %vm3940_vm7, %v3941_v14, %v7057_v4 }
 0x475   :  { %v3663_v0 = vmul.f32 -0.00019511016, %v7026_v55  ;;  %v4269_v20 = vxor.u32 2147483648, %v4268_v17  ;;  %v3943_v33 = vclz %v3942_v50  ;;  %v3511_v39 = vadd.f32 -0.16666654, %v3510_v56  ;;  %v7699_v50 = vld [vmem:[#allocation59_spill] sm:$0xff] }
 0x476   :  { %vm7079_vm4 = vcmp.le.f32.partialorder %v7689_v15, 0.7853982  ;;  %v2417_v22 = vadd.f32 0.041655596, %v2416_v38  ;;  %v3802_v60 = vcvt.s32.f32 %v3795_v52  ;;  %v2266_v37 = vadd.f32 1.0, %v2265_v25  ;;  %v7693_v52 = vld [vmem:[#allocation17_spill] sm:$0xff] }
 0x477   :  { %v3656_v1 = vmul.f32 -0.001358992, %v7026_v55  ;;  %v3664_v36 = vadd.f32 0.008332121, %v3663_v0  ;;  %v4374_v30 = vadd.s32 4294967294, %v3943_v33  ;;  %v2277_v40 = vand.u32 3, %v2276_v46 }
 0x478   :  { %v3503_v19 = vmul.f32 %v3502_v51, %v6840_v29  ;;  %v7091_v12 = vsel %vm3994_vm5, %v4116_v18, %v6704_v63  ;;  %v3803_v23 = vmul.f32 %v3802_v60, %v3800_v9  ;;  %v2280_v54 = vxor.u32 2147483648, %v7692_v47 }
 0x479   :  { %v3665_v56 = vmul.f32 %v3664_v36, %v7026_v55  ;;  %v7098_v38 = vsel %vm7051_vm0, %v6354_v7, %v4115_v28  ;;  %vm4375_vm7 = vcmp.lt.s32.totalorder %v4374_v30, 0  ;;  %v3512_v14 = vmul.f32 %v3511_v39, %v6840_v29 }
 0x47a   :  { %v2418_v25 = vmul.f32 %v2417_v22, %v7685_v13  ;;  %vm7694_vm5 = vcmp.lt.s32.totalorder %v6403_v31, 0  ;;  %v7696_v11 = vand.u32 2147483647, %v6662_v42  ;;  %v7697_v43 = vmov 0 }
 0x47b   :  { %v4270_v63 = vsel %vm7694_vm5, %v4269_v20, %v4268_v17  ;;  %vm7695_vm12 = vmmov %vm7694_vm5  ;;  %v2283_v58 = vxor.u32 2147483648, %v2266_v37  ;;  %v3657_v46 = vadd.f32 0.041655596, %v3656_v1  ;;  %v3806_v51 = vsub.s32 4, %v6877_v3 }
 0x47c   :  { %v7108_v18 = vsel %vm7695_vm12, %v4271_v16, %v6797_v5  ;;  %vm7112_vm3 = vcmp.le.f32.partialorder %v7696_v11, 0.7853982  ;;  %v7117_v28 = vsel %vm4375_vm7, 0, %v4374_v30  ;;  %vm2279_vm6 = vcmp.eq.s32.totalorder %v2277_v40, 0 }
 0x47d   :  { %v7698_v43 = vsel %vm7112_vm3, 4294967295, %v7697_v43  ;;  %v3504_v15 = vadd.f32 -0.4999988, %v3503_v19  ;;  %v3804_v17 = vxor.u32 2147483648, %v3803_v23  ;;  %v2281_v9 = vsel %vm2279_vm6, %v2266_v37, %v2280_v54 }
 0x47e   :  { %v3499_v5 = vsel %vm6700_vm13, 0, %v7699_v50  ;;  %v3666_v16 = vadd.f32 -0.16666654, %v3665_v56  ;;  %v7125_v20 = vsel %vm7079_vm4, %v6403_v31, %v4270_v63  ;;  %vm2282_vm12 = vcmp.eq.s32.totalorder %v2277_v40, 2  ;;  %v7704_v63 = vld [vmem:[#allocation27_spill] sm:$0xff] }
 0x47f   :  { %v3513_v33 = vadd.f32 1.0, %v3512_v14  ;;  %v2419_v39 = vadd.f32 -0.4999988, %v2418_v25  ;;  %v3951_v22 = vsub.s32 4294967266, %v7117_v28  ;;  %vm2278_vm7 = vcmp.lt.s32.totalorder %v2277_v40, 2 }
 0x480   :  { %v2284_v60 = vsel %vm2282_vm12, %v2283_v58, %v7692_v47  ;;  %v3658_v37 = vmul.f32 %v3657_v46, %v7026_v55  ;;  %v7132_v1 = vmul.f32 %v7098_v38, %v7098_v38  ;;  %v3505_v30 = vmul.f32 %v3504_v15, %v6840_v29 }
 0x481   :  { %v2285_v36 = vsel %vm2278_vm7, %v2281_v9, %v2284_v60  ;;  %v3516_v19 = vadd.s32 3, %v3499_v5  ;;  %v7137_v54 = vmul.f32 %v7125_v20, %v7125_v20  ;;  %vm7701_vm13 = vcmp.lt.s32.totalorder %v6662_v42, 0  ;;  %v7707_v9 = vld [vmem:[#allocation47_spill] sm:$0xff]  ;;  %v7709_v60 = vld [vmem:[#allocation36_spill] sm:$0xff] }
 0x482   :  { %v3805_v56 = vsel %vm7701_vm13, %v3804_v17, %v3803_v23  ;;  %vm7702_vm6 = vmmov %vm7701_vm13  ;;  %v3667_v47 = vmul.f32 %v3666_v16, %v7026_v55  ;;  %v3514_v14 = vmul.f32 %v3513_v33, %v6754_v45  ;;  %v2420_v25 = vmul.f32 %v2419_v39, %v7685_v13  ;;  %v7708_v16 = vld [vmem:[#allocation33_spill] sm:$0xff] }
 0x483   :  { %v7144_v40 = vsel %vm7702_vm6, %v3806_v51, %v6877_v3  ;;  %v7705_v11 = vsel %vm5473_vm9, 0, %v7704_v63  ;;  %v3654_v23 = vsel %vm6940_vm11, 0, %v6998_v53  ;;  %v3931_v46 = vadd.s32 %v6967_v62, %v6965_v44 }
 0x484   :  { %v2431_v58 = vadd.s32 3, %v7705_v11  ;;  %v3952_v3 = vadd.s32 127, %v3951_v22  ;;  %vm7706_vm5 = vweird.f32 %v7693_v52  ;;  %v3659_v45 = vadd.f32 -0.4999988, %v3658_v37 }
 0x485   :  { %v7160_v51 = vsel %vm7706_vm5, nan, %v2285_v36  ;;  %v7165_v13 = vsel %vm7112_vm3, %v6662_v42, %v3805_v56  ;;  %v3506_v15 = vadd.f32 1.0, %v3505_v30  ;;  %v3517_v17 = vand.u32 3, %v3516_v19 }
 0x486   :  { %v2435_v50 = vxor.u32 2147483648, %v7707_v9  ;;  %v3947_v59 = vsub.s32 32, %v7117_v28  ;;  %v3668_v53 = vadd.f32 1.0, %v3667_v47  ;;  %v3671_v0 = vadd.s32 3, %v3654_v23 }
 0x487   :  { %v3198_v44 = vmul.f32 -0.00019511016, %v7041_v32  ;;  %v3520_v62 = vxor.u32 2147483648, %v3514_v14  ;;  %v2421_v52 = vadd.f32 1.0, %v2420_v25  ;;  %v2432_v5 = vand.u32 3, %v2431_v58 }
 0x488   :  { %v1951_v33 = vmul.f32 -0.001358992, %v7708_v16  ;;  %v3953_v39 = vshll.u32 %v3952_v3, 23  ;;  %v3961_v22 = vsub.s32 4, %v7022_v34  ;;  %v3660_v37 = vmul.f32 %v3659_v45, %v7026_v55 }
 0x489   :  { %v3199_v36 = vadd.f32 0.008332121, %v3198_v44  ;;  %vm3518_vm11 = vcmp.lt.s32.totalorder %v3517_v17, 2  ;;  %vm3519_vm12 = vcmp.eq.s32.totalorder %v3517_v17, 0  ;;  %v3523_v30 = vxor.u32 2147483648, %v3506_v15 }
 0x48a   :  { %v3191_v19 = vmul.f32 -0.001358992, %v7041_v32  ;;  %v3949_v56 = vshrl.u32 %v3931_v46, %v3947_v59  ;;  %vm3522_vm7 = vcmp.eq.s32.totalorder %v3517_v17, 2  ;;  %v3669_v47 = vmul.f32 %v3668_v53, %v7004_v8 }
 0x48b   :  { %v3672_v25 = vand.u32 3, %v3671_v0  ;;  %v3521_v29 = vsel %vm3519_vm12, %v3506_v15, %v3520_v62  ;;  %v2438_v63 = vxor.u32 2147483648, %v2421_v52  ;;  %v1952_v11 = vadd.f32 0.041655596, %v1951_v33  ;;  %v7710_v15 = vld [vmem:[#allocation38_spill] sm:$0xff] }
 0x48c   :  { %v3200_v58 = vmul.f32 %v3199_v36, %v7041_v32  ;;  %v3948_v55 = vshll.u32 %v7057_v4, %v7117_v28  ;;  %v3954_v23 = vor.u32 4788187, %v3953_v39  ;;  %vm2434_vm6 = vcmp.eq.s32.totalorder %v2432_v5, 0  ;;  %v7711_v62 = vld [vmem:[#allocation18_spill] sm:$0xff] }
 0x48d   :  { %v3661_v3 = vadd.f32 1.0, %v3660_v37  ;;  %v3524_v45 = vsel %vm3522_vm7, %v3523_v30, %v3514_v14  ;;  %v2436_v44 = vsel %vm2434_vm6, %v2421_v52, %v2435_v50  ;;  %vm2437_vm5 = vcmp.eq.s32.totalorder %v2432_v5, 2 }
 0x48e   :  { %v3192_v46 = vadd.f32 0.041655596, %v3191_v19  ;;  %v3950_v59 = vor.u32 %v3949_v56, %v3948_v55  ;;  %v3525_v8 = vsel %vm3518_vm11, %v3521_v29, %v3524_v45  ;;  %v3675_v53 = vxor.u32 2147483648, %v3669_v47  ;;  %v7721_v29 = vld [vmem:[#allocation49_spill] sm:$0xff] }
 0x48f   :  { %v2106_v0 = vmul.f32 -0.001358992, %v7710_v15  ;;  %vm3839_vm12 = vcmp.lt.s32.totalorder %v6791_v61, 0  ;;  %vm2430_vm13 = vweird.f32 %v7711_v62  ;;  %v2439_v33 = vsel %vm2437_vm5, %v2438_v63, %v7707_v9  ;;  %v7714_v63 = vld [vmem:[#allocation41_spill] sm:$0xff] }
 0x490   :  { %vm3670_vm9 = vweird.f32 %v7662_v48  ;;  %vm3673_vm3 = vcmp.lt.s32.totalorder %v3672_v25, 2  ;;  %v1953_v4 = vmul.f32 %v1952_v11, %v7708_v16  ;;  %v3201_v28 = vadd.f32 -0.16666654, %v3200_v58 }
 0x491   :  { %v3955_v14 = vand.u32 2147483647, %v3954_v23  ;;  %vm3674_vm7 = vcmp.eq.s32.totalorder %v3672_v25, 0  ;;  %v3678_v50 = vxor.u32 2147483648, %v3661_v3  ;;  %v3346_v17 = vmul.f32 -0.001358992, %v7061_v26 }
 0x492   :  { %vm7712_vm11 = vweird.f32 %v7709_v60  ;;  %vm3677_vm6 = vcmp.eq.s32.totalorder %v3672_v25, 2  ;;  %v3193_v39 = vmul.f32 %v3192_v46, %v7041_v32  ;;  %v3353_v37 = vmul.f32 -0.00019511016, %v7061_v26 }
 0x493   :  { %v3526_v52 = vsel %vm7712_vm11, nan, %v3525_v8  ;;  %v3957_v9 = vcvt.s32.f32 %v3950_v59  ;;  %v3676_v36 = vsel %vm3674_vm7, %v3661_v3, %v3675_v53  ;;  %v2107_v30 = vadd.f32 0.041655596, %v2106_v0  ;;  %v1719_v3 = vpop.f32.mrf.mxu0 }
 0x494   :  { %v3347_v19 = vadd.f32 0.041655596, %v3346_v17  ;;  %v1954_v56 = vadd.f32 -0.4999988, %v1953_v4  ;;  %v7715_v11 = vsel %vm5540_vm1, 0, %v7714_v63  ;;  %v3202_v55 = vmul.f32 %v3201_v28, %v7041_v32 }
 0x495   :  { %v1966_v58 = vadd.s32 3, %v7715_v11  ;;  %v3354_v23 = vadd.f32 0.008332121, %v3353_v37  ;;  %v3958_v60 = vmul.f32 %v3957_v9, %v3955_v14  ;;  %vm7716_vm5 = vcmp.lt.s32.totalorder %v2432_v5, 2  ;;  %v1739_v11 = vpop.f32.mrf.mxu1 }
 0x496   :  { %v2440_v45 = vsel %vm7716_vm5, %v2436_v44, %v2439_v33  ;;  %v3679_v8 = vsel %vm3677_vm6, %v3678_v50, %v3669_v47  ;;  %v3189_v46 = vsel %vm6946_vm15, 0, %v7031_v6  ;;  %v3194_v53 = vadd.f32 -0.4999988, %v3193_v39  ;;  %v7717_v47 = vld [vmem:[#allocation45_spill] sm:$0xff]  ;;  %v7748_v6 = vld [vmem:[#allocation43_spill] sm:$0xff] }
 0x497   :  { %v3680_v59 = vsel %vm3673_vm3, %v3676_v36, %v3679_v8  ;;  %v3348_v0 = vmul.f32 %v3347_v19, %v7061_v26  ;;  %v3355_v4 = vmul.f32 %v3354_v23, %v7061_v26  ;;  %v7205_v28 = vmul.f32 %v7165_v13, %v7165_v13 }
 0x498   :  { %v4304_v14 = vmul.f32 %v3526_v52, %v1719_v3  ;;  %v2108_v5 = vmul.f32 %v2107_v30, %v7710_v15  ;;  %v2881_v44 = vmul.f32 -0.001358992, %v7717_v47  ;;  %v7718_v2 = vand.u32 2147483647, %v6791_v61 }
 0x499   :  { %v1955_v25 = vmul.f32 %v1954_v56, %v7708_v16  ;;  %v1967_v33 = vand.u32 3, %v1966_v58  ;;  %v3203_v50 = vadd.f32 1.0, %v3202_v55  ;;  %v3356_v17 = vadd.f32 -0.16666654, %v3355_v4 }
 0x49a   :  { %vm7211_vm1 = vcmp.le.f32.partialorder %v7718_v2, 0.7853982  ;;  %v7221_v52 = vsel %vm3839_vm12, %v3961_v22, %v7022_v34  ;;  %v2441_v39 = vsel %vm2430_vm13, nan, %v2440_v45  ;;  %v3681_v37 = vsel %vm3670_vm9, nan, %v3680_v59 }
 0x49b   :  { %v3206_v9 = vadd.s32 3, %v3189_v46  ;;  %v3959_v36 = vxor.u32 2147483648, %v3958_v60  ;;  %v3195_v16 = vmul.f32 %v3194_v53, %v7041_v32  ;;  %v3349_v30 = vadd.f32 -0.4999988, %v3348_v0 }
 0x49c   :  { %v3357_v19 = vmul.f32 %v3356_v17, %v7061_v26  ;;  %v7230_v56 = vmul.f32 %v4304_v14, %v7160_v51  ;;  %v1970_v63 = vxor.u32 2147483648, %v7721_v29  ;;  %v2109_v34 = vadd.f32 -0.4999988, %v2108_v5  ;;  %v7723_v51 = vld [vmem:[#allocation44_spill] sm:$0xff] }
 0x49d   :  { %v2882_v22 = vadd.f32 0.041655596, %v2881_v44  ;;  %v1956_v62 = vadd.f32 1.0, %v1955_v25  ;;  %vm1968_vm3 = vcmp.lt.s32.totalorder %v1967_v33, 2  ;;  %v3204_v48 = vmul.f32 %v3203_v50, %v7009_v27 }
 0x49e   :  { %v3344_v58 = vsel %vm6979_vm14, 0, %v7046_v35  ;;  %v3358_v32 = vadd.f32 1.0, %v3357_v19  ;;  %v4305_v55 = vmul.f32 %v3681_v37, %v1739_v11  ;;  %vm1969_vm15 = vcmp.eq.s32.totalorder %v1967_v33, 0 }
 0x49f   :  { %v7724_v45 = vsel %vm5612_vm10, 0, %v7723_v51  ;;  %v4128_v46 = vmul.f32 -0.00019511016, %v7132_v1  ;;  %v3960_v3 = vsel %vm3839_vm12, %v3959_v36, %v3958_v60  ;;  %v3196_v59 = vadd.f32 1.0, %v3195_v16 }
 0x4a0   :  { %v2121_v8 = vadd.s32 3, %v7724_v45  ;;  %v3207_v53 = vand.u32 3, %v3206_v9  ;;  %v3350_v27 = vmul.f32 %v3349_v30, %v7061_v26  ;;  %vm1972_vm9 = vcmp.eq.s32.totalorder %v1967_v33, 2  ;;  %v7730_v33 = vld [vmem:[#allocation20_spill] sm:$0xff] }
 0x4a1   :  { %v2110_v49 = vmul.f32 %v2109_v34, %v7710_v15  ;;  %v3361_v35 = vadd.s32 3, %v3344_v58  ;;  %v2883_v0 = vmul.f32 %v2882_v22, %v7717_v47  ;;  %v1973_v4 = vxor.u32 2147483648, %v1956_v62  ;;  %v7726_v22 = vld [vmem:[#allocation19_spill] sm:$0xff] }
 0x4a2   :  { %v3210_v14 = vxor.u32 2147483648, %v3204_v48  ;;  %v3359_v5 = vmul.f32 %v3358_v32, %v7036_v57  ;;  %v4129_v44 = vadd.f32 0.008332121, %v4128_v46  ;;  %v7251_v2 = vsel %vm7211_vm1, %v6791_v61, %v3960_v3  ;;  %v7728_v32 = vld [vmem:[#allocation48_spill] sm:$0xff] }
 0x4a3   :  { %v7253_v60 = vmul.f32 %v4305_v55, %v2441_v39  ;;  %v1971_v26 = vsel %vm1969_vm15, %v1956_v62, %v1970_v63  ;;  %v2122_v25 = vand.u32 3, %v2121_v8  ;;  %vm3205_vm10 = vweird.f32 %v7663_v24  ;;  %v7725_v63 = vld [vmem:[#allocation52_spill] sm:$0xff] }
 0x4a4   :  { %vm3208_vm14 = vcmp.lt.s32.totalorder %v3207_v53, 2  ;;  %v3213_v15 = vxor.u32 2147483648, %v3196_v59  ;;  %v3351_v50 = vadd.f32 1.0, %v3350_v27  ;;  %v4121_v17 = vmul.f32 -0.001358992, %v7132_v1 }
 0x4a5   :  { %vm3209_vm13 = vcmp.eq.s32.totalorder %v3207_v53, 0  ;;  %v2111_v57 = vadd.f32 1.0, %v2110_v49  ;;  %v3362_v37 = vand.u32 3, %v3361_v35  ;;  %v2884_v9 = vadd.f32 -0.4999988, %v2883_v0 }
 0x4a6   :  { %v1974_v36 = vsel %vm1972_vm9, %v1973_v4, %v7721_v29  ;;  %v3211_v16 = vsel %vm3209_vm13, %v3196_v59, %v3210_v14  ;;  %v3365_v39 = vxor.u32 2147483648, %v3359_v5  ;;  %v4130_v30 = vmul.f32 %v4129_v44, %v7132_v1  ;;  %v7731_v59 = vld [vmem:[#allocation32_spill] sm:$0xff] }
 0x4a7   :  { %v1975_v19 = vsel %vm1968_vm3, %v1971_v26, %v1974_v36  ;;  %vm3212_vm12 = vcmp.eq.s32.totalorder %v3207_v53, 2  ;;  %vm2124_vm7 = vcmp.eq.s32.totalorder %v2122_v25, 0  ;;  %v2125_v34 = vxor.u32 2147483648, %v7725_v63 }
 0x4a8   :  { %vm3360_vm11 = vweird.f32 %v6178_v10  ;;  %vm1965_vm6 = vweird.f32 %v7726_v22  ;;  %v3214_v11 = vsel %vm3212_vm12, %v3213_v15, %v3204_v48  ;;  %v3368_v62 = vxor.u32 2147483648, %v3351_v50 }
 0x4a9   :  { %v7729_v29 = vsel %vm5750_vm2, 0, %v7728_v32  ;;  %v4122_v23 = vadd.f32 0.041655596, %v4121_v17  ;;  %v3215_v51 = vsel %vm3208_vm14, %v3211_v16, %v3214_v11  ;;  %vm2120_vm5 = vweird.f32 %v7730_v33 }
 0x4aa   :  { %v2896_v55 = vadd.s32 3, %v7729_v29  ;;  %v2128_v45 = vxor.u32 2147483648, %v2111_v57  ;;  %vm3364_vm3 = vcmp.eq.s32.totalorder %v3362_v37, 0  ;;  %v2885_v8 = vmul.f32 %v2884_v9, %v7717_v47 }
 0x4ab   :  { %v3366_v46 = vsel %vm3364_vm3, %v3351_v50, %v3365_v39  ;;  %v4119_v48 = vsel %vm7051_vm0, 0, %v7091_v12  ;;  %v4131_v3 = vadd.f32 -0.16666654, %v4130_v30  ;;  %v3036_v27 = vmul.f32 -0.001358992, %v7731_v59  ;;  %v1679_v50 = vpop.f32.mrf.mxu2 }
 0x4ac   :  { %vm2123_vm15 = vcmp.lt.s32.totalorder %v2122_v25, 2  ;;  %v2126_v49 = vsel %vm2124_vm7, %v2111_v57, %v2125_v34  ;;  %vm2127_vm2 = vcmp.eq.s32.totalorder %v2122_v25, 2  ;;  %vm3367_vm9 = vcmp.eq.s32.totalorder %v3362_v37, 2 }
 0x4ad   :  { %vm3363_vm14 = vcmp.lt.s32.totalorder %v3362_v37, 2  ;;  %v3369_v53 = vsel %vm3367_vm9, %v3368_v62, %v3359_v5  ;;  %v4123_v35 = vmul.f32 %v4122_v23, %v7132_v1  ;;  %v4283_v0 = vmul.f32 -0.00019511016, %v7137_v54  ;;  %v7732_v37 = vld [vmem:[#allocation54_spill] sm:$0xff]  ;;  %v1699_v62 = vpop.f32.mrf.mxu3 }
 0x4ae   :  { %v3216_v47 = vsel %vm3205_vm10, nan, %v3215_v51  ;;  %v3370_v4 = vsel %vm3363_vm14, %v3366_v46, %v3369_v53  ;;  %v2886_v41 = vadd.f32 1.0, %v2885_v8  ;;  %v4136_v12 = vadd.s32 3, %v4119_v48  ;;  %v7735_v48 = vld [vmem:[#allocation53_spill] sm:$0xff] }
 0x4af   :  { %v2129_v14 = vsel %vm2127_vm2, %v2128_v45, %v7725_v63  ;;  %v7282_v44 = vand.u32 3, %v2896_v55  ;;  %v4132_v26 = vmul.f32 %v4131_v3, %v7132_v1  ;;  %v3037_v15 = vadd.f32 0.041655596, %v3036_v27  ;;  %v7733_v63 = vld [vmem:[#allocation37_spill] sm:$0xff] }
 0x4b0   :  { %v2130_v5 = vsel %vm2123_vm15, %v2126_v49, %v2129_v14  ;;  %v4276_v17 = vmul.f32 -0.001358992, %v7137_v54  ;;  %v4284_v57 = vadd.f32 0.008332121, %v4283_v0  ;;  %v2571_v9 = vmul.f32 -0.001358992, %v7732_v37 }
 0x4b1   :  { %v7290_v24 = vmul.f32 %v7251_v2, %v7251_v2  ;;  %v4302_v36 = vmul.f32 %v3216_v47, %v1679_v50  ;;  %v3371_v16 = vsel %vm3360_vm11, nan, %v3370_v4  ;;  %v4124_v39 = vadd.f32 -0.4999988, %v4123_v35 }
 0x4b2   :  { %v1976_v30 = vsel %vm1965_vm6, nan, %v1975_v19  ;;  %v2900_v25 = vxor.u32 2147483648, %v7733_v63  ;;  %v2903_v34 = vxor.u32 2147483648, %v2886_v41  ;;  %v7297_v11 = vand.u32 3, %v4136_v12 }
 0x4b3   :  { %v2131_v58 = vsel %vm2120_vm5, nan, %v2130_v5  ;;  %vm2899_vm0 = vcmp.eq.s32.totalorder %v7282_v44, 0  ;;  %v4133_v32 = vadd.f32 1.0, %v4132_v26  ;;  %v3038_v29 = vmul.f32 %v3037_v15, %v7731_v59  ;;  %v7738_v5 = vld [vmem:[#allocation56_spill] sm:$0xff] }
 0x4b4   :  { %v4303_v10 = vmul.f32 %v3371_v16, %v1699_v62  ;;  %v4277_v55 = vadd.f32 0.041655596, %v4276_v17  ;;  %v4285_v23 = vmul.f32 %v4284_v57, %v7137_v54  ;;  %v2572_v22 = vadd.f32 0.041655596, %v2571_v9 }
 0x4b5   :  { %v4310_v19 = vmul.f32 %v4302_v36, %v1976_v30  ;;  %vm2902_vm10 = vcmp.eq.s32.totalorder %v7282_v44, 2  ;;  %v4125_v51 = vmul.f32 %v4124_v39, %v7132_v1  ;;  %v3811_v45 = vmul.f32 -0.001358992, %v7205_v28 }
 0x4b6   :  { %v7307_v8 = vsel %vm2899_vm0, %v2886_v41, %v2900_v25  ;;  %v7310_v33 = vsel %vm2902_vm10, %v2903_v34, %v7733_v63  ;;  %vm4139_vm13 = vcmp.eq.s32.totalorder %v7297_v11, 0  ;;  %v7736_v3 = vsel %vm5971_vm8, 0, %v7735_v48 }
 0x4b7   :  { %v3051_v27 = vadd.s32 3, %v7736_v3  ;;  %v4134_v49 = vmul.f32 %v4133_v32, %v7098_v38  ;;  %v3039_v53 = vadd.f32 -0.4999988, %v3038_v29  ;;  %v3812_v35 = vadd.f32 0.041655596, %v3811_v45  ;;  %v7740_v32 = vld [vmem:[#allocation39_spill] sm:$0xff] }
 0x4b8   :  { %v3818_v1 = vmul.f32 -0.00019511016, %v7205_v28  ;;  %v4311_v0 = vmul.f32 %v4303_v10, %v2131_v58  ;;  %v4278_v47 = vmul.f32 %v4277_v55, %v7137_v54  ;;  %v4286_v4 = vadd.f32 -0.16666654, %v4285_v23  ;;  %v7742_v29 = vld [vmem:[#allocation42_spill] sm:$0xff] }
 0x4b9   :  { %v2573_v41 = vmul.f32 %v2572_v22, %v7732_v37  ;;  %v4126_v12 = vadd.f32 1.0, %v4125_v51  ;;  %vm4138_vm12 = vcmp.lt.s32.totalorder %v7297_v11, 2  ;;  %vm4142_vm7 = vcmp.eq.s32.totalorder %v7297_v11, 2 }
 0x4ba   :  { %v3813_v14 = vmul.f32 %v3812_v35, %v7205_v28  ;;  %v3819_v26 = vadd.f32 0.008332121, %v3818_v1  ;;  %v7324_v15 = vand.u32 3, %v3051_v27  ;;  %v4274_v38 = vsel %vm7079_vm4, 0, %v7108_v18 }
 0x4bb   :  { %vm7737_vm8 = vnez %v7698_v43  ;;  %v2726_v17 = vmul.f32 -0.001358992, %v7738_v5  ;;  %v4140_v57 = vxor.u32 2147483648, %v4134_v49  ;;  %v3040_v9 = vmul.f32 %v3039_v53, %v7731_v59  ;;  %v7739_v43 = vld [vmem:[#allocation57_spill] sm:$0xff] }
 0x4bc   :  { %v3809_v50 = vsel %vm7737_vm8, 0, %v7144_v40  ;;  %v3814_v36 = vadd.f32 -0.4999988, %v3813_v14  ;;  %v3820_v16 = vmul.f32 %v3819_v26, %v7205_v28  ;;  %v4318_v39 = vadd.f32 %v4311_v0, %v4310_v19  ;;  %v7744_v26 = vld [vmem:[#allocation58_spill] sm:$0xff] }
 0x4bd   :  { %v4279_v30 = vadd.f32 -0.4999988, %v4278_v47  ;;  %v4287_v63 = vmul.f32 %v4286_v4, %v7137_v54  ;;  %v2574_v25 = vadd.f32 -0.4999988, %v2573_v41  ;;  %v4143_v34 = vxor.u32 2147483648, %v4126_v12 }
 0x4be   :  { %v3815_v21 = vmul.f32 %v3814_v36, %v7205_v28  ;;  %v3821_v18 = vadd.f32 -0.16666654, %v3820_v16  ;;  %v3826_v62 = vadd.s32 3, %v3809_v50  ;;  %v3055_v40 = vxor.u32 2147483648, %v7739_v43 }
 0x4bf   :  { %v4291_v58 = vadd.s32 3, %v4274_v38  ;;  %vm7741_vm4 = vnez %v7740_v32  ;;  %v2727_v55 = vadd.f32 0.041655596, %v2726_v17  ;;  %v4141_v23 = vsel %vm4139_vm13, %v4126_v12, %v4140_v57 }
 0x4c0   :  { %v7743_v59 = vsel %vm7741_vm4, 0, %v7742_v29  ;;  %v7344_v22 = vadd.f32 1.0, %v3040_v9  ;;  %v3816_v19 = vadd.f32 1.0, %v3815_v21  ;;  %v3822_v51 = vmul.f32 %v3821_v18, %v7205_v28 }
 0x4c1   :  { %v2586_v10 = vadd.s32 3, %v7743_v59  ;;  %v4280_v45 = vmul.f32 %v4279_v30, %v7137_v54  ;;  %v4288_v46 = vadd.f32 1.0, %v4287_v63  ;;  %v2575_v48 = vmul.f32 %v2574_v25, %v7732_v37  ;;  %v7745_v30 = vld [vmem:[#allocation26_spill] sm:$0xff]  ;;  %v7746_v63 = vld [vmem:[#allocation55_spill] sm:$0xff] }
 0x4c2   :  { %v2728_v3 = vmul.f32 %v2727_v55, %v7738_v5  ;;  %v7351_v27 = vadd.f32 %v4318_v39, %v7230_v56  ;;  %v4144_v53 = vsel %vm4142_vm7, %v4143_v34, %v4134_v49  ;;  %v3823_v35 = vadd.f32 1.0, %v3822_v51 }
 0x4c3   :  { %v3827_v1 = vand.u32 3, %v3826_v62  ;;  %v7357_v0 = vsel %vm4138_vm12, %v4141_v23, %v4144_v53  ;;  %v7359_v28 = vand.u32 3, %v4291_v58  ;;  %v2587_v54 = vand.u32 3, %v2586_v10 }
 0x4c4   :  { %v2729_v47 = vadd.f32 -0.4999988, %v2728_v3  ;;  %v3824_v37 = vmul.f32 %v3823_v35, %v7165_v13  ;;  %v3833_v4 = vxor.u32 2147483648, %v3816_v19  ;;  %v3966_v41 = vmul.f32 -0.001358992, %v7290_v24  ;;  %v7751_v35 = vld [vmem:[#allocation30_spill] sm:$0xff] }
 0x4c5   :  { %v3973_v56 = vmul.f32 -0.00019511016, %v7290_v24  ;;  %v4281_v12 = vadd.f32 1.0, %v4280_v45  ;;  %v4289_v49 = vmul.f32 %v4288_v46, %v7125_v20  ;;  %v2576_v14 = vadd.f32 1.0, %v2575_v48  ;;  %v7750_v45 = vld [vmem:[#allocation60_spill] sm:$0xff] }
 0x4c6   :  { %v2590_v38 = vxor.u32 2147483648, %v7744_v26  ;;  %vm3828_vm11 = vcmp.lt.s32.totalorder %v3827_v1, 2  ;;  %v3830_v11 = vxor.u32 2147483648, %v3824_v37  ;;  %v3967_v50 = vadd.f32 0.041655596, %v3966_v41 }
 0x4c7   :  { %v3974_v17 = vadd.f32 0.008332121, %v3973_v56  ;;  %vm3829_vm6 = vcmp.eq.s32.totalorder %v3827_v1, 0  ;;  %vm3832_vm5 = vcmp.eq.s32.totalorder %v3827_v1, 2  ;;  %v2730_v57 = vmul.f32 %v2729_v47, %v7738_v5 }
 0x4c8   :  { %v3964_v13 = vsel %vm7211_vm1, 0, %v7221_v52  ;;  %vm4135_vm3 = vweird.f32 %v6354_v7  ;;  %vm4293_vm15 = vcmp.lt.s32.totalorder %v7359_v28, 2  ;;  %v3831_v20 = vsel %vm3829_vm6, %v3816_v19, %v3830_v11 }
 0x4c9   :  { %v3834_v9 = vsel %vm3832_vm5, %v3833_v4, %v3824_v37  ;;  %v3968_v36 = vmul.f32 %v3967_v50, %v7290_v24  ;;  %v3975_v16 = vmul.f32 %v3974_v17, %v7290_v24  ;;  %vm4294_vm2 = vcmp.eq.s32.totalorder %v7359_v28, 0  ;;  %v1799_v17 = vpop.f32.mrf.mxu0 }
 0x4ca   :  { %v4295_v39 = vxor.u32 2147483648, %v4289_v49  ;;  %vm2585_vm9 = vweird.f32 %v7745_v30  ;;  %v3835_v5 = vsel %vm3828_vm11, %v3831_v20, %v3834_v9  ;;  %vm7747_vm14 = vnez %v7746_v63 }
 0x4cb   :  { %v7749_v52 = vsel %vm7747_vm14, 0, %v7748_v6  ;;  %vm2589_vm1 = vcmp.eq.s32.totalorder %v2587_v54, 0  ;;  %v2593_v34 = vxor.u32 2147483648, %v2576_v14  ;;  %v3969_v21 = vadd.f32 -0.4999988, %v3968_v36 }
 0x4cc   :  { %v2741_v25 = vadd.s32 3, %v7749_v52  ;;  %v3976_v18 = vadd.f32 -0.16666654, %v3975_v16  ;;  %v4298_v62 = vxor.u32 2147483648, %v4281_v12  ;;  %v2591_v58 = vsel %vm2589_vm1, %v2576_v14, %v2590_v38  ;;  %v1819_v16 = vpop.f32.mrf.mxu1 }
 0x4cd   :  { %vm3825_vm0 = vweird.f32 %v6662_v42  ;;  %v3981_v32 = vadd.s32 3, %v3964_v13  ;;  %v2731_v59 = vadd.f32 1.0, %v2730_v57  ;;  %v3970_v10 = vmul.f32 %v3969_v21, %v7290_v24  ;;  %v1759_v42 = vpop.f32.mrf.mxu2 }
 0x4ce   :  { %v3836_v29 = vsel %vm3825_vm0, nan, %v3835_v5  ;;  %v3977_v55 = vmul.f32 %v3976_v18, %v7290_v24  ;;  %vm2898_vm10 = vcmp.lt.s32.totalorder %v7282_v44, 2  ;;  %vm3054_vm13 = vcmp.eq.s32.totalorder %v7324_v15, 0  ;;  %v7753_v5 = vld [vmem:[#allocation22_spill] sm:$0xff] }
 0x4cf   :  { %vm4290_vm12 = vweird.f32 %v6403_v31  ;;  %v4296_v23 = vsel %vm4294_vm2, %v4281_v12, %v4295_v39  ;;  %vm2588_vm7 = vcmp.lt.s32.totalorder %v2587_v54, 2  ;;  %vm2592_vm8 = vcmp.eq.s32.totalorder %v2587_v54, 2 }
 0x4d0   :  { %v2742_v19 = vand.u32 3, %v2741_v25  ;;  %v2594_v51 = vsel %vm2592_vm8, %v2593_v34, %v7744_v26  ;;  %v2745_v46 = vxor.u32 2147483648, %v7750_v45  ;;  %v3971_v48 = vadd.f32 1.0, %v3970_v10 }
 0x4d1   :  { %v3978_v3 = vadd.f32 1.0, %v3977_v55  ;;  %vm4297_vm4 = vcmp.eq.s32.totalorder %v7359_v28, 2  ;;  %v2595_v24 = vsel %vm2588_vm7, %v2591_v58, %v2594_v51  ;;  %v4306_v53 = vmul.f32 %v3836_v29, %v1759_v42 }
 0x4d2   :  { %vm2740_vm11 = vweird.f32 %v7751_v35  ;;  %v3982_v1 = vand.u32 3, %v3981_v32  ;;  %v4299_v47 = vsel %vm4297_vm4, %v4298_v62, %v4289_v49  ;;  %v2748_v37 = vxor.u32 2147483648, %v2731_v59 }
 0x4d3   :  { %v3979_v4 = vmul.f32 %v3978_v3, %v7251_v2  ;;  %v3988_v54 = vxor.u32 2147483648, %v3971_v48  ;;  %v4146_v41 = vsel %vm4135_vm3, nan, %v7357_v0  ;;  %v3058_v56 = vxor.u32 2147483648, %v7344_v22 }
 0x4d4   :  { %v4300_v12 = vsel %vm4293_vm15, %v4296_v23, %v4299_v47  ;;  %vm2744_vm6 = vcmp.eq.s32.totalorder %v2742_v19, 0  ;;  %v2596_v14 = vsel %vm2585_vm9, nan, %v2595_v24  ;;  %vm2743_vm5 = vcmp.lt.s32.totalorder %v2742_v19, 2 }
 0x4d5   :  { %v2746_v26 = vsel %vm2744_vm6, %v2731_v59, %v2745_v46  ;;  %v3985_v49 = vxor.u32 2147483648, %v3979_v4  ;;  %v4314_v38 = vmul.f32 %v4306_v53, %v2596_v14  ;;  %vm2747_vm2 = vcmp.eq.s32.totalorder %v2742_v19, 2 }
 0x4d6   :  { %vm3984_vm14 = vcmp.eq.s32.totalorder %v3982_v1, 0  ;;  %vm3987_vm1 = vcmp.eq.s32.totalorder %v3982_v1, 2  ;;  %v2749_v2 = vsel %vm2747_vm2, %v2748_v37, %v7750_v45  ;;  %vm3983_vm0 = vcmp.lt.s32.totalorder %v3982_v1, 2 }
 0x4d7   :  { %v3986_v7 = vsel %vm3984_vm14, %v3971_v48, %v3985_v49  ;;  %v3989_v0 = vsel %vm3987_vm1, %v3988_v54, %v3979_v4  ;;  %v4320_v28 = vadd.f32 %v7351_v27, %v7253_v60  ;;  %v2750_v11 = vsel %vm2743_vm5, %v2746_v26, %v2749_v2  ;;  %v1779_v60 = vpop.f32.mrf.mxu3 }
 0x4d8   :  { %vm3980_vm3 = vweird.f32 %v6791_v61  ;;  %v3990_v50 = vsel %vm3983_vm0, %v3986_v7, %v3989_v0  ;;  %v2905_v57 = vsel %vm2898_vm10, %v7307_v8, %v7310_v33  ;;  %v3056_v13 = vsel %vm3054_vm13, %v7344_v22, %v3055_v40  ;;  %v7752_v33 = vld [vmem:[#allocation21_spill] sm:$0xff] }
 0x4d9   :  { %v4301_v20 = vsel %vm4290_vm12, nan, %v4300_v12  ;;  %v3991_v27 = vsel %vm3980_vm3, nan, %v3990_v50  ;;  %v4308_v9 = vmul.f32 %v4146_v41, %v1799_v17  ;;  %vm3057_vm15 = vcmp.eq.s32.totalorder %v7324_v15, 2 }
 0x4da   :  { %v4321_v61 = vadd.f32 %v4320_v28, %v4314_v38  ;;  %v4307_v36 = vmul.f32 %v3991_v27, %v1779_v60  ;;  %vm3053_vm9 = vcmp.lt.s32.totalorder %v7324_v15, 2  ;;  %v3059_v44 = vsel %vm3057_vm15, %v3058_v56, %v7739_v43 }
 0x4db   :  { %v2751_v8 = vsel %vm2740_vm11, nan, %v2750_v11  ;;  %vm2895_vm10 = vweird.f32 %v7752_v33  ;;  %v3060_v40 = vsel %vm3053_vm9, %v3056_v13, %v3059_v44  ;;  %v4309_v31 = vmul.f32 %v4301_v20, %v1819_v16 }
 0x4dc   :  { %v4315_v22 = vmul.f32 %v4307_v36, %v2751_v8  ;;  %v2906_v39 = vsel %vm2895_vm10, nan, %v2905_v57  ;;  %vm3050_vm13 = vweird.f32 %v7753_v5 }
 0x4dd   :  { %v4316_v30 = vmul.f32 %v4308_v9, %v2906_v39  ;;  %v3061_v6 = vsel %vm3050_vm13, nan, %v3060_v40 }
 0x4de   :  { %v4322_v63 = vadd.f32 %v4321_v61, %v4315_v22  ;;  %v4317_v52 = vmul.f32 %v4309_v31, %v3061_v6 }
 0x4e0   :  { %v4323_v25 = vadd.f32 %v4322_v63, %v4316_v30 }
 0x4e2   :  { %v4324_v34 = vadd.f32 %v4323_v25, %v4317_v52 }
 0x4e4   :  { %4325 = vst [vmem:[%s7435_s8] sm:$0xff] %v4324_v34 }
 0x4e5   :  { %4330 = vsyncpa [#allocation3], 1 }
 0x4e6   :  { %4331 = vsyncpa [#allocation5], 1 }
 0x4e7   :  { %4332 = vsyncpa [#allocation8], 1 }
 0x4e8   :  { %4333 = vsyncpa [#allocation11], 1 }

</bundles_post_ra>
